<compile_context>
chip_gen: v7x
topology: tpu7x:2x2x1
jax: 0.10.0
libtpu: 0.0.40
codegen_flags: <defaults>
</compile_context>

<pallas_src>
import functools
import math

import jax
import jax.numpy as jnp
from jax.experimental import pallas as pl
from jax.experimental.pallas import tpu as pltpu


# bf16 sublane tile granule: keeps every dynamic row offset (t*Bp) into packed
# bf16 buffers tile-aligned, and doubles MXU row occupancy vs. Bp=8.
SUB = 16


# ----------------------------------------------------------------------------
# helpers
# ----------------------------------------------------------------------------

def _round_up(x, m):
    return ((x + m - 1) // m) * m


def _pad_to(x, axis, size):
    pad = [(0, 0)] * x.ndim
    ax = axis % x.ndim
    pad[ax] = (0, size - x.shape[ax])
    return jnp.pad(x, pad)


def _pad_blocks(w, h, hp, n):
    """Re-lay (..., n*h) block-ordered columns so each block occupies a
    128-lane-aligned slot of width hp: result (..., n*hp), zero padded."""
    parts = [_pad_to(w[..., k * h:(k + 1) * h], -1, hp) for k in range(n)]
    return jnp.concatenate(parts, axis=-1)


def _vmem_spec():
    return pl.BlockSpec(memory_space=pltpu.MemorySpace.VMEM)


def _nbytes(*arrays):
    return int(sum(math.prod(a.shape) * jnp.dtype(a.dtype).itemsize
                   for a in arrays))


def _vmem_limit(need_bytes):
    # generous headroom over the actual residents, capped below v7x's 64 MiB
    return int(min(64 << 20, max(4 * need_bytes, 16 << 20)))


# ----------------------------------------------------------------------------
# Kernel A: encoder LSTM + fused heads
# ----------------------------------------------------------------------------

def _encoder_heads_kernel(x_ref, m_ref, tp_ref,
                          wih_ref, whh_ref, b_ref,
                          wmh_ref, wmt_ref, bm_ref,
                          w1_ref, b1_ref, wtp2_ref, btp2_ref,
                          wbow2_ref, bbow2_ref,
                          wch_ref, wct_ref, bc_ref,
                          muvar_ref, alphas_ref, bow_ref, hc_ref,
                          gx_ref, *, T, Bp):
    """Masked encoder LSTM -> packed h_n, then all dense heads on it (fused).

    x_ref : (T*Bp, E) bf16 time-major flattened, m_ref : (T*Bp, 1) f32 validity
    gx_ref: (T*Bp, 4Hp) bf16 scratch (hoisted input projection, gate blocks
            128-lane-aligned).
    """
    Hp = whh_ref.shape[0]

    # Hoisted input projection: one big matmul instead of T tiny ones.  Stored
    # bf16 (halves the largest scratch); gates are re-summed/activated in f32.
    gx_ref[...] = (jnp.dot(x_ref[...], wih_ref[...],
                           preferred_element_type=jnp.float32)
                   + b_ref[...]).astype(jnp.bfloat16)

    def step(t, carry):
        h, c = carry                                  # h: bf16, c: f32
        row = pl.multiple_of(t * Bp, Bp)
        gates = gx_ref[pl.ds(row, Bp), :] + jnp.dot(
            h, whh_ref[...], preferred_element_type=jnp.float32)
        i_g = jax.nn.sigmoid(gates[:, 0 * Hp:1 * Hp])
        f_g = jax.nn.sigmoid(gates[:, 1 * Hp:2 * Hp])
        g_g = jnp.tanh(gates[:, 2 * Hp:3 * Hp])
        o_g = jax.nn.sigmoid(gates[:, 3 * Hp:4 * Hp])
        c_new = f_g * c + i_g * g_g
        h_new = (o_g * jnp.tanh(c_new)).astype(jnp.bfloat16)
        valid = m_ref[pl.ds(row, Bp), :] > 0.5        # (Bp, 1)
        h = jnp.where(valid, h_new, h)                # freeze past length -> packed h_n
        c = jnp.where(valid, c_new, c)
        return (h, c)

    hn, _ = jax.lax.fori_loop(
        0, T, step,
        (jnp.zeros((Bp, Hp), jnp.bfloat16), jnp.zeros((Bp, Hp), jnp.float32)),
        unroll=True)

    # ---- fused heads on the VMEM-resident h_n (no HBM round trip) ----
    tp = tp_ref[...].astype(jnp.bfloat16)

    # fcmu & fclogvar fused; [hn || topics] concat folded into two dots.
    muvar = (jnp.dot(hn, wmh_ref[...], preferred_element_type=jnp.float32)
             + jnp.dot(tp, wmt_ref[...], preferred_element_type=jnp.float32)
             + bm_ref[...])
    muvar_ref[...] = muvar

    C = bm_ref.shape[1] // 2
    zb = muvar[:, :C].astype(jnp.bfloat16)            # eval mode: z = mu

    # topic_prior fc1 + bow_predictor fc1 fused into one matmul on z.
    h1 = jnp.maximum(
        jnp.dot(zb, w1_ref[...], preferred_element_type=jnp.float32)
        + b1_ref[...], 0.0)                           # (Bp, 2Hp)
    h_tp = h1[:, :Hp].astype(jnp.bfloat16)
    h_bow = h1[:, Hp:].astype(jnp.bfloat16)

    alphas_ref[...] = jnp.exp(
        jnp.dot(h_tp, wtp2_ref[...], preferred_element_type=jnp.float32)
        + btp2_ref[...])
    # TODO(synk): for realistic vocab sizes, tile this bow matmul over V like fcout.
    bow_ref[...] = (jnp.dot(h_bow, wbow2_ref[...],
                            preferred_element_type=jnp.float32) + bbow2_ref[...])

    # fccode on [z || topics] -> tanh -> (h0 | c0) for the decoder, Hp-padded.
    hc_ref[...] = jnp.tanh(
        jnp.dot(zb, wch_ref[...], preferred_element_type=jnp.float32)
        + jnp.dot(tp, wct_ref[...], preferred_element_type=jnp.float32)
        + bc_ref[...])


# ----------------------------------------------------------------------------
# Kernel B: decoder LSTM -> masked hidden slab (bf16)
# ----------------------------------------------------------------------------

def _decoder_lstm_kernel(x_ref, m_ref, wih_ref, whh_ref, b_ref, h0_ref, c0_ref,
                         hs_ref, gx_ref, *, T, Bp):
    """Masked decoder LSTM; emits hs = mask * h_t in bf16 (T*Bp, Hp).

    Zeroed rows past each length reproduce pad_packed_sequence, so the later
    fcout stage produces exactly its bias at padded positions.
    """
    Hp = whh_ref.shape[0]

    gx_ref[...] = (jnp.dot(x_ref[...], wih_ref[...],
                           preferred_element_type=jnp.float32)
                   + b_ref[...]).astype(jnp.bfloat16)

    def step(t, carry):
        h, c = carry                                  # h: bf16, c: f32
        row = pl.multiple_of(t * Bp, Bp)
        gates = gx_ref[pl.ds(row, Bp), :] + jnp.dot(
            h, whh_ref[...], preferred_element_type=jnp.float32)
        i_g = jax.nn.sigmoid(gates[:, 0 * Hp:1 * Hp])
        f_g = jax.nn.sigmoid(gates[:, 1 * Hp:2 * Hp])
        g_g = jnp.tanh(gates[:, 2 * Hp:3 * Hp])
        o_g = jax.nn.sigmoid(gates[:, 3 * Hp:4 * Hp])
        c_new = f_g * c + i_g * g_g
        h_new_bf = (o_g * jnp.tanh(c_new)).astype(jnp.bfloat16)
        valid = m_ref[pl.ds(row, Bp), :] > 0.5
        # pad_packed semantics: zero hidden past length (state freeze not needed:
        # padded-step state never feeds a valid output).
        hs_ref[pl.ds(row, Bp), :] = jnp.where(
            valid, h_new_bf, jnp.zeros_like(h_new_bf))
        return (h_new_bf, c_new)

    jax.lax.fori_loop(0, T, step,
                      (h0_ref[...].astype(jnp.bfloat16), c0_ref[...]),
                      unroll=True)


# ----------------------------------------------------------------------------
# Kernel C: fcout, gridded over the vocab dimension
# ----------------------------------------------------------------------------

def _fcout_kernel(hs_ref, w_ref, b_ref, out_ref):
    out_ref[...] = (jnp.dot(hs_ref[...], w_ref[...],
                            preferred_element_type=jnp.float32) + b_ref[...])


# ----------------------------------------------------------------------------
# pallas_call wrappers
# ----------------------------------------------------------------------------

def encoder_heads_pallas(x, m, topics, kp, *, T, Bp):
    Hp = kp["enc_whh"].shape[0]
    E = x.shape[1]
    C2 = kp["bm"].shape[1]
    K = kp["btp2"].shape[1]
    Vp = kp["wbow2"].shape[1]

    ins = (x, m, topics, kp["enc_wih"], kp["enc_whh"], kp["enc_b"],
           kp["wmh"], kp["wmt"], kp["bm"], kp["w1"], kp["b1"],
           kp["wtp2"], kp["btp2"], kp["wbow2"], kp["bbow2"],
           kp["wch"], kp["wct"], kp["bc"])
    out_shape = (jax.ShapeDtypeStruct((Bp, C2), jnp.float32),       # [mu | logvar]
                 jax.ShapeDtypeStruct((Bp, K), jnp.float32),        # alphas
                 jax.ShapeDtypeStruct((Bp, Vp), jnp.float32),       # bow
                 jax.ShapeDtypeStruct((Bp, 2 * Hp), jnp.float32))   # [h0 | c0]

    out_bytes = (Bp * C2 + Bp * K + Bp * Vp + Bp * 2 * Hp) * 4
    need = _nbytes(*ins) + out_bytes + T * Bp * 4 * Hp * 2          # + bf16 gx scratch
    flops = (2 * T * Bp * E * 4 * Hp + 2 * T * Bp * Hp * 4 * Hp
             + 2 * Bp * (Hp * C2 + K * C2 + (C2 // 2) * 2 * Hp
                         + Hp * K + Hp * Vp + (C2 // 2) * 2 * Hp + K * 2 * Hp))
    transc = 5 * T * Bp * Hp + Bp * (K + 2 * Hp)

    return pl.pallas_call(
        functools.partial(_encoder_heads_kernel, T=T, Bp=Bp),
        out_shape=out_shape,
        in_specs=[_vmem_spec()] * len(ins),
        out_specs=(_vmem_spec(),) * 4,
        scratch_shapes=[pltpu.VMEM((T * Bp, 4 * Hp), jnp.bfloat16)],
        compiler_params=pltpu.CompilerParams(vmem_limit_bytes=_vmem_limit(need)),
        cost_estimate=pl.CostEstimate(flops=flops, transcendentals=transc,
                                      bytes_accessed=need),
    )(*ins)


def decoder_lstm_pallas(x, m, wih, whh, b, h0, c0, *, T, Bp):
    Hp = whh.shape[0]
    E = x.shape[1]
    ins = (x, m, wih, whh, b, h0, c0)
    need = _nbytes(*ins) + T * Bp * Hp * 2 + T * Bp * 4 * Hp * 2
    flops = 2 * T * Bp * E * 4 * Hp + 2 * T * Bp * Hp * 4 * Hp
    transc = 5 * T * Bp * Hp

    return pl.pallas_call(
        functools.partial(_decoder_lstm_kernel, T=T, Bp=Bp),
        out_shape=jax.ShapeDtypeStruct((T * Bp, Hp), jnp.bfloat16),
        in_specs=[_vmem_spec()] * len(ins),
        out_specs=_vmem_spec(),
        scratch_shapes=[pltpu.VMEM((T * Bp, 4 * Hp), jnp.bfloat16)],
        compiler_params=pltpu.CompilerParams(vmem_limit_bytes=_vmem_limit(need)),
        cost_estimate=pl.CostEstimate(flops=flops, transcendentals=transc,
                                      bytes_accessed=need),
    )(x, m, wih, whh, b, h0, c0)


def fcout_pallas(hs, wout, bout):
    """(T*Bp, Hp) @ (Hp, Vp) + b, gridded over Vp so weight/logits tiles stream
    HBM<->VMEM double-buffered and the vocab axis is parallel across v7x cores."""
    R, Hp = hs.shape
    Vp = wout.shape[1]
    tile_v = 128
    for cand in (2048, 1024, 512, 256, 128):     # largest exact divisor of Vp
        if Vp % cand == 0:
            tile_v = cand
            break
    nv = Vp // tile_v

    flops = 2 * R * Hp * Vp
    bytes_accessed = R * Hp * 2 + Hp * Vp * 2 + Vp * 4 + R * Vp * 4
    # residents: hs + double-buffered (wout tile, bout tile, logits tile)
    need = R * Hp * 2 + 2 * (Hp * tile_v * 2 + tile_v * 4 + R * tile_v * 4)

    return pl.pallas_call(
        _fcout_kernel,
        out_shape=jax.ShapeDtypeStruct((R, Vp), jnp.float32),
        grid=(nv,),
        in_specs=[pl.BlockSpec((R, Hp), lambda j: (0, 0)),          # resident
                  pl.BlockSpec((Hp, tile_v), lambda j: (0, j)),     # streamed
                  pl.BlockSpec((1, tile_v), lambda j: (0, j))],
        out_specs=pl.BlockSpec((R, tile_v), lambda j: (0, j)),
        compiler_params=pltpu.CompilerParams(
            dimension_semantics=("parallel",),
            vmem_limit_bytes=_vmem_limit(need)),
        cost_estimate=pl.CostEstimate(flops=flops, transcendentals=0,
                                      bytes_accessed=bytes_accessed),
    )(hs, wout, bout)


# ----------------------------------------------------------------------------
# Parameter init (deterministic, synthetic) and kernel-layout preparation
# ----------------------------------------------------------------------------

def init_params(key, vocab_size, num_topics, embed_size, hidden_size, code_size):
    E, H, C, K, V = embed_size, hidden_size, code_size, num_topics, vocab_size
    keys = iter(jax.random.split(key, 32))

    def w(shape, scale=0.1):
        return scale * jax.random.normal(next(keys), shape, dtype=jnp.float32)

    # Weights stored (in, out); LSTM bias is the PyTorch b_ih + b_hh combined.
    return {
        "embedding": w((V, E)),
        "enc_wih": w((E, 4 * H)), "enc_whh": w((H, 4 * H)), "enc_b": w((4 * H,)),
        "dec_wih": w((E, 4 * H)), "dec_whh": w((H, 4 * H)), "dec_b": w((4 * H,)),
        "fccode_w": w((C + K, 2 * H)), "fccode_b": w((2 * H,)),
        "fcmu_w": w((H + K, C)), "fcmu_b": w((C,)),
        "fclogvar_w": w((H + K, C)), "fclogvar_b": w((C,)),
        "fcout_w": w((H, V)), "fcout_b": w((V,)),
        "tp_w1": w((C, H)), "tp_b1": w((H,)), "tp_w2": w((H, K)), "tp_b2": w((K,)),
        "bow_w1": w((C, H)), "bow_b1": w((H,)), "bow_w2": w((H, V)), "bow_b2": w((V,)),
    }


def prepare_kernel_params(p):
    """Pad / fuse / bf16-cast weights into the kernel-friendly layout.
    NOTE: contains only jnp arrays (no python ints) so it can be a jit arg."""
    bf, f32 = jnp.bfloat16, jnp.float32
    H = p["enc_whh"].shape[0]
    V = p["fcout_w"].shape[1]
    C = p["fcmu_w"].shape[1]
    K = p["tp_w2"].shape[1]
    Hp = _round_up(H, 128)
    Vp = _round_up(V, 128)

    def lstm(prefix):
        wih = _pad_blocks(p[f"{prefix}_wih"], H, Hp, 4).astype(bf)            # (E, 4Hp)
        whh = _pad_blocks(_pad_to(p[f"{prefix}_whh"], 0, Hp), H, Hp, 4).astype(bf)
        b = _pad_blocks(p[f"{prefix}_b"], H, Hp, 4).reshape(1, 4 * Hp).astype(f32)
        return wih, whh, b

    enc_wih, enc_whh, enc_b = lstm("enc")
    dec_wih, dec_whh, dec_b = lstm("dec")

    # fcmu & fclogvar fused -> (., 2C); [hn || topics] concat split into two dots
    wm = jnp.concatenate([p["fcmu_w"], p["fclogvar_w"]], axis=1)              # (H+K, 2C)
    wmh = _pad_to(wm[:H], 0, Hp).astype(bf)                                   # (Hp, 2C)
    wmt = wm[H:].astype(bf)                                                   # (K, 2C)
    bm = jnp.concatenate([p["fcmu_b"], p["fclogvar_b"]]).reshape(1, 2 * C).astype(f32)

    # topic_prior fc1 & bow fc1 fused on the shared z input; hidden padded to Hp
    w1 = jnp.concatenate([_pad_to(p["tp_w1"], 1, Hp),
                          _pad_to(p["bow_w1"], 1, Hp)], axis=1).astype(bf)    # (C, 2Hp)
    b1 = jnp.concatenate([_pad_to(p["tp_b1"], 0, Hp),
                          _pad_to(p["bow_b1"], 0, Hp)]).reshape(1, 2 * Hp).astype(f32)
    wtp2 = _pad_to(p["tp_w2"], 0, Hp).astype(bf)                              # (Hp, K)
    btp2 = p["tp_b2"].reshape(1, K).astype(f32)
    wbow2 = _pad_to(_pad_to(p["bow_w2"], 0, Hp), 1, Vp).astype(bf)            # (Hp, Vp)
    bbow2 = _pad_to(p["bow_b2"], 0, Vp).reshape(1, Vp).astype(f32)

    # fccode: split [z || topics] rows; pad the (h0 | c0) column blocks to Hp each
    wc = p["fccode_w"]
    wch = _pad_blocks(wc[:C], H, Hp, 2).astype(bf)                            # (C, 2Hp)
    wct = _pad_blocks(wc[C:], H, Hp, 2).astype(bf)                            # (K, 2Hp)
    bc = _pad_blocks(p["fccode_b"], H, Hp, 2).reshape(1, 2 * Hp).astype(f32)

    # fcout padded to (Hp, Vp) with zero pad rows/cols
    wout = _pad_to(_pad_to(p["fcout_w"], 0, Hp), 1, Vp).astype(bf)
    bout = _pad_to(p["fcout_b"], 0, Vp).reshape(1, Vp).astype(f32)

    # NOTE: _pad_blocks pads each gate block from H to Hp=128; wasteful for tiny
    # demo H=32 but the correct layout once H is a multiple of 128.
    return {
        "enc_wih": enc_wih, "enc_whh": enc_whh, "enc_b": enc_b,
        "dec_wih": dec_wih, "dec_whh": dec_whh, "dec_b": dec_b,
        "wmh": wmh, "wmt": wmt, "bm": bm,
        "w1": w1, "b1": b1, "wtp2": wtp2, "btp2": btp2,
        "wbow2": wbow2, "bbow2": bbow2,
        "wch": wch, "wct": wct, "bc": bc,
        "wout": wout, "bout": bout,
    }


# ----------------------------------------------------------------------------
# TextVAE forward (eval mode, joint=True)
# ----------------------------------------------------------------------------

def textvae_forward(params, kp, inputs, topics, lengths, *, max_len):
    """inputs:(B,T) int32 token ids, topics:(B,K), lengths:(B,) int32 (desc.)."""
    B, T = inputs.shape
    V, E = params["embedding"].shape          # static (shapes, not traced values)
    Hp = kp["enc_whh"].shape[0]
    C = kp["bm"].shape[1] // 2
    assert max_len <= T
    Bp = _round_up(max(B, SUB), SUB)          # bf16-tile-pad the batch

    # embedding lookup (XLA glue), time-major, batch-padded, bf16 matmul input.
    # The reference feeds lookup(inputs) to BOTH encoder and decoder.
    emb = params["embedding"][inputs]                          # (B, T, E)
    emb_tm = jnp.transpose(emb, (1, 0, 2))                     # (T, B, E)
    x_flat = _pad_to(emb_tm, 1, Bp).astype(jnp.bfloat16).reshape(T * Bp, E)

    # validity mask precomputed once (pack_padded semantics); padded rows len=0
    lengths_p = _pad_to(lengths.astype(jnp.int32), 0, Bp)
    maskf = (jax.lax.broadcasted_iota(jnp.int32, (T, Bp), 0)
             < lengths_p[None, :]).astype(jnp.float32).reshape(T * Bp, 1)

    topics_p = _pad_to(topics.astype(jnp.float32), 0, Bp)      # (Bp, K)

    # ----- Kernel A: encoder LSTM + fused heads -----
    muvar, alphas_p, bow_p, hc = encoder_heads_pallas(
        x_flat, maskf, topics_p, kp, T=T, Bp=Bp)

    mu = muvar[:B, :C][None]                   # (1, B, C)
    logvar = muvar[:B, C:][None]               # (1, B, C)
    alphas = alphas_p[:B][None]                # (1, B, K)
    bow = bow_p[:B, :V]                        # (B, V)
    h0d, c0d = hc[:, :Hp], hc[:, Hp:]          # (Bp, Hp) each

    # ----- Kernel B: decoder LSTM -> masked bf16 hiddens -----
    hs = decoder_lstm_pallas(x_flat, maskf, kp["dec_wih"], kp["dec_whh"],
                             kp["dec_b"], h0d, c0d, T=T, Bp=Bp)  # (T*Bp, Hp) bf16

    # ----- Kernel C: fcout, vocab-tiled + parallel grid -----
    logits_tm = fcout_pallas(hs, kp["wout"], kp["bout"])         # (T*Bp, Vp) f32
    Vp = logits_tm.shape[1]
    # slice to the valid region BEFORE transposing so only real data moves
    logits = jnp.transpose(
        logits_tm.reshape(T, Bp, Vp)[:max_len, :B, :V], (1, 0, 2))  # (B, max_len, V)
    # TODO(synk): for realistic sizes, consume time-major logits downstream (or
    # emit batch-major tiles from the fcout kernel) to drop this transpose too.

    return logits, mu, logvar, alphas, bow


# ----------------------------------------------------------------------------
# Demo
# ----------------------------------------------------------------------------

if __name__ == "__main__":
    vocab_size, num_topics, embed_size, hidden_size, code_size = 50, 8, 16, 32, 12
    B, T = 2, 8

    root = jax.random.PRNGKey(0)
    k_params, k_tok, k_topic = jax.random.split(root, 3)

    params = init_params(k_params, vocab_size, num_topics, embed_size,
                         hidden_size, code_size)
    kp = prepare_kernel_params(params)

    inputs = jax.random.randint(k_tok, (B, T), 0, vocab_size, dtype=jnp.int32)
    topics_raw = jax.random.uniform(k_topic, (B, num_topics), dtype=jnp.float32)
    topics = topics_raw / topics_raw.sum(-1, keepdims=True)
    lengths_list = [8, 5]                      # descending (pack_padded_sequence)
    lengths = jnp.array(lengths_list, dtype=jnp.int32)
    max_len = max(lengths_list)

    fwd = jax.jit(textvae_forward, static_argnames=("max_len",))
    outs = fwd(params, kp, inputs, topics, lengths, max_len=max_len)
    outs = jax.block_until_ready(outs)

    logits, mu, logvar, alphas, bow = outs
    assert logits.shape == (B, max_len, vocab_size)
    assert mu.shape == (1, B, code_size) and logvar.shape == (1, B, code_size)
    assert alphas.shape == (1, B, num_topics)
    assert bow.shape == (B, vocab_size)
    assert all(bool(jnp.all(jnp.isfinite(o))) for o in outs)

    print("KERNEL_OK")
</pallas_src>

<mosaic_0001>
module attributes {stable_mosaic.version = 11 : i64} {
  func.func @_encoder_heads_kernel(%arg0: memref<128x16xbf16, #tpu.memory_space<vmem>>, %arg1: memref<128x1xf32, #tpu.memory_space<vmem>>, %arg2: memref<16x8xf32, #tpu.memory_space<vmem>>, %arg3: memref<16x512xbf16, #tpu.memory_space<vmem>>, %arg4: memref<128x512xbf16, #tpu.memory_space<vmem>>, %arg5: memref<1x512xf32, #tpu.memory_space<vmem>>, %arg6: memref<128x24xbf16, #tpu.memory_space<vmem>>, %arg7: memref<8x24xbf16, #tpu.memory_space<vmem>>, %arg8: memref<1x24xf32, #tpu.memory_space<vmem>>, %arg9: memref<12x256xbf16, #tpu.memory_space<vmem>>, %arg10: memref<1x256xf32, #tpu.memory_space<vmem>>, %arg11: memref<128x8xbf16, #tpu.memory_space<vmem>>, %arg12: memref<1x8xf32, #tpu.memory_space<vmem>>, %arg13: memref<128x128xbf16, #tpu.memory_space<vmem>>, %arg14: memref<1x128xf32, #tpu.memory_space<vmem>>, %arg15: memref<12x256xbf16, #tpu.memory_space<vmem>>, %arg16: memref<8x256xbf16, #tpu.memory_space<vmem>>, %arg17: memref<1x256xf32, #tpu.memory_space<vmem>>, %arg18: memref<16x24xf32, #tpu.memory_space<vmem>>, %arg19: memref<16x8xf32, #tpu.memory_space<vmem>>, %arg20: memref<16x128xf32, #tpu.memory_space<vmem>>, %arg21: memref<16x256xf32, #tpu.memory_space<vmem>>, %arg22: memref<128x512xbf16, #tpu.memory_space<vmem>>) attributes {dimension_semantics = [], scalar_prefetch = 0 : i64, scratch_operands = 1 : i64, tpu.core_type = #tpu.core_type<tc>} {
    %c0 = arith.constant 0 : index
    %c0_0 = arith.constant 0 : index
    %0 = vector.load %arg0[%c0, %c0_0] : memref<128x16xbf16, #tpu.memory_space<vmem>>, vector<128x16xbf16>
    %c0_1 = arith.constant 0 : index
    %c0_2 = arith.constant 0 : index
    %1 = vector.load %arg3[%c0_1, %c0_2] : memref<16x512xbf16, #tpu.memory_space<vmem>>, vector<16x512xbf16>
    %cst = arith.constant dense<0.000000e+00> : vector<128x512xf32>
    %2 = tpu.matmul %0, %1, %cst {dimension_numbers = #tpu.dot_dimension_numbers<[1], [0], [0], [1], [0, 0, 1, 1], [], []>} : vector<128x16xbf16>, vector<16x512xbf16>, vector<128x512xf32> -> vector<128x512xf32>
    %c0_3 = arith.constant 0 : index
    %c0_4 = arith.constant 0 : index
    %3 = vector.load %arg5[%c0_3, %c0_4] : memref<1x512xf32, #tpu.memory_space<vmem>>, vector<1x512xf32>
    %4 = vector.broadcast %3 : vector<1x512xf32> to vector<128x512xf32>
    %5 = arith.addf %2, %4 : vector<128x512xf32>
    %6 = arith.truncf %5 : vector<128x512xf32> to vector<128x512xbf16>
    %c0_5 = arith.constant 0 : index
    %c0_6 = arith.constant 0 : index
    %7 = vector.load %arg22[%c0_5, %c0_6] : memref<128x512xbf16, #tpu.memory_space<vmem>>, vector<128x512xbf16>
    tpu.vector_store %arg22[%c0_5, %c0_6], %6 {strides = array<i32>} : memref<128x512xbf16, #tpu.memory_space<vmem>>, vector<128x512xbf16>,
    %cst_7 = arith.constant 0.000000e+00 : bf16
    %8 = vector.broadcast %cst_7 : bf16 to vector<16x128xbf16>
    %cst_8 = arith.constant 0.000000e+00 : f32
    %9 = vector.broadcast %cst_8 : f32 to vector<16x128xf32>
    %c0_i32 = arith.constant 0 : i32
    %c16_i32 = arith.constant 16 : i32
    %10 = arith.muli %c0_i32, %c16_i32 : i32
    %11 = tpu.assume_multiple %10, 16 : i32
    %12 = arith.index_cast %11 : i32 to index
    %c0_9 = arith.constant 0 : index
    %13 = vector.load %arg22[%12, %c0_9] : memref<128x512xbf16, #tpu.memory_space<vmem>>, vector<16x512xbf16>
    %c0_10 = arith.constant 0 : index
    %c0_11 = arith.constant 0 : index
    %14 = vector.load %arg4[%c0_10, %c0_11] : memref<128x512xbf16, #tpu.memory_space<vmem>>, vector<128x512xbf16>
    %cst_12 = arith.constant dense<0.000000e+00> : vector<16x512xf32>
    %15 = tpu.matmul %8, %14, %cst_12 {dimension_numbers = #tpu.dot_dimension_numbers<[1], [0], [0], [1], [0, 0, 1, 1], [], []>} : vector<16x128xbf16>, vector<128x512xbf16>, vector<16x512xf32> -> vector<16x512xf32>
    %16 = arith.extf %13 : vector<16x512xbf16> to vector<16x512xf32>
    %17 = arith.addf %16, %15 : vector<16x512xf32>
    %18 = vector.extract_strided_slice %17 {offsets = [0, 0], sizes = [16, 128], strides = [1, 1]} : vector<16x512xf32> to vector<16x128xf32>
    %19 = arith.negf %18 : vector<16x128xf32>
    %20 = math.exp %19 : vector<16x128xf32>
    %cst_13 = arith.constant 1.000000e+00 : f32
    %21 = vector.broadcast %cst_13 : f32 to vector<16x128xf32>
    %22 = arith.addf %21, %20 : vector<16x128xf32>
    %23 = arith.divf %21, %22 : vector<16x128xf32>
    %24 = vector.extract_strided_slice %17 {offsets = [0, 128], sizes = [16, 128], strides = [1, 1]} : vector<16x512xf32> to vector<16x128xf32>
    %25 = arith.negf %24 : vector<16x128xf32>
    %26 = math.exp %25 : vector<16x128xf32>
    %cst_14 = arith.constant 1.000000e+00 : f32
    %27 = vector.broadcast %cst_14 : f32 to vector<16x128xf32>
    %28 = arith.addf %27, %26 : vector<16x128xf32>
    %29 = arith.divf %27, %28 : vector<16x128xf32>
    %30 = vector.extract_strided_slice %17 {offsets = [0, 256], sizes = [16, 128], strides = [1, 1]} : vector<16x512xf32> to vector<16x128xf32>
    %31 = math.tanh %30 : vector<16x128xf32>
    %32 = vector.extract_strided_slice %17 {offsets = [0, 384], sizes = [16, 128], strides = [1, 1]} : vector<16x512xf32> to vector<16x128xf32>
    %33 = arith.negf %32 : vector<16x128xf32>
    %34 = math.exp %33 : vector<16x128xf32>
    %cst_15 = arith.constant 1.000000e+00 : f32
    %35 = vector.broadcast %cst_15 : f32 to vector<16x128xf32>
    %36 = arith.addf %35, %34 : vector<16x128xf32>
    %37 = arith.divf %35, %36 : vector<16x128xf32>
    %38 = arith.mulf %29, %9 : vector<16x128xf32>
    %39 = arith.mulf %23, %31 : vector<16x128xf32>
    %40 = arith.addf %38, %39 : vector<16x128xf32>
    %41 = math.tanh %40 : vector<16x128xf32>
    %42 = arith.mulf %37, %41 : vector<16x128xf32>
    %43 = arith.truncf %42 : vector<16x128xf32> to vector<16x128xbf16>
    %44 = arith.index_cast %11 : i32 to index
    %c0_16 = arith.constant 0 : index
    %45 = vector.load %arg1[%44, %c0_16] : memref<128x1xf32, #tpu.memory_space<vmem>>, vector<16x1xf32>
    %cst_17 = arith.constant 5.000000e-01 : f32
    %46 = vector.broadcast %cst_17 : f32 to vector<16x1xf32>
    %47 = arith.cmpf ogt, %45, %46 : vector<16x1xf32>
    %48 = vector.shape_cast %47 : vector<16x1xi1> to vector<16x1xi1>
    %49 = vector.broadcast %48 : vector<16x1xi1> to vector<16x128xi1>
    %50 = arith.select %49, %43, %8 : vector<16x128xi1>, vector<16x128xbf16>
    %51 = vector.shape_cast %47 : vector<16x1xi1> to vector<16x1xi1>
    %52 = vector.broadcast %51 : vector<16x1xi1> to vector<16x128xi1>
    %53 = arith.select %52, %40, %9 : vector<16x128xi1>, vector<16x128xf32>
    %c1_i32 = arith.constant 1 : i32
    %c16_i32_18 = arith.constant 16 : i32
    %54 = arith.muli %c1_i32, %c16_i32_18 : i32
    %55 = tpu.assume_multiple %54, 16 : i32
    %56 = arith.index_cast %55 : i32 to index
    %c0_19 = arith.constant 0 : index
    %57 = vector.load %arg22[%56, %c0_19] : memref<128x512xbf16, #tpu.memory_space<vmem>>, vector<16x512xbf16>
    %c0_20 = arith.constant 0 : index
    %c0_21 = arith.constant 0 : index
    %58 = vector.load %arg4[%c0_20, %c0_21] : memref<128x512xbf16, #tpu.memory_space<vmem>>, vector<128x512xbf16>
    %cst_22 = arith.constant dense<0.000000e+00> : vector<16x512xf32>
    %59 = tpu.matmul %50, %58, %cst_22 {dimension_numbers = #tpu.dot_dimension_numbers<[1], [0], [0], [1], [0, 0, 1, 1], [], []>} : vector<16x128xbf16>, vector<128x512xbf16>, vector<16x512xf32> -> vector<16x512xf32>
    %60 = arith.extf %57 : vector<16x512xbf16> to vector<16x512xf32>
    %61 = arith.addf %60, %59 : vector<16x512xf32>
    %62 = vector.extract_strided_slice %61 {offsets = [0, 0], sizes = [16, 128], strides = [1, 1]} : vector<16x512xf32> to vector<16x128xf32>
    %63 = arith.negf %62 : vector<16x128xf32>
    %64 = math.exp %63 : vector<16x128xf32>
    %cst_23 = arith.constant 1.000000e+00 : f32
    %65 = vector.broadcast %cst_23 : f32 to vector<16x128xf32>
    %66 = arith.addf %65, %64 : vector<16x128xf32>
    %67 = arith.divf %65, %66 : vector<16x128xf32>
    %68 = vector.extract_strided_slice %61 {offsets = [0, 128], sizes = [16, 128], strides = [1, 1]} : vector<16x512xf32> to vector<16x128xf32>
    %69 = arith.negf %68 : vector<16x128xf32>
    %70 = math.exp %69 : vector<16x128xf32>
    %cst_24 = arith.constant 1.000000e+00 : f32
    %71 = vector.broadcast %cst_24 : f32 to vector<16x128xf32>
    %72 = arith.addf %71, %70 : vector<16x128xf32>
    %73 = arith.divf %71, %72 : vector<16x128xf32>
    %74 = vector.extract_strided_slice %61 {offsets = [0, 256], sizes = [16, 128], strides = [1, 1]} : vector<16x512xf32> to vector<16x128xf32>
    %75 = math.tanh %74 : vector<16x128xf32>
    %76 = vector.extract_strided_slice %61 {offsets = [0, 384], sizes = [16, 128], strides = [1, 1]} : vector<16x512xf32> to vector<16x128xf32>
    %77 = arith.negf %76 : vector<16x128xf32>
    %78 = math.exp %77 : vector<16x128xf32>
    %cst_25 = arith.constant 1.000000e+00 : f32
    %79 = vector.broadcast %cst_25 : f32 to vector<16x128xf32>
    %80 = arith.addf %79, %78 : vector<16x128xf32>
    %81 = arith.divf %79, %80 : vector<16x128xf32>
    %82 = arith.mulf %73, %53 : vector<16x128xf32>
    %83 = arith.mulf %67, %75 : vector<16x128xf32>
    %84 = arith.addf %82, %83 : vector<16x128xf32>
    %85 = math.tanh %84 : vector<16x128xf32>
    %86 = arith.mulf %81, %85 : vector<16x128xf32>
    %87 = arith.truncf %86 : vector<16x128xf32> to vector<16x128xbf16>
    %88 = arith.index_cast %55 : i32 to index
    %c0_26 = arith.constant 0 : index
    %89 = vector.load %arg1[%88, %c0_26] : memref<128x1xf32, #tpu.memory_space<vmem>>, vector<16x1xf32>
    %cst_27 = arith.constant 5.000000e-01 : f32
    %90 = vector.broadcast %cst_27 : f32 to vector<16x1xf32>
    %91 = arith.cmpf ogt, %89, %90 : vector<16x1xf32>
    %92 = vector.shape_cast %91 : vector<16x1xi1> to vector<16x1xi1>
    %93 = vector.broadcast %92 : vector<16x1xi1> to vector<16x128xi1>
    %94 = arith.select %93, %87, %50 : vector<16x128xi1>, vector<16x128xbf16>
    %95 = vector.shape_cast %91 : vector<16x1xi1> to vector<16x1xi1>
    %96 = vector.broadcast %95 : vector<16x1xi1> to vector<16x128xi1>
    %97 = arith.select %96, %84, %53 : vector<16x128xi1>, vector<16x128xf32>
    %c2_i32 = arith.constant 2 : i32
    %c16_i32_28 = arith.constant 16 : i32
    %98 = arith.muli %c2_i32, %c16_i32_28 : i32
    %99 = tpu.assume_multiple %98, 16 : i32
    %100 = arith.index_cast %99 : i32 to index
    %c0_29 = arith.constant 0 : index
    %101 = vector.load %arg22[%100, %c0_29] : memref<128x512xbf16, #tpu.memory_space<vmem>>, vector<16x512xbf16>
    %c0_30 = arith.constant 0 : index
    %c0_31 = arith.constant 0 : index
    %102 = vector.load %arg4[%c0_30, %c0_31] : memref<128x512xbf16, #tpu.memory_space<vmem>>, vector<128x512xbf16>
    %cst_32 = arith.constant dense<0.000000e+00> : vector<16x512xf32>
    %103 = tpu.matmul %94, %102, %cst_32 {dimension_numbers = #tpu.dot_dimension_numbers<[1], [0], [0], [1], [0, 0, 1, 1], [], []>} : vector<16x128xbf16>, vector<128x512xbf16>, vector<16x512xf32> -> vector<16x512xf32>
    %104 = arith.extf %101 : vector<16x512xbf16> to vector<16x512xf32>
    %105 = arith.addf %104, %103 : vector<16x512xf32>
    %106 = vector.extract_strided_slice %105 {offsets = [0, 0], sizes = [16, 128], strides = [1, 1]} : vector<16x512xf32> to vector<16x128xf32>
    %107 = arith.negf %106 : vector<16x128xf32>
    %108 = math.exp %107 : vector<16x128xf32>
    %cst_33 = arith.constant 1.000000e+00 : f32
    %109 = vector.broadcast %cst_33 : f32 to vector<16x128xf32>
    %110 = arith.addf %109, %108 : vector<16x128xf32>
    %111 = arith.divf %109, %110 : vector<16x128xf32>
    %112 = vector.extract_strided_slice %105 {offsets = [0, 128], sizes = [16, 128], strides = [1, 1]} : vector<16x512xf32> to vector<16x128xf32>
    %113 = arith.negf %112 : vector<16x128xf32>
    %114 = math.exp %113 : vector<16x128xf32>
    %cst_34 = arith.constant 1.000000e+00 : f32
    %115 = vector.broadcast %cst_34 : f32 to vector<16x128xf32>
    %116 = arith.addf %115, %114 : vector<16x128xf32>
    %117 = arith.divf %115, %116 : vector<16x128xf32>
    %118 = vector.extract_strided_slice %105 {offsets = [0, 256], sizes = [16, 128], strides = [1, 1]} : vector<16x512xf32> to vector<16x128xf32>
    %119 = math.tanh %118 : vector<16x128xf32>
    %120 = vector.extract_strided_slice %105 {offsets = [0, 384], sizes = [16, 128], strides = [1, 1]} : vector<16x512xf32> to vector<16x128xf32>
    %121 = arith.negf %120 : vector<16x128xf32>
    %122 = math.exp %121 : vector<16x128xf32>
    %cst_35 = arith.constant 1.000000e+00 : f32
    %123 = vector.broadcast %cst_35 : f32 to vector<16x128xf32>
    %124 = arith.addf %123, %122 : vector<16x128xf32>
    %125 = arith.divf %123, %124 : vector<16x128xf32>
    %126 = arith.mulf %117, %97 : vector<16x128xf32>
    %127 = arith.mulf %111, %119 : vector<16x128xf32>
    %128 = arith.addf %126, %127 : vector<16x128xf32>
    %129 = math.tanh %128 : vector<16x128xf32>
    %130 = arith.mulf %125, %129 : vector<16x128xf32>
    %131 = arith.truncf %130 : vector<16x128xf32> to vector<16x128xbf16>
    %132 = arith.index_cast %99 : i32 to index
    %c0_36 = arith.constant 0 : index
    %133 = vector.load %arg1[%132, %c0_36] : memref<128x1xf32, #tpu.memory_space<vmem>>, vector<16x1xf32>
    %cst_37 = arith.constant 5.000000e-01 : f32
    %134 = vector.broadcast %cst_37 : f32 to vector<16x1xf32>
    %135 = arith.cmpf ogt, %133, %134 : vector<16x1xf32>
    %136 = vector.shape_cast %135 : vector<16x1xi1> to vector<16x1xi1>
    %137 = vector.broadcast %136 : vector<16x1xi1> to vector<16x128xi1>
    %138 = arith.select %137, %131, %94 : vector<16x128xi1>, vector<16x128xbf16>
    %139 = vector.shape_cast %135 : vector<16x1xi1> to vector<16x1xi1>
    %140 = vector.broadcast %139 : vector<16x1xi1> to vector<16x128xi1>
    %141 = arith.select %140, %128, %97 : vector<16x128xi1>, vector<16x128xf32>
    %c3_i32 = arith.constant 3 : i32
    %c16_i32_38 = arith.constant 16 : i32
    %142 = arith.muli %c3_i32, %c16_i32_38 : i32
    %143 = tpu.assume_multiple %142, 16 : i32
    %144 = arith.index_cast %143 : i32 to index
    %c0_39 = arith.constant 0 : index
    %145 = vector.load %arg22[%144, %c0_39] : memref<128x512xbf16, #tpu.memory_space<vmem>>, vector<16x512xbf16>
    %c0_40 = arith.constant 0 : index
    %c0_41 = arith.constant 0 : index
    %146 = vector.load %arg4[%c0_40, %c0_41] : memref<128x512xbf16, #tpu.memory_space<vmem>>, vector<128x512xbf16>
    %cst_42 = arith.constant dense<0.000000e+00> : vector<16x512xf32>
    %147 = tpu.matmul %138, %146, %cst_42 {dimension_numbers = #tpu.dot_dimension_numbers<[1], [0], [0], [1], [0, 0, 1, 1], [], []>} : vector<16x128xbf16>, vector<128x512xbf16>, vector<16x512xf32> -> vector<16x512xf32>
    %148 = arith.extf %145 : vector<16x512xbf16> to vector<16x512xf32>
    %149 = arith.addf %148, %147 : vector<16x512xf32>
    %150 = vector.extract_strided_slice %149 {offsets = [0, 0], sizes = [16, 128], strides = [1, 1]} : vector<16x512xf32> to vector<16x128xf32>
    %151 = arith.negf %150 : vector<16x128xf32>
    %152 = math.exp %151 : vector<16x128xf32>
    %cst_43 = arith.constant 1.000000e+00 : f32
    %153 = vector.broadcast %cst_43 : f32 to vector<16x128xf32>
    %154 = arith.addf %153, %152 : vector<16x128xf32>
    %155 = arith.divf %153, %154 : vector<16x128xf32>
    %156 = vector.extract_strided_slice %149 {offsets = [0, 128], sizes = [16, 128], strides = [1, 1]} : vector<16x512xf32> to vector<16x128xf32>
    %157 = arith.negf %156 : vector<16x128xf32>
    %158 = math.exp %157 : vector<16x128xf32>
    %cst_44 = arith.constant 1.000000e+00 : f32
    %159 = vector.broadcast %cst_44 : f32 to vector<16x128xf32>
    %160 = arith.addf %159, %158 : vector<16x128xf32>
    %161 = arith.divf %159, %160 : vector<16x128xf32>
    %162 = vector.extract_strided_slice %149 {offsets = [0, 256], sizes = [16, 128], strides = [1, 1]} : vector<16x512xf32> to vector<16x128xf32>
    %163 = math.tanh %162 : vector<16x128xf32>
    %164 = vector.extract_strided_slice %149 {offsets = [0, 384], sizes = [16, 128], strides = [1, 1]} : vector<16x512xf32> to vector<16x128xf32>
    %165 = arith.negf %164 : vector<16x128xf32>
    %166 = math.exp %165 : vector<16x128xf32>
    %cst_45 = arith.constant 1.000000e+00 : f32
    %167 = vector.broadcast %cst_45 : f32 to vector<16x128xf32>
    %168 = arith.addf %167, %166 : vector<16x128xf32>
    %169 = arith.divf %167, %168 : vector<16x128xf32>
    %170 = arith.mulf %161, %141 : vector<16x128xf32>
    %171 = arith.mulf %155, %163 : vector<16x128xf32>
    %172 = arith.addf %170, %171 : vector<16x128xf32>
    %173 = math.tanh %172 : vector<16x128xf32>
    %174 = arith.mulf %169, %173 : vector<16x128xf32>
    %175 = arith.truncf %174 : vector<16x128xf32> to vector<16x128xbf16>
    %176 = arith.index_cast %143 : i32 to index
    %c0_46 = arith.constant 0 : index
    %177 = vector.load %arg1[%176, %c0_46] : memref<128x1xf32, #tpu.memory_space<vmem>>, vector<16x1xf32>
    %cst_47 = arith.constant 5.000000e-01 : f32
    %178 = vector.broadcast %cst_47 : f32 to vector<16x1xf32>
    %179 = arith.cmpf ogt, %177, %178 : vector<16x1xf32>
    %180 = vector.shape_cast %179 : vector<16x1xi1> to vector<16x1xi1>
    %181 = vector.broadcast %180 : vector<16x1xi1> to vector<16x128xi1>
    %182 = arith.select %181, %175, %138 : vector<16x128xi1>, vector<16x128xbf16>
    %183 = vector.shape_cast %179 : vector<16x1xi1> to vector<16x1xi1>
    %184 = vector.broadcast %183 : vector<16x1xi1> to vector<16x128xi1>
    %185 = arith.select %184, %172, %141 : vector<16x128xi1>, vector<16x128xf32>
    %c4_i32 = arith.constant 4 : i32
    %c16_i32_48 = arith.constant 16 : i32
    %186 = arith.muli %c4_i32, %c16_i32_48 : i32
    %187 = tpu.assume_multiple %186, 16 : i32
    %188 = arith.index_cast %187 : i32 to index
    %c0_49 = arith.constant 0 : index
    %189 = vector.load %arg22[%188, %c0_49] : memref<128x512xbf16, #tpu.memory_space<vmem>>, vector<16x512xbf16>
    %c0_50 = arith.constant 0 : index
    %c0_51 = arith.constant 0 : index
    %190 = vector.load %arg4[%c0_50, %c0_51] : memref<128x512xbf16, #tpu.memory_space<vmem>>, vector<128x512xbf16>
    %cst_52 = arith.constant dense<0.000000e+00> : vector<16x512xf32>
    %191 = tpu.matmul %182, %190, %cst_52 {dimension_numbers = #tpu.dot_dimension_numbers<[1], [0], [0], [1], [0, 0, 1, 1], [], []>} : vector<16x128xbf16>, vector<128x512xbf16>, vector<16x512xf32> -> vector<16x512xf32>
    %192 = arith.extf %189 : vector<16x512xbf16> to vector<16x512xf32>
    %193 = arith.addf %192, %191 : vector<16x512xf32>
    %194 = vector.extract_strided_slice %193 {offsets = [0, 0], sizes = [16, 128], strides = [1, 1]} : vector<16x512xf32> to vector<16x128xf32>
    %195 = arith.negf %194 : vector<16x128xf32>
    %196 = math.exp %195 : vector<16x128xf32>
    %cst_53 = arith.constant 1.000000e+00 : f32
    %197 = vector.broadcast %cst_53 : f32 to vector<16x128xf32>
    %198 = arith.addf %197, %196 : vector<16x128xf32>
    %199 = arith.divf %197, %198 : vector<16x128xf32>
    %200 = vector.extract_strided_slice %193 {offsets = [0, 128], sizes = [16, 128], strides = [1, 1]} : vector<16x512xf32> to vector<16x128xf32>
    %201 = arith.negf %200 : vector<16x128xf32>
    %202 = math.exp %201 : vector<16x128xf32>
    %cst_54 = arith.constant 1.000000e+00 : f32
    %203 = vector.broadcast %cst_54 : f32 to vector<16x128xf32>
    %204 = arith.addf %203, %202 : vector<16x128xf32>
    %205 = arith.divf %203, %204 : vector<16x128xf32>
    %206 = vector.extract_strided_slice %193 {offsets = [0, 256], sizes = [16, 128], strides = [1, 1]} : vector<16x512xf32> to vector<16x128xf32>
    %207 = math.tanh %206 : vector<16x128xf32>
    %208 = vector.extract_strided_slice %193 {offsets = [0, 384], sizes = [16, 128], strides = [1, 1]} : vector<16x512xf32> to vector<16x128xf32>
    %209 = arith.negf %208 : vector<16x128xf32>
    %210 = math.exp %209 : vector<16x128xf32>
    %cst_55 = arith.constant 1.000000e+00 : f32
    %211 = vector.broadcast %cst_55 : f32 to vector<16x128xf32>
    %212 = arith.addf %211, %210 : vector<16x128xf32>
    %213 = arith.divf %211, %212 : vector<16x128xf32>
    %214 = arith.mulf %205, %185 : vector<16x128xf32>
    %215 = arith.mulf %199, %207 : vector<16x128xf32>
    %216 = arith.addf %214, %215 : vector<16x128xf32>
    %217 = math.tanh %216 : vector<16x128xf32>
    %218 = arith.mulf %213, %217 : vector<16x128xf32>
    %219 = arith.truncf %218 : vector<16x128xf32> to vector<16x128xbf16>
    %220 = arith.index_cast %187 : i32 to index
    %c0_56 = arith.constant 0 : index
    %221 = vector.load %arg1[%220, %c0_56] : memref<128x1xf32, #tpu.memory_space<vmem>>, vector<16x1xf32>
    %cst_57 = arith.constant 5.000000e-01 : f32
    %222 = vector.broadcast %cst_57 : f32 to vector<16x1xf32>
    %223 = arith.cmpf ogt, %221, %222 : vector<16x1xf32>
    %224 = vector.shape_cast %223 : vector<16x1xi1> to vector<16x1xi1>
    %225 = vector.broadcast %224 : vector<16x1xi1> to vector<16x128xi1>
    %226 = arith.select %225, %219, %182 : vector<16x128xi1>, vector<16x128xbf16>
    %227 = vector.shape_cast %223 : vector<16x1xi1> to vector<16x1xi1>
    %228 = vector.broadcast %227 : vector<16x1xi1> to vector<16x128xi1>
    %229 = arith.select %228, %216, %185 : vector<16x128xi1>, vector<16x128xf32>
    %c5_i32 = arith.constant 5 : i32
    %c16_i32_58 = arith.constant 16 : i32
    %230 = arith.muli %c5_i32, %c16_i32_58 : i32
    %231 = tpu.assume_multiple %230, 16 : i32
    %232 = arith.index_cast %231 : i32 to index
    %c0_59 = arith.constant 0 : index
    %233 = vector.load %arg22[%232, %c0_59] : memref<128x512xbf16, #tpu.memory_space<vmem>>, vector<16x512xbf16>
    %c0_60 = arith.constant 0 : index
    %c0_61 = arith.constant 0 : index
    %234 = vector.load %arg4[%c0_60, %c0_61] : memref<128x512xbf16, #tpu.memory_space<vmem>>, vector<128x512xbf16>
    %cst_62 = arith.constant dense<0.000000e+00> : vector<16x512xf32>
    %235 = tpu.matmul %226, %234, %cst_62 {dimension_numbers = #tpu.dot_dimension_numbers<[1], [0], [0], [1], [0, 0, 1, 1], [], []>} : vector<16x128xbf16>, vector<128x512xbf16>, vector<16x512xf32> -> vector<16x512xf32>
    %236 = arith.extf %233 : vector<16x512xbf16> to vector<16x512xf32>
    %237 = arith.addf %236, %235 : vector<16x512xf32>
    %238 = vector.extract_strided_slice %237 {offsets = [0, 0], sizes = [16, 128], strides = [1, 1]} : vector<16x512xf32> to vector<16x128xf32>
    %239 = arith.negf %238 : vector<16x128xf32>
    %240 = math.exp %239 : vector<16x128xf32>
    %cst_63 = arith.constant 1.000000e+00 : f32
    %241 = vector.broadcast %cst_63 : f32 to vector<16x128xf32>
    %242 = arith.addf %241, %240 : vector<16x128xf32>
    %243 = arith.divf %241, %242 : vector<16x128xf32>
    %244 = vector.extract_strided_slice %237 {offsets = [0, 128], sizes = [16, 128], strides = [1, 1]} : vector<16x512xf32> to vector<16x128xf32>
    %245 = arith.negf %244 : vector<16x128xf32>
    %246 = math.exp %245 : vector<16x128xf32>
    %cst_64 = arith.constant 1.000000e+00 : f32
    %247 = vector.broadcast %cst_64 : f32 to vector<16x128xf32>
    %248 = arith.addf %247, %246 : vector<16x128xf32>
    %249 = arith.divf %247, %248 : vector<16x128xf32>
    %250 = vector.extract_strided_slice %237 {offsets = [0, 256], sizes = [16, 128], strides = [1, 1]} : vector<16x512xf32> to vector<16x128xf32>
    %251 = math.tanh %250 : vector<16x128xf32>
    %252 = vector.extract_strided_slice %237 {offsets = [0, 384], sizes = [16, 128], strides = [1, 1]} : vector<16x512xf32> to vector<16x128xf32>
    %253 = arith.negf %252 : vector<16x128xf32>
    %254 = math.exp %253 : vector<16x128xf32>
    %cst_65 = arith.constant 1.000000e+00 : f32
    %255 = vector.broadcast %cst_65 : f32 to vector<16x128xf32>
    %256 = arith.addf %255, %254 : vector<16x128xf32>
    %257 = arith.divf %255, %256 : vector<16x128xf32>
    %258 = arith.mulf %249, %229 : vector<16x128xf32>
    %259 = arith.mulf %243, %251 : vector<16x128xf32>
    %260 = arith.addf %258, %259 : vector<16x128xf32>
    %261 = math.tanh %260 : vector<16x128xf32>
    %262 = arith.mulf %257, %261 : vector<16x128xf32>
    %263 = arith.truncf %262 : vector<16x128xf32> to vector<16x128xbf16>
    %264 = arith.index_cast %231 : i32 to index
    %c0_66 = arith.constant 0 : index
    %265 = vector.load %arg1[%264, %c0_66] : memref<128x1xf32, #tpu.memory_space<vmem>>, vector<16x1xf32>
    %cst_67 = arith.constant 5.000000e-01 : f32
    %266 = vector.broadcast %cst_67 : f32 to vector<16x1xf32>
    %267 = arith.cmpf ogt, %265, %266 : vector<16x1xf32>
    %268 = vector.shape_cast %267 : vector<16x1xi1> to vector<16x1xi1>
    %269 = vector.broadcast %268 : vector<16x1xi1> to vector<16x128xi1>
    %270 = arith.select %269, %263, %226 : vector<16x128xi1>, vector<16x128xbf16>
    %271 = vector.shape_cast %267 : vector<16x1xi1> to vector<16x1xi1>
    %272 = vector.broadcast %271 : vector<16x1xi1> to vector<16x128xi1>
    %273 = arith.select %272, %260, %229 : vector<16x128xi1>, vector<16x128xf32>
    %c6_i32 = arith.constant 6 : i32
    %c16_i32_68 = arith.constant 16 : i32
    %274 = arith.muli %c6_i32, %c16_i32_68 : i32
    %275 = tpu.assume_multiple %274, 16 : i32
    %276 = arith.index_cast %275 : i32 to index
    %c0_69 = arith.constant 0 : index
    %277 = vector.load %arg22[%276, %c0_69] : memref<128x512xbf16, #tpu.memory_space<vmem>>, vector<16x512xbf16>
    %c0_70 = arith.constant 0 : index
    %c0_71 = arith.constant 0 : index
    %278 = vector.load %arg4[%c0_70, %c0_71] : memref<128x512xbf16, #tpu.memory_space<vmem>>, vector<128x512xbf16>
    %cst_72 = arith.constant dense<0.000000e+00> : vector<16x512xf32>
    %279 = tpu.matmul %270, %278, %cst_72 {dimension_numbers = #tpu.dot_dimension_numbers<[1], [0], [0], [1], [0, 0, 1, 1], [], []>} : vector<16x128xbf16>, vector<128x512xbf16>, vector<16x512xf32> -> vector<16x512xf32>
    %280 = arith.extf %277 : vector<16x512xbf16> to vector<16x512xf32>
    %281 = arith.addf %280, %279 : vector<16x512xf32>
    %282 = vector.extract_strided_slice %281 {offsets = [0, 0], sizes = [16, 128], strides = [1, 1]} : vector<16x512xf32> to vector<16x128xf32>
    %283 = arith.negf %282 : vector<16x128xf32>
    %284 = math.exp %283 : vector<16x128xf32>
    %cst_73 = arith.constant 1.000000e+00 : f32
    %285 = vector.broadcast %cst_73 : f32 to vector<16x128xf32>
    %286 = arith.addf %285, %284 : vector<16x128xf32>
    %287 = arith.divf %285, %286 : vector<16x128xf32>
    %288 = vector.extract_strided_slice %281 {offsets = [0, 128], sizes = [16, 128], strides = [1, 1]} : vector<16x512xf32> to vector<16x128xf32>
    %289 = arith.negf %288 : vector<16x128xf32>
    %290 = math.exp %289 : vector<16x128xf32>
    %cst_74 = arith.constant 1.000000e+00 : f32
    %291 = vector.broadcast %cst_74 : f32 to vector<16x128xf32>
    %292 = arith.addf %291, %290 : vector<16x128xf32>
    %293 = arith.divf %291, %292 : vector<16x128xf32>
    %294 = vector.extract_strided_slice %281 {offsets = [0, 256], sizes = [16, 128], strides = [1, 1]} : vector<16x512xf32> to vector<16x128xf32>
    %295 = math.tanh %294 : vector<16x128xf32>
    %296 = vector.extract_strided_slice %281 {offsets = [0, 384], sizes = [16, 128], strides = [1, 1]} : vector<16x512xf32> to vector<16x128xf32>
    %297 = arith.negf %296 : vector<16x128xf32>
    %298 = math.exp %297 : vector<16x128xf32>
    %cst_75 = arith.constant 1.000000e+00 : f32
    %299 = vector.broadcast %cst_75 : f32 to vector<16x128xf32>
    %300 = arith.addf %299, %298 : vector<16x128xf32>
    %301 = arith.divf %299, %300 : vector<16x128xf32>
    %302 = arith.mulf %293, %273 : vector<16x128xf32>
    %303 = arith.mulf %287, %295 : vector<16x128xf32>
    %304 = arith.addf %302, %303 : vector<16x128xf32>
    %305 = math.tanh %304 : vector<16x128xf32>
    %306 = arith.mulf %301, %305 : vector<16x128xf32>
    %307 = arith.truncf %306 : vector<16x128xf32> to vector<16x128xbf16>
    %308 = arith.index_cast %275 : i32 to index
    %c0_76 = arith.constant 0 : index
    %309 = vector.load %arg1[%308, %c0_76] : memref<128x1xf32, #tpu.memory_space<vmem>>, vector<16x1xf32>
    %cst_77 = arith.constant 5.000000e-01 : f32
    %310 = vector.broadcast %cst_77 : f32 to vector<16x1xf32>
    %311 = arith.cmpf ogt, %309, %310 : vector<16x1xf32>
    %312 = vector.shape_cast %311 : vector<16x1xi1> to vector<16x1xi1>
    %313 = vector.broadcast %312 : vector<16x1xi1> to vector<16x128xi1>
    %314 = arith.select %313, %307, %270 : vector<16x128xi1>, vector<16x128xbf16>
    %315 = vector.shape_cast %311 : vector<16x1xi1> to vector<16x1xi1>
    %316 = vector.broadcast %315 : vector<16x1xi1> to vector<16x128xi1>
    %317 = arith.select %316, %304, %273 : vector<16x128xi1>, vector<16x128xf32>
    %c7_i32 = arith.constant 7 : i32
    %c16_i32_78 = arith.constant 16 : i32
    %318 = arith.muli %c7_i32, %c16_i32_78 : i32
    %319 = tpu.assume_multiple %318, 16 : i32
    %320 = arith.index_cast %319 : i32 to index
    %c0_79 = arith.constant 0 : index
    %321 = vector.load %arg22[%320, %c0_79] : memref<128x512xbf16, #tpu.memory_space<vmem>>, vector<16x512xbf16>
    %c0_80 = arith.constant 0 : index
    %c0_81 = arith.constant 0 : index
    %322 = vector.load %arg4[%c0_80, %c0_81] : memref<128x512xbf16, #tpu.memory_space<vmem>>, vector<128x512xbf16>
    %cst_82 = arith.constant dense<0.000000e+00> : vector<16x512xf32>
    %323 = tpu.matmul %314, %322, %cst_82 {dimension_numbers = #tpu.dot_dimension_numbers<[1], [0], [0], [1], [0, 0, 1, 1], [], []>} : vector<16x128xbf16>, vector<128x512xbf16>, vector<16x512xf32> -> vector<16x512xf32>
    %324 = arith.extf %321 : vector<16x512xbf16> to vector<16x512xf32>
    %325 = arith.addf %324, %323 : vector<16x512xf32>
    %326 = vector.extract_strided_slice %325 {offsets = [0, 0], sizes = [16, 128], strides = [1, 1]} : vector<16x512xf32> to vector<16x128xf32>
    %327 = arith.negf %326 : vector<16x128xf32>
    %328 = math.exp %327 : vector<16x128xf32>
    %cst_83 = arith.constant 1.000000e+00 : f32
    %329 = vector.broadcast %cst_83 : f32 to vector<16x128xf32>
    %330 = arith.addf %329, %328 : vector<16x128xf32>
    %331 = arith.divf %329, %330 : vector<16x128xf32>
    %332 = vector.extract_strided_slice %325 {offsets = [0, 128], sizes = [16, 128], strides = [1, 1]} : vector<16x512xf32> to vector<16x128xf32>
    %333 = arith.negf %332 : vector<16x128xf32>
    %334 = math.exp %333 : vector<16x128xf32>
    %cst_84 = arith.constant 1.000000e+00 : f32
    %335 = vector.broadcast %cst_84 : f32 to vector<16x128xf32>
    %336 = arith.addf %335, %334 : vector<16x128xf32>
    %337 = arith.divf %335, %336 : vector<16x128xf32>
    %338 = vector.extract_strided_slice %325 {offsets = [0, 256], sizes = [16, 128], strides = [1, 1]} : vector<16x512xf32> to vector<16x128xf32>
    %339 = math.tanh %338 : vector<16x128xf32>
    %340 = vector.extract_strided_slice %325 {offsets = [0, 384], sizes = [16, 128], strides = [1, 1]} : vector<16x512xf32> to vector<16x128xf32>
    %341 = arith.negf %340 : vector<16x128xf32>
    %342 = math.exp %341 : vector<16x128xf32>
    %cst_85 = arith.constant 1.000000e+00 : f32
    %343 = vector.broadcast %cst_85 : f32 to vector<16x128xf32>
    %344 = arith.addf %343, %342 : vector<16x128xf32>
    %345 = arith.divf %343, %344 : vector<16x128xf32>
    %346 = arith.mulf %337, %317 : vector<16x128xf32>
    %347 = arith.mulf %331, %339 : vector<16x128xf32>
    %348 = arith.addf %346, %347 : vector<16x128xf32>
    %349 = math.tanh %348 : vector<16x128xf32>
    %350 = arith.mulf %345, %349 : vector<16x128xf32>
    %351 = arith.truncf %350 : vector<16x128xf32> to vector<16x128xbf16>
    %352 = arith.index_cast %319 : i32 to index
    %c0_86 = arith.constant 0 : index
    %353 = vector.load %arg1[%352, %c0_86] : memref<128x1xf32, #tpu.memory_space<vmem>>, vector<16x1xf32>
    %cst_87 = arith.constant 5.000000e-01 : f32
    %354 = vector.broadcast %cst_87 : f32 to vector<16x1xf32>
    %355 = arith.cmpf ogt, %353, %354 : vector<16x1xf32>
    %356 = vector.shape_cast %355 : vector<16x1xi1> to vector<16x1xi1>
    %357 = vector.broadcast %356 : vector<16x1xi1> to vector<16x128xi1>
    %358 = arith.select %357, %351, %314 : vector<16x128xi1>, vector<16x128xbf16>
    %359 = vector.shape_cast %355 : vector<16x1xi1> to vector<16x1xi1>
    %360 = vector.broadcast %359 : vector<16x1xi1> to vector<16x128xi1>
    %361 = arith.select %360, %348, %317 : vector<16x128xi1>, vector<16x128xf32>
    %c8_i32 = arith.constant 8 : i32
    %c0_88 = arith.constant 0 : index
    %c0_89 = arith.constant 0 : index
    %362 = vector.load %arg2[%c0_88, %c0_89] : memref<16x8xf32, #tpu.memory_space<vmem>>, vector<16x8xf32>
    %363 = arith.truncf %362 : vector<16x8xf32> to vector<16x8xbf16>
    %c0_90 = arith.constant 0 : index
    %c0_91 = arith.constant 0 : index
    %364 = vector.load %arg6[%c0_90, %c0_91] : memref<128x24xbf16, #tpu.memory_space<vmem>>, vector<128x24xbf16>
    %cst_92 = arith.constant dense<0.000000e+00> : vector<16x24xf32>
    %365 = tpu.matmul %358, %364, %cst_92 {dimension_numbers = #tpu.dot_dimension_numbers<[1], [0], [0], [1], [0, 0, 1, 1], [], []>} : vector<16x128xbf16>, vector<128x24xbf16>, vector<16x24xf32> -> vector<16x24xf32>
    %c0_93 = arith.constant 0 : index
    %c0_94 = arith.constant 0 : index
    %366 = vector.load %arg7[%c0_93, %c0_94] : memref<8x24xbf16, #tpu.memory_space<vmem>>, vector<8x24xbf16>
    %cst_95 = arith.constant dense<0.000000e+00> : vector<16x24xf32>
    %367 = tpu.matmul %363, %366, %cst_95 {dimension_numbers = #tpu.dot_dimension_numbers<[1], [0], [0], [1], [0, 0, 1, 1], [], []>} : vector<16x8xbf16>, vector<8x24xbf16>, vector<16x24xf32> -> vector<16x24xf32>
    %368 = arith.addf %365, %367 : vector<16x24xf32>
    %c0_96 = arith.constant 0 : index
    %c0_97 = arith.constant 0 : index
    %369 = vector.load %arg8[%c0_96, %c0_97] : memref<1x24xf32, #tpu.memory_space<vmem>>, vector<1x24xf32>
    %370 = vector.broadcast %369 : vector<1x24xf32> to vector<16x24xf32>
    %371 = arith.addf %368, %370 : vector<16x24xf32>
    %c0_98 = arith.constant 0 : index
    %c0_99 = arith.constant 0 : index
    %372 = vector.load %arg18[%c0_98, %c0_99] : memref<16x24xf32, #tpu.memory_space<vmem>>, vector<16x24xf32>
    tpu.vector_store %arg18[%c0_98, %c0_99], %371 {strides = array<i32>} : memref<16x24xf32, #tpu.memory_space<vmem>>, vector<16x24xf32>,
    %373 = vector.extract_strided_slice %371 {offsets = [0, 0], sizes = [16, 12], strides = [1, 1]} : vector<16x24xf32> to vector<16x12xf32>
    %374 = arith.truncf %373 : vector<16x12xf32> to vector<16x12xbf16>
    %c0_100 = arith.constant 0 : index
    %c0_101 = arith.constant 0 : index
    %375 = vector.load %arg9[%c0_100, %c0_101] : memref<12x256xbf16, #tpu.memory_space<vmem>>, vector<12x256xbf16>
    %cst_102 = arith.constant dense<0.000000e+00> : vector<16x256xf32>
    %376 = tpu.matmul %374, %375, %cst_102 {dimension_numbers = #tpu.dot_dimension_numbers<[1], [0], [0], [1], [0, 0, 1, 1], [], []>} : vector<16x12xbf16>, vector<12x256xbf16>, vector<16x256xf32> -> vector<16x256xf32>
    %c0_103 = arith.constant 0 : index
    %c0_104 = arith.constant 0 : index
    %377 = vector.load %arg10[%c0_103, %c0_104] : memref<1x256xf32, #tpu.memory_space<vmem>>, vector<1x256xf32>
    %378 = vector.broadcast %377 : vector<1x256xf32> to vector<16x256xf32>
    %379 = arith.addf %376, %378 : vector<16x256xf32>
    %cst_105 = arith.constant 0.000000e+00 : f32
    %380 = vector.broadcast %cst_105 : f32 to vector<16x256xf32>
    %381 = arith.maximumf %379, %380 : vector<16x256xf32>
    %382 = vector.extract_strided_slice %381 {offsets = [0, 0], sizes = [16, 128], strides = [1, 1]} : vector<16x256xf32> to vector<16x128xf32>
    %383 = arith.truncf %382 : vector<16x128xf32> to vector<16x128xbf16>
    %384 = vector.extract_strided_slice %381 {offsets = [0, 128], sizes = [16, 128], strides = [1, 1]} : vector<16x256xf32> to vector<16x128xf32>
    %385 = arith.truncf %384 : vector<16x128xf32> to vector<16x128xbf16>
    %c0_106 = arith.constant 0 : index
    %c0_107 = arith.constant 0 : index
    %386 = vector.load %arg11[%c0_106, %c0_107] : memref<128x8xbf16, #tpu.memory_space<vmem>>, vector<128x8xbf16>
    %cst_108 = arith.constant dense<0.000000e+00> : vector<16x8xf32>
    %387 = tpu.matmul %383, %386, %cst_108 {dimension_numbers = #tpu.dot_dimension_numbers<[1], [0], [0], [1], [0, 0, 1, 1], [], []>} : vector<16x128xbf16>, vector<128x8xbf16>, vector<16x8xf32> -> vector<16x8xf32>
    %c0_109 = arith.constant 0 : index
    %c0_110 = arith.constant 0 : index
    %388 = vector.load %arg12[%c0_109, %c0_110] : memref<1x8xf32, #tpu.memory_space<vmem>>, vector<1x8xf32>
    %389 = vector.broadcast %388 : vector<1x8xf32> to vector<16x8xf32>
    %390 = arith.addf %387, %389 : vector<16x8xf32>
    %391 = math.exp %390 : vector<16x8xf32>
    %c0_111 = arith.constant 0 : index
    %c0_112 = arith.constant 0 : index
    %392 = vector.load %arg19[%c0_111, %c0_112] : memref<16x8xf32, #tpu.memory_space<vmem>>, vector<16x8xf32>
    tpu.vector_store %arg19[%c0_111, %c0_112], %391 {strides = array<i32>} : memref<16x8xf32, #tpu.memory_space<vmem>>, vector<16x8xf32>,
    %c0_113 = arith.constant 0 : index
    %c0_114 = arith.constant 0 : index
    %393 = vector.load %arg13[%c0_113, %c0_114] : memref<128x128xbf16, #tpu.memory_space<vmem>>, vector<128x128xbf16>
    %cst_115 = arith.constant dense<0.000000e+00> : vector<16x128xf32>
    %394 = tpu.matmul %385, %393, %cst_115 {dimension_numbers = #tpu.dot_dimension_numbers<[1], [0], [0], [1], [0, 0, 1, 1], [], []>} : vector<16x128xbf16>, vector<128x128xbf16>, vector<16x128xf32> -> vector<16x128xf32>
    %c0_116 = arith.constant 0 : index
    %c0_117 = arith.constant 0 : index
    %395 = vector.load %arg14[%c0_116, %c0_117] : memref<1x128xf32, #tpu.memory_space<vmem>>, vector<1x128xf32>
    %396 = vector.broadcast %395 : vector<1x128xf32> to vector<16x128xf32>
    %397 = arith.addf %394, %396 : vector<16x128xf32>
    %c0_118 = arith.constant 0 : index
    %c0_119 = arith.constant 0 : index
    %398 = vector.load %arg20[%c0_118, %c0_119] : memref<16x128xf32, #tpu.memory_space<vmem>>, vector<16x128xf32>
    tpu.vector_store %arg20[%c0_118, %c0_119], %397 {strides = array<i32>} : memref<16x128xf32, #tpu.memory_space<vmem>>, vector<16x128xf32>,
    %c0_120 = arith.constant 0 : index
    %c0_121 = arith.constant 0 : index
    %399 = vector.load %arg15[%c0_120, %c0_121] : memref<12x256xbf16, #tpu.memory_space<vmem>>, vector<12x256xbf16>
    %cst_122 = arith.constant dense<0.000000e+00> : vector<16x256xf32>
    %400 = tpu.matmul %374, %399, %cst_122 {dimension_numbers = #tpu.dot_dimension_numbers<[1], [0], [0], [1], [0, 0, 1, 1], [], []>} : vector<16x12xbf16>, vector<12x256xbf16>, vector<16x256xf32> -> vector<16x256xf32>
    %c0_123 = arith.constant 0 : index
    %c0_124 = arith.constant 0 : index
    %401 = vector.load %arg16[%c0_123, %c0_124] : memref<8x256xbf16, #tpu.memory_space<vmem>>, vector<8x256xbf16>
    %cst_125 = arith.constant dense<0.000000e+00> : vector<16x256xf32>
    %402 = tpu.matmul %363, %401, %cst_125 {dimension_numbers = #tpu.dot_dimension_numbers<[1], [0], [0], [1], [0, 0, 1, 1], [], []>} : vector<16x8xbf16>, vector<8x256xbf16>, vector<16x256xf32> -> vector<16x256xf32>
    %403 = arith.addf %400, %402 : vector<16x256xf32>
    %c0_126 = arith.constant 0 : index
    %c0_127 = arith.constant 0 : index
    %404 = vector.load %arg17[%c0_126, %c0_127] : memref<1x256xf32, #tpu.memory_space<vmem>>, vector<1x256xf32>
    %405 = vector.broadcast %404 : vector<1x256xf32> to vector<16x256xf32>
    %406 = arith.addf %403, %405 : vector<16x256xf32>
    %407 = math.tanh %406 : vector<16x256xf32>
    %c0_128 = arith.constant 0 : index
    %c0_129 = arith.constant 0 : index
    %408 = vector.load %arg21[%c0_128, %c0_129] : memref<16x256xf32, #tpu.memory_space<vmem>>, vector<16x256xf32>
    tpu.vector_store %arg21[%c0_128, %c0_129], %407 {strides = array<i32>} : memref<16x256xf32, #tpu.memory_space<vmem>>, vector<16x256xf32>,
    return
  }
}

module attributes {stable_mosaic.version = 11 : i64} {
  func.func @_decoder_lstm_kernel(%arg0: memref<128x16xbf16, #tpu.memory_space<vmem>>, %arg1: memref<128x1xf32, #tpu.memory_space<vmem>>, %arg2: memref<16x512xbf16, #tpu.memory_space<vmem>>, %arg3: memref<128x512xbf16, #tpu.memory_space<vmem>>, %arg4: memref<1x512xf32, #tpu.memory_space<vmem>>, %arg5: memref<16x128xf32, #tpu.memory_space<vmem>>, %arg6: memref<16x128xf32, #tpu.memory_space<vmem>>, %arg7: memref<128x128xbf16, #tpu.memory_space<vmem>>, %arg8: memref<128x512xbf16, #tpu.memory_space<vmem>>) attributes {dimension_semantics = [], scalar_prefetch = 0 : i64, scratch_operands = 1 : i64, tpu.core_type = #tpu.core_type<tc>} {
    %c0 = arith.constant 0 : index
    %c0_0 = arith.constant 0 : index
    %0 = vector.load %arg0[%c0, %c0_0] : memref<128x16xbf16, #tpu.memory_space<vmem>>, vector<128x16xbf16>
    %c0_1 = arith.constant 0 : index
    %c0_2 = arith.constant 0 : index
    %1 = vector.load %arg2[%c0_1, %c0_2] : memref<16x512xbf16, #tpu.memory_space<vmem>>, vector<16x512xbf16>
    %cst = arith.constant dense<0.000000e+00> : vector<128x512xf32>
    %2 = tpu.matmul %0, %1, %cst {dimension_numbers = #tpu.dot_dimension_numbers<[1], [0], [0], [1], [0, 0, 1, 1], [], []>} : vector<128x16xbf16>, vector<16x512xbf16>, vector<128x512xf32> -> vector<128x512xf32>
    %c0_3 = arith.constant 0 : index
    %c0_4 = arith.constant 0 : index
    %3 = vector.load %arg4[%c0_3, %c0_4] : memref<1x512xf32, #tpu.memory_space<vmem>>, vector<1x512xf32>
    %4 = vector.broadcast %3 : vector<1x512xf32> to vector<128x512xf32>
    %5 = arith.addf %2, %4 : vector<128x512xf32>
    %6 = arith.truncf %5 : vector<128x512xf32> to vector<128x512xbf16>
    %c0_5 = arith.constant 0 : index
    %c0_6 = arith.constant 0 : index
    %7 = vector.load %arg8[%c0_5, %c0_6] : memref<128x512xbf16, #tpu.memory_space<vmem>>, vector<128x512xbf16>
    tpu.vector_store %arg8[%c0_5, %c0_6], %6 {strides = array<i32>} : memref<128x512xbf16, #tpu.memory_space<vmem>>, vector<128x512xbf16>,
    %c0_7 = arith.constant 0 : index
    %c0_8 = arith.constant 0 : index
    %8 = vector.load %arg5[%c0_7, %c0_8] : memref<16x128xf32, #tpu.memory_space<vmem>>, vector<16x128xf32>
    %9 = arith.truncf %8 : vector<16x128xf32> to vector<16x128xbf16>
    %c0_9 = arith.constant 0 : index
    %c0_10 = arith.constant 0 : index
    %10 = vector.load %arg6[%c0_9, %c0_10] : memref<16x128xf32, #tpu.memory_space<vmem>>, vector<16x128xf32>
    %c0_i32 = arith.constant 0 : i32
    %c16_i32 = arith.constant 16 : i32
    %11 = arith.muli %c0_i32, %c16_i32 : i32
    %12 = tpu.assume_multiple %11, 16 : i32
    %13 = arith.index_cast %12 : i32 to index
    %c0_11 = arith.constant 0 : index
    %14 = vector.load %arg8[%13, %c0_11] : memref<128x512xbf16, #tpu.memory_space<vmem>>, vector<16x512xbf16>
    %c0_12 = arith.constant 0 : index
    %c0_13 = arith.constant 0 : index
    %15 = vector.load %arg3[%c0_12, %c0_13] : memref<128x512xbf16, #tpu.memory_space<vmem>>, vector<128x512xbf16>
    %cst_14 = arith.constant dense<0.000000e+00> : vector<16x512xf32>
    %16 = tpu.matmul %9, %15, %cst_14 {dimension_numbers = #tpu.dot_dimension_numbers<[1], [0], [0], [1], [0, 0, 1, 1], [], []>} : vector<16x128xbf16>, vector<128x512xbf16>, vector<16x512xf32> -> vector<16x512xf32>
    %17 = arith.extf %14 : vector<16x512xbf16> to vector<16x512xf32>
    %18 = arith.addf %17, %16 : vector<16x512xf32>
    %19 = vector.extract_strided_slice %18 {offsets = [0, 0], sizes = [16, 128], strides = [1, 1]} : vector<16x512xf32> to vector<16x128xf32>
    %20 = arith.negf %19 : vector<16x128xf32>
    %21 = math.exp %20 : vector<16x128xf32>
    %cst_15 = arith.constant 1.000000e+00 : f32
    %22 = vector.broadcast %cst_15 : f32 to vector<16x128xf32>
    %23 = arith.addf %22, %21 : vector<16x128xf32>
    %24 = arith.divf %22, %23 : vector<16x128xf32>
    %25 = vector.extract_strided_slice %18 {offsets = [0, 128], sizes = [16, 128], strides = [1, 1]} : vector<16x512xf32> to vector<16x128xf32>
    %26 = arith.negf %25 : vector<16x128xf32>
    %27 = math.exp %26 : vector<16x128xf32>
    %cst_16 = arith.constant 1.000000e+00 : f32
    %28 = vector.broadcast %cst_16 : f32 to vector<16x128xf32>
    %29 = arith.addf %28, %27 : vector<16x128xf32>
    %30 = arith.divf %28, %29 : vector<16x128xf32>
    %31 = vector.extract_strided_slice %18 {offsets = [0, 256], sizes = [16, 128], strides = [1, 1]} : vector<16x512xf32> to vector<16x128xf32>
    %32 = math.tanh %31 : vector<16x128xf32>
    %33 = vector.extract_strided_slice %18 {offsets = [0, 384], sizes = [16, 128], strides = [1, 1]} : vector<16x512xf32> to vector<16x128xf32>
    %34 = arith.negf %33 : vector<16x128xf32>
    %35 = math.exp %34 : vector<16x128xf32>
    %cst_17 = arith.constant 1.000000e+00 : f32
    %36 = vector.broadcast %cst_17 : f32 to vector<16x128xf32>
    %37 = arith.addf %36, %35 : vector<16x128xf32>
    %38 = arith.divf %36, %37 : vector<16x128xf32>
    %39 = arith.mulf %30, %10 : vector<16x128xf32>
    %40 = arith.mulf %24, %32 : vector<16x128xf32>
    %41 = arith.addf %39, %40 : vector<16x128xf32>
    %42 = math.tanh %41 : vector<16x128xf32>
    %43 = arith.mulf %38, %42 : vector<16x128xf32>
    %44 = arith.truncf %43 : vector<16x128xf32> to vector<16x128xbf16>
    %45 = arith.index_cast %12 : i32 to index
    %c0_18 = arith.constant 0 : index
    %46 = vector.load %arg1[%45, %c0_18] : memref<128x1xf32, #tpu.memory_space<vmem>>, vector<16x1xf32>
    %cst_19 = arith.constant 5.000000e-01 : f32
    %47 = vector.broadcast %cst_19 : f32 to vector<16x1xf32>
    %48 = arith.cmpf ogt, %46, %47 : vector<16x1xf32>
    %cst_20 = arith.constant 0.000000e+00 : bf16
    %49 = vector.broadcast %cst_20 : bf16 to vector<16x128xbf16>
    %50 = vector.shape_cast %48 : vector<16x1xi1> to vector<16x1xi1>
    %51 = vector.broadcast %50 : vector<16x1xi1> to vector<16x128xi1>
    %52 = arith.select %51, %44, %49 : vector<16x128xi1>, vector<16x128xbf16>
    %53 = arith.index_cast %12 : i32 to index
    %c0_21 = arith.constant 0 : index
    %54 = vector.load %arg7[%53, %c0_21] : memref<128x128xbf16, #tpu.memory_space<vmem>>, vector<16x128xbf16>
    tpu.vector_store %arg7[%53, %c0_21], %52 {strides = array<i32>} : memref<128x128xbf16, #tpu.memory_space<vmem>>, vector<16x128xbf16>,
    %c1_i32 = arith.constant 1 : i32
    %c16_i32_22 = arith.constant 16 : i32
    %55 = arith.muli %c1_i32, %c16_i32_22 : i32
    %56 = tpu.assume_multiple %55, 16 : i32
    %57 = arith.index_cast %56 : i32 to index
    %c0_23 = arith.constant 0 : index
    %58 = vector.load %arg8[%57, %c0_23] : memref<128x512xbf16, #tpu.memory_space<vmem>>, vector<16x512xbf16>
    %c0_24 = arith.constant 0 : index
    %c0_25 = arith.constant 0 : index
    %59 = vector.load %arg3[%c0_24, %c0_25] : memref<128x512xbf16, #tpu.memory_space<vmem>>, vector<128x512xbf16>
    %cst_26 = arith.constant dense<0.000000e+00> : vector<16x512xf32>
    %60 = tpu.matmul %44, %59, %cst_26 {dimension_numbers = #tpu.dot_dimension_numbers<[1], [0], [0], [1], [0, 0, 1, 1], [], []>} : vector<16x128xbf16>, vector<128x512xbf16>, vector<16x512xf32> -> vector<16x512xf32>
    %61 = arith.extf %58 : vector<16x512xbf16> to vector<16x512xf32>
    %62 = arith.addf %61, %60 : vector<16x512xf32>
    %63 = vector.extract_strided_slice %62 {offsets = [0, 0], sizes = [16, 128], strides = [1, 1]} : vector<16x512xf32> to vector<16x128xf32>
    %64 = arith.negf %63 : vector<16x128xf32>
    %65 = math.exp %64 : vector<16x128xf32>
    %cst_27 = arith.constant 1.000000e+00 : f32
    %66 = vector.broadcast %cst_27 : f32 to vector<16x128xf32>
    %67 = arith.addf %66, %65 : vector<16x128xf32>
    %68 = arith.divf %66, %67 : vector<16x128xf32>
    %69 = vector.extract_strided_slice %62 {offsets = [0, 128], sizes = [16, 128], strides = [1, 1]} : vector<16x512xf32> to vector<16x128xf32>
    %70 = arith.negf %69 : vector<16x128xf32>
    %71 = math.exp %70 : vector<16x128xf32>
    %cst_28 = arith.constant 1.000000e+00 : f32
    %72 = vector.broadcast %cst_28 : f32 to vector<16x128xf32>
    %73 = arith.addf %72, %71 : vector<16x128xf32>
    %74 = arith.divf %72, %73 : vector<16x128xf32>
    %75 = vector.extract_strided_slice %62 {offsets = [0, 256], sizes = [16, 128], strides = [1, 1]} : vector<16x512xf32> to vector<16x128xf32>
    %76 = math.tanh %75 : vector<16x128xf32>
    %77 = vector.extract_strided_slice %62 {offsets = [0, 384], sizes = [16, 128], strides = [1, 1]} : vector<16x512xf32> to vector<16x128xf32>
    %78 = arith.negf %77 : vector<16x128xf32>
    %79 = math.exp %78 : vector<16x128xf32>
    %cst_29 = arith.constant 1.000000e+00 : f32
    %80 = vector.broadcast %cst_29 : f32 to vector<16x128xf32>
    %81 = arith.addf %80, %79 : vector<16x128xf32>
    %82 = arith.divf %80, %81 : vector<16x128xf32>
    %83 = arith.mulf %74, %41 : vector<16x128xf32>
    %84 = arith.mulf %68, %76 : vector<16x128xf32>
    %85 = arith.addf %83, %84 : vector<16x128xf32>
    %86 = math.tanh %85 : vector<16x128xf32>
    %87 = arith.mulf %82, %86 : vector<16x128xf32>
    %88 = arith.truncf %87 : vector<16x128xf32> to vector<16x128xbf16>
    %89 = arith.index_cast %56 : i32 to index
    %c0_30 = arith.constant 0 : index
    %90 = vector.load %arg1[%89, %c0_30] : memref<128x1xf32, #tpu.memory_space<vmem>>, vector<16x1xf32>
    %cst_31 = arith.constant 5.000000e-01 : f32
    %91 = vector.broadcast %cst_31 : f32 to vector<16x1xf32>
    %92 = arith.cmpf ogt, %90, %91 : vector<16x1xf32>
    %cst_32 = arith.constant 0.000000e+00 : bf16
    %93 = vector.broadcast %cst_32 : bf16 to vector<16x128xbf16>
    %94 = vector.shape_cast %92 : vector<16x1xi1> to vector<16x1xi1>
    %95 = vector.broadcast %94 : vector<16x1xi1> to vector<16x128xi1>
    %96 = arith.select %95, %88, %93 : vector<16x128xi1>, vector<16x128xbf16>
    %97 = arith.index_cast %56 : i32 to index
    %c0_33 = arith.constant 0 : index
    %98 = vector.load %arg7[%97, %c0_33] : memref<128x128xbf16, #tpu.memory_space<vmem>>, vector<16x128xbf16>
    tpu.vector_store %arg7[%97, %c0_33], %96 {strides = array<i32>} : memref<128x128xbf16, #tpu.memory_space<vmem>>, vector<16x128xbf16>,
    %c2_i32 = arith.constant 2 : i32
    %c16_i32_34 = arith.constant 16 : i32
    %99 = arith.muli %c2_i32, %c16_i32_34 : i32
    %100 = tpu.assume_multiple %99, 16 : i32
    %101 = arith.index_cast %100 : i32 to index
    %c0_35 = arith.constant 0 : index
    %102 = vector.load %arg8[%101, %c0_35] : memref<128x512xbf16, #tpu.memory_space<vmem>>, vector<16x512xbf16>
    %c0_36 = arith.constant 0 : index
    %c0_37 = arith.constant 0 : index
    %103 = vector.load %arg3[%c0_36, %c0_37] : memref<128x512xbf16, #tpu.memory_space<vmem>>, vector<128x512xbf16>
    %cst_38 = arith.constant dense<0.000000e+00> : vector<16x512xf32>
    %104 = tpu.matmul %88, %103, %cst_38 {dimension_numbers = #tpu.dot_dimension_numbers<[1], [0], [0], [1], [0, 0, 1, 1], [], []>} : vector<16x128xbf16>, vector<128x512xbf16>, vector<16x512xf32> -> vector<16x512xf32>
    %105 = arith.extf %102 : vector<16x512xbf16> to vector<16x512xf32>
    %106 = arith.addf %105, %104 : vector<16x512xf32>
    %107 = vector.extract_strided_slice %106 {offsets = [0, 0], sizes = [16, 128], strides = [1, 1]} : vector<16x512xf32> to vector<16x128xf32>
    %108 = arith.negf %107 : vector<16x128xf32>
    %109 = math.exp %108 : vector<16x128xf32>
    %cst_39 = arith.constant 1.000000e+00 : f32
    %110 = vector.broadcast %cst_39 : f32 to vector<16x128xf32>
    %111 = arith.addf %110, %109 : vector<16x128xf32>
    %112 = arith.divf %110, %111 : vector<16x128xf32>
    %113 = vector.extract_strided_slice %106 {offsets = [0, 128], sizes = [16, 128], strides = [1, 1]} : vector<16x512xf32> to vector<16x128xf32>
    %114 = arith.negf %113 : vector<16x128xf32>
    %115 = math.exp %114 : vector<16x128xf32>
    %cst_40 = arith.constant 1.000000e+00 : f32
    %116 = vector.broadcast %cst_40 : f32 to vector<16x128xf32>
    %117 = arith.addf %116, %115 : vector<16x128xf32>
    %118 = arith.divf %116, %117 : vector<16x128xf32>
    %119 = vector.extract_strided_slice %106 {offsets = [0, 256], sizes = [16, 128], strides = [1, 1]} : vector<16x512xf32> to vector<16x128xf32>
    %120 = math.tanh %119 : vector<16x128xf32>
    %121 = vector.extract_strided_slice %106 {offsets = [0, 384], sizes = [16, 128], strides = [1, 1]} : vector<16x512xf32> to vector<16x128xf32>
    %122 = arith.negf %121 : vector<16x128xf32>
    %123 = math.exp %122 : vector<16x128xf32>
    %cst_41 = arith.constant 1.000000e+00 : f32
    %124 = vector.broadcast %cst_41 : f32 to vector<16x128xf32>
    %125 = arith.addf %124, %123 : vector<16x128xf32>
    %126 = arith.divf %124, %125 : vector<16x128xf32>
    %127 = arith.mulf %118, %85 : vector<16x128xf32>
    %128 = arith.mulf %112, %120 : vector<16x128xf32>
    %129 = arith.addf %127, %128 : vector<16x128xf32>
    %130 = math.tanh %129 : vector<16x128xf32>
    %131 = arith.mulf %126, %130 : vector<16x128xf32>
    %132 = arith.truncf %131 : vector<16x128xf32> to vector<16x128xbf16>
    %133 = arith.index_cast %100 : i32 to index
    %c0_42 = arith.constant 0 : index
    %134 = vector.load %arg1[%133, %c0_42] : memref<128x1xf32, #tpu.memory_space<vmem>>, vector<16x1xf32>
    %cst_43 = arith.constant 5.000000e-01 : f32
    %135 = vector.broadcast %cst_43 : f32 to vector<16x1xf32>
    %136 = arith.cmpf ogt, %134, %135 : vector<16x1xf32>
    %cst_44 = arith.constant 0.000000e+00 : bf16
    %137 = vector.broadcast %cst_44 : bf16 to vector<16x128xbf16>
    %138 = vector.shape_cast %136 : vector<16x1xi1> to vector<16x1xi1>
    %139 = vector.broadcast %138 : vector<16x1xi1> to vector<16x128xi1>
    %140 = arith.select %139, %132, %137 : vector<16x128xi1>, vector<16x128xbf16>
    %141 = arith.index_cast %100 : i32 to index
    %c0_45 = arith.constant 0 : index
    %142 = vector.load %arg7[%141, %c0_45] : memref<128x128xbf16, #tpu.memory_space<vmem>>, vector<16x128xbf16>
    tpu.vector_store %arg7[%141, %c0_45], %140 {strides = array<i32>} : memref<128x128xbf16, #tpu.memory_space<vmem>>, vector<16x128xbf16>,
    %c3_i32 = arith.constant 3 : i32
    %c16_i32_46 = arith.constant 16 : i32
    %143 = arith.muli %c3_i32, %c16_i32_46 : i32
    %144 = tpu.assume_multiple %143, 16 : i32
    %145 = arith.index_cast %144 : i32 to index
    %c0_47 = arith.constant 0 : index
    %146 = vector.load %arg8[%145, %c0_47] : memref<128x512xbf16, #tpu.memory_space<vmem>>, vector<16x512xbf16>
    %c0_48 = arith.constant 0 : index
    %c0_49 = arith.constant 0 : index
    %147 = vector.load %arg3[%c0_48, %c0_49] : memref<128x512xbf16, #tpu.memory_space<vmem>>, vector<128x512xbf16>
    %cst_50 = arith.constant dense<0.000000e+00> : vector<16x512xf32>
    %148 = tpu.matmul %132, %147, %cst_50 {dimension_numbers = #tpu.dot_dimension_numbers<[1], [0], [0], [1], [0, 0, 1, 1], [], []>} : vector<16x128xbf16>, vector<128x512xbf16>, vector<16x512xf32> -> vector<16x512xf32>
    %149 = arith.extf %146 : vector<16x512xbf16> to vector<16x512xf32>
    %150 = arith.addf %149, %148 : vector<16x512xf32>
    %151 = vector.extract_strided_slice %150 {offsets = [0, 0], sizes = [16, 128], strides = [1, 1]} : vector<16x512xf32> to vector<16x128xf32>
    %152 = arith.negf %151 : vector<16x128xf32>
    %153 = math.exp %152 : vector<16x128xf32>
    %cst_51 = arith.constant 1.000000e+00 : f32
    %154 = vector.broadcast %cst_51 : f32 to vector<16x128xf32>
    %155 = arith.addf %154, %153 : vector<16x128xf32>
    %156 = arith.divf %154, %155 : vector<16x128xf32>
    %157 = vector.extract_strided_slice %150 {offsets = [0, 128], sizes = [16, 128], strides = [1, 1]} : vector<16x512xf32> to vector<16x128xf32>
    %158 = arith.negf %157 : vector<16x128xf32>
    %159 = math.exp %158 : vector<16x128xf32>
    %cst_52 = arith.constant 1.000000e+00 : f32
    %160 = vector.broadcast %cst_52 : f32 to vector<16x128xf32>
    %161 = arith.addf %160, %159 : vector<16x128xf32>
    %162 = arith.divf %160, %161 : vector<16x128xf32>
    %163 = vector.extract_strided_slice %150 {offsets = [0, 256], sizes = [16, 128], strides = [1, 1]} : vector<16x512xf32> to vector<16x128xf32>
    %164 = math.tanh %163 : vector<16x128xf32>
    %165 = vector.extract_strided_slice %150 {offsets = [0, 384], sizes = [16, 128], strides = [1, 1]} : vector<16x512xf32> to vector<16x128xf32>
    %166 = arith.negf %165 : vector<16x128xf32>
    %167 = math.exp %166 : vector<16x128xf32>
    %cst_53 = arith.constant 1.000000e+00 : f32
    %168 = vector.broadcast %cst_53 : f32 to vector<16x128xf32>
    %169 = arith.addf %168, %167 : vector<16x128xf32>
    %170 = arith.divf %168, %169 : vector<16x128xf32>
    %171 = arith.mulf %162, %129 : vector<16x128xf32>
    %172 = arith.mulf %156, %164 : vector<16x128xf32>
    %173 = arith.addf %171, %172 : vector<16x128xf32>
    %174 = math.tanh %173 : vector<16x128xf32>
    %175 = arith.mulf %170, %174 : vector<16x128xf32>
    %176 = arith.truncf %175 : vector<16x128xf32> to vector<16x128xbf16>
    %177 = arith.index_cast %144 : i32 to index
    %c0_54 = arith.constant 0 : index
    %178 = vector.load %arg1[%177, %c0_54] : memref<128x1xf32, #tpu.memory_space<vmem>>, vector<16x1xf32>
    %cst_55 = arith.constant 5.000000e-01 : f32
    %179 = vector.broadcast %cst_55 : f32 to vector<16x1xf32>
    %180 = arith.cmpf ogt, %178, %179 : vector<16x1xf32>
    %cst_56 = arith.constant 0.000000e+00 : bf16
    %181 = vector.broadcast %cst_56 : bf16 to vector<16x128xbf16>
    %182 = vector.shape_cast %180 : vector<16x1xi1> to vector<16x1xi1>
    %183 = vector.broadcast %182 : vector<16x1xi1> to vector<16x128xi1>
    %184 = arith.select %183, %176, %181 : vector<16x128xi1>, vector<16x128xbf16>
    %185 = arith.index_cast %144 : i32 to index
    %c0_57 = arith.constant 0 : index
    %186 = vector.load %arg7[%185, %c0_57] : memref<128x128xbf16, #tpu.memory_space<vmem>>, vector<16x128xbf16>
    tpu.vector_store %arg7[%185, %c0_57], %184 {strides = array<i32>} : memref<128x128xbf16, #tpu.memory_space<vmem>>, vector<16x128xbf16>,
    %c4_i32 = arith.constant 4 : i32
    %c16_i32_58 = arith.constant 16 : i32
    %187 = arith.muli %c4_i32, %c16_i32_58 : i32
    %188 = tpu.assume_multiple %187, 16 : i32
    %189 = arith.index_cast %188 : i32 to index
    %c0_59 = arith.constant 0 : index
    %190 = vector.load %arg8[%189, %c0_59] : memref<128x512xbf16, #tpu.memory_space<vmem>>, vector<16x512xbf16>
    %c0_60 = arith.constant 0 : index
    %c0_61 = arith.constant 0 : index
    %191 = vector.load %arg3[%c0_60, %c0_61] : memref<128x512xbf16, #tpu.memory_space<vmem>>, vector<128x512xbf16>
    %cst_62 = arith.constant dense<0.000000e+00> : vector<16x512xf32>
    %192 = tpu.matmul %176, %191, %cst_62 {dimension_numbers = #tpu.dot_dimension_numbers<[1], [0], [0], [1], [0, 0, 1, 1], [], []>} : vector<16x128xbf16>, vector<128x512xbf16>, vector<16x512xf32> -> vector<16x512xf32>
    %193 = arith.extf %190 : vector<16x512xbf16> to vector<16x512xf32>
    %194 = arith.addf %193, %192 : vector<16x512xf32>
    %195 = vector.extract_strided_slice %194 {offsets = [0, 0], sizes = [16, 128], strides = [1, 1]} : vector<16x512xf32> to vector<16x128xf32>
    %196 = arith.negf %195 : vector<16x128xf32>
    %197 = math.exp %196 : vector<16x128xf32>
    %cst_63 = arith.constant 1.000000e+00 : f32
    %198 = vector.broadcast %cst_63 : f32 to vector<16x128xf32>
    %199 = arith.addf %198, %197 : vector<16x128xf32>
    %200 = arith.divf %198, %199 : vector<16x128xf32>
    %201 = vector.extract_strided_slice %194 {offsets = [0, 128], sizes = [16, 128], strides = [1, 1]} : vector<16x512xf32> to vector<16x128xf32>
    %202 = arith.negf %201 : vector<16x128xf32>
    %203 = math.exp %202 : vector<16x128xf32>
    %cst_64 = arith.constant 1.000000e+00 : f32
    %204 = vector.broadcast %cst_64 : f32 to vector<16x128xf32>
    %205 = arith.addf %204, %203 : vector<16x128xf32>
    %206 = arith.divf %204, %205 : vector<16x128xf32>
    %207 = vector.extract_strided_slice %194 {offsets = [0, 256], sizes = [16, 128], strides = [1, 1]} : vector<16x512xf32> to vector<16x128xf32>
    %208 = math.tanh %207 : vector<16x128xf32>
    %209 = vector.extract_strided_slice %194 {offsets = [0, 384], sizes = [16, 128], strides = [1, 1]} : vector<16x512xf32> to vector<16x128xf32>
    %210 = arith.negf %209 : vector<16x128xf32>
    %211 = math.exp %210 : vector<16x128xf32>
    %cst_65 = arith.constant 1.000000e+00 : f32
    %212 = vector.broadcast %cst_65 : f32 to vector<16x128xf32>
    %213 = arith.addf %212, %211 : vector<16x128xf32>
    %214 = arith.divf %212, %213 : vector<16x128xf32>
    %215 = arith.mulf %206, %173 : vector<16x128xf32>
    %216 = arith.mulf %200, %208 : vector<16x128xf32>
    %217 = arith.addf %215, %216 : vector<16x128xf32>
    %218 = math.tanh %217 : vector<16x128xf32>
    %219 = arith.mulf %214, %218 : vector<16x128xf32>
    %220 = arith.truncf %219 : vector<16x128xf32> to vector<16x128xbf16>
    %221 = arith.index_cast %188 : i32 to index
    %c0_66 = arith.constant 0 : index
    %222 = vector.load %arg1[%221, %c0_66] : memref<128x1xf32, #tpu.memory_space<vmem>>, vector<16x1xf32>
    %cst_67 = arith.constant 5.000000e-01 : f32
    %223 = vector.broadcast %cst_67 : f32 to vector<16x1xf32>
    %224 = arith.cmpf ogt, %222, %223 : vector<16x1xf32>
    %cst_68 = arith.constant 0.000000e+00 : bf16
    %225 = vector.broadcast %cst_68 : bf16 to vector<16x128xbf16>
    %226 = vector.shape_cast %224 : vector<16x1xi1> to vector<16x1xi1>
    %227 = vector.broadcast %226 : vector<16x1xi1> to vector<16x128xi1>
    %228 = arith.select %227, %220, %225 : vector<16x128xi1>, vector<16x128xbf16>
    %229 = arith.index_cast %188 : i32 to index
    %c0_69 = arith.constant 0 : index
    %230 = vector.load %arg7[%229, %c0_69] : memref<128x128xbf16, #tpu.memory_space<vmem>>, vector<16x128xbf16>
    tpu.vector_store %arg7[%229, %c0_69], %228 {strides = array<i32>} : memref<128x128xbf16, #tpu.memory_space<vmem>>, vector<16x128xbf16>,
    %c5_i32 = arith.constant 5 : i32
    %c16_i32_70 = arith.constant 16 : i32
    %231 = arith.muli %c5_i32, %c16_i32_70 : i32
    %232 = tpu.assume_multiple %231, 16 : i32
    %233 = arith.index_cast %232 : i32 to index
    %c0_71 = arith.constant 0 : index
    %234 = vector.load %arg8[%233, %c0_71] : memref<128x512xbf16, #tpu.memory_space<vmem>>, vector<16x512xbf16>
    %c0_72 = arith.constant 0 : index
    %c0_73 = arith.constant 0 : index
    %235 = vector.load %arg3[%c0_72, %c0_73] : memref<128x512xbf16, #tpu.memory_space<vmem>>, vector<128x512xbf16>
    %cst_74 = arith.constant dense<0.000000e+00> : vector<16x512xf32>
    %236 = tpu.matmul %220, %235, %cst_74 {dimension_numbers = #tpu.dot_dimension_numbers<[1], [0], [0], [1], [0, 0, 1, 1], [], []>} : vector<16x128xbf16>, vector<128x512xbf16>, vector<16x512xf32> -> vector<16x512xf32>
    %237 = arith.extf %234 : vector<16x512xbf16> to vector<16x512xf32>
    %238 = arith.addf %237, %236 : vector<16x512xf32>
    %239 = vector.extract_strided_slice %238 {offsets = [0, 0], sizes = [16, 128], strides = [1, 1]} : vector<16x512xf32> to vector<16x128xf32>
    %240 = arith.negf %239 : vector<16x128xf32>
    %241 = math.exp %240 : vector<16x128xf32>
    %cst_75 = arith.constant 1.000000e+00 : f32
    %242 = vector.broadcast %cst_75 : f32 to vector<16x128xf32>
    %243 = arith.addf %242, %241 : vector<16x128xf32>
    %244 = arith.divf %242, %243 : vector<16x128xf32>
    %245 = vector.extract_strided_slice %238 {offsets = [0, 128], sizes = [16, 128], strides = [1, 1]} : vector<16x512xf32> to vector<16x128xf32>
    %246 = arith.negf %245 : vector<16x128xf32>
    %247 = math.exp %246 : vector<16x128xf32>
    %cst_76 = arith.constant 1.000000e+00 : f32
    %248 = vector.broadcast %cst_76 : f32 to vector<16x128xf32>
    %249 = arith.addf %248, %247 : vector<16x128xf32>
    %250 = arith.divf %248, %249 : vector<16x128xf32>
    %251 = vector.extract_strided_slice %238 {offsets = [0, 256], sizes = [16, 128], strides = [1, 1]} : vector<16x512xf32> to vector<16x128xf32>
    %252 = math.tanh %251 : vector<16x128xf32>
    %253 = vector.extract_strided_slice %238 {offsets = [0, 384], sizes = [16, 128], strides = [1, 1]} : vector<16x512xf32> to vector<16x128xf32>
    %254 = arith.negf %253 : vector<16x128xf32>
    %255 = math.exp %254 : vector<16x128xf32>
    %cst_77 = arith.constant 1.000000e+00 : f32
    %256 = vector.broadcast %cst_77 : f32 to vector<16x128xf32>
    %257 = arith.addf %256, %255 : vector<16x128xf32>
    %258 = arith.divf %256, %257 : vector<16x128xf32>
    %259 = arith.mulf %250, %217 : vector<16x128xf32>
    %260 = arith.mulf %244, %252 : vector<16x128xf32>
    %261 = arith.addf %259, %260 : vector<16x128xf32>
    %262 = math.tanh %261 : vector<16x128xf32>
    %263 = arith.mulf %258, %262 : vector<16x128xf32>
    %264 = arith.truncf %263 : vector<16x128xf32> to vector<16x128xbf16>
    %265 = arith.index_cast %232 : i32 to index
    %c0_78 = arith.constant 0 : index
    %266 = vector.load %arg1[%265, %c0_78] : memref<128x1xf32, #tpu.memory_space<vmem>>, vector<16x1xf32>
    %cst_79 = arith.constant 5.000000e-01 : f32
    %267 = vector.broadcast %cst_79 : f32 to vector<16x1xf32>
    %268 = arith.cmpf ogt, %266, %267 : vector<16x1xf32>
    %cst_80 = arith.constant 0.000000e+00 : bf16
    %269 = vector.broadcast %cst_80 : bf16 to vector<16x128xbf16>
    %270 = vector.shape_cast %268 : vector<16x1xi1> to vector<16x1xi1>
    %271 = vector.broadcast %270 : vector<16x1xi1> to vector<16x128xi1>
    %272 = arith.select %271, %264, %269 : vector<16x128xi1>, vector<16x128xbf16>
    %273 = arith.index_cast %232 : i32 to index
    %c0_81 = arith.constant 0 : index
    %274 = vector.load %arg7[%273, %c0_81] : memref<128x128xbf16, #tpu.memory_space<vmem>>, vector<16x128xbf16>
    tpu.vector_store %arg7[%273, %c0_81], %272 {strides = array<i32>} : memref<128x128xbf16, #tpu.memory_space<vmem>>, vector<16x128xbf16>,
    %c6_i32 = arith.constant 6 : i32
    %c16_i32_82 = arith.constant 16 : i32
    %275 = arith.muli %c6_i32, %c16_i32_82 : i32
    %276 = tpu.assume_multiple %275, 16 : i32
    %277 = arith.index_cast %276 : i32 to index
    %c0_83 = arith.constant 0 : index
    %278 = vector.load %arg8[%277, %c0_83] : memref<128x512xbf16, #tpu.memory_space<vmem>>, vector<16x512xbf16>
    %c0_84 = arith.constant 0 : index
    %c0_85 = arith.constant 0 : index
    %279 = vector.load %arg3[%c0_84, %c0_85] : memref<128x512xbf16, #tpu.memory_space<vmem>>, vector<128x512xbf16>
    %cst_86 = arith.constant dense<0.000000e+00> : vector<16x512xf32>
    %280 = tpu.matmul %264, %279, %cst_86 {dimension_numbers = #tpu.dot_dimension_numbers<[1], [0], [0], [1], [0, 0, 1, 1], [], []>} : vector<16x128xbf16>, vector<128x512xbf16>, vector<16x512xf32> -> vector<16x512xf32>
    %281 = arith.extf %278 : vector<16x512xbf16> to vector<16x512xf32>
    %282 = arith.addf %281, %280 : vector<16x512xf32>
    %283 = vector.extract_strided_slice %282 {offsets = [0, 0], sizes = [16, 128], strides = [1, 1]} : vector<16x512xf32> to vector<16x128xf32>
    %284 = arith.negf %283 : vector<16x128xf32>
    %285 = math.exp %284 : vector<16x128xf32>
    %cst_87 = arith.constant 1.000000e+00 : f32
    %286 = vector.broadcast %cst_87 : f32 to vector<16x128xf32>
    %287 = arith.addf %286, %285 : vector<16x128xf32>
    %288 = arith.divf %286, %287 : vector<16x128xf32>
    %289 = vector.extract_strided_slice %282 {offsets = [0, 128], sizes = [16, 128], strides = [1, 1]} : vector<16x512xf32> to vector<16x128xf32>
    %290 = arith.negf %289 : vector<16x128xf32>
    %291 = math.exp %290 : vector<16x128xf32>
    %cst_88 = arith.constant 1.000000e+00 : f32
    %292 = vector.broadcast %cst_88 : f32 to vector<16x128xf32>
    %293 = arith.addf %292, %291 : vector<16x128xf32>
    %294 = arith.divf %292, %293 : vector<16x128xf32>
    %295 = vector.extract_strided_slice %282 {offsets = [0, 256], sizes = [16, 128], strides = [1, 1]} : vector<16x512xf32> to vector<16x128xf32>
    %296 = math.tanh %295 : vector<16x128xf32>
    %297 = vector.extract_strided_slice %282 {offsets = [0, 384], sizes = [16, 128], strides = [1, 1]} : vector<16x512xf32> to vector<16x128xf32>
    %298 = arith.negf %297 : vector<16x128xf32>
    %299 = math.exp %298 : vector<16x128xf32>
    %cst_89 = arith.constant 1.000000e+00 : f32
    %300 = vector.broadcast %cst_89 : f32 to vector<16x128xf32>
    %301 = arith.addf %300, %299 : vector<16x128xf32>
    %302 = arith.divf %300, %301 : vector<16x128xf32>
    %303 = arith.mulf %294, %261 : vector<16x128xf32>
    %304 = arith.mulf %288, %296 : vector<16x128xf32>
    %305 = arith.addf %303, %304 : vector<16x128xf32>
    %306 = math.tanh %305 : vector<16x128xf32>
    %307 = arith.mulf %302, %306 : vector<16x128xf32>
    %308 = arith.truncf %307 : vector<16x128xf32> to vector<16x128xbf16>
    %309 = arith.index_cast %276 : i32 to index
    %c0_90 = arith.constant 0 : index
    %310 = vector.load %arg1[%309, %c0_90] : memref<128x1xf32, #tpu.memory_space<vmem>>, vector<16x1xf32>
    %cst_91 = arith.constant 5.000000e-01 : f32
    %311 = vector.broadcast %cst_91 : f32 to vector<16x1xf32>
    %312 = arith.cmpf ogt, %310, %311 : vector<16x1xf32>
    %cst_92 = arith.constant 0.000000e+00 : bf16
    %313 = vector.broadcast %cst_92 : bf16 to vector<16x128xbf16>
    %314 = vector.shape_cast %312 : vector<16x1xi1> to vector<16x1xi1>
    %315 = vector.broadcast %314 : vector<16x1xi1> to vector<16x128xi1>
    %316 = arith.select %315, %308, %313 : vector<16x128xi1>, vector<16x128xbf16>
    %317 = arith.index_cast %276 : i32 to index
    %c0_93 = arith.constant 0 : index
    %318 = vector.load %arg7[%317, %c0_93] : memref<128x128xbf16, #tpu.memory_space<vmem>>, vector<16x128xbf16>
    tpu.vector_store %arg7[%317, %c0_93], %316 {strides = array<i32>} : memref<128x128xbf16, #tpu.memory_space<vmem>>, vector<16x128xbf16>,
    %c7_i32 = arith.constant 7 : i32
    %c16_i32_94 = arith.constant 16 : i32
    %319 = arith.muli %c7_i32, %c16_i32_94 : i32
    %320 = tpu.assume_multiple %319, 16 : i32
    %321 = arith.index_cast %320 : i32 to index
    %c0_95 = arith.constant 0 : index
    %322 = vector.load %arg8[%321, %c0_95] : memref<128x512xbf16, #tpu.memory_space<vmem>>, vector<16x512xbf16>
    %c0_96 = arith.constant 0 : index
    %c0_97 = arith.constant 0 : index
    %323 = vector.load %arg3[%c0_96, %c0_97] : memref<128x512xbf16, #tpu.memory_space<vmem>>, vector<128x512xbf16>
    %cst_98 = arith.constant dense<0.000000e+00> : vector<16x512xf32>
    %324 = tpu.matmul %308, %323, %cst_98 {dimension_numbers = #tpu.dot_dimension_numbers<[1], [0], [0], [1], [0, 0, 1, 1], [], []>} : vector<16x128xbf16>, vector<128x512xbf16>, vector<16x512xf32> -> vector<16x512xf32>
    %325 = arith.extf %322 : vector<16x512xbf16> to vector<16x512xf32>
    %326 = arith.addf %325, %324 : vector<16x512xf32>
    %327 = vector.extract_strided_slice %326 {offsets = [0, 0], sizes = [16, 128], strides = [1, 1]} : vector<16x512xf32> to vector<16x128xf32>
    %328 = arith.negf %327 : vector<16x128xf32>
    %329 = math.exp %328 : vector<16x128xf32>
    %cst_99 = arith.constant 1.000000e+00 : f32
    %330 = vector.broadcast %cst_99 : f32 to vector<16x128xf32>
    %331 = arith.addf %330, %329 : vector<16x128xf32>
    %332 = arith.divf %330, %331 : vector<16x128xf32>
    %333 = vector.extract_strided_slice %326 {offsets = [0, 128], sizes = [16, 128], strides = [1, 1]} : vector<16x512xf32> to vector<16x128xf32>
    %334 = arith.negf %333 : vector<16x128xf32>
    %335 = math.exp %334 : vector<16x128xf32>
    %cst_100 = arith.constant 1.000000e+00 : f32
    %336 = vector.broadcast %cst_100 : f32 to vector<16x128xf32>
    %337 = arith.addf %336, %335 : vector<16x128xf32>
    %338 = arith.divf %336, %337 : vector<16x128xf32>
    %339 = vector.extract_strided_slice %326 {offsets = [0, 256], sizes = [16, 128], strides = [1, 1]} : vector<16x512xf32> to vector<16x128xf32>
    %340 = math.tanh %339 : vector<16x128xf32>
    %341 = vector.extract_strided_slice %326 {offsets = [0, 384], sizes = [16, 128], strides = [1, 1]} : vector<16x512xf32> to vector<16x128xf32>
    %342 = arith.negf %341 : vector<16x128xf32>
    %343 = math.exp %342 : vector<16x128xf32>
    %cst_101 = arith.constant 1.000000e+00 : f32
    %344 = vector.broadcast %cst_101 : f32 to vector<16x128xf32>
    %345 = arith.addf %344, %343 : vector<16x128xf32>
    %346 = arith.divf %344, %345 : vector<16x128xf32>
    %347 = arith.mulf %338, %305 : vector<16x128xf32>
    %348 = arith.mulf %332, %340 : vector<16x128xf32>
    %349 = arith.addf %347, %348 : vector<16x128xf32>
    %350 = math.tanh %349 : vector<16x128xf32>
    %351 = arith.mulf %346, %350 : vector<16x128xf32>
    %352 = arith.truncf %351 : vector<16x128xf32> to vector<16x128xbf16>
    %353 = arith.index_cast %320 : i32 to index
    %c0_102 = arith.constant 0 : index
    %354 = vector.load %arg1[%353, %c0_102] : memref<128x1xf32, #tpu.memory_space<vmem>>, vector<16x1xf32>
    %cst_103 = arith.constant 5.000000e-01 : f32
    %355 = vector.broadcast %cst_103 : f32 to vector<16x1xf32>
    %356 = arith.cmpf ogt, %354, %355 : vector<16x1xf32>
    %cst_104 = arith.constant 0.000000e+00 : bf16
    %357 = vector.broadcast %cst_104 : bf16 to vector<16x128xbf16>
    %358 = vector.shape_cast %356 : vector<16x1xi1> to vector<16x1xi1>
    %359 = vector.broadcast %358 : vector<16x1xi1> to vector<16x128xi1>
    %360 = arith.select %359, %352, %357 : vector<16x128xi1>, vector<16x128xbf16>
    %361 = arith.index_cast %320 : i32 to index
    %c0_105 = arith.constant 0 : index
    %362 = vector.load %arg7[%361, %c0_105] : memref<128x128xbf16, #tpu.memory_space<vmem>>, vector<16x128xbf16>
    tpu.vector_store %arg7[%361, %c0_105], %360 {strides = array<i32>} : memref<128x128xbf16, #tpu.memory_space<vmem>>, vector<16x128xbf16>,
    %c8_i32 = arith.constant 8 : i32
    return
  }
}

module attributes {stable_mosaic.version = 11 : i64} {
  func.func @_fcout_kernel(%arg0: i32, %arg1: memref<128x128xbf16, #tpu.memory_space<vmem>>, %arg2: memref<128x128xbf16, #tpu.memory_space<vmem>>, %arg3: memref<1x128xf32, #tpu.memory_space<vmem>>, %arg4: memref<128x128xf32, #tpu.memory_space<vmem>>) attributes {dimension_semantics = [#tpu.dimension_semantics<parallel>], iteration_bounds = array<i64: 1>, scalar_prefetch = 0 : i64, scratch_operands = 0 : i64, tpu.core_type = #tpu.core_type<tc>, window_params = [{pipeline_mode = #tpu.pipeline_mode<synchronous>, transform_indices = @transform_0, window_bounds = array<i64: 128, 128>}, {transform_indices = @transform_1, window_bounds = array<i64: 128, 128>}, {transform_indices = @transform_2, window_bounds = array<i64: 1, 128>}, {transform_indices = @transform_3, window_bounds = array<i64: 128, 128>}]} {
    %c0 = arith.constant 0 : index
    %c0_0 = arith.constant 0 : index
    %0 = vector.load %arg1[%c0, %c0_0] : memref<128x128xbf16, #tpu.memory_space<vmem>>, vector<128x128xbf16>
    %c0_1 = arith.constant 0 : index
    %c0_2 = arith.constant 0 : index
    %1 = vector.load %arg2[%c0_1, %c0_2] : memref<128x128xbf16, #tpu.memory_space<vmem>>, vector<128x128xbf16>
    %cst = arith.constant dense<0.000000e+00> : vector<128x128xf32>
    %2 = tpu.matmul %0, %1, %cst {dimension_numbers = #tpu.dot_dimension_numbers<[1], [0], [0], [1], [0, 0, 1, 1], [], []>} : vector<128x128xbf16>, vector<128x128xbf16>, vector<128x128xf32> -> vector<128x128xf32>
    %c0_3 = arith.constant 0 : index
    %c0_4 = arith.constant 0 : index
    %3 = vector.load %arg3[%c0_3, %c0_4] : memref<1x128xf32, #tpu.memory_space<vmem>>, vector<1x128xf32>
    %4 = vector.broadcast %3 : vector<1x128xf32> to vector<128x128xf32>
    %5 = arith.addf %2, %4 : vector<128x128xf32>
    %c0_5 = arith.constant 0 : index
    %c0_6 = arith.constant 0 : index
    %6 = vector.load %arg4[%c0_5, %c0_6] : memref<128x128xf32, #tpu.memory_space<vmem>>, vector<128x128xf32>
    tpu.vector_store %arg4[%c0_5, %c0_6], %5 {strides = array<i32>} : memref<128x128xf32, #tpu.memory_space<vmem>>, vector<128x128xf32>,
    return
  }
  func.func @transform_0(%arg0: i32) -> (i32, i32) {
    %c0_i32 = arith.constant 0 : i32
    %c0_i32_0 = arith.constant 0 : i32
    %c0_i32_1 = arith.constant 0 : i32
    return %c0_i32, %c0_i32_0 : i32, i32
  }
  func.func @transform_1(%arg0: i32) -> (i32, i32) {
    %c0_i32 = arith.constant 0 : i32
    %c0_i32_0 = arith.constant 0 : i32
    return %c0_i32, %arg0 : i32, i32
  }
  func.func @transform_2(%arg0: i32) -> (i32, i32) {
    %c0_i32 = arith.constant 0 : i32
    %c0_i32_0 = arith.constant 0 : i32
    return %c0_i32, %arg0 : i32, i32
  }
  func.func @transform_3(%arg0: i32) -> (i32, i32) {
    %c0_i32 = arith.constant 0 : i32
    %c0_i32_0 = arith.constant 0 : i32
    return %c0_i32, %arg0 : i32, i32
  }
}

</mosaic_0001>

<bundles_post_ra>
// kernel: textvae_forward.5
= control target key start
LH: loop header
LB: loop body
LE: loop exit
PB: predicated region body
PF: predicated region fallthrough
CT: control target
= control target key end

     0   :  { %s483_s1 = inlined_call_operand.vmem [shape: bf16[128,128], index: 1, kind: input, shape index: {}]   ;;  %s484_s0 = inlined_call_operand.vmem [shape: bf16[128,128], index: 0, kind: input, shape index: {}]   ;;  %s485_s2 = inlined_call_operand.vmem [shape: f32[1,128], index: 2, kind: input, shape index: {}]   ;;  %s486_s3 = inlined_call_operand.vmem [shape: f32[128,128], index: 3, kind: output, shape index: {}]  }
   0x1   :  { %v348_v0 = vld [vmem:[%s483_s1] sm:$0xff]   ;;  %v349_v1 = vld [vmem:[%s483_s1 + $0x8] sm:$0xff]   ;;  %v350_v2 = vld [vmem:[%s483_s1 + $0x10] sm:$0xff]  }
   0x2   :  { %300 = vmatprep.subr.bf16.mxu0 %v348_v0  ;;  %332 = vmatprep.subr.bf16.mxu1 %v348_v0  ;;  %v351_v3 = vld [vmem:[%s483_s1 + $0x18] sm:$0xff]   ;;  %v356_v4 = vld [vmem:[%s484_s0] sm:$0xff]   ;;  %v353_v7 = vld [vmem:[%s483_s1 + $0x28] sm:$0xff]  }
   0x3   :  { %301 = vmatpush3.bf16.msra.mxu0 %v348_v0  ;;  %340 = vmatpush3.bf16.msra.mxu1 %v348_v0  ;;  %v357_v5 = vld [vmem:[%s484_s0 + $0x20] sm:$0xff]   ;;  %v354_v8 = vld [vmem:[%s483_s1 + $0x30] sm:$0xff]   ;;  %v355_v9 = vld [vmem:[%s483_s1 + $0x38] sm:$0xff]  }
   0x4   :  { %302 = vmatprep.subr.bf16.mxu0 %v349_v1  ;;  %333 = vmatprep.subr.bf16.mxu1 %v349_v1  ;;  %v352_v6 = vld [vmem:[%s483_s1 + $0x20] sm:$0xff]   ;;  %v358_v10 = vld [vmem:[%s484_s0 + $0x8] sm:$0xff]   ;;  %v360_v12 = vld [vmem:[%s484_s0 + $0x10] sm:$0xff]  }
   0x5   :  { %316 = vmatprep.mubr.bf16.mxu0 %v356_v4  ;;  %324 = vmatprep.mubr.bf16.mxu1 %v357_v5  ;;  %v359_v11 = vld [vmem:[%s484_s0 + $0x28] sm:$0xff]   ;;  %v361_v13 = vld [vmem:[%s484_s0 + $0x30] sm:$0xff]   ;;  %v362_v14 = vld [vmem:[%s484_s0 + $0x18] sm:$0xff]  }
   0x6   :  { %v363_v15 = vld [vmem:[%s484_s0 + $0x38] sm:$0xff]   ;;  %v267_v16 = vld [vmem:[%s485_s2] ss:$0 sm:$0xff] }
   0x7   :  { %303 = vmatpush3.bf16.msra.mxu0 %v349_v1  ;;  %341 = vmatpush3.bf16.msra.mxu1 %v349_v1 }
   0x8   :  { %304 = vmatprep.subr.bf16.mxu0 %v350_v2  ;;  %334 = vmatprep.subr.bf16.mxu1 %v350_v2 }
   0xb   :  { %305 = vmatpush3.bf16.msra.mxu0 %v350_v2  ;;  %342 = vmatpush3.bf16.msra.mxu1 %v350_v2 }
   0xc   :  { %306 = vmatprep.subr.bf16.mxu0 %v351_v3  ;;  %335 = vmatprep.subr.bf16.mxu1 %v351_v3 }
   0xf   :  { %307 = vmatpush3.bf16.msra.mxu0 %v351_v3  ;;  %343 = vmatpush3.bf16.msra.mxu1 %v351_v3 }
  0x10   :  { %308 = vmatprep.subr.bf16.mxu0 %v352_v6  ;;  %336 = vmatprep.subr.bf16.mxu1 %v352_v6 }
  0x13   :  { %309 = vmatpush3.bf16.msra.mxu0 %v352_v6  ;;  %344 = vmatpush3.bf16.msra.mxu1 %v352_v6 }
  0x14   :  { %310 = vmatprep.subr.bf16.mxu0 %v353_v7  ;;  %337 = vmatprep.subr.bf16.mxu1 %v353_v7 }
  0x17   :  { %311 = vmatpush3.bf16.msra.mxu0 %v353_v7  ;;  %345 = vmatpush3.bf16.msra.mxu1 %v353_v7 }
  0x18   :  { %312 = vmatprep.subr.bf16.mxu0 %v354_v8  ;;  %338 = vmatprep.subr.bf16.mxu1 %v354_v8 }
  0x1b   :  { %313 = vmatpush3.bf16.msra.mxu0 %v354_v8  ;;  %346 = vmatpush3.bf16.msra.mxu1 %v354_v8 }
  0x1c   :  { %314 = vmatprep.subr.bf16.mxu0 %v355_v9  ;;  %339 = vmatprep.subr.bf16.mxu1 %v355_v9 }
  0x1f   :  { %315 = vmatpush3.bf16.msra.mxu0 %v355_v9  ;;  %347 = vmatpush3.bf16.msra.mxu1 %v355_v9 }
  0x22   :  { %317 = vmatmul.mubr.bf16.vlgmr.msra.gmra.mrb[0].mxu0 %v358_v10  ;;  %325 = vmatmul.mubr.bf16.vlgmr.msra.gmra.mrb[0].mxu1 %v359_v11 }
  0x23   :  { %320 = vmatprep.mubr.bf16.mxu0 %v360_v12  ;;  %328 = vmatprep.mubr.bf16.mxu1 %v361_v13 }
  0x2a   :  { %321 = vmatmul.mubr.bf16.gmra.mrb[4].mxu0 %v362_v14  ;;  %329 = vmatmul.mubr.bf16.gmra.mrb[4].mxu1 %v363_v15 }
  0xf5   :  { %v318_v17 = vpop.f32.mrb[0].mxu0  ;;  %v326_v18 = vpop.f32.mrb[0].mxu1 }
  0xf6   :  { %v193_v19 = vadd.f32 %v318_v17, %v267_v16  ;;  %v225_v20 = vadd.f32 %v326_v18, %v267_v16  ;;  %v184_v21 = vpop.f32.mrb[1].mxu0  ;;  %v216_v22 = vpop.f32.mrb[1].mxu1 }
  0xf7   :  { %v185_v23 = vadd.f32 %v267_v16, %v184_v21  ;;  %v217_v24 = vadd.f32 %v267_v16, %v216_v22  ;;  %v319_v25 = vpop.f32.mrb[2].mxu0  ;;  %v327_v26 = vpop.f32.mrb[2].mxu1 }
  0xf8   :  { %249 = vst [vmem:[%s486_s3 + $0x10] sm:$0xff] %v193_v19  ;;  %257 = vst [vmem:[%s486_s3 + $0x50] sm:$0xff] %v225_v20  ;;  %v196_v27 = vadd.f32 %v319_v25, %v267_v16  ;;  %v228_v28 = vadd.f32 %v327_v26, %v267_v16  ;;  %v187_v29 = vpop.f32.mrb[3].mxu0  ;;  %v219_v30 = vpop.f32.mrb[3].mxu1 }
  0xf9   :  { %247 = vst [vmem:[%s486_s3] sm:$0xff] %v185_v23  ;;  %255 = vst [vmem:[%s486_s3 + $0x40] sm:$0xff] %v217_v24  ;;  %v188_v31 = vadd.f32 %v267_v16, %v187_v29  ;;  %v220_v32 = vadd.f32 %v267_v16, %v219_v30 }
  0xfa   :  { %250 = vst [vmem:[%s486_s3 + $0x18] sm:$0xff] %v196_v27  ;;  %258 = vst [vmem:[%s486_s3 + $0x58] sm:$0xff] %v228_v28 }
  0xfb   :  { %248 = vst [vmem:[%s486_s3 + $0x8] sm:$0xff] %v188_v31  ;;  %256 = vst [vmem:[%s486_s3 + $0x48] sm:$0xff] %v220_v32 }
  0xfd   :  { %v322_v33 = vpop.f32.mrb[4].mxu0  ;;  %v330_v34 = vpop.f32.mrb[4].mxu1 }
  0xfe   :  { %v209_v35 = vadd.f32 %v322_v33, %v267_v16  ;;  %v241_v36 = vadd.f32 %v330_v34, %v267_v16  ;;  %v200_v37 = vpop.f32.mrb[5].mxu0  ;;  %v232_v38 = vpop.f32.mrb[5].mxu1 }
  0xff   :  { %v201_v39 = vadd.f32 %v267_v16, %v200_v37  ;;  %v233_v40 = vadd.f32 %v267_v16, %v232_v38  ;;  %v323_v41 = vpop.f32.mrb[6].mxu0  ;;  %v331_v42 = vpop.f32.mrb[6].mxu1 }
 0x100   :  { %253 = vst [vmem:[%s486_s3 + $0x30] sm:$0xff] %v209_v35  ;;  %261 = vst [vmem:[%s486_s3 + $0x70] sm:$0xff] %v241_v36  ;;  %v212_v43 = vadd.f32 %v323_v41, %v267_v16  ;;  %v244_v44 = vadd.f32 %v331_v42, %v267_v16  ;;  %v203_v45 = vpop.f32.mrb[7].mxu0  ;;  %v235_v46 = vpop.f32.mrb[7].mxu1 }
 0x101   :  { %251 = vst [vmem:[%s486_s3 + $0x20] sm:$0xff] %v201_v39  ;;  %259 = vst [vmem:[%s486_s3 + $0x60] sm:$0xff] %v233_v40  ;;  %v204_v47 = vadd.f32 %v267_v16, %v203_v45  ;;  %v236_v48 = vadd.f32 %v267_v16, %v235_v46 }
 0x102   :  { %254 = vst [vmem:[%s486_s3 + $0x38] sm:$0xff] %v212_v43  ;;  %262 = vst [vmem:[%s486_s3 + $0x78] sm:$0xff] %v244_v44 }
 0x103   :  { %252 = vst [vmem:[%s486_s3 + $0x28] sm:$0xff] %v204_v47  ;;  %260 = vst [vmem:[%s486_s3 + $0x68] sm:$0xff] %v236_v48 }

// kernel: textvae_forward.3
= control target key start
LH: loop header
LB: loop body
LE: loop exit
PB: predicated region body
PF: predicated region fallthrough
CT: control target
= control target key end

     0   :  { %v4879_v1 = vmov 0   ;;  %vm168_vm0 = vcmask 130048   ;;  %s4852_s3 = inlined_call_operand.vmem [shape: bf16[16,512], index: 3, kind: input, shape index: {}]   ;;  %s4853_s0 = inlined_call_operand.vmem [shape: bf16[128,16], index: 0, kind: input, shape index: {}]   ;;  %s4854_s4 = inlined_call_operand.vmem [shape: bf16[128,512], index: 4, kind: input, shape index: {}]   ;;  %s4855_s1 = inlined_call_operand.vmem [shape: f32[128,1], index: 1, kind: input, shape index: {}]   ;;  %s4856_s5 = inlined_call_operand.vmem [shape: f32[1,512], index: 5, kind: input, shape index: {}]   ;;  %s4857_s6 = inlined_call_operand.vmem [shape: bf16[128,24], index: 6, kind: input, shape index: {}]   ;;  %s4858_s7 = inlined_call_operand.vmem [shape: bf16[8,24], index: 7, kind: input, shape index: {}]   ;;  %s4859_s2 = inlined_call_operand.vmem [shape: f32[16,8], index: 2, kind: input, shape index: {}]   ;;  %s4860_s9 = inlined_call_operand.vmem [shape: bf16[12,256], index: 9, kind: input, shape index: {}]   ;;  %s4861_s11 = inlined_call_operand.vmem [shape: bf16[128,8], index: 11, kind: input, shape index: {}]   ;;  %s4862_s13 = inlined_call_operand.vmem [shape: bf16[128,128], index: 13, kind: input, shape index: {}]   ;;  %s4863_s8 = inlined_call_operand.vmem [shape: f32[1,24], index: 8, kind: input, shape index: {}]   ;;  %s4864_s18 = inlined_call_operand.vmem [shape: f32[16,24], index: 18, kind: output, shape index: {0}]   ;;  %s4865_s16 = inlined_call_operand.vmem [shape: bf16[8,256], index: 16, kind: input, shape index: {}]   ;;  %s4866_s15 = inlined_call_operand.vmem [shape: bf16[12,256], index: 15, kind: input, shape index: {}]   ;;  %s4867_s10 = inlined_call_operand.vmem [shape: f32[1,256], index: 10, kind: input, shape index: {}]   ;;  %s4868_s12 = inlined_call_operand.vmem [shape: f32[1,8], index: 12, kind: input, shape index: {}]   ;;  %s4869_s14 = inlined_call_operand.vmem [shape: f32[1,128], index: 14, kind: input, shape index: {}]   ;;  %s4870_s20 = inlined_call_operand.vmem [shape: f32[16,128], index: 20, kind: output, shape index: {2}]   ;;  %s4871_s17 = inlined_call_operand.vmem [shape: f32[1,256], index: 17, kind: input, shape index: {}]   ;;  %s4872_s19 = inlined_call_operand.vmem [shape: f32[16,8], index: 19, kind: output, shape index: {1}]   ;;  %s4873_s21 = inlined_call_operand.vmem [shape: f32[16,256], index: 21, kind: output, shape index: {3}]  }
   0x1   :  { %4906 = sst [smem:[#allocation26_spill]] %s4852_s3  ;;  %225 = vmatprep.mubr.bf16.mxu0 %v4879_v1  ;;  %338 = vmatprep.mubr.bf16.mxu1 %v4879_v1 }
   0x2   :  { %4907 = sst [smem:[#allocation27_spill]] %s4853_s0  ;;  %s4912_s26 = sld [smem:[#allocation26_spill]]  ;;  %3065 = vset.pattern.permute.xlu1 %v4879_v1  ;;  %3064 = vset.pattern.permute.xlu0 %v4879_v1 }
   0x3   :  { %4908 = sst [smem:[#allocation28_spill]] %s4854_s4  ;;  %s4913_s22 = sld [smem:[#allocation27_spill]] }
   0x4   :  { %4909 = sst [smem:[#allocation29_spill]] %s4855_s1  ;;  %s4914_s24 = sld [smem:[#allocation28_spill]] }
   0x5   :  { %4910 = sst [smem:[#allocation30_spill]] %s4856_s5  ;;  %s4915_s0 = sld [smem:[#allocation29_spill]] }
   0x6   :  { %4911 = sst [smem:[#allocation31_spill]] %s4857_s6  ;;  %s4917_s5 = sld [smem:[#allocation30_spill]] }
   0x7   :  { %s4960_s29 = sld [smem:[#allocation31_spill]] }
   0x8   :  { %v3066_v0 = vld [vmem:[%s4912_s26 + $0x4] ss:$16 sps:$4 sm:$0xff]   ;;  %v3068_v2 = vld [vmem:[%s4912_s26 + $0xc] ss:$16 sps:$4 sm:$0xff]   ;;  %v3070_v3 = vld [vmem:[%s4912_s26] ss:$16 sps:$4 sm:$0xff]  }
   0x9   :  { %193 = vmatprep.subr.bf16.mxu0 %v3066_v0  ;;  %v3071_v4 = vld [vmem:[%s4912_s26 + $0x8] ss:$16 sps:$4 sm:$0xff]   ;;  %306 = vmatprep.subr.bf16.mxu1 %v3068_v2  ;;  %v3072_v5 = vld [vmem:[%s4913_s22] sm:$0xff]   ;;  %v3082_v19 = vld [vmem:[%s4913_s22 + $0x10] sm:$0xff]  }
   0xa   :  { %194 = vmatpush1.bf16.msra.mxu0 %v3070_v3  ;;  %307 = vmatpush1.bf16.msra.mxu1 %v3071_v4  ;;  %v3594_v6 = vld [vmem:[%s4914_s24 + $0x4] ss:$16 sps:$4 sm:$0xff]   ;;  %v3599_v7 = vld [vmem:[%s4914_s24] ss:$16 sps:$4 sm:$0xff]   ;;  %v3619_v10 = vld [vmem:[%s4914_s24 + $0xc] ss:$16 sps:$4 sm:$0xff]  }
   0xb   :  { %682 = vmatprep.subr.bf16.mxu0 %v3594_v6  ;;  %v3605_v8 = vld [vmem:[%s4914_s24 + $0x24] ss:$16 sps:$4 sm:$0xff]   ;;  %v3612_v9 = vld [vmem:[%s4914_s24 + $0x20] ss:$16 sps:$4 sm:$0xff]   ;;  %v3076_v11 = vld [vmem:[%s4913_s22 + $0x8] sm:$0xff]   ;;  %725 = vmatprep.subr.bf16.mxu1 %v3619_v10 }
   0xc   :  { %v3630_v12 = vld [vmem:[%s4914_s24 + $0x44] ss:$16 sps:$4 sm:$0xff]   ;;  %v3635_v13 = vld [vmem:[%s4914_s24 + $0x8] ss:$16 sps:$4 sm:$0xff]   ;;  %v3640_v14 = vld [vmem:[%s4914_s24 + $0x2c] ss:$16 sps:$4 sm:$0xff]  }
   0xd   :  { %2802 = vmatmul.mubr.msk.bf16.vlgmr.msra.gmra.mrb[0].mxu0 %vm168_vm0, %v3072_v5  ;;  %2810 = vmatmul.mubr.msk.bf16.vlgmr.msra.gmra.mrb[0].mxu1 %vm168_vm0, %v3072_v5  ;;  %v3648_v15 = vld [vmem:[%s4914_s24 + $0x40] ss:$16 sps:$4 sm:$0xff]   ;;  %v3654_v16 = vld [vmem:[%s4914_s24 + $0x64] ss:$16 sps:$4 sm:$0xff]   ;;  %v3659_v17 = vld [vmem:[%s4914_s24 + $0x28] ss:$16 sps:$4 sm:$0xff]  }
   0xe   :  { %683 = vmatpush1.bf16.msra.mxu0 %v3599_v7  ;;  %235 = vmatprep.mubr.bf16.mxu0 %v4879_v1  ;;  %v3666_v18 = vld [vmem:[%s4914_s24 + $0x4c] ss:$16 sps:$4 sm:$0xff]   ;;  %v3678_v20 = vld [vmem:[%s4914_s24 + $0x60] ss:$16 sps:$4 sm:$0xff]   ;;  %v3683_v21 = vld [vmem:[%s4914_s24 + $0x48] ss:$16 sps:$4 sm:$0xff]  }
   0xf   :  { %348 = vmatprep.mubr.bf16.mxu1 %v4879_v1  ;;  %684 = vmatprep.subr.bf16.mxu0 %v3605_v8  ;;  %v3690_v22 = vld [vmem:[%s4914_s24 + $0x84] ss:$16 sps:$4 sm:$0xff]   ;;  %v3695_v23 = vld [vmem:[%s4914_s24 + $0x6c] ss:$16 sps:$4 sm:$0xff]   ;;  %v3702_v24 = vld [vmem:[%s4914_s24 + $0x80] ss:$16 sps:$4 sm:$0xff]  }
  0x10   :  { %726 = vmatpush1.bf16.msra.mxu1 %v3635_v13  ;;  %v3707_v25 = vld [vmem:[%s4914_s24 + $0xa4] ss:$16 sps:$4 sm:$0xff]   ;;  %v3712_v26 = vld [vmem:[%s4914_s24 + $0x68] ss:$16 sps:$4 sm:$0xff]   ;;  %v3719_v27 = vld [vmem:[%s4914_s24 + $0x8c] ss:$16 sps:$4 sm:$0xff]  }
  0x11   :  { %727 = vmatprep.subr.bf16.mxu1 %v3640_v14  ;;  %v3730_v28 = vld [vmem:[%s4914_s24 + $0xa0] ss:$16 sps:$4 sm:$0xff]   ;;  %v3735_v29 = vld [vmem:[%s4914_s24 + $0x88] ss:$16 sps:$4 sm:$0xff]   ;;  %v3742_v30 = vld [vmem:[%s4914_s24 + $0xc4] ss:$16 sps:$4 sm:$0xff]  }
  0x12   :  { %685 = vmatpush1.bf16.msra.mxu0 %v3612_v9  ;;  %v3747_v31 = vld [vmem:[%s4914_s24 + $0xac] ss:$16 sps:$4 sm:$0xff]   ;;  %v3755_v33 = vld [vmem:[%s4914_s24 + $0xc0] ss:$16 sps:$4 sm:$0xff]   ;;  %v3762_v34 = vld [vmem:[%s4914_s24 + $0xa8] ss:$16 sps:$4 sm:$0xff]  }
  0x13   :  { %686 = vmatprep.subr.bf16.mxu0 %v3630_v12  ;;  %v3089_v32 = vld [vmem:[%s4913_s22 + $0x18] sm:$0xff]   ;;  %v3769_v35 = vld [vmem:[%s4914_s24 + $0xe4] ss:$16 sps:$4 sm:$0xff]   ;;  %v3781_v37 = vld [vmem:[%s4914_s24 + $0xe0] ss:$16 sps:$4 sm:$0xff]  }
  0x14   :  { %728 = vmatpush1.bf16.msra.mxu1 %v3659_v17  ;;  %v3774_v36 = vld [vmem:[%s4914_s24 + $0xcc] ss:$16 sps:$4 sm:$0xff]   ;;  %v2865_v38 = vld [vmem:[%s4915_s0 + $0x10] sm:$0xff]  ;;  %v833_v39 = vld [vmem:[%s4915_s0] sm:$0xff] }
  0x15   :  { %2803 = vmatmul.mubr.msk.bf16.gmra.mrb[4].mxu0 %vm168_vm0, %v3076_v11  ;;  %2811 = vmatmul.mubr.msk.bf16.gmra.mrb[4].mxu1 %vm168_vm0, %v3076_v11  ;;  %v2866_v40 = vld [vmem:[%s4915_s0 + $0x18] sm:$0xff]  ;;  %vm1019_vm1 = vcmp.gt.f32.partialorder %v2865_v38, 0.5  ;;  %vm835_vm2 = vcmp.gt.f32.partialorder %v833_v39, 0.5  ;;  %v834_v42 = vld [vmem:[%s4915_s0 + $0x8] sm:$0xff]  ;;  %v3096_v46 = vld [vmem:[%s4913_s22 + $0x20] sm:$0xff]  }
  0x16   :  { %245 = vmatprep.mubr.bf16.mxu0 %v4879_v1  ;;  %358 = vmatprep.mubr.bf16.mxu1 %v4879_v1  ;;  %v3799_v41 = vld [vmem:[%s4914_s24 + $0xc8] ss:$16 sps:$4 sm:$0xff]   ;;  %v3809_v43 = vld [vmem:[%s4914_s24 + $0xec] ss:$16 sps:$4 sm:$0xff]   ;;  %v1021_v44 = vsel %vm1019_vm1, 1, %v4879_v1  ;;  %v837_v45 = vsel %vm835_vm2, 1, %v4879_v1 }
  0x17   :  { %687 = vmatpush1.bf16.msra.mxu0 %v3648_v15  ;;  %729 = vmatprep.subr.bf16.mxu1 %v3666_v18  ;;  %vm1020_vm3 = vcmp.gt.f32.partialorder %v2866_v40, 0.5  ;;  %vm836_vm4 = vcmp.gt.f32.partialorder %v834_v42, 0.5  ;;  %v2875_v47 = vld [vmem:[%s4915_s0 + $0x28] sm:$0xff]  ;;  %v2874_v49 = vld [vmem:[%s4915_s0 + $0x20] sm:$0xff]  ;;  %v2884_v52 = vld [vmem:[%s4915_s0 + $0x38] sm:$0xff] }
  0x18   :  { %688 = vmatprep.subr.bf16.mxu0 %v3654_v16  ;;  %730 = vmatpush1.bf16.msra.mxu1 %v3683_v21  ;;  %v3824_v48 = vld [vmem:[%s4914_s24 + $0xe8] ss:$16 sps:$4 sm:$0xff]   ;;  %v1022_v50 = vsel %vm1020_vm3, 1, %v4879_v1  ;;  %v838_v51 = vsel %vm836_vm4, 1, %v4879_v1  ;;  %vm1204_vm5 = vcmp.gt.f32.partialorder %v2875_v47, 0.5  ;;  %vm1203_vm6 = vcmp.gt.f32.partialorder %v2874_v49, 0.5 }
  0x19   :  { %731 = vmatprep.subr.bf16.mxu1 %v3695_v23  ;;  %1024 = vperm.xlu1 %3065, %v1021_v44   ;;  %v2883_v53 = vld [vmem:[%s4915_s0 + $0x30] sm:$0xff]  ;;  %v1206_v54 = vsel %vm1204_vm5, 1, %v4879_v1  ;;  %v3103_v55 = vld [vmem:[%s4913_s22 + $0x28] sm:$0xff]   ;;  %v1205_v56 = vsel %vm1203_vm6, 1, %v4879_v1  ;;  %vm1388_vm7 = vcmp.gt.f32.partialorder %v2884_v52, 0.5  ;;  %v2892_v58 = vld [vmem:[%s4915_s0 + $0x40] sm:$0xff] }
  0x1a   :  { %840 = vperm.xlu0 %3064, %v837_v45   ;;  %vm1387_vm8 = vcmp.gt.f32.partialorder %v2883_v53, 0.5  ;;  %v2893_v57 = vld [vmem:[%s4915_s0 + $0x48] sm:$0xff]  ;;  %v1390_v59 = vsel %vm1388_vm7, 1, %v4879_v1  ;;  %vm1571_vm10 = vcmp.gt.f32.partialorder %v2892_v58, 0.5  ;;  %v2902_v61 = vld [vmem:[%s4915_s0 + $0x58] sm:$0xff]  ;;  %v2901_v62 = vld [vmem:[%s4915_s0 + $0x50] sm:$0xff]  ;;  %v88_v45 = vlaneseq }
  0x1b   :  { %689 = vmatpush1.bf16.msra.mxu0 %v3678_v20  ;;  %v1389_v60 = vsel %vm1387_vm8, 1, %v4879_v1  ;;  %vm1572_vm9 = vcmp.gt.f32.partialorder %v2893_v57, 0.5  ;;  %v3110_v0 = vld [vmem:[%s4913_s22 + $0x30] sm:$0xff]   ;;  %v1573_v2 = vsel %vm1571_vm10, 1, %v4879_v1  ;;  %vm1756_vm11 = vcmp.gt.f32.partialorder %v2902_v61, 0.5  ;;  %v2911_v3 = vld [vmem:[%s4915_s0 + $0x68] sm:$0xff] }
  0x1c   :  { %690 = vmatprep.subr.bf16.mxu0 %v3690_v22  ;;  %732 = vmatpush1.bf16.msra.mxu1 %v3712_v26  ;;  %v1574_v63 = vsel %vm1572_vm9, 1, %v4879_v1  ;;  %vm1755_vm12 = vcmp.gt.f32.partialorder %v2901_v62, 0.5  ;;  %v2910_v4 = vld [vmem:[%s4915_s0 + $0x60] sm:$0xff]  ;;  %v1758_v5 = vsel %vm1756_vm11, 1, %v4879_v1  ;;  %vm1940_vm13 = vcmp.gt.f32.partialorder %v2911_v3, 0.5  ;;  %v3118_v39 = vld [vmem:[%s4913_s22 + $0x38] sm:$0xff]  }
  0x1d   :  { %2804 = vmatmul.mubr.msk.bf16.gmra.mrb[8].mxu0 %vm168_vm0, %v3082_v19  ;;  %2812 = vmatmul.mubr.msk.bf16.gmra.mrb[8].mxu1 %vm168_vm0, %v3082_v19  ;;  %v1757_v11 = vsel %vm1755_vm12, 1, %v4879_v1  ;;  %vm1939_vm14 = vcmp.gt.f32.partialorder %v2910_v4, 0.5  ;;  %v2920_v19 = vld [vmem:[%s4915_s0 + $0x78] sm:$0xff]  ;;  %v1942_v38 = vsel %vm1940_vm13, 1, %v4879_v1 }
  0x1e   :  { %255 = vmatprep.mubr.bf16.mxu0 %v4879_v1  ;;  %368 = vmatprep.mubr.bf16.mxu1 %v4879_v1  ;;  %v1941_v40 = vsel %vm1939_vm14, 1, %v4879_v1  ;;  %vm2124_vm15 = vcmp.gt.f32.partialorder %v2920_v19, 0.5 }
  0x1f   :  { %691 = vmatpush1.bf16.msra.mxu0 %v3702_v24  ;;  %733 = vmatprep.subr.bf16.mxu1 %v3719_v27  ;;  %v2126_v42 = vsel %vm2124_vm15, 1, %v4879_v1 }
  0x20   :  { %692 = vmatprep.subr.bf16.mxu0 %v3707_v25  ;;  %734 = vmatpush1.bf16.msra.mxu1 %v3735_v29 }
  0x21   :  { %735 = vmatprep.subr.bf16.mxu1 %v3747_v31  ;;  %1027 = vperm.xlu1 %3065, %v1022_v50  }
  0x22   :  { %843 = vperm.xlu0 %3064, %v838_v51   ;;  %v86_v51 = vld [vmem:[%s4917_s5] sm:$0xf] }
  0x23   :  { %693 = vmatpush1.bf16.msra.mxu0 %v3730_v28 }
  0x24   :  { %694 = vmatprep.subr.bf16.mxu0 %v3742_v30  ;;  %736 = vmatpush1.bf16.msra.mxu1 %v3762_v34 }
  0x25   :  { %2805 = vmatmul.mubr.msk.bf16.gmra.mrb[12].mxu0 %vm168_vm0, %v3089_v32  ;;  %2813 = vmatmul.mubr.msk.bf16.gmra.mrb[12].mxu1 %vm168_vm0, %v3089_v32  ;;  %v2919_v32 = vld [vmem:[%s4915_s0 + $0x70] sm:$0xff] }
  0x26   :  { %265 = vmatprep.mubr.bf16.mxu0 %v4879_v1  ;;  %378 = vmatprep.mubr.bf16.mxu1 %v4879_v1  ;;  %vm2123_vm1 = vcmp.gt.f32.partialorder %v2919_v32, 0.5 }
  0x27   :  { %695 = vmatpush1.bf16.msra.mxu0 %v3755_v33  ;;  %737 = vmatprep.subr.bf16.mxu1 %v3774_v36  ;;  %v2125_v44 = vsel %vm2123_vm1, 1, %v4879_v1 }
  0x28   :  { %696 = vmatprep.subr.bf16.mxu0 %v3769_v35  ;;  %738 = vmatpush1.bf16.msra.mxu1 %v3799_v41 }
  0x29   :  { %739 = vmatprep.subr.bf16.mxu1 %v3809_v43  ;;  %1211 = vperm.xlu1 %3065, %v1206_v54  }
  0x2a   :  { %1208 = vperm.xlu0 %3064, %v1205_v56  }
  0x2b   :  { %697 = vmatpush1.bf16.msra.mxu0 %v3781_v37 }
  0x2c   :  { %865 = vmatprep.subr.bf16.mxu0 %v3594_v6  ;;  %740 = vmatpush1.bf16.msra.mxu1 %v3824_v48 }
  0x2d   :  { %2806 = vmatmul.mubr.msk.bf16.gmra.mrb[16].mxu0 %vm168_vm0, %v3096_v46  ;;  %2814 = vmatmul.mubr.msk.bf16.gmra.mrb[16].mxu1 %vm168_vm0, %v3096_v46  ;;  %v89_v46 = vshrl.u32 %v88_v45, 7 }
  0x2e   :  { %275 = vmatprep.mubr.bf16.mxu0 %v4879_v1  ;;  %388 = vmatprep.mubr.bf16.mxu1 %v4879_v1 }
  0x2f   :  { %908 = vmatprep.subr.bf16.mxu1 %v3619_v10  ;;  %1395 = vperm.xlu1 %3065, %v1390_v59   ;;  %v98_v47 = vsub.s32 2, %v89_v46  ;;  %v102_v49 = vsub.s32 3, %v89_v46  ;;  %v3938_v50 = vsub.s32 0, %v89_v46  ;;  %v3943_v52 = vsub.s32 1, %v89_v46 }
  0x30   :  { %1392 = vperm.xlu0 %3064, %v1389_v60  }
  0x31   :  { %4916 = vst [vmem:[#allocation3_spill] sm:$0xff] %v3938_v50  ;;  %4918 = vst [vmem:[#allocation4_spill] sm:$0xff] %v3943_v52  ;;  %v3945_v53 = vrot.slane %v86_v51, %v98_v47  ;;  %v3947_v54 = vrot.slane %v86_v51, %v102_v49 }
  0x33   :  { %1579 = vperm.xlu1 %3065, %v1574_v63  }
  0x34   :  { %1576 = vperm.xlu0 %3064, %v1573_v2  }
  0x35   :  { %2807 = vmatmul.mubr.msk.bf16.gmra.mrb[20].mxu0 %vm168_vm0, %v3103_v55  ;;  %2815 = vmatmul.mubr.msk.bf16.gmra.mrb[20].mxu1 %vm168_vm0, %v3103_v55  ;;  %v3953_v55 = vrot.slane %v86_v51, %v3943_v52 }
  0x36   :  { %285 = vmatprep.mubr.bf16.mxu0 %v4879_v1  ;;  %398 = vmatprep.mubr.bf16.mxu1 %v4879_v1 }
  0x37   :  { %1763 = vperm.xlu1 %3065, %v1758_v5  }
  0x38   :  { %1760 = vperm.xlu0 %3064, %v1757_v11  }
  0x3b   :  { %1947 = vperm.xlu1 %3065, %v1942_v38  }
  0x3c   :  { %1944 = vperm.xlu0 %3064, %v1941_v40  }
  0x3d   :  { %2808 = vmatmul.mubr.msk.bf16.gmra.mrb[24].mxu0 %vm168_vm0, %v3110_v0  ;;  %2816 = vmatmul.mubr.msk.bf16.gmra.mrb[24].mxu1 %vm168_vm0, %v3110_v0 }
  0x3e   :  { %295 = vmatprep.mubr.bf16.mxu0 %v4879_v1  ;;  %408 = vmatprep.mubr.bf16.mxu1 %v4879_v1 }
  0x3f   :  { %2131 = vperm.xlu1 %3065, %v2126_v42  }
  0x40   :  { %2128 = vperm.xlu0 %3064, %v2125_v44  }
  0x45   :  { %2809 = vmatmul.mubr.msk.bf16.gmra.mrb[28].mxu0 %vm168_vm0, %v3118_v39  ;;  %2817 = vmatmul.mubr.msk.bf16.gmra.mrb[28].mxu1 %vm168_vm0, %v3118_v39 }
  0x46   :  { %714 = vmatprep.mubr.bf16.mxu0 %v4879_v1  ;;  %757 = vmatprep.mubr.bf16.mxu1 %v4879_v1 }
  0x4d   :  { %715 = vmatmul.mubr.bf16.vlgmr.msra.gmra.mrb[32].mxu0 %v4879_v1  ;;  %758 = vmatmul.mubr.bf16.vlgmr.msra.gmra.mrb[32].mxu1 %v4879_v1 }
  0x4e   :  { %866 = vmatpush1.bf16.msra.mxu0 %v3599_v7  ;;  %909 = vmatpush1.bf16.msra.mxu1 %v3635_v13 }
  0x4f   :  { %867 = vmatprep.subr.bf16.mxu0 %v3605_v8  ;;  %910 = vmatprep.subr.bf16.mxu1 %v3640_v14 }
  0x50   :  { %897 = vmatprep.mubr.bf16.mxu0 %v4879_v1  ;;  %940 = vmatprep.mubr.bf16.mxu1 %v4879_v1 }
  0x52   :  { %868 = vmatpush1.bf16.msra.mxu0 %v3612_v9  ;;  %911 = vmatpush1.bf16.msra.mxu1 %v3659_v17 }
  0x53   :  { %869 = vmatprep.subr.bf16.mxu0 %v3630_v12  ;;  %912 = vmatprep.subr.bf16.mxu1 %v3666_v18 }
  0x56   :  { %870 = vmatpush1.bf16.msra.mxu0 %v3648_v15  ;;  %913 = vmatpush1.bf16.msra.mxu1 %v3683_v21 }
  0x57   :  { %871 = vmatprep.subr.bf16.mxu0 %v3654_v16  ;;  %914 = vmatprep.subr.bf16.mxu1 %v3695_v23 }
  0x5a   :  { %872 = vmatpush1.bf16.msra.mxu0 %v3678_v20  ;;  %915 = vmatpush1.bf16.msra.mxu1 %v3712_v26 }
  0x5b   :  { %873 = vmatprep.subr.bf16.mxu0 %v3690_v22  ;;  %916 = vmatprep.subr.bf16.mxu1 %v3719_v27 }
  0x5e   :  { %874 = vmatpush1.bf16.msra.mxu0 %v3702_v24  ;;  %917 = vmatpush1.bf16.msra.mxu1 %v3735_v29 }
  0x5f   :  { %875 = vmatprep.subr.bf16.mxu0 %v3707_v25  ;;  %918 = vmatprep.subr.bf16.mxu1 %v3747_v31 }
  0x62   :  { %876 = vmatpush1.bf16.msra.mxu0 %v3730_v28  ;;  %919 = vmatpush1.bf16.msra.mxu1 %v3762_v34 }
  0x63   :  { %877 = vmatprep.subr.bf16.mxu0 %v3742_v30  ;;  %920 = vmatprep.subr.bf16.mxu1 %v3774_v36 }
  0x66   :  { %878 = vmatpush1.bf16.msra.mxu0 %v3755_v33  ;;  %921 = vmatpush1.bf16.msra.mxu1 %v3799_v41 }
  0x67   :  { %879 = vmatprep.subr.bf16.mxu0 %v3769_v35  ;;  %922 = vmatprep.subr.bf16.mxu1 %v3809_v43 }
  0x6a   :  { %880 = vmatpush1.bf16.msra.mxu0 %v3781_v37  ;;  %923 = vmatpush1.bf16.msra.mxu1 %v3824_v48 }
  0x6b   :  { %1049 = vmatprep.subr.bf16.mxu0 %v3594_v6  ;;  %1092 = vmatprep.subr.bf16.mxu1 %v3619_v10  ;;  %v3950_v6 = vrot.slane %v86_v51, %v3938_v50 }
  0xe0   :  { %v227_v10 = vpop.f32.mrb[0].mxu0  ;;  %v340_v56 = vpop.f32.mrb[0].mxu1 }
  0xe1   :  { %v229_v57 = vpop.f32.mrb[1].mxu0  ;;  %v341_v58 = vadd.f32 %v340_v56, %v3945_v53  ;;  %v342_v59 = vpop.f32.mrb[1].mxu1  ;;  %v228_v63 = vadd.f32 %v227_v10, %v3950_v6 }
  0xe2   :  { %v231_v60 = vpop.f32.mrb[2].mxu0  ;;  %v343_v61 = vadd.f32 %v342_v59, %v3947_v54  ;;  %v344_v62 = vpop.f32.mrb[2].mxu1  ;;  %v230_v5 = vadd.f32 %v229_v57, %v3953_v55 }
  0xe3   :  { %v232_v0 = vadd.f32 %v231_v60, %v3950_v6  ;;  %v233_v2 = vpop.f32.mrb[3].mxu0  ;;  %v345_v3 = vadd.f32 %v344_v62, %v3945_v53  ;;  %v346_v4 = vpop.f32.mrb[3].mxu1 }
  0xe4   :  { %v234_v11 = vadd.f32 %v233_v2, %v3953_v55  ;;  %v347_v19 = vadd.f32 %v346_v4, %v3947_v54 }
  0xe5   :  { %v3963_v32 = vpack.c.bf16 %v232_v0, %v228_v63  ;;  %v3965_v38 = vpack.c.bf16 %v345_v3, %v341_v58 }
  0xe6   :  { %v3967_v39 = vpack.c.bf16 %v234_v11, %v230_v5  ;;  %v3969_v40 = vpack.c.bf16 %v347_v19, %v343_v61 }
  0xe8   :  { %v237_v42 = vpop.f32.mrb[4].mxu0  ;;  %v350_v44 = vpop.f32.mrb[4].mxu1 }
  0xe9   :  { %v238_v45 = vadd.f32 %v237_v42, %v3950_v6  ;;  %v239_v46 = vpop.f32.mrb[5].mxu0  ;;  %v351_v47 = vadd.f32 %v350_v44, %v3945_v53  ;;  %v352_v49 = vpop.f32.mrb[5].mxu1 }
  0xea   :  { %v240_v51 = vadd.f32 %v239_v46, %v3953_v55  ;;  %v241_v10 = vpop.f32.mrb[6].mxu0  ;;  %v353_v56 = vadd.f32 %v352_v49, %v3947_v54  ;;  %v354_v57 = vpop.f32.mrb[6].mxu1 }
  0xeb   :  { %v242_v58 = vadd.f32 %v241_v10, %v3950_v6  ;;  %v243_v59 = vpop.f32.mrb[7].mxu0  ;;  %v355_v60 = vadd.f32 %v354_v57, %v3945_v53  ;;  %v356_v61 = vpop.f32.mrb[7].mxu1 }
  0xec   :  { %v244_v62 = vadd.f32 %v243_v59, %v3953_v55  ;;  %v357_v63 = vadd.f32 %v356_v61, %v3947_v54 }
  0xed   :  { %v3979_v0 = vpack.c.bf16 %v242_v58, %v238_v45  ;;  %v3981_v2 = vpack.c.bf16 %v355_v60, %v351_v47 }
  0xee   :  { %v3983_v3 = vpack.c.bf16 %v244_v62, %v240_v51  ;;  %v3985_v4 = vpack.c.bf16 %v357_v63, %v353_v56 }
  0xf0   :  { %v247_v5 = vpop.f32.mrb[8].mxu0  ;;  %v360_v11 = vpop.f32.mrb[8].mxu1 }
  0xf1   :  { %v248_v19 = vadd.f32 %v247_v5, %v3950_v6  ;;  %v249_v42 = vpop.f32.mrb[9].mxu0  ;;  %v361_v44 = vadd.f32 %v360_v11, %v3945_v53  ;;  %v362_v46 = vpop.f32.mrb[9].mxu1 }
  0xf2   :  { %v250_v49 = vadd.f32 %v249_v42, %v3953_v55  ;;  %v251_v10 = vpop.f32.mrb[10].mxu0  ;;  %v363_v45 = vadd.f32 %v362_v46, %v3947_v54  ;;  %v364_v57 = vpop.f32.mrb[10].mxu1 }
  0xf3   :  { %v252_v47 = vadd.f32 %v251_v10, %v3950_v6  ;;  %v253_v51 = vpop.f32.mrb[11].mxu0  ;;  %v365_v56 = vadd.f32 %v364_v57, %v3945_v53  ;;  %v366_v58 = vpop.f32.mrb[11].mxu1 }
  0xf4   :  { %v254_v59 = vadd.f32 %v253_v51, %v3953_v55  ;;  %v367_v60 = vadd.f32 %v366_v58, %v3947_v54 }
  0xf5   :  { %v3995_v61 = vpack.c.bf16 %v252_v47, %v248_v19  ;;  %v3997_v62 = vpack.c.bf16 %v365_v56, %v361_v44 }
  0xf6   :  { %v3999_v63 = vpack.c.bf16 %v254_v59, %v250_v49  ;;  %v4001_v5 = vpack.c.bf16 %v367_v60, %v363_v45 }
  0xf7   :  { %4919 = vst [vmem:[#allocation5_spill] sm:$0xff] %v3997_v62 }
  0xf8   :  { %4920 = vst [vmem:[#allocation6_spill] sm:$0xff] %v3999_v63  ;;  %4921 = vst [vmem:[#allocation7_spill] sm:$0xff] %v4001_v5  ;;  %v257_v11 = vpop.f32.mrb[12].mxu0  ;;  %v370_v42 = vpop.f32.mrb[12].mxu1 }
  0xf9   :  { %v258_v46 = vadd.f32 %v257_v11, %v3950_v6  ;;  %v259_v10 = vpop.f32.mrb[13].mxu0  ;;  %v371_v57 = vadd.f32 %v370_v42, %v3945_v53  ;;  %v372_v1 = vpop.f32.mrb[13].mxu1 }
  0xfa   :  { %v260_v51 = vadd.f32 %v259_v10, %v3953_v55  ;;  %v261_v52 = vpop.f32.mrb[14].mxu0  ;;  %v373_v19 = vadd.f32 %v372_v1, %v3947_v54  ;;  %v374_v47 = vpop.f32.mrb[14].mxu1 }
  0xfb   :  { %v262_v44 = vadd.f32 %v261_v52, %v3950_v6  ;;  %v263_v49 = vpop.f32.mrb[15].mxu0  ;;  %v375_v45 = vadd.f32 %v374_v47, %v3945_v53  ;;  %v376_v56 = vpop.f32.mrb[15].mxu1 }
  0xfc   :  { %v264_v58 = vadd.f32 %v263_v49, %v3953_v55  ;;  %v377_v59 = vadd.f32 %v376_v56, %v3947_v54 }
  0xfd   :  { %v4011_v60 = vpack.c.bf16 %v262_v44, %v258_v46  ;;  %v4013_v11 = vpack.c.bf16 %v375_v45, %v371_v57 }
  0xfe   :  { %v4015_v42 = vpack.c.bf16 %v264_v58, %v260_v51  ;;  %v4017_v10 = vpack.c.bf16 %v377_v59, %v373_v19 }
  0xff   :  { %4922 = vst [vmem:[#allocation8_spill] sm:$0xff] %v4011_v60  ;;  %4923 = vst [vmem:[#allocation9_spill] sm:$0xff] %v4013_v11 }
 0x100   :  { %4924 = vst [vmem:[#allocation10_spill] sm:$0xff] %v4015_v42  ;;  %4925 = vst [vmem:[#allocation11_spill] sm:$0xff] %v4017_v10  ;;  %v267_v1 = vpop.f32.mrb[16].mxu0  ;;  %v380_v50 = vpop.f32.mrb[16].mxu1 }
 0x101   :  { %v268_v52 = vadd.f32 %v267_v1, %v3950_v6  ;;  %v269_v5 = vpop.f32.mrb[17].mxu0  ;;  %v381_v47 = vadd.f32 %v380_v50, %v3945_v53  ;;  %v382_v63 = vpop.f32.mrb[17].mxu1 }
 0x102   :  { %v270_v49 = vadd.f32 %v269_v5, %v3953_v55  ;;  %v271_v62 = vpop.f32.mrb[18].mxu0  ;;  %v383_v46 = vadd.f32 %v382_v63, %v3947_v54  ;;  %v384_v44 = vpop.f32.mrb[18].mxu1 }
 0x103   :  { %v272_v57 = vadd.f32 %v271_v62, %v3950_v6  ;;  %v273_v51 = vpop.f32.mrb[19].mxu0  ;;  %v385_v19 = vadd.f32 %v384_v44, %v3945_v53  ;;  %v386_v45 = vpop.f32.mrb[19].mxu1 }
 0x104   :  { %v274_v56 = vadd.f32 %v273_v51, %v3953_v55  ;;  %v387_v58 = vadd.f32 %v386_v45, %v3947_v54 }
 0x105   :  { %v4027_v59 = vpack.c.bf16 %v272_v57, %v268_v52  ;;  %v4029_v50 = vpack.c.bf16 %v385_v19, %v381_v47 }
 0x106   :  { %v4031_v1 = vpack.c.bf16 %v274_v56, %v270_v49  ;;  %v4033_v5 = vpack.c.bf16 %v387_v58, %v383_v46 }
 0x107   :  { %4926 = vst [vmem:[#allocation12_spill] sm:$0xff] %v4027_v59  ;;  %4927 = vst [vmem:[#allocation13_spill] sm:$0xff] %v4029_v50 }
 0x108   :  { %4928 = vst [vmem:[#allocation14_spill] sm:$0xff] %v4031_v1  ;;  %4929 = vst [vmem:[#allocation15_spill] sm:$0xff] %v4033_v5  ;;  %v277_v63 = vpop.f32.mrb[20].mxu0  ;;  %v390_v10 = vpop.f32.mrb[20].mxu1 }
 0x109   :  { %v278_v62 = vadd.f32 %v277_v63, %v3950_v6  ;;  %v279_v42 = vpop.f32.mrb[21].mxu0  ;;  %v391_v44 = vadd.f32 %v390_v10, %v3945_v53  ;;  %v392_v11 = vpop.f32.mrb[21].mxu1 }
 0x10a   :  { %v280_v51 = vadd.f32 %v279_v42, %v3953_v55  ;;  %v281_v60 = vpop.f32.mrb[22].mxu0  ;;  %v393_v52 = vadd.f32 %v392_v11, %v3947_v54  ;;  %v394_v57 = vpop.f32.mrb[22].mxu1 }
 0x10b   :  { %v282_v47 = vadd.f32 %v281_v60, %v3950_v6  ;;  %v283_v49 = vpop.f32.mrb[23].mxu0  ;;  %v395_v46 = vadd.f32 %v394_v57, %v3945_v53  ;;  %v396_v19 = vpop.f32.mrb[23].mxu1 }
 0x10c   :  { %v284_v45 = vadd.f32 %v283_v49, %v3953_v55  ;;  %v397_v56 = vadd.f32 %v396_v19, %v3947_v54 }
 0x10d   :  { %v4043_v58 = vpack.c.bf16 %v282_v47, %v278_v62  ;;  %v4045_v10 = vpack.c.bf16 %v395_v46, %v391_v44 }
 0x10e   :  { %v4047_v63 = vpack.c.bf16 %v284_v45, %v280_v51  ;;  %v4049_v42 = vpack.c.bf16 %v397_v56, %v393_v52 }
 0x10f   :  { %4930 = vst [vmem:[#allocation16_spill] sm:$0xff] %v4043_v58  ;;  %4931 = vst [vmem:[#allocation17_spill] sm:$0xff] %v4045_v10 }
 0x110   :  { %4932 = vst [vmem:[#allocation18_spill] sm:$0xff] %v4047_v63  ;;  %4933 = vst [vmem:[#allocation19_spill] sm:$0xff] %v4049_v42  ;;  %v287_v11 = vpop.f32.mrb[24].mxu0  ;;  %v400_v5 = vpop.f32.mrb[24].mxu1 }
 0x111   :  { %v288_v60 = vadd.f32 %v287_v11, %v3950_v6  ;;  %v289_v1 = vpop.f32.mrb[25].mxu0  ;;  %v401_v57 = vadd.f32 %v400_v5, %v3945_v53  ;;  %v402_v50 = vpop.f32.mrb[25].mxu1 }
 0x112   :  { %v290_v49 = vadd.f32 %v289_v1, %v3953_v55  ;;  %v291_v59 = vpop.f32.mrb[26].mxu0  ;;  %v403_v62 = vadd.f32 %v402_v50, %v3947_v54  ;;  %v404_v47 = vpop.f32.mrb[26].mxu1 }
 0x113   :  { %v292_v44 = vadd.f32 %v291_v59, %v3950_v6  ;;  %v293_v51 = vpop.f32.mrb[27].mxu0  ;;  %v405_v52 = vadd.f32 %v404_v47, %v3945_v53  ;;  %v406_v46 = vpop.f32.mrb[27].mxu1 }
 0x114   :  { %v294_v19 = vadd.f32 %v293_v51, %v3953_v55  ;;  %v407_v45 = vadd.f32 %v406_v46, %v3947_v54 }
 0x115   :  { %v4059_v56 = vpack.c.bf16 %v292_v44, %v288_v60  ;;  %v4061_v5 = vpack.c.bf16 %v405_v52, %v401_v57 }
 0x116   :  { %v4063_v11 = vpack.c.bf16 %v294_v19, %v290_v49  ;;  %v4065_v1 = vpack.c.bf16 %v407_v45, %v403_v62 }
 0x118   :  { %4934 = vst [vmem:[#allocation20_spill] sm:$0xff] %v4063_v11  ;;  %4935 = vst [vmem:[#allocation21_spill] sm:$0xff] %v4065_v1  ;;  %v297_v50 = vpop.f32.mrb[28].mxu0  ;;  %v410_v42 = vpop.f32.mrb[28].mxu1 }
 0x119   :  { %v298_v59 = vadd.f32 %v297_v50, %v3950_v6  ;;  %v299_v63 = vpop.f32.mrb[29].mxu0  ;;  %v411_v47 = vadd.f32 %v410_v42, %v3945_v53  ;;  %v412_v10 = vpop.f32.mrb[29].mxu1 }
 0x11a   :  { %v300_v51 = vadd.f32 %v299_v63, %v3953_v55  ;;  %v301_v58 = vpop.f32.mrb[30].mxu0  ;;  %v413_v60 = vadd.f32 %v412_v10, %v3947_v54  ;;  %v414_v44 = vpop.f32.mrb[30].mxu1  ;;  %v768_v10 = vunpack.c.l.bf16 %v3963_v32 }
 0x11b   :  { %v302_v57 = vadd.f32 %v301_v58, %v3950_v6  ;;  %v303_v49 = vpop.f32.mrb[31].mxu0  ;;  %v415_v62 = vadd.f32 %v414_v44, %v3945_v53  ;;  %v416_v52 = vpop.f32.mrb[31].mxu1  ;;  %v770_v6 = vunpack.c.l.bf16 %v3965_v38  ;;  %v769_v53 = vunpack.c.l.bf16 %v3967_v39 }
 0x11c   :  { %v304_v46 = vadd.f32 %v303_v49, %v3953_v55  ;;  %v417_v19 = vadd.f32 %v416_v52, %v3947_v54  ;;  %v771_v55 = vunpack.c.l.bf16 %v3969_v40 }
 0x11d   :  { %v4075_v45 = vpack.c.bf16 %v302_v57, %v298_v59  ;;  %v4077_v42 = vpack.c.bf16 %v415_v62, %v411_v47  ;;  %v772_v47 = vunpack.c.h.bf16 %v3963_v32 }
 0x11e   :  { %v4079_v50 = vpack.c.bf16 %v304_v46, %v300_v51  ;;  %v4081_v63 = vpack.c.bf16 %v417_v19, %v413_v60  ;;  %v774_v51 = vunpack.c.h.bf16 %v3965_v38  ;;  %v773_v46 = vunpack.c.h.bf16 %v3967_v39 }
 0x11f   :  { %4936 = vst [vmem:[#allocation22_spill] sm:$0xff] %v4075_v45  ;;  %4937 = vst [vmem:[#allocation23_spill] sm:$0xff] %v4077_v42  ;;  %v775_v19 = vunpack.c.h.bf16 %v3969_v40 }
 0x120   :  { %4938 = vst [vmem:[#allocation24_spill] sm:$0xff] %v4079_v50  ;;  %4939 = vst [vmem:[#allocation25_spill] sm:$0xff] %v4081_v63  ;;  %v716_v58 = vpop.f32.mrb[32].mxu0  ;;  %v759_v1 = vpop.f32.mrb[32].mxu1 }
 0x121   :  { %v776_v44 = vadd.f32 %v768_v10, %v716_v58  ;;  %v778_v54 = vadd.f32 %v770_v6, %v759_v1  ;;  %v718_v59 = vpop.f32.mrb[33].mxu0  ;;  %v761_v57 = vpop.f32.mrb[33].mxu1 }
 0x122   :  { %v777_v60 = vadd.f32 %v769_v53, %v718_v59  ;;  %v779_v49 = vadd.f32 %v771_v55, %v761_v57  ;;  %v720_v62 = vpop.f32.mrb[34].mxu0  ;;  %v763_v52 = vpop.f32.mrb[34].mxu1 }
 0x123   :  { %v2850_v63 = vmul.f32 -1.442695, %v776_v44  ;;  %v780_v50 = vadd.f32 %v772_v47, %v720_v62  ;;  %v782_v42 = vadd.f32 %v774_v51, %v763_v52  ;;  %v722_v45 = vpop.f32.mrb[35].mxu0  ;;  %v765_v10 = vpop.f32.mrb[35].mxu1 }
 0x124   :  { %v2852_v1 = vmul.f32 -1.442695, %v777_v60  ;;  %v781_v6 = vadd.f32 %v773_v46, %v722_v45  ;;  %v783_v58 = vadd.f32 %v775_v19, %v765_v10  ;;  %v2854_v53 = vmul.f32 -1.442695, %v779_v49 }
 0x125   :  { %3159 = vpow2.f32 %v2850_v63  ;;  %v2851_v32 = vmul.f32 -1.442695, %v780_v50 }
 0x126   :  { %3161 = vpow2.f32 %v2852_v1  ;;  %v2853_v38 = vmul.f32 -1.442695, %v781_v6  ;;  %v2855_v40 = vmul.f32 -1.442695, %v783_v58 }
 0x127   :  { %3163 = vpow2.f32 %v2851_v32  ;;  %v4093_v32 = vpop.permute.xlu0 %840 }
 0x128   :  { %3165 = vpow2.f32 %v2853_v38  ;;  %vm845_vm0 = vcmp.eq.s32.totalorder %v4093_v32, 1 }
 0x129   :  { %3167 = vtanh.f32 %v778_v54  ;;  %vm847_vm2 = vmpackc.low %vm845_vm0, %vm845_vm0 }
 0x12a   :  { %3169 = vpow2.f32 %v2854_v53 }
 0x12b   :  { %3171 = vtanh.f32 %v782_v42 }
 0x12f   :  { %v3160_v55 = vpop.eup %3159 }
 0x130   :  { %v3162_v39 = vpop.eup %3161  ;;  %v790_v59 = vadd.f32 1.0, %v3160_v55  ;;  %v4100_v55 = vpop.permute.xlu0 %843 }
 0x131   :  { %v802_v44 = vadd.f32 1.0, %v3162_v39  ;;  %v3164_v57 = vpop.eup %3163  ;;  %vm846_vm3 = vcmp.eq.s32.totalorder %v4100_v55, 1 }
 0x132   :  { %3173 = vrcp.f32 %v790_v59  ;;  %v791_v45 = vadd.f32 1.0, %v3164_v57  ;;  %v3166_v47 = vpop.eup %3165  ;;  %vm848_vm4 = vmpackc.low %vm846_vm3, %vm846_vm3 }
 0x133   :  { %3175 = vrcp.f32 %v802_v44  ;;  %v803_v50 = vadd.f32 1.0, %v3166_v47  ;;  %v3168_v63 = vpop.eup %3167 }
 0x134   :  { %3177 = vpow2.f32 %v2855_v40  ;;  %v3170_v51 = vpop.eup %3169  ;;  %v4940_v40 = vmov 0  }
 0x135   :  { %3179 = vrcp.f32 %v791_v45  ;;  %v3172_v60 = vpop.eup %3171  ;;  %v816_v62 = vadd.f32 1.0, %v3170_v51  ;;  %v849_v44 = vsel %vm847_vm2, 65537, %v4940_v40  ;;  %v850_v57 = vsel %vm848_vm4, 65537, %v4940_v40 }
 0x136   :  { %3181 = vrcp.f32 %v803_v50 }
 0x137   :  { %3183 = vrcp.f32 %v816_v62 }
 0x13c   :  { %v3174_v49 = vpop.eup %3173 }
 0x13d   :  { %v3176_v54 = vpop.eup %3175  ;;  %v824_v52 = vmul.f32 %v3174_v49, %v3168_v63  ;;  %v2856_v63 = vcombine.low %v849_v44, %v850_v57  ;;  %v4222_v49 = vld [vmem:[%s4914_s24 + $0x2c] ss:$16 sps:$4 sm:$0xff]  }
 0x13e   :  { %v3178_v46 = vpop.eup %3177  ;;  %v822_v19 = vmul.f32 0.0, %v3176_v54 }
 0x13f   :  { %v3180_v10 = vpop.eup %3179  ;;  %v817_v58 = vadd.f32 1.0, %v3178_v46  ;;  %vm4113_vm5 = vcmp.ne.s16.totalorder %v2856_v63, 0 }
 0x140   :  { %v4091_v42 = vadd.f32 %v824_v52, %v822_v19  ;;  %v825_v1 = vmul.f32 %v3180_v10, %v3172_v60  ;;  %v3182_v6 = vpop.eup %3181 }
 0x141   :  { %v823_v38 = vmul.f32 0.0, %v3182_v6  ;;  %v3184_v39 = vpop.eup %3183 }
 0x142   :  { %3185 = vtanh.f32 %v4091_v42  ;;  %v856_v57 = vsel %vm845_vm0, %v4091_v42, 0.0 }
 0x143   :  { %v4096_v53 = vadd.f32 %v825_v1, %v823_v38  ;;  %3187 = vrcp.f32 %v817_v58 }
 0x145   :  { %3189 = vtanh.f32 %v4096_v53 }
 0x14c   :  { %v3186_v59 = vpop.eup %3185 }
 0x14d   :  { %v830_v45 = vmul.f32 %v3186_v59, %v3184_v39  ;;  %v3188_v47 = vpop.eup %3187  ;;  %v1025_v59 = vpop.permute.xlu1 %1024 }
 0x14e   :  { %vm1029_vm6 = vcmp.eq.s32.totalorder %v1025_v59, 1  ;;  %v4374_v59 = vld [vmem:[%s4914_s24 + $0xe0] ss:$16 sps:$4 sm:$0xff]  }
 0x14f   :  { %v3190_v50 = vpop.eup %3189  ;;  %vm1031_vm8 = vmpackc.low %vm1029_vm6, %vm1029_vm6 }
 0x150   :  { %v831_v51 = vmul.f32 %v3190_v50, %v3188_v47 }
 0x152   :  { %v4111_v60 = vpack.c.bf16 %v831_v51, %v830_v45 }
 0x154   :  { %2857 = vmatmul.mubr.msk.bf16.vlgmr.msra.gmra.mrb[36].mxu0 %vm4113_vm5, %v4111_v60  ;;  %2858 = vmatmul.mubr.msk.bf16.vlgmr.msra.gmra.mrb[36].mxu1 %vm4113_vm5, %v4111_v60  ;;  %v855_v54 = vsel %vm4113_vm5, %v4111_v60, 0  ;;  %v4216_v60 = vld [vmem:[%s4914_s24 + $0x24] ss:$16 sps:$4 sm:$0xff]  }
 0x155   :  { %1050 = vmatpush1.bf16.msra.mxu0 %v3599_v7  ;;  %1093 = vmatpush1.bf16.msra.mxu1 %v3635_v13  ;;  %v4161_v7 = vld [vmem:[%s4914_s24 + $0x4] ss:$16 sps:$4 sm:$0xff]  }
 0x156   :  { %1051 = vmatprep.subr.bf16.mxu0 %v3605_v8  ;;  %1094 = vmatprep.subr.bf16.mxu1 %v3640_v14  ;;  %v4167_v8 = vld [vmem:[%s4914_s24 + $0xc] ss:$16 sps:$4 sm:$0xff]  }
 0x157   :  { %1081 = vmatprep.mubr.bf16.mxu0 %v4940_v40  ;;  %1124 = vmatprep.mubr.bf16.mxu1 %v4940_v40 }
 0x159   :  { %1052 = vmatpush1.bf16.msra.mxu0 %v3612_v9  ;;  %1095 = vmatpush1.bf16.msra.mxu1 %v3659_v17  ;;  %v951_v9 = vunpack.c.l.bf16 %v3979_v0 }
 0x15a   :  { %1053 = vmatprep.subr.bf16.mxu0 %v3630_v12  ;;  %1096 = vmatprep.subr.bf16.mxu1 %v3666_v18  ;;  %v953_v12 = vunpack.c.l.bf16 %v3981_v2 }
 0x15d   :  { %1054 = vmatpush1.bf16.msra.mxu0 %v3648_v15  ;;  %1097 = vmatpush1.bf16.msra.mxu1 %v3683_v21  ;;  %v952_v15 = vunpack.c.l.bf16 %v3983_v3 }
 0x15e   :  { %1055 = vmatprep.subr.bf16.mxu0 %v3654_v16  ;;  %1098 = vmatprep.subr.bf16.mxu1 %v3695_v23  ;;  %v954_v16 = vunpack.c.l.bf16 %v3985_v4  ;;  %v957_v23 = vunpack.c.h.bf16 %v3981_v2 }
 0x161   :  { %1056 = vmatpush1.bf16.msra.mxu0 %v3678_v20  ;;  %1099 = vmatpush1.bf16.msra.mxu1 %v3712_v26 }
 0x162   :  { %1057 = vmatprep.subr.bf16.mxu0 %v3690_v22  ;;  %1100 = vmatprep.subr.bf16.mxu1 %v3719_v27  ;;  %v955_v22 = vunpack.c.h.bf16 %v3979_v0 }
 0x165   :  { %1058 = vmatpush1.bf16.msra.mxu0 %v3702_v24  ;;  %1101 = vmatpush1.bf16.msra.mxu1 %v3735_v29  ;;  %v958_v29 = vunpack.c.h.bf16 %v3985_v4 }
 0x166   :  { %1059 = vmatprep.subr.bf16.mxu0 %v3707_v25  ;;  %1102 = vmatprep.subr.bf16.mxu1 %v3747_v31 }
 0x169   :  { %1060 = vmatpush1.bf16.msra.mxu0 %v3730_v28  ;;  %1103 = vmatpush1.bf16.msra.mxu1 %v3762_v34  ;;  %v956_v28 = vunpack.c.h.bf16 %v3983_v3 }
 0x16a   :  { %1061 = vmatprep.subr.bf16.mxu0 %v3742_v30  ;;  %1104 = vmatprep.subr.bf16.mxu1 %v3774_v36 }
 0x16d   :  { %1062 = vmatpush1.bf16.msra.mxu0 %v3755_v33  ;;  %1105 = vmatpush1.bf16.msra.mxu1 %v3799_v41 }
 0x16e   :  { %1063 = vmatprep.subr.bf16.mxu0 %v3769_v35  ;;  %1106 = vmatprep.subr.bf16.mxu1 %v3809_v43 }
 0x171   :  { %1064 = vmatpush1.bf16.msra.mxu0 %v3781_v37  ;;  %1107 = vmatpush1.bf16.msra.mxu1 %v3824_v48 }
 0x172   :  { %1233 = vmatprep.subr.bf16.mxu0 %v4161_v7  ;;  %1276 = vmatprep.subr.bf16.mxu1 %v4167_v8 }
 0x227   :  { %v899_v13 = vpop.f32.mrb[36].mxu0  ;;  %v942_v14 = vpop.f32.mrb[36].mxu1 }
 0x228   :  { %v959_v17 = vadd.f32 %v951_v9, %v899_v13  ;;  %v961_v18 = vadd.f32 %v953_v12, %v942_v14  ;;  %v901_v20 = vpop.f32.mrb[37].mxu0  ;;  %v944_v21 = vpop.f32.mrb[37].mxu1  ;;  %v857_v14 = vsel %vm846_vm3, %v4096_v53, 0.0 }
 0x229   :  { %v960_v24 = vadd.f32 %v952_v15, %v901_v20  ;;  %v962_v25 = vadd.f32 %v954_v16, %v944_v21  ;;  %v903_v26 = vpop.f32.mrb[38].mxu0  ;;  %v946_v27 = vpop.f32.mrb[38].mxu1  ;;  %v1033_v20 = vsel %vm1031_vm8, 65537, %v4940_v40 }
 0x22a   :  { %v2859_v30 = vmul.f32 -1.442695, %v959_v17  ;;  %v963_v31 = vadd.f32 %v955_v22, %v903_v26  ;;  %v965_v33 = vadd.f32 %v957_v23, %v946_v27  ;;  %v905_v34 = vpop.f32.mrb[39].mxu0  ;;  %v948_v35 = vpop.f32.mrb[39].mxu1 }
 0x22b   :  { %v2861_v36 = vmul.f32 -1.442695, %v960_v24  ;;  %v964_v37 = vadd.f32 %v956_v28, %v905_v34  ;;  %v966_v41 = vadd.f32 %v958_v29, %v948_v35  ;;  %v2863_v0 = vmul.f32 -1.442695, %v962_v25  ;;  %v1028_v16 = vpop.permute.xlu1 %1027  ;;  %v4204_v29 = vld [vmem:[%s4914_s24] ss:$16 sps:$4 sm:$0xff]  }
 0x22c   :  { %3191 = vpow2.f32 %v2859_v30  ;;  %v2860_v43 = vmul.f32 -1.442695, %v963_v31  ;;  %vm1030_vm7 = vcmp.eq.s32.totalorder %v1028_v16, 1  ;;  %v4210_v30 = vld [vmem:[%s4914_s24 + $0x8] ss:$16 sps:$4 sm:$0xff]  }
 0x22d   :  { %3193 = vpow2.f32 %v2861_v36  ;;  %v2862_v48 = vmul.f32 -1.442695, %v964_v37  ;;  %v2864_v4 = vmul.f32 -1.442695, %v966_v41  ;;  %vm1032_vm9 = vmpackc.low %vm1030_vm7, %vm1030_vm7  ;;  %v4236_v31 = vld [vmem:[%s4914_s24 + $0x28] ss:$16 sps:$4 sm:$0xff]  }
 0x22e   :  { %3195 = vpow2.f32 %v2860_v43  ;;  %v1034_v21 = vsel %vm1032_vm9, 65537, %v4940_v40  ;;  %v4248_v34 = vld [vmem:[%s4914_s24 + $0x4c] ss:$16 sps:$4 sm:$0xff]   ;;  %v4254_v35 = vld [vmem:[%s4914_s24 + $0x40] ss:$16 sps:$4 sm:$0xff]  }
 0x22f   :  { %3197 = vpow2.f32 %v2862_v48  ;;  %v2867_v25 = vcombine.low %v1033_v20, %v1034_v21  ;;  %v4260_v36 = vld [vmem:[%s4914_s24 + $0x48] ss:$16 sps:$4 sm:$0xff]   ;;  %v4266_v37 = vld [vmem:[%s4914_s24 + $0x64] ss:$16 sps:$4 sm:$0xff]   ;;  %v4272_v41 = vld [vmem:[%s4914_s24 + $0x6c] ss:$16 sps:$4 sm:$0xff]  }
 0x230   :  { %3199 = vtanh.f32 %v961_v18  ;;  %v4278_v43 = vld [vmem:[%s4914_s24 + $0x60] ss:$16 sps:$4 sm:$0xff]   ;;  %v4284_v48 = vld [vmem:[%s4914_s24 + $0x68] ss:$16 sps:$4 sm:$0xff]  }
 0x231   :  { %3201 = vpow2.f32 %v2863_v0  ;;  %vm1038_vm10 = vcmp.ne.s16.totalorder %v2867_v25, 0  ;;  %v4290_v0 = vld [vmem:[%s4914_s24 + $0x84] ss:$16 sps:$4 sm:$0xff]  }
 0x232   :  { %3203 = vtanh.f32 %v965_v33  ;;  %v4242_v33 = vld [vmem:[%s4914_s24 + $0x44] ss:$16 sps:$4 sm:$0xff]  }
 0x236   :  { %v3192_v2 = vpop.eup %3191 }
 0x237   :  { %v3194_v3 = vpop.eup %3193  ;;  %v973_v62 = vadd.f32 1.0, %v3192_v2  ;;  %v4296_v2 = vld [vmem:[%s4914_s24 + $0x8c] ss:$16 sps:$4 sm:$0xff]  }
 0x238   :  { %v985_v52 = vadd.f32 1.0, %v3194_v3  ;;  %v3196_v46 = vpop.eup %3195  ;;  %v4302_v3 = vld [vmem:[%s4914_s24 + $0x80] ss:$16 sps:$4 sm:$0xff]  }
 0x239   :  { %3205 = vrcp.f32 %v973_v62  ;;  %v974_v19 = vadd.f32 1.0, %v3196_v46  ;;  %v3198_v10 = vpop.eup %3197  ;;  %v4308_v62 = vld [vmem:[%s4914_s24 + $0x88] ss:$16 sps:$4 sm:$0xff]   ;;  %v4326_v46 = vld [vmem:[%s4914_s24 + $0xa0] ss:$16 sps:$4 sm:$0xff]  }
 0x23a   :  { %3207 = vrcp.f32 %v985_v52  ;;  %v986_v1 = vadd.f32 1.0, %v3198_v10  ;;  %v3200_v6 = vpop.eup %3199  ;;  %v4320_v52 = vld [vmem:[%s4914_s24 + $0xac] ss:$16 sps:$4 sm:$0xff]   ;;  %v4338_v10 = vld [vmem:[%s4914_s24 + $0xc4] ss:$16 sps:$4 sm:$0xff]  }
 0x23b   :  { %3209 = vpow2.f32 %v2864_v4  ;;  %v3202_v58 = vpop.eup %3201  ;;  %v4314_v4 = vld [vmem:[%s4914_s24 + $0xa4] ss:$16 sps:$4 sm:$0xff]  }
 0x23c   :  { %3211 = vrcp.f32 %v974_v19  ;;  %v3204_v38 = vpop.eup %3203  ;;  %v999_v47 = vadd.f32 1.0, %v3202_v58  ;;  %v4332_v19 = vld [vmem:[%s4914_s24 + $0xa8] ss:$16 sps:$4 sm:$0xff]  }
 0x23d   :  { %3213 = vrcp.f32 %v986_v1  ;;  %v4344_v1 = vld [vmem:[%s4914_s24 + $0xcc] ss:$16 sps:$4 sm:$0xff]   ;;  %v4356_v58 = vld [vmem:[%s4914_s24 + $0xc8] ss:$16 sps:$4 sm:$0xff]  }
 0x23e   :  { %3215 = vrcp.f32 %v999_v47 }
 0x243   :  { %v3206_v39 = vpop.eup %3205 }
 0x244   :  { %v3208_v44 = vpop.eup %3207  ;;  %v1007_v45 = vmul.f32 %v3206_v39, %v3200_v6  ;;  %v4350_v6 = vld [vmem:[%s4914_s24 + $0xc0] ss:$16 sps:$4 sm:$0xff]   ;;  %v4368_v39 = vld [vmem:[%s4914_s24 + $0xec] ss:$16 sps:$4 sm:$0xff]  }
 0x245   :  { %v3210_v50 = vpop.eup %3209  ;;  %v1005_v63 = vmul.f32 %v3208_v44, %v856_v57  ;;  %v4380_v44 = vld [vmem:[%s4914_s24 + $0xe8] ss:$16 sps:$4 sm:$0xff]  }
 0x246   :  { %v3212_v51 = vpop.eup %3211  ;;  %v1000_v15 = vadd.f32 1.0, %v3210_v50 }
 0x247   :  { %v1009_v9 = vadd.f32 %v1007_v45, %v1005_v63  ;;  %v1008_v12 = vmul.f32 %v3212_v51, %v3204_v38  ;;  %v3214_v13 = vpop.eup %3213  ;;  %v4362_v38 = vld [vmem:[%s4914_s24 + $0xe4] ss:$16 sps:$4 sm:$0xff]   ;;  %v4944_v51 = vld [vmem:[#allocation6_spill] sm:$0xff] }
 0x248   :  { %v1006_v17 = vmul.f32 %v3214_v13, %v857_v14  ;;  %v3216_v55 = vpop.eup %3215  ;;  %v4943_v45 = vld [vmem:[#allocation5_spill] sm:$0xff] }
 0x249   :  { %3217 = vtanh.f32 %v1009_v9  ;;  %v4185_v42 = vsel %vm1029_vm6, %v1009_v9, %v856_v57  ;;  %v1135_v57 = vunpack.c.l.bf16 %v3995_v61  ;;  %v1137_v47 = vunpack.c.l.bf16 %v4943_v45 }
 0x24a   :  { %v1010_v32 = vadd.f32 %v1008_v12, %v1006_v17  ;;  %3219 = vrcp.f32 %v1000_v15  ;;  %v1136_v9 = vunpack.c.l.bf16 %v4944_v51  ;;  %v4945_v12 = vld [vmem:[#allocation7_spill] sm:$0xff] }
 0x24b   :  { %v1138_v13 = vunpack.c.l.bf16 %v4945_v12 }
 0x24c   :  { %3221 = vtanh.f32 %v1010_v32  ;;  %v4187_v18 = vsel %vm1030_vm7, %v1010_v32, %v857_v14  ;;  %v1139_v32 = vunpack.c.h.bf16 %v3995_v61 }
 0x253   :  { %v3218_v53 = vpop.eup %3217 }
 0x254   :  { %v1013_v22 = vmul.f32 %v3218_v53, %v3216_v55  ;;  %v3220_v23 = vpop.eup %3219  ;;  %v1141_v55 = vunpack.c.h.bf16 %v4943_v45 }
 0x256   :  { %v3222_v24 = vpop.eup %3221 }
 0x257   :  { %v1014_v26 = vmul.f32 %v3222_v24, %v3220_v23  ;;  %v1140_v23 = vunpack.c.h.bf16 %v4944_v51  ;;  %v1142_v24 = vunpack.c.h.bf16 %v4945_v12 }
 0x259   :  { %v1015_v27 = vpack.c.bf16 %v1014_v26, %v1013_v22 }
 0x25b   :  { %v4197_v28 = vsel %vm1038_vm10, %v1015_v27, %v855_v54  ;;  %v4230_v54 = vld [vmem:[%s4914_s24 + $0x20] ss:$16 sps:$4 sm:$0xff]  }
 0x25c   :  { %1082 = vmatmul.mubr.bf16.vlgmr.msra.gmra.mrb[40].mxu0 %v4197_v28  ;;  %1125 = vmatmul.mubr.bf16.vlgmr.msra.gmra.mrb[40].mxu1 %v4197_v28 }
 0x25d   :  { %1234 = vmatpush1.bf16.msra.mxu0 %v4204_v29  ;;  %1277 = vmatpush1.bf16.msra.mxu1 %v4210_v30 }
 0x25e   :  { %1235 = vmatprep.subr.bf16.mxu0 %v4216_v60  ;;  %1278 = vmatprep.subr.bf16.mxu1 %v4222_v49 }
 0x25f   :  { %1265 = vmatprep.mubr.bf16.mxu0 %v4940_v40  ;;  %1308 = vmatprep.mubr.bf16.mxu1 %v4940_v40 }
 0x261   :  { %1236 = vmatpush1.bf16.msra.mxu0 %v4230_v54  ;;  %1279 = vmatpush1.bf16.msra.mxu1 %v4236_v31 }
 0x262   :  { %1237 = vmatprep.subr.bf16.mxu0 %v4242_v33  ;;  %1280 = vmatprep.subr.bf16.mxu1 %v4248_v34 }
 0x265   :  { %1238 = vmatpush1.bf16.msra.mxu0 %v4254_v35  ;;  %1281 = vmatpush1.bf16.msra.mxu1 %v4260_v36 }
 0x266   :  { %1239 = vmatprep.subr.bf16.mxu0 %v4266_v37  ;;  %1282 = vmatprep.subr.bf16.mxu1 %v4272_v41 }
 0x269   :  { %1240 = vmatpush1.bf16.msra.mxu0 %v4278_v43  ;;  %1283 = vmatpush1.bf16.msra.mxu1 %v4284_v48 }
 0x26a   :  { %1241 = vmatprep.subr.bf16.mxu0 %v4290_v0  ;;  %1284 = vmatprep.subr.bf16.mxu1 %v4296_v2 }
 0x26d   :  { %1242 = vmatpush1.bf16.msra.mxu0 %v4302_v3  ;;  %1285 = vmatpush1.bf16.msra.mxu1 %v4308_v62 }
 0x26e   :  { %1243 = vmatprep.subr.bf16.mxu0 %v4314_v4  ;;  %1286 = vmatprep.subr.bf16.mxu1 %v4320_v52 }
 0x271   :  { %1244 = vmatpush1.bf16.msra.mxu0 %v4326_v46  ;;  %1287 = vmatpush1.bf16.msra.mxu1 %v4332_v19 }
 0x272   :  { %1245 = vmatprep.subr.bf16.mxu0 %v4338_v10  ;;  %1288 = vmatprep.subr.bf16.mxu1 %v4344_v1 }
 0x275   :  { %1246 = vmatpush1.bf16.msra.mxu0 %v4350_v6  ;;  %1289 = vmatpush1.bf16.msra.mxu1 %v4356_v58 }
 0x276   :  { %1247 = vmatprep.subr.bf16.mxu0 %v4362_v38  ;;  %1290 = vmatprep.subr.bf16.mxu1 %v4368_v39 }
 0x279   :  { %1248 = vmatpush1.bf16.msra.mxu0 %v4374_v59  ;;  %1291 = vmatpush1.bf16.msra.mxu1 %v4380_v44 }
 0x27a   :  { %1417 = vmatprep.subr.bf16.mxu0 %v4161_v7  ;;  %1460 = vmatprep.subr.bf16.mxu1 %v4167_v8 }
 0x32f   :  { %v1083_v50 = vpop.f32.mrb[40].mxu0  ;;  %v1126_v63 = vpop.f32.mrb[40].mxu1 }
 0x330   :  { %v1143_v14 = vadd.f32 %v1135_v57, %v1083_v50  ;;  %v1145_v15 = vadd.f32 %v1137_v47, %v1126_v63  ;;  %v1085_v16 = vpop.f32.mrb[41].mxu0  ;;  %v1128_v17 = vpop.f32.mrb[41].mxu1 }
 0x331   :  { %v1144_v53 = vadd.f32 %v1136_v9, %v1085_v16  ;;  %v1146_v20 = vadd.f32 %v1138_v13, %v1128_v17  ;;  %v1087_v21 = vpop.f32.mrb[42].mxu0  ;;  %v1130_v22 = vpop.f32.mrb[42].mxu1 }
 0x332   :  { %v2868_v25 = vmul.f32 -1.442695, %v1143_v14  ;;  %v1147_v26 = vadd.f32 %v1139_v32, %v1087_v21  ;;  %v1149_v27 = vadd.f32 %v1141_v55, %v1130_v22  ;;  %v1089_v11 = vpop.f32.mrb[43].mxu0  ;;  %v1132_v57 = vpop.f32.mrb[43].mxu1 }
 0x333   :  { %v2870_v47 = vmul.f32 -1.442695, %v1144_v53  ;;  %v1148_v50 = vadd.f32 %v1140_v23, %v1089_v11  ;;  %v1150_v63 = vadd.f32 %v1142_v24, %v1132_v57  ;;  %v2872_v9 = vmul.f32 -1.442695, %v1146_v20  ;;  %v1209_v57 = vpop.permute.xlu0 %1208 }
 0x334   :  { %3223 = vpow2.f32 %v2868_v25  ;;  %v2869_v61 = vmul.f32 -1.442695, %v1147_v26  ;;  %vm1213_vm11 = vcmp.eq.s32.totalorder %v1209_v57, 1  ;;  %v4949_v57 = vld [vmem:[#allocation11_spill] sm:$0xff] }
 0x335   :  { %3225 = vpow2.f32 %v2870_v47  ;;  %v2871_v45 = vmul.f32 -1.442695, %v1148_v50  ;;  %v2873_v12 = vmul.f32 -1.442695, %v1150_v63  ;;  %vm1215_vm14 = vmpackc.low %vm1213_vm11, %vm1213_vm11 }
 0x336   :  { %3227 = vpow2.f32 %v2869_v61 }
 0x337   :  { %3229 = vpow2.f32 %v2871_v45 }
 0x338   :  { %3231 = vtanh.f32 %v1145_v15 }
 0x339   :  { %3233 = vpow2.f32 %v2872_v9 }
 0x33a   :  { %3235 = vtanh.f32 %v1149_v27 }
 0x33e   :  { %v3224_v13 = vpop.eup %3223 }
 0x33f   :  { %v3226_v51 = vpop.eup %3225  ;;  %v1157_v16 = vadd.f32 1.0, %v3224_v13  ;;  %v1212_v13 = vpop.permute.xlu1 %1211 }
 0x340   :  { %v1169_v14 = vadd.f32 1.0, %v3226_v51  ;;  %v3228_v17 = vpop.eup %3227  ;;  %vm1214_vm12 = vcmp.eq.s32.totalorder %v1212_v13, 1 }
 0x341   :  { %3237 = vrcp.f32 %v1157_v16  ;;  %v1158_v11 = vadd.f32 1.0, %v3228_v17  ;;  %v3230_v32 = vpop.eup %3229  ;;  %vm1216_vm13 = vmpackc.low %vm1214_vm12, %vm1214_vm12 }
 0x342   :  { %3239 = vrcp.f32 %v1169_v14  ;;  %v1170_v55 = vadd.f32 1.0, %v3230_v32  ;;  %v3232_v53 = vpop.eup %3231  ;;  %v1218_v17 = vsel %vm1216_vm13, 65537, %v4940_v40 }
 0x343   :  { %3241 = vpow2.f32 %v2873_v12  ;;  %v3234_v21 = vpop.eup %3233 }
 0x344   :  { %3243 = vrcp.f32 %v1158_v11  ;;  %v3236_v20 = vpop.eup %3235  ;;  %v1183_v24 = vadd.f32 1.0, %v3234_v21  ;;  %v1217_v11 = vsel %vm1215_vm14, 65537, %v4940_v40 }
 0x345   :  { %3245 = vrcp.f32 %v1170_v55 }
 0x346   :  { %3247 = vrcp.f32 %v1183_v24 }
 0x34b   :  { %v3238_v22 = vpop.eup %3237 }
 0x34c   :  { %v3240_v15 = vpop.eup %3239  ;;  %v1191_v23 = vmul.f32 %v3238_v22, %v3232_v53  ;;  %v2876_v53 = vcombine.low %v1217_v11, %v1218_v17 }
 0x34d   :  { %v3242_v25 = vpop.eup %3241  ;;  %v1189_v26 = vmul.f32 %v3240_v15, %v4185_v42  ;;  %v4947_v15 = vld [vmem:[#allocation9_spill] sm:$0xff] }
 0x34e   :  { %v3244_v27 = vpop.eup %3243  ;;  %v1184_v61 = vadd.f32 1.0, %v3242_v25  ;;  %vm1222_vm15 = vcmp.ne.s16.totalorder %v2876_v53, 0 }
 0x34f   :  { %v1193_v47 = vadd.f32 %v1191_v23, %v1189_v26  ;;  %v1192_v50 = vmul.f32 %v3244_v27, %v3236_v20  ;;  %v3246_v63 = vpop.eup %3245  ;;  %v1321_v23 = vunpack.c.l.bf16 %v4947_v15  ;;  %v4948_v26 = vld [vmem:[#allocation10_spill] sm:$0xff] }
 0x350   :  { %v1190_v45 = vmul.f32 %v3246_v63, %v4187_v18  ;;  %v3248_v12 = vpop.eup %3247  ;;  %v1320_v27 = vunpack.c.l.bf16 %v4948_v26 }
 0x351   :  { %3249 = vtanh.f32 %v1193_v47  ;;  %v4396_v9 = vsel %vm1213_vm11, %v1193_v47, %v4185_v42  ;;  %v1322_v47 = vunpack.c.l.bf16 %v4949_v57 }
 0x352   :  { %v1194_v51 = vadd.f32 %v1192_v50, %v1190_v45  ;;  %3251 = vrcp.f32 %v1184_v61 }
 0x354   :  { %3253 = vtanh.f32 %v1194_v51  ;;  %v4399_v16 = vsel %vm1214_vm12, %v1194_v51, %v4187_v18  ;;  %v4946_v18 = vld [vmem:[#allocation8_spill] sm:$0xff]  ;;  %v1325_v51 = vunpack.c.h.bf16 %v4947_v15 }
 0x355   :  { %v1323_v13 = vunpack.c.h.bf16 %v4946_v18 }
 0x35b   :  { %v3250_v14 = vpop.eup %3249 }
 0x35c   :  { %v1197_v32 = vmul.f32 %v3250_v14, %v3248_v12  ;;  %v3252_v55 = vpop.eup %3251 }
 0x35e   :  { %v3254_v42 = vpop.eup %3253 }
 0x35f   :  { %v1198_v21 = vmul.f32 %v3254_v42, %v3252_v55  ;;  %v1326_v55 = vunpack.c.h.bf16 %v4949_v57 }
 0x361   :  { %v1199_v20 = vpack.c.bf16 %v1198_v21, %v1197_v32  ;;  %v1324_v32 = vunpack.c.h.bf16 %v4948_v26 }
 0x363   :  { %v4404_v22 = vsel %vm1222_vm15, %v1199_v20, %v4197_v28  ;;  %v1319_v28 = vunpack.c.l.bf16 %v4946_v18 }
 0x364   :  { %1266 = vmatmul.mubr.bf16.vlgmr.msra.gmra.mrb[44].mxu0 %v4404_v22  ;;  %1309 = vmatmul.mubr.bf16.vlgmr.msra.gmra.mrb[44].mxu1 %v4404_v22 }
 0x365   :  { %1418 = vmatpush1.bf16.msra.mxu0 %v4204_v29  ;;  %1461 = vmatpush1.bf16.msra.mxu1 %v4210_v30 }
 0x366   :  { %1419 = vmatprep.subr.bf16.mxu0 %v4216_v60  ;;  %1462 = vmatprep.subr.bf16.mxu1 %v4222_v49 }
 0x367   :  { %1449 = vmatprep.mubr.bf16.mxu0 %v4940_v40  ;;  %1492 = vmatprep.mubr.bf16.mxu1 %v4940_v40 }
 0x369   :  { %1420 = vmatpush1.bf16.msra.mxu0 %v4230_v54  ;;  %1463 = vmatpush1.bf16.msra.mxu1 %v4236_v31 }
 0x36a   :  { %1421 = vmatprep.subr.bf16.mxu0 %v4242_v33  ;;  %1464 = vmatprep.subr.bf16.mxu1 %v4248_v34 }
 0x36d   :  { %1422 = vmatpush1.bf16.msra.mxu0 %v4254_v35  ;;  %1465 = vmatpush1.bf16.msra.mxu1 %v4260_v36 }
 0x36e   :  { %1423 = vmatprep.subr.bf16.mxu0 %v4266_v37  ;;  %1466 = vmatprep.subr.bf16.mxu1 %v4272_v41 }
 0x371   :  { %1424 = vmatpush1.bf16.msra.mxu0 %v4278_v43  ;;  %1467 = vmatpush1.bf16.msra.mxu1 %v4284_v48 }
 0x372   :  { %1425 = vmatprep.subr.bf16.mxu0 %v4290_v0  ;;  %1468 = vmatprep.subr.bf16.mxu1 %v4296_v2 }
 0x375   :  { %1426 = vmatpush1.bf16.msra.mxu0 %v4302_v3  ;;  %1469 = vmatpush1.bf16.msra.mxu1 %v4308_v62 }
 0x376   :  { %1427 = vmatprep.subr.bf16.mxu0 %v4314_v4  ;;  %1470 = vmatprep.subr.bf16.mxu1 %v4320_v52 }
 0x379   :  { %1428 = vmatpush1.bf16.msra.mxu0 %v4326_v46  ;;  %1471 = vmatpush1.bf16.msra.mxu1 %v4332_v19 }
 0x37a   :  { %1429 = vmatprep.subr.bf16.mxu0 %v4338_v10  ;;  %1472 = vmatprep.subr.bf16.mxu1 %v4344_v1 }
 0x37d   :  { %1430 = vmatpush1.bf16.msra.mxu0 %v4350_v6  ;;  %1473 = vmatpush1.bf16.msra.mxu1 %v4356_v58 }
 0x37e   :  { %1431 = vmatprep.subr.bf16.mxu0 %v4362_v38  ;;  %1474 = vmatprep.subr.bf16.mxu1 %v4368_v39 }
 0x381   :  { %1432 = vmatpush1.bf16.msra.mxu0 %v4374_v59  ;;  %1475 = vmatpush1.bf16.msra.mxu1 %v4380_v44 }
 0x382   :  { %1601 = vmatprep.subr.bf16.mxu0 %v4161_v7  ;;  %1644 = vmatprep.subr.bf16.mxu1 %v4167_v8 }
 0x437   :  { %v1267_v24 = vpop.f32.mrb[44].mxu0  ;;  %v1310_v25 = vpop.f32.mrb[44].mxu1 }
 0x438   :  { %v1327_v50 = vadd.f32 %v1319_v28, %v1267_v24  ;;  %v1329_v63 = vadd.f32 %v1321_v23, %v1310_v25  ;;  %v1269_v61 = vpop.f32.mrb[45].mxu0  ;;  %v1312_v45 = vpop.f32.mrb[45].mxu1 }
 0x439   :  { %v1328_v12 = vadd.f32 %v1320_v27, %v1269_v61  ;;  %v1330_v14 = vadd.f32 %v1322_v47, %v1312_v45  ;;  %v1271_v17 = vpop.f32.mrb[46].mxu0  ;;  %v1314_v11 = vpop.f32.mrb[46].mxu1 }
 0x43a   :  { %v2877_v42 = vmul.f32 -1.442695, %v1327_v50  ;;  %v1331_v53 = vadd.f32 %v1323_v13, %v1271_v17  ;;  %v1333_v21 = vadd.f32 %v1325_v51, %v1314_v11  ;;  %v1273_v20 = vpop.f32.mrb[47].mxu0  ;;  %v1316_v28 = vpop.f32.mrb[47].mxu1 }
 0x43b   :  { %v2879_v23 = vmul.f32 -1.442695, %v1328_v12  ;;  %v1332_v24 = vadd.f32 %v1324_v32, %v1273_v20  ;;  %v1334_v25 = vadd.f32 %v1326_v55, %v1316_v28  ;;  %v2881_v27 = vmul.f32 -1.442695, %v1330_v14  ;;  %v1393_v28 = vpop.permute.xlu0 %1392 }
 0x43c   :  { %3255 = vpow2.f32 %v2877_v42  ;;  %v2878_v18 = vmul.f32 -1.442695, %v1331_v53  ;;  %vm1397_vm1 = vcmp.eq.s32.totalorder %v1393_v28, 1  ;;  %v4953_v28 = vld [vmem:[#allocation15_spill] sm:$0xff] }
 0x43d   :  { %3257 = vpow2.f32 %v2879_v23  ;;  %v2880_v15 = vmul.f32 -1.442695, %v1332_v24  ;;  %v2882_v57 = vmul.f32 -1.442695, %v1334_v25  ;;  %vm1399_vm3 = vmpackc.low %vm1397_vm1, %vm1397_vm1 }
 0x43e   :  { %3259 = vpow2.f32 %v2878_v18 }
 0x43f   :  { %3261 = vpow2.f32 %v2880_v15 }
 0x440   :  { %3263 = vtanh.f32 %v1329_v63 }
 0x441   :  { %3265 = vpow2.f32 %v2881_v27 }
 0x442   :  { %3267 = vtanh.f32 %v1333_v21 }
 0x446   :  { %v3256_v47 = vpop.eup %3255 }
 0x447   :  { %v3258_v26 = vpop.eup %3257  ;;  %v1341_v61 = vadd.f32 1.0, %v3256_v47  ;;  %v1396_v47 = vpop.permute.xlu1 %1395 }
 0x448   :  { %v1353_v50 = vadd.f32 1.0, %v3258_v26  ;;  %v3260_v45 = vpop.eup %3259  ;;  %vm1398_vm0 = vcmp.eq.s32.totalorder %v1396_v47, 1 }
 0x449   :  { %3269 = vrcp.f32 %v1341_v61  ;;  %v1342_v13 = vadd.f32 1.0, %v3260_v45  ;;  %v3262_v51 = vpop.eup %3261  ;;  %vm1400_vm2 = vmpackc.low %vm1398_vm0, %vm1398_vm0 }
 0x44a   :  { %3271 = vrcp.f32 %v1353_v50  ;;  %v1354_v12 = vadd.f32 1.0, %v3262_v51  ;;  %v3264_v17 = vpop.eup %3263  ;;  %v1402_v45 = vsel %vm1400_vm2, 65537, %v4940_v40 }
 0x44b   :  { %3273 = vpow2.f32 %v2882_v57  ;;  %v3266_v11 = vpop.eup %3265 }
 0x44c   :  { %3275 = vrcp.f32 %v1342_v13  ;;  %v3268_v14 = vpop.eup %3267  ;;  %v1367_v42 = vadd.f32 1.0, %v3266_v11  ;;  %v1401_v13 = vsel %vm1399_vm3, 65537, %v4940_v40 }
 0x44d   :  { %3277 = vrcp.f32 %v1354_v12 }
 0x44e   :  { %3279 = vrcp.f32 %v1367_v42 }
 0x453   :  { %v3270_v32 = vpop.eup %3269 }
 0x454   :  { %v3272_v63 = vpop.eup %3271  ;;  %v1375_v55 = vmul.f32 %v3270_v32, %v3264_v17  ;;  %v2885_v17 = vcombine.low %v1401_v13, %v1402_v45 }
 0x455   :  { %v3274_v53 = vpop.eup %3273  ;;  %v1373_v20 = vmul.f32 %v3272_v63, %v4396_v9  ;;  %v4951_v63 = vld [vmem:[#allocation13_spill] sm:$0xff] }
 0x456   :  { %v3276_v21 = vpop.eup %3275  ;;  %v1368_v18 = vadd.f32 1.0, %v3274_v53  ;;  %vm1406_vm4 = vcmp.ne.s16.totalorder %v2885_v17, 0 }
 0x457   :  { %v1377_v23 = vadd.f32 %v1375_v55, %v1373_v20  ;;  %v1376_v24 = vmul.f32 %v3276_v21, %v3268_v14  ;;  %v3278_v25 = vpop.eup %3277  ;;  %v1505_v55 = vunpack.c.l.bf16 %v4951_v63  ;;  %v4952_v20 = vld [vmem:[#allocation14_spill] sm:$0xff] }
 0x458   :  { %v1374_v15 = vmul.f32 %v3278_v25, %v4399_v16  ;;  %v3280_v57 = vpop.eup %3279  ;;  %v1504_v21 = vunpack.c.l.bf16 %v4952_v20 }
 0x459   :  { %3281 = vtanh.f32 %v1377_v23  ;;  %v4453_v27 = vsel %vm1397_vm1, %v1377_v23, %v4396_v9  ;;  %v1506_v23 = vunpack.c.l.bf16 %v4953_v28 }
 0x45a   :  { %v1378_v26 = vadd.f32 %v1376_v24, %v1374_v15  ;;  %3283 = vrcp.f32 %v1368_v18 }
 0x45c   :  { %3285 = vtanh.f32 %v1378_v26  ;;  %v4456_v61 = vsel %vm1398_vm0, %v1378_v26, %v4399_v16  ;;  %v4950_v16 = vld [vmem:[#allocation12_spill] sm:$0xff]  ;;  %v1509_v26 = vunpack.c.h.bf16 %v4951_v63 }
 0x45d   :  { %v1507_v47 = vunpack.c.h.bf16 %v4950_v16 }
 0x463   :  { %v3282_v50 = vpop.eup %3281 }
 0x464   :  { %v1381_v51 = vmul.f32 %v3282_v50, %v3280_v57  ;;  %v3284_v12 = vpop.eup %3283 }
 0x466   :  { %v3286_v9 = vpop.eup %3285 }
 0x467   :  { %v1382_v11 = vmul.f32 %v3286_v9, %v3284_v12  ;;  %v1510_v12 = vunpack.c.h.bf16 %v4953_v28 }
 0x469   :  { %v1383_v14 = vpack.c.bf16 %v1382_v11, %v1381_v51  ;;  %v1508_v51 = vunpack.c.h.bf16 %v4952_v20 }
 0x46b   :  { %v4461_v32 = vsel %vm1406_vm4, %v1383_v14, %v4404_v22  ;;  %v1503_v22 = vunpack.c.l.bf16 %v4950_v16  ;;  %vm2168_vm4 = vcmask 1043456  }
 0x46c   :  { %1450 = vmatmul.mubr.bf16.vlgmr.msra.gmra.mrb[48].mxu0 %v4461_v32  ;;  %1493 = vmatmul.mubr.bf16.vlgmr.msra.gmra.mrb[48].mxu1 %v4461_v32 }
 0x46d   :  { %1602 = vmatpush1.bf16.msra.mxu0 %v4204_v29  ;;  %1645 = vmatpush1.bf16.msra.mxu1 %v4210_v30 }
 0x46e   :  { %1603 = vmatprep.subr.bf16.mxu0 %v4216_v60  ;;  %1646 = vmatprep.subr.bf16.mxu1 %v4222_v49 }
 0x46f   :  { %1633 = vmatprep.mubr.bf16.mxu0 %v4940_v40  ;;  %1676 = vmatprep.mubr.bf16.mxu1 %v4940_v40 }
 0x471   :  { %1604 = vmatpush1.bf16.msra.mxu0 %v4230_v54  ;;  %1647 = vmatpush1.bf16.msra.mxu1 %v4236_v31 }
 0x472   :  { %1605 = vmatprep.subr.bf16.mxu0 %v4242_v33  ;;  %1648 = vmatprep.subr.bf16.mxu1 %v4248_v34 }
 0x475   :  { %1606 = vmatpush1.bf16.msra.mxu0 %v4254_v35  ;;  %1649 = vmatpush1.bf16.msra.mxu1 %v4260_v36 }
 0x476   :  { %1607 = vmatprep.subr.bf16.mxu0 %v4266_v37  ;;  %1650 = vmatprep.subr.bf16.mxu1 %v4272_v41 }
 0x479   :  { %1608 = vmatpush1.bf16.msra.mxu0 %v4278_v43  ;;  %1651 = vmatpush1.bf16.msra.mxu1 %v4284_v48 }
 0x47a   :  { %1609 = vmatprep.subr.bf16.mxu0 %v4290_v0  ;;  %1652 = vmatprep.subr.bf16.mxu1 %v4296_v2 }
 0x47d   :  { %1610 = vmatpush1.bf16.msra.mxu0 %v4302_v3  ;;  %1653 = vmatpush1.bf16.msra.mxu1 %v4308_v62 }
 0x47e   :  { %1611 = vmatprep.subr.bf16.mxu0 %v4314_v4  ;;  %1654 = vmatprep.subr.bf16.mxu1 %v4320_v52 }
 0x481   :  { %1612 = vmatpush1.bf16.msra.mxu0 %v4326_v46  ;;  %1655 = vmatpush1.bf16.msra.mxu1 %v4332_v19 }
 0x482   :  { %1613 = vmatprep.subr.bf16.mxu0 %v4338_v10  ;;  %1656 = vmatprep.subr.bf16.mxu1 %v4344_v1 }
 0x485   :  { %1614 = vmatpush1.bf16.msra.mxu0 %v4350_v6  ;;  %1657 = vmatpush1.bf16.msra.mxu1 %v4356_v58 }
 0x486   :  { %1615 = vmatprep.subr.bf16.mxu0 %v4362_v38  ;;  %1658 = vmatprep.subr.bf16.mxu1 %v4368_v39 }
 0x489   :  { %1616 = vmatpush1.bf16.msra.mxu0 %v4374_v59  ;;  %1659 = vmatpush1.bf16.msra.mxu1 %v4380_v44 }
 0x48a   :  { %1785 = vmatprep.subr.bf16.mxu0 %v4161_v7  ;;  %1828 = vmatprep.subr.bf16.mxu1 %v4167_v8 }
 0x53f   :  { %v1451_v42 = vpop.f32.mrb[48].mxu0  ;;  %v1494_v53 = vpop.f32.mrb[48].mxu1 }
 0x540   :  { %v1511_v24 = vadd.f32 %v1503_v22, %v1451_v42  ;;  %v1513_v25 = vadd.f32 %v1505_v55, %v1494_v53  ;;  %v1453_v18 = vpop.f32.mrb[49].mxu0  ;;  %v1496_v15 = vpop.f32.mrb[49].mxu1 }
 0x541   :  { %v1512_v57 = vadd.f32 %v1504_v21, %v1453_v18  ;;  %v1514_v50 = vadd.f32 %v1506_v23, %v1496_v15  ;;  %v1455_v45 = vpop.f32.mrb[50].mxu0  ;;  %v1498_v13 = vpop.f32.mrb[50].mxu1 }
 0x542   :  { %v2886_v9 = vmul.f32 -1.442695, %v1511_v24  ;;  %v1515_v17 = vadd.f32 %v1507_v47, %v1455_v45  ;;  %v1517_v11 = vadd.f32 %v1509_v26, %v1498_v13  ;;  %v1457_v14 = vpop.f32.mrb[51].mxu0  ;;  %v1500_v22 = vpop.f32.mrb[51].mxu1 }
 0x543   :  { %v2888_v55 = vmul.f32 -1.442695, %v1512_v57  ;;  %v1516_v42 = vadd.f32 %v1508_v51, %v1457_v14  ;;  %v1518_v53 = vadd.f32 %v1510_v12, %v1500_v22  ;;  %v2890_v21 = vmul.f32 -1.442695, %v1514_v50  ;;  %v1577_v22 = vpop.permute.xlu0 %1576 }
 0x544   :  { %3287 = vpow2.f32 %v2886_v9  ;;  %v2887_v16 = vmul.f32 -1.442695, %v1515_v17  ;;  %vm1581_vm5 = vcmp.eq.s32.totalorder %v1577_v22, 1  ;;  %v4957_v22 = vld [vmem:[#allocation19_spill] sm:$0xff] }
 0x545   :  { %3289 = vpow2.f32 %v2888_v55  ;;  %v2889_v63 = vmul.f32 -1.442695, %v1516_v42  ;;  %v2891_v28 = vmul.f32 -1.442695, %v1518_v53  ;;  %vm1583_vm8 = vmpackc.low %vm1581_vm5, %vm1581_vm5 }
 0x546   :  { %3291 = vpow2.f32 %v2887_v16 }
 0x547   :  { %3293 = vpow2.f32 %v2889_v63 }
 0x548   :  { %3295 = vtanh.f32 %v1513_v25 }
 0x549   :  { %3297 = vpow2.f32 %v2890_v21 }
 0x54a   :  { %3299 = vtanh.f32 %v1517_v11 }
 0x54e   :  { %v3288_v23 = vpop.eup %3287 }
 0x54f   :  { %v3290_v20 = vpop.eup %3289  ;;  %v1525_v18 = vadd.f32 1.0, %v3288_v23  ;;  %v1580_v23 = vpop.permute.xlu1 %1579 }
 0x550   :  { %v1537_v24 = vadd.f32 1.0, %v3290_v20  ;;  %v3292_v15 = vpop.eup %3291  ;;  %vm1582_vm6 = vcmp.eq.s32.totalorder %v1580_v23, 1 }
 0x551   :  { %3301 = vrcp.f32 %v1525_v18  ;;  %v1526_v47 = vadd.f32 1.0, %v3292_v15  ;;  %v3294_v26 = vpop.eup %3293  ;;  %vm1584_vm7 = vmpackc.low %vm1582_vm6, %vm1582_vm6 }
 0x552   :  { %3303 = vrcp.f32 %v1537_v24  ;;  %v1538_v57 = vadd.f32 1.0, %v3294_v26  ;;  %v3296_v45 = vpop.eup %3295  ;;  %v1586_v15 = vsel %vm1584_vm7, 65537, %v4940_v40 }
 0x553   :  { %3305 = vpow2.f32 %v2891_v28  ;;  %v3298_v13 = vpop.eup %3297 }
 0x554   :  { %3307 = vrcp.f32 %v1526_v47  ;;  %v3300_v50 = vpop.eup %3299  ;;  %v1551_v9 = vadd.f32 1.0, %v3298_v13  ;;  %v1585_v47 = vsel %vm1583_vm8, 65537, %v4940_v40 }
 0x555   :  { %3309 = vrcp.f32 %v1538_v57 }
 0x556   :  { %3311 = vrcp.f32 %v1551_v9 }
 0x55b   :  { %v3302_v51 = vpop.eup %3301 }
 0x55c   :  { %v3304_v25 = vpop.eup %3303  ;;  %v1559_v12 = vmul.f32 %v3302_v51, %v3296_v45  ;;  %v2894_v45 = vcombine.low %v1585_v47, %v1586_v15  ;;  %v1694_v47 = vunpack.c.h.bf16 %v4957_v22 }
 0x55d   :  { %v3306_v17 = vpop.eup %3305  ;;  %v1557_v14 = vmul.f32 %v3304_v25, %v4453_v27  ;;  %v4955_v25 = vld [vmem:[#allocation17_spill] sm:$0xff] }
 0x55e   :  { %v3308_v11 = vpop.eup %3307  ;;  %v1552_v16 = vadd.f32 1.0, %v3306_v17  ;;  %vm1590_vm9 = vcmp.ne.s16.totalorder %v2894_v45, 0 }
 0x55f   :  { %v1561_v55 = vadd.f32 %v1559_v12, %v1557_v14  ;;  %v1560_v42 = vmul.f32 %v3308_v11, %v3300_v50  ;;  %v3310_v53 = vpop.eup %3309  ;;  %v1689_v12 = vunpack.c.l.bf16 %v4955_v25  ;;  %v4956_v14 = vld [vmem:[#allocation18_spill] sm:$0xff] }
 0x560   :  { %v1558_v63 = vmul.f32 %v3310_v53, %v4456_v61  ;;  %v3312_v28 = vpop.eup %3311  ;;  %v1688_v11 = vunpack.c.l.bf16 %v4956_v14  ;;  %v1692_v15 = vunpack.c.h.bf16 %v4956_v14 }
 0x561   :  { %3313 = vtanh.f32 %v1561_v55  ;;  %v4510_v21 = vsel %vm1581_vm5, %v1561_v55, %v4453_v27  ;;  %v1690_v55 = vunpack.c.l.bf16 %v4957_v22  ;;  %vm3461_vm5 = vmmov 0  }
 0x562   :  { %v1562_v20 = vadd.f32 %v1560_v42, %v1558_v63  ;;  %3315 = vrcp.f32 %v1552_v16 }
 0x564   :  { %3317 = vtanh.f32 %v1562_v20  ;;  %v4513_v18 = vsel %vm1582_vm6, %v1562_v20, %v4456_v61  ;;  %v4954_v61 = vld [vmem:[#allocation16_spill] sm:$0xff]  ;;  %vm2164_vm6 = vcmask 64512  }
 0x565   :  { %v1691_v23 = vunpack.c.h.bf16 %v4954_v61 }
 0x56b   :  { %v3314_v24 = vpop.eup %3313 }
 0x56c   :  { %v1565_v26 = vmul.f32 %v3314_v24, %v3312_v28  ;;  %v3316_v57 = vpop.eup %3315 }
 0x56e   :  { %v3318_v27 = vpop.eup %3317 }
 0x56f   :  { %v1566_v13 = vmul.f32 %v3318_v27, %v3316_v57 }
 0x571   :  { %v1567_v50 = vpack.c.bf16 %v1566_v13, %v1565_v26 }
 0x573   :  { %v4518_v51 = vsel %vm1590_vm9, %v1567_v50, %v4461_v32  ;;  %v1687_v32 = vunpack.c.l.bf16 %v4954_v61 }
 0x574   :  { %1634 = vmatmul.mubr.bf16.vlgmr.msra.gmra.mrb[52].mxu0 %v4518_v51  ;;  %1677 = vmatmul.mubr.bf16.vlgmr.msra.gmra.mrb[52].mxu1 %v4518_v51 }
 0x575   :  { %1786 = vmatpush1.bf16.msra.mxu0 %v4204_v29  ;;  %1829 = vmatpush1.bf16.msra.mxu1 %v4210_v30 }
 0x576   :  { %1787 = vmatprep.subr.bf16.mxu0 %v4216_v60  ;;  %1830 = vmatprep.subr.bf16.mxu1 %v4222_v49 }
 0x577   :  { %1817 = vmatprep.mubr.bf16.mxu0 %v4940_v40  ;;  %1860 = vmatprep.mubr.bf16.mxu1 %v4940_v40 }
 0x579   :  { %1788 = vmatpush1.bf16.msra.mxu0 %v4230_v54  ;;  %1831 = vmatpush1.bf16.msra.mxu1 %v4236_v31 }
 0x57a   :  { %1789 = vmatprep.subr.bf16.mxu0 %v4242_v33  ;;  %1832 = vmatprep.subr.bf16.mxu1 %v4248_v34 }
 0x57d   :  { %1790 = vmatpush1.bf16.msra.mxu0 %v4254_v35  ;;  %1833 = vmatpush1.bf16.msra.mxu1 %v4260_v36 }
 0x57e   :  { %1791 = vmatprep.subr.bf16.mxu0 %v4266_v37  ;;  %1834 = vmatprep.subr.bf16.mxu1 %v4272_v41 }
 0x581   :  { %1792 = vmatpush1.bf16.msra.mxu0 %v4278_v43  ;;  %1835 = vmatpush1.bf16.msra.mxu1 %v4284_v48 }
 0x582   :  { %1793 = vmatprep.subr.bf16.mxu0 %v4290_v0  ;;  %1836 = vmatprep.subr.bf16.mxu1 %v4296_v2 }
 0x585   :  { %1794 = vmatpush1.bf16.msra.mxu0 %v4302_v3  ;;  %1837 = vmatpush1.bf16.msra.mxu1 %v4308_v62 }
 0x586   :  { %1795 = vmatprep.subr.bf16.mxu0 %v4314_v4  ;;  %1838 = vmatprep.subr.bf16.mxu1 %v4320_v52 }
 0x589   :  { %1796 = vmatpush1.bf16.msra.mxu0 %v4326_v46  ;;  %1839 = vmatpush1.bf16.msra.mxu1 %v4332_v19 }
 0x58a   :  { %1797 = vmatprep.subr.bf16.mxu0 %v4338_v10  ;;  %1840 = vmatprep.subr.bf16.mxu1 %v4344_v1 }
 0x58d   :  { %1798 = vmatpush1.bf16.msra.mxu0 %v4350_v6  ;;  %1841 = vmatpush1.bf16.msra.mxu1 %v4356_v58 }
 0x58e   :  { %1799 = vmatprep.subr.bf16.mxu0 %v4362_v38  ;;  %1842 = vmatprep.subr.bf16.mxu1 %v4368_v39 }
 0x591   :  { %1800 = vmatpush1.bf16.msra.mxu0 %v4374_v59  ;;  %1843 = vmatpush1.bf16.msra.mxu1 %v4380_v44 }
 0x592   :  { %1969 = vmatprep.subr.bf16.mxu0 %v4161_v7  ;;  %2012 = vmatprep.subr.bf16.mxu1 %v4167_v8  ;;  %v1693_v7 = vunpack.c.h.bf16 %v4955_v25 }
 0x647   :  { %v1635_v9 = vpop.f32.mrb[52].mxu0  ;;  %v1678_v17 = vpop.f32.mrb[52].mxu1 }
 0x648   :  { %v1695_v42 = vadd.f32 %v1687_v32, %v1635_v9  ;;  %v1697_v53 = vadd.f32 %v1689_v12, %v1678_v17  ;;  %v1637_v16 = vpop.f32.mrb[53].mxu0  ;;  %v1680_v63 = vpop.f32.mrb[53].mxu1 }
 0x649   :  { %v1696_v20 = vadd.f32 %v1688_v11, %v1637_v16  ;;  %v1698_v8 = vadd.f32 %v1690_v55, %v1680_v63  ;;  %v1639_v28 = vpop.f32.mrb[54].mxu0  ;;  %v1682_v24 = vpop.f32.mrb[54].mxu1 }
 0x64a   :  { %v2895_v26 = vmul.f32 -1.442695, %v1695_v42  ;;  %v1699_v57 = vadd.f32 %v1691_v23, %v1639_v28  ;;  %v1701_v27 = vadd.f32 %v1693_v7, %v1682_v24  ;;  %v1641_v45 = vpop.f32.mrb[55].mxu0  ;;  %v1684_v13 = vpop.f32.mrb[55].mxu1 }
 0x64b   :  { %v2897_v50 = vmul.f32 -1.442695, %v1696_v20  ;;  %v1700_v32 = vadd.f32 %v1692_v15, %v1641_v45  ;;  %v1702_v12 = vadd.f32 %v1694_v47, %v1684_v13  ;;  %v2899_v9 = vmul.f32 -1.442695, %v1698_v8 }
 0x64c   :  { %3319 = vpow2.f32 %v2895_v26  ;;  %v2896_v61 = vmul.f32 -1.442695, %v1699_v57 }
 0x64d   :  { %3321 = vpow2.f32 %v2897_v50  ;;  %v2898_v25 = vmul.f32 -1.442695, %v1700_v32  ;;  %v2900_v22 = vmul.f32 -1.442695, %v1702_v12 }
 0x64e   :  { %3323 = vpow2.f32 %v2896_v61 }
 0x64f   :  { %3325 = vpow2.f32 %v2898_v25  ;;  %v1764_v25 = vpop.permute.xlu1 %1763 }
 0x650   :  { %3327 = vtanh.f32 %v1697_v53  ;;  %vm1766_vm11 = vcmp.eq.s32.totalorder %v1764_v25, 1 }
 0x651   :  { %3329 = vpow2.f32 %v2899_v9  ;;  %vm1768_vm12 = vmpackc.low %vm1766_vm11, %vm1766_vm11 }
 0x652   :  { %3331 = vtanh.f32 %v1701_v27  ;;  %v1761_v27 = vpop.permute.xlu0 %1760 }
 0x653   :  { %vm1765_vm10 = vcmp.eq.s32.totalorder %v1761_v27, 1 }
 0x654   :  { %vm1767_vm13 = vmpackc.low %vm1765_vm10, %vm1765_vm10 }
 0x656   :  { %v3320_v17 = vpop.eup %3319 }
 0x657   :  { %v3322_v14 = vpop.eup %3321  ;;  %v1709_v11 = vadd.f32 1.0, %v3320_v17 }
 0x658   :  { %v1721_v55 = vadd.f32 1.0, %v3322_v14  ;;  %v3324_v42 = vpop.eup %3323 }
 0x659   :  { %3333 = vrcp.f32 %v1709_v11  ;;  %v1710_v16 = vadd.f32 1.0, %v3324_v42  ;;  %v3326_v63 = vpop.eup %3325 }
 0x65a   :  { %3335 = vrcp.f32 %v1721_v55  ;;  %v1722_v23 = vadd.f32 1.0, %v3326_v63  ;;  %v3328_v7 = vpop.eup %3327  ;;  %v1769_v55 = vsel %vm1767_vm13, 65537, %v4940_v40  ;;  %vm2311_vm13 = vcmask 195584  }
 0x65b   :  { %3337 = vpow2.f32 %v2900_v22  ;;  %v3330_v20 = vpop.eup %3329  ;;  %v1770_v22 = vsel %vm1768_vm12, 65537, %v4940_v40  ;;  %vm2341_vm12 = vcmask 1045504  }
 0x65c   :  { %3339 = vrcp.f32 %v1710_v16  ;;  %v3332_v8 = vpop.eup %3331  ;;  %v1735_v15 = vadd.f32 1.0, %v3330_v20  ;;  %v2903_v63 = vcombine.low %v1769_v55, %v1770_v22 }
 0x65d   :  { %3341 = vrcp.f32 %v1722_v23 }
 0x65e   :  { %3343 = vrcp.f32 %v1735_v15  ;;  %vm1774_vm14 = vcmp.ne.s16.totalorder %v2903_v63, 0  ;;  %v1948_v63 = vpop.permute.xlu1 %1947 }
 0x65f   :  { %vm1950_vm1 = vcmp.eq.s32.totalorder %v1948_v63, 1 }
 0x660   :  { %vm1952_vm0 = vmpackc.low %vm1950_vm1, %vm1950_vm1 }
 0x663   :  { %v3334_v28 = vpop.eup %3333 }
 0x664   :  { %v3336_v53 = vpop.eup %3335  ;;  %v1743_v24 = vmul.f32 %v3334_v28, %v3328_v7 }
 0x665   :  { %v3338_v47 = vpop.eup %3337  ;;  %v1741_v26 = vmul.f32 %v3336_v53, %v4510_v21 }
 0x666   :  { %v3340_v57 = vpop.eup %3339  ;;  %v1736_v32 = vadd.f32 1.0, %v3338_v47 }
 0x667   :  { %v1745_v45 = vadd.f32 %v1743_v24, %v1741_v26  ;;  %v1744_v13 = vmul.f32 %v3340_v57, %v3332_v8  ;;  %v3342_v50 = vpop.eup %3341 }
 0x668   :  { %v1742_v12 = vmul.f32 %v3342_v50, %v4513_v18  ;;  %v3344_v14 = vpop.eup %3343 }
 0x669   :  { %3345 = vtanh.f32 %v1745_v45  ;;  %v4567_v61 = vsel %vm1765_vm10, %v1745_v45, %v4510_v21 }
 0x66a   :  { %v1746_v9 = vadd.f32 %v1744_v13, %v1742_v12  ;;  %3347 = vrcp.f32 %v1736_v32 }
 0x66c   :  { %3349 = vtanh.f32 %v1746_v9  ;;  %v4570_v17 = vsel %vm1766_vm11, %v1746_v9, %v4513_v18 }
 0x673   :  { %v3346_v11 = vpop.eup %3345 }
 0x674   :  { %v1749_v42 = vmul.f32 %v3346_v11, %v3344_v14  ;;  %v3348_v16 = vpop.eup %3347  ;;  %v1945_v14 = vpop.permute.xlu0 %1944 }
 0x675   :  { %vm1949_vm15 = vcmp.eq.s32.totalorder %v1945_v14, 1 }
 0x676   :  { %v3350_v21 = vpop.eup %3349  ;;  %vm1951_vm2 = vmpackc.low %vm1949_vm15, %vm1949_vm15 }
 0x677   :  { %v1750_v23 = vmul.f32 %v3350_v21, %v3348_v16 }
 0x679   :  { %v1751_v7 = vpack.c.bf16 %v1750_v23, %v1749_v42 }
 0x67b   :  { %v4575_v20 = vsel %vm1774_vm14, %v1751_v7, %v4518_v51  ;;  %vm2337_vm14 = vcmask 97280  }
 0x67c   :  { %1818 = vmatmul.mubr.bf16.vlgmr.msra.gmra.mrb[56].mxu0 %v4575_v20  ;;  %1861 = vmatmul.mubr.bf16.vlgmr.msra.gmra.mrb[56].mxu1 %v4575_v20 }
 0x67d   :  { %1970 = vmatpush1.bf16.msra.mxu0 %v4204_v29  ;;  %2013 = vmatpush1.bf16.msra.mxu1 %v4210_v30  ;;  %v1871_v29 = vunpack.c.l.bf16 %v4059_v56  ;;  %v1873_v30 = vunpack.c.l.bf16 %v4061_v5 }
 0x67e   :  { %1971 = vmatprep.subr.bf16.mxu0 %v4216_v60  ;;  %2014 = vmatprep.subr.bf16.mxu1 %v4222_v49 }
 0x67f   :  { %2001 = vmatprep.mubr.bf16.mxu0 %v4940_v40  ;;  %2044 = vmatprep.mubr.bf16.mxu1 %v4940_v40 }
 0x681   :  { %1972 = vmatpush1.bf16.msra.mxu0 %v4230_v54  ;;  %2015 = vmatpush1.bf16.msra.mxu1 %v4236_v31  ;;  %v4958_v54 = vld [vmem:[#allocation20_spill] sm:$0xff] }
 0x682   :  { %1973 = vmatprep.subr.bf16.mxu0 %v4242_v33  ;;  %2016 = vmatprep.subr.bf16.mxu1 %v4248_v34  ;;  %v1872_v31 = vunpack.c.l.bf16 %v4958_v54  ;;  %v4959_v33 = vld [vmem:[#allocation21_spill] sm:$0xff] }
 0x683   :  { %v1874_v34 = vunpack.c.l.bf16 %v4959_v33 }
 0x685   :  { %1974 = vmatpush1.bf16.msra.mxu0 %v4254_v35  ;;  %2017 = vmatpush1.bf16.msra.mxu1 %v4260_v36 }
 0x686   :  { %1975 = vmatprep.subr.bf16.mxu0 %v4266_v37  ;;  %2018 = vmatprep.subr.bf16.mxu1 %v4272_v41 }
 0x689   :  { %1976 = vmatpush1.bf16.msra.mxu0 %v4278_v43  ;;  %2019 = vmatpush1.bf16.msra.mxu1 %v4284_v48  ;;  %v1875_v43 = vunpack.c.h.bf16 %v4059_v56  ;;  %v1877_v48 = vunpack.c.h.bf16 %v4061_v5 }
 0x68a   :  { %1977 = vmatprep.subr.bf16.mxu0 %v4290_v0  ;;  %2020 = vmatprep.subr.bf16.mxu1 %v4296_v2 }
 0x68d   :  { %1978 = vmatpush1.bf16.msra.mxu0 %v4302_v3  ;;  %2021 = vmatpush1.bf16.msra.mxu1 %v4308_v62 }
 0x68e   :  { %1979 = vmatprep.subr.bf16.mxu0 %v4314_v4  ;;  %2022 = vmatprep.subr.bf16.mxu1 %v4320_v52  ;;  %v1876_v4 = vunpack.c.h.bf16 %v4958_v54  ;;  %v1878_v52 = vunpack.c.h.bf16 %v4959_v33 }
 0x691   :  { %1980 = vmatpush1.bf16.msra.mxu0 %v4326_v46  ;;  %2023 = vmatpush1.bf16.msra.mxu1 %v4332_v19 }
 0x692   :  { %1981 = vmatprep.subr.bf16.mxu0 %v4338_v10  ;;  %2024 = vmatprep.subr.bf16.mxu1 %v4344_v1 }
 0x695   :  { %1982 = vmatpush1.bf16.msra.mxu0 %v4350_v6  ;;  %2025 = vmatpush1.bf16.msra.mxu1 %v4356_v58 }
 0x696   :  { %1983 = vmatprep.subr.bf16.mxu0 %v4362_v38  ;;  %2026 = vmatprep.subr.bf16.mxu1 %v4368_v39 }
 0x699   :  { %1984 = vmatpush1.bf16.msra.mxu0 %v4374_v59  ;;  %2027 = vmatpush1.bf16.msra.mxu1 %v4380_v44 }
 0x74f   :  { %v1819_v60 = vpop.f32.mrb[56].mxu0  ;;  %v1862_v49 = vpop.f32.mrb[56].mxu1 }
 0x750   :  { %v1879_v35 = vadd.f32 %v1871_v29, %v1819_v60  ;;  %v1881_v36 = vadd.f32 %v1873_v30, %v1862_v49  ;;  %v1821_v37 = vpop.f32.mrb[57].mxu0  ;;  %v1864_v41 = vpop.f32.mrb[57].mxu1  ;;  %v1954_v60 = vsel %vm1952_vm0, 65537, %v4940_v40  ;;  %v1953_v49 = vsel %vm1951_vm2, 65537, %v4940_v40 }
 0x751   :  { %v1880_v0 = vadd.f32 %v1872_v31, %v1821_v37  ;;  %v1882_v2 = vadd.f32 %v1874_v34, %v1864_v41  ;;  %v1823_v3 = vpop.f32.mrb[58].mxu0  ;;  %v1866_v62 = vpop.f32.mrb[58].mxu1  ;;  %v2912_v33 = vcombine.low %v1953_v49, %v1954_v60  ;;  %v3460_v37 = vmov 0.0   ;;  %v3130_v41 = vld [vmem:[%s4960_s29 + $0x10] sm:$0xff]  }
 0x752   :  { %v2904_v46 = vmul.f32 -1.442695, %v1879_v35  ;;  %v1883_v19 = vadd.f32 %v1875_v43, %v1823_v3  ;;  %v1885_v10 = vadd.f32 %v1877_v48, %v1866_v62  ;;  %v1825_v1 = vpop.f32.mrb[59].mxu0  ;;  %v1868_v6 = vpop.f32.mrb[59].mxu1  ;;  %2997 = vmatprep.subr.bf16.mxu1 %v3460_v37  ;;  %2991 = vmatprep.subr.bf16.mxu0 %v3460_v37  ;;  %v3131_v43 = vld [vmem:[%s4960_s29 + $0x18] sm:$0xff]   ;;  %v3132_v48 = vld [vmem:[%s4960_s29 + $0x20] sm:$0xff]  }
 0x753   :  { %v2906_v58 = vmul.f32 -1.442695, %v1880_v0  ;;  %v1884_v38 = vadd.f32 %v1876_v4, %v1825_v1  ;;  %v1886_v39 = vadd.f32 %v1878_v52, %v1868_v6  ;;  %v2908_v59 = vmul.f32 -1.442695, %v1882_v2  ;;  %v2163_v0 = vld [vmem:[%s4858_s7] sm:$0xf] }
 0x754   :  { %3351 = vpow2.f32 %v2904_v46  ;;  %v2905_v56 = vmul.f32 -1.442695, %v1883_v19  ;;  %vm1958_vm3 = vcmp.ne.s16.totalorder %v2912_v33, 0  ;;  %v2144_v2 = vld [vmem:[%s4859_s2] sm:$0xff]  ;;  %v2170_v3 = vsel %vm2168_vm4, %v2163_v0, 0  ;;  %v2145_v62 = vld [vmem:[%s4859_s2 + $0x8] sm:$0xff] }
 0x755   :  { %3353 = vpow2.f32 %v2906_v58  ;;  %v2907_v5 = vmul.f32 -1.442695, %v1884_v38  ;;  %v2909_v8 = vmul.f32 -1.442695, %v1886_v39  ;;  %v3133_v4 = vld [vmem:[%s4960_s29 + $0x28] sm:$0xff]   ;;  %v4672_v52 = vpack.c.bf16 %v2145_v62, %v2144_v2  ;;  %v3134_v46 = vld [vmem:[%s4960_s29 + $0x30] sm:$0xff]  }
 0x756   :  { %3355 = vpow2.f32 %v2905_v56  ;;  %v3135_v19 = vld [vmem:[%s4960_s29 + $0x38] sm:$0xff]   ;;  %v4962_v6 = vld [vmem:[#allocation23_spill] sm:$0xff]  ;;  %v4963_v56 = vld [vmem:[#allocation24_spill] sm:$0xff] }
 0x757   :  { %3357 = vpow2.f32 %v2907_v5  ;;  %v2057_v58 = vunpack.c.l.bf16 %v4962_v6  ;;  %v2056_v5 = vunpack.c.l.bf16 %v4963_v56 }
 0x758   :  { %3359 = vtanh.f32 %v1881_v36 }
 0x759   :  { %3361 = vpow2.f32 %v2908_v59  ;;  %v4964_v59 = vld [vmem:[#allocation25_spill] sm:$0xff] }
 0x75a   :  { %3363 = vtanh.f32 %v1885_v10  ;;  %v4961_v10 = vld [vmem:[#allocation22_spill] sm:$0xff] }
 0x75b   :  { %v2055_v1 = vunpack.c.l.bf16 %v4961_v10 }
 0x75e   :  { %v3352_v44 = vpop.eup %3351 }
 0x75f   :  { %v3354_v18 = vpop.eup %3353  ;;  %v1893_v51 = vadd.f32 1.0, %v3352_v44  ;;  %v2058_v44 = vunpack.c.l.bf16 %v4964_v59 }
 0x760   :  { %v1905_v28 = vadd.f32 1.0, %v3354_v18  ;;  %v3356_v53 = vpop.eup %3355 }
 0x761   :  { %3365 = vrcp.f32 %v1893_v51  ;;  %v1894_v24 = vadd.f32 1.0, %v3356_v53  ;;  %v3358_v15 = vpop.eup %3357  ;;  %v2059_v53 = vunpack.c.h.bf16 %v4961_v10  ;;  %v2129_v10 = vpop.permute.xlu0 %2128 }
 0x762   :  { %3367 = vrcp.f32 %v1905_v28  ;;  %v1906_v47 = vadd.f32 1.0, %v3358_v15  ;;  %v3360_v26 = vpop.eup %3359  ;;  %vm2133_vm8 = vcmp.eq.s32.totalorder %v2129_v10, 1 }
 0x763   :  { %3369 = vpow2.f32 %v2909_v8  ;;  %v3362_v57 = vpop.eup %3361  ;;  %vm2135_vm10 = vmpackc.low %vm2133_vm8, %vm2133_vm8 }
 0x764   :  { %3371 = vrcp.f32 %v1894_v24  ;;  %v3364_v27 = vpop.eup %3363  ;;  %v1919_v32 = vadd.f32 1.0, %v3362_v57  ;;  %v2061_v24 = vunpack.c.h.bf16 %v4962_v6 }
 0x765   :  { %3373 = vrcp.f32 %v1906_v47 }
 0x766   :  { %3375 = vrcp.f32 %v1919_v32 }
 0x76b   :  { %v3366_v45 = vpop.eup %3365 }
 0x76c   :  { %v3368_v13 = vpop.eup %3367  ;;  %v1927_v50 = vmul.f32 %v3366_v45, %v3360_v26  ;;  %v2062_v45 = vunpack.c.h.bf16 %v4964_v59 }
 0x76d   :  { %v3370_v12 = vpop.eup %3369  ;;  %v1925_v25 = vmul.f32 %v3368_v13, %v4567_v61 }
 0x76e   :  { %v3372_v9 = vpop.eup %3371  ;;  %v1920_v42 = vadd.f32 1.0, %v3370_v12 }
 0x76f   :  { %v1929_v11 = vadd.f32 %v1927_v50, %v1925_v25  ;;  %v1928_v22 = vmul.f32 %v3372_v9, %v3364_v27  ;;  %v3374_v55 = vpop.eup %3373  ;;  %v2060_v27 = vunpack.c.h.bf16 %v4963_v56 }
 0x770   :  { %v1926_v16 = vmul.f32 %v3374_v55, %v4570_v17  ;;  %v3376_v29 = vpop.eup %3375 }
 0x771   :  { %3377 = vtanh.f32 %v1929_v11  ;;  %v4622_v21 = vsel %vm1949_vm15, %v1929_v11, %v4567_v61 }
 0x772   :  { %v1930_v23 = vadd.f32 %v1928_v22, %v1926_v16  ;;  %3379 = vrcp.f32 %v1920_v42 }
 0x774   :  { %3381 = vtanh.f32 %v1930_v23  ;;  %v4625_v7 = vsel %vm1950_vm1, %v1930_v23, %v4570_v17  ;;  %v3128_v17 = vld [vmem:[%s4960_s29] sm:$0xff]  }
 0x77b   :  { %v3378_v30 = vpop.eup %3377 }
 0x77c   :  { %v1933_v54 = vmul.f32 %v3378_v30, %v3376_v29  ;;  %v3380_v31 = vpop.eup %3379 }
 0x77e   :  { %v3382_v61 = vpop.eup %3381 }
 0x77f   :  { %v1934_v34 = vmul.f32 %v3382_v61, %v3380_v31 }
 0x781   :  { %v1935_v35 = vpack.c.bf16 %v1934_v34, %v1933_v54 }
 0x783   :  { %v4630_v36 = vsel %vm1958_vm3, %v1935_v35, %v4575_v20  ;;  %v3129_v20 = vld [vmem:[%s4960_s29 + $0x8] sm:$0xff]  }
 0x784   :  { %2002 = vmatmul.mubr.bf16.vlgmr.msra.gmra.mrb[60].mxu0 %v4630_v36  ;;  %2045 = vmatmul.mubr.bf16.vlgmr.msra.gmra.mrb[60].mxu1 %v4630_v36 }
 0x785   :  { %2998 = vmatpush3.bf16.msra.mxu1 %v3128_v17  ;;  %2993 = vmatprep.mubr.msk.bf16.mxu0 %vm3461_vm5, %v3460_v37 }
 0x786   :  { %2999 = vmatprep.subr.bf16.mxu1 %v3460_v37  ;;  %3013 = vmatprep.mubr.msk.bf16.mxu1 %vm3461_vm5, %v3460_v37 }
 0x787   :  { %2992 = vmatpush3.bf16.msra.mxu0 %v2170_v3 }
 0x789   :  { %3000 = vmatpush3.bf16.msra.mxu1 %v3129_v20 }
 0x78a   :  { %3001 = vmatprep.subr.bf16.mxu1 %v3460_v37 }
 0x78c   :  { %2994 = vmatmul.mubr.msk.bf16.vlgmr.msra.gmra.mrb[64].mxu0 %vm2164_vm6, %v4672_v52 }
 0x78d   :  { %3002 = vmatpush3.bf16.msra.mxu1 %v3130_v41  ;;  %2380 = vmatprep.mubr.bf16.mxu0 %v4940_v40 }
 0x78e   :  { %3003 = vmatprep.subr.bf16.mxu1 %v3460_v37 }
 0x791   :  { %3004 = vmatpush3.bf16.msra.mxu1 %v3131_v43 }
 0x792   :  { %3005 = vmatprep.subr.bf16.mxu1 %v3460_v37 }
 0x795   :  { %3006 = vmatpush3.bf16.msra.mxu1 %v3132_v48 }
 0x796   :  { %3007 = vmatprep.subr.bf16.mxu1 %v3460_v37 }
 0x799   :  { %3008 = vmatpush3.bf16.msra.mxu1 %v3133_v4 }
 0x79a   :  { %3009 = vmatprep.subr.bf16.mxu1 %v3460_v37 }
 0x79d   :  { %3010 = vmatpush3.bf16.msra.mxu1 %v3134_v46 }
 0x79e   :  { %3011 = vmatprep.subr.bf16.mxu1 %v3460_v37 }
 0x7a1   :  { %3012 = vmatpush3.bf16.msra.mxu1 %v3135_v19  ;;  %v2132_v19 = vpop.permute.xlu1 %2131 }
 0x7a2   :  { %3037 = vmatprep.subr.bf16.mxu1 %v3460_v37  ;;  %vm2134_vm7 = vcmp.eq.s32.totalorder %v2132_v19, 1 }
 0x7a3   :  { %vm2136_vm9 = vmpackc.low %vm2134_vm7, %vm2134_vm7 }
 0x857   :  { %v2003_v38 = vpop.f32.mrb[60].mxu0  ;;  %v2046_v39 = vpop.f32.mrb[60].mxu1 }
 0x858   :  { %v2063_v18 = vadd.f32 %v2055_v1, %v2003_v38  ;;  %v2065_v51 = vadd.f32 %v2057_v58, %v2046_v39  ;;  %v2005_v8 = vpop.f32.mrb[61].mxu0  ;;  %v2048_v28 = vpop.f32.mrb[61].mxu1  ;;  %v2138_v58 = vsel %vm2136_vm9, 65537, %v4940_v40  ;;  %v2137_v38 = vsel %vm2135_vm10, 65537, %v4940_v40 }
 0x859   :  { %v2064_v15 = vadd.f32 %v2056_v5, %v2005_v8  ;;  %v2066_v47 = vadd.f32 %v2058_v44, %v2048_v28  ;;  %v2007_v26 = vpop.f32.mrb[62].mxu0  ;;  %v2050_v57 = vpop.f32.mrb[62].mxu1  ;;  %v2921_v59 = vcombine.low %v2137_v38, %v2138_v58 }
 0x85a   :  { %v2913_v13 = vmul.f32 -1.442695, %v2063_v18  ;;  %v2067_v50 = vadd.f32 %v2059_v53, %v2007_v26  ;;  %v2069_v32 = vadd.f32 %v2061_v24, %v2050_v57  ;;  %v2009_v12 = vpop.f32.mrb[63].mxu0  ;;  %v2052_v25 = vpop.f32.mrb[63].mxu1  ;;  %v2315_v24 = vld [vmem:[%s4860_s9] sm:$0xff] }
 0x85b   :  { %v2915_v9 = vmul.f32 -1.442695, %v2064_v15  ;;  %v2068_v14 = vadd.f32 %v2060_v27, %v2009_v12  ;;  %v2070_v11 = vadd.f32 %v2062_v45, %v2052_v25  ;;  %v2917_v42 = vmul.f32 -1.442695, %v2066_v47  ;;  %v2316_v15 = vld [vmem:[%s4860_s9 + $0x8] sm:$0x33] }
 0x85c   :  { %3383 = vpow2.f32 %v2913_v13  ;;  %v2914_v22 = vmul.f32 -1.442695, %v2067_v50  ;;  %vm2142_vm11 = vcmp.ne.s16.totalorder %v2921_v59, 0  ;;  %v2932_v47 = vcombine.low %v2315_v24, %v2316_v15  ;;  %v3139_v57 = vld [vmem:[%s4862_s13] sm:$0xff]   ;;  %v3141_v27 = vld [vmem:[%s4862_s13 + $0x8] sm:$0xff]   ;;  %v3143_v45 = vld [vmem:[%s4862_s13 + $0x10] sm:$0xff]  }
 0x85d   :  { %3385 = vpow2.f32 %v2915_v9  ;;  %v2916_v55 = vmul.f32 -1.442695, %v2068_v14  ;;  %v2918_v29 = vmul.f32 -1.442695, %v2070_v11  ;;  %v3145_v13 = vld [vmem:[%s4862_s13 + $0x18] sm:$0xff]   ;;  %v3147_v50 = vld [vmem:[%s4862_s13 + $0x20] sm:$0xff]  }
 0x85e   :  { %3387 = vpow2.f32 %v2914_v22  ;;  %v2343_v26 = vsel %vm2341_vm12, %v2932_v47, 0  ;;  %v2931_v25 = vld [vmem:[%s4863_s8] ss:$0 sm:$0xff] }
 0x85f   :  { %3389 = vpow2.f32 %v2916_v55 }
 0x860   :  { %3391 = vtanh.f32 %v2065_v51  ;;  %v2206_v51 = vpop.f32.mrb[64].mxu0 }
 0x861   :  { %3393 = vpow2.f32 %v2917_v42  ;;  %v2995_v8 = vpop.f32.mrb[65].mxu0 }
 0x862   :  { %3395 = vtanh.f32 %v2069_v32  ;;  %v2209_v28 = vpop.f32.mrb[66].mxu0  ;;  %v3149_v32 = vld [vmem:[%s4862_s13 + $0x28] sm:$0xff]  }
 0x863   :  { %v2996_v53 = vpop.f32.mrb[67].mxu0 }
 0x866   :  { %v3384_v16 = vpop.eup %3383 }
 0x867   :  { %v3386_v63 = vpop.eup %3385  ;;  %v2077_v23 = vadd.f32 1.0, %v3384_v16 }
 0x868   :  { %v2089_v30 = vadd.f32 1.0, %v3386_v63  ;;  %v3388_v60 = vpop.eup %3387  ;;  %v3138_v63 = vld [vmem:[%s4861_s11] sm:$0xff]  }
 0x869   :  { %3397 = vrcp.f32 %v2077_v23  ;;  %v2078_v49 = vadd.f32 1.0, %v3388_v60  ;;  %v3390_v54 = vpop.eup %3389  ;;  %v3144_v60 = vld [vmem:[%s4861_s11 + $0x18] sm:$0xff]  }
 0x86a   :  { %3399 = vrcp.f32 %v2089_v30  ;;  %v2090_v31 = vadd.f32 1.0, %v3390_v54  ;;  %v3392_v61 = vpop.eup %3391  ;;  %v3142_v30 = vld [vmem:[%s4861_s11 + $0x10] sm:$0xff]   ;;  %v3148_v54 = vld [vmem:[%s4861_s11 + $0x28] sm:$0xff]  }
 0x86b   :  { %3401 = vpow2.f32 %v2918_v29  ;;  %v3394_v33 = vpop.eup %3393  ;;  %v3140_v29 = vld [vmem:[%s4861_s11 + $0x8] sm:$0xff]  }
 0x86c   :  { %3403 = vrcp.f32 %v2078_v49  ;;  %v3396_v34 = vpop.eup %3395  ;;  %v2103_v41 = vadd.f32 1.0, %v3394_v33  ;;  %v3146_v49 = vld [vmem:[%s4861_s11 + $0x20] sm:$0xff]   ;;  %v3152_v33 = vld [vmem:[%s4861_s11 + $0x38] sm:$0xff]  }
 0x86d   :  { %3405 = vrcp.f32 %v2090_v31  ;;  %v3150_v31 = vld [vmem:[%s4861_s11 + $0x30] sm:$0xff]  }
 0x86e   :  { %3407 = vrcp.f32 %v2103_v41  ;;  %v4965_v41 = vld [vmem:[#allocation3_spill] sm:$0xff] }
 0x873   :  { %v3398_v35 = vpop.eup %3397 }
 0x874   :  { %v3400_v17 = vpop.eup %3399  ;;  %v2111_v20 = vmul.f32 %v3398_v35, %v3392_v61  ;;  %v3151_v61 = vld [vmem:[%s4862_s13 + $0x30] sm:$0xff]   ;;  %v2631_v35 = vld [vmem:[%s4865_s16] sm:$0xff] }
 0x875   :  { %v3402_v43 = vpop.eup %3401  ;;  %v2109_v48 = vmul.f32 %v3400_v17, %v4622_v21  ;;  %v2955_v17 = vcombine.high %v2631_v35, %v2631_v35  ;;  %v2954_v10 = vcombine.low %v2631_v35, %v2631_v35 }
 0x876   :  { %v3404_v0 = vpop.eup %3403  ;;  %v2104_v4 = vadd.f32 1.0, %v3402_v43 }
 0x877   :  { %v2113_v2 = vadd.f32 %v2111_v20, %v2109_v48  ;;  %v2112_v3 = vmul.f32 %v3404_v0, %v3396_v34  ;;  %v3406_v62 = vpop.eup %3405  ;;  %v3153_v34 = vld [vmem:[%s4862_s13 + $0x38] sm:$0xff]   ;;  %v2317_v20 = vld [vmem:[%s4867_s10] sm:$0x3] }
 0x878   :  { %v2110_v46 = vmul.f32 %v3406_v62, %v4625_v7  ;;  %v3408_v6 = vpop.eup %3407  ;;  %v2322_v43 = vrot.slane %v2317_v20, %v4965_v41 }
 0x879   :  { %3409 = vtanh.f32 %v2113_v2 }
 0x87a   :  { %v2114_v1 = vadd.f32 %v2112_v3, %v2110_v46  ;;  %3411 = vrcp.f32 %v2104_v4 }
 0x87c   :  { %3413 = vtanh.f32 %v2114_v1 }
 0x883   :  { %v3410_v21 = vpop.eup %3409 }
 0x884   :  { %v2117_v39 = vmul.f32 %v3410_v21, %v3408_v6  ;;  %v3412_v56 = vpop.eup %3411 }
 0x886   :  { %v3414_v5 = vpop.eup %3413 }
 0x887   :  { %v2118_v7 = vmul.f32 %v3414_v5, %v3412_v56  ;;  %v2638_v56 = vsel %vm2168_vm4, %v2954_v10, 0  ;;  %v3156_v5 = vld [vmem:[%s4866_s15 + $0x4] ss:$8 sps:$4 sm:$0x3f]  }
 0x889   :  { %v2119_v44 = vpack.c.bf16 %v2118_v7, %v2117_v39  ;;  %v3158_v7 = vld [vmem:[%s4866_s15] ss:$8 sps:$4 sm:$0x3f]  }
 0x88b   :  { %v2143_v18 = vsel %vm2142_vm11, %v2119_v44, %v4630_v36  ;;  %v3136_v36 = vld [vmem:[%s4860_s9 + $0x4] ss:$8 sps:$4 sm:$0x3f]   ;;  %v2695_v44 = vsel %vm2341_vm12, %v3158_v7, 0 }
 0x88c   :  { %3014 = vmatmul.mubr.bf16.vlgmr.msra.gmra.mrb[64].mxu1 %v2143_v18  ;;  %2934 = vmatprep.subr.msk.bf16.mxu0 %vm2341_vm12, %v3136_v36  ;;  %v2936_v18 = vld [vmem:[%s4868_s12] ss:$0 sm:$0xff] }
 0x88d   :  { %3053 = vmatprep.mubr.msk.bf16.mxu1 %vm3461_vm5, %v3460_v37  ;;  %2349 = vmatpush1.bf16.msra.mxu0 %v2343_v26 }
 0x88e   :  { %3017 = vmatprep.subr.bf16.mxu0 %v3460_v37  ;;  %3038 = vmatpush3.bf16.msra.mxu1 %v3139_v57 }
 0x88f   :  { %3039 = vmatprep.subr.bf16.mxu1 %v3460_v37 }
 0x892   :  { %3040 = vmatpush3.bf16.msra.mxu1 %v3141_v27 }
 0x893   :  { %3041 = vmatprep.subr.bf16.mxu1 %v3460_v37 }
 0x896   :  { %3042 = vmatpush3.bf16.msra.mxu1 %v3143_v45 }
 0x897   :  { %3043 = vmatprep.subr.bf16.mxu1 %v3460_v37 }
 0x89a   :  { %3044 = vmatpush3.bf16.msra.mxu1 %v3145_v13 }
 0x89b   :  { %3045 = vmatprep.subr.bf16.mxu1 %v3460_v37 }
 0x89e   :  { %3046 = vmatpush3.bf16.msra.mxu1 %v3147_v50  ;;  %v2743_v50 = vld [vmem:[%s4871_s17] sm:$0x3] }
 0x89f   :  { %3047 = vmatprep.subr.bf16.mxu1 %v3460_v37 }
 0x8a2   :  { %3048 = vmatpush3.bf16.msra.mxu1 %v3149_v32 }
 0x8a3   :  { %3049 = vmatprep.subr.bf16.mxu1 %v3460_v37 }
 0x8a6   :  { %3050 = vmatpush3.bf16.msra.mxu1 %v3151_v61 }
 0x8a7   :  { %3051 = vmatprep.subr.bf16.mxu1 %v3460_v37 }
 0x8aa   :  { %3052 = vmatpush3.bf16.msra.mxu1 %v3153_v34 }
 0x95f   :  { %v2295_v12 = vpop.f32.mrb[64].mxu1 }
 0x960   :  { %v2296_v9 = vadd.f32 %v2295_v12, %v2206_v51  ;;  %v3015_v14 = vpop.f32.mrb[65].mxu1  ;;  %v2945_v51 = vld [vmem:[%s4869_s14] ss:$0 sm:$0xff] }
 0x961   :  { %v2298_v11 = vpop.f32.mrb[66].mxu1 }
 0x962   :  { %v2309_v22 = vadd.f32 %v2931_v25, %v2296_v9  ;;  %v2299_v55 = vadd.f32 %v2298_v11, %v2209_v28  ;;  %v3016_v42 = vpop.f32.mrb[67].mxu1 }
 0x964   :  { %2312 = vst.msk [vmem:[%s4864_s18] sm:$0xff] %vm2311_vm13, %v2309_v22  ;;  %v2310_v16 = vadd.f32 %v2931_v25, %v2299_v55  ;;  %v2748_v25 = vrot.slane %v2743_v50, %v4965_v41 }
 0x966   :  { %2313 = vst.msk [vmem:[%s4864_s18 + $0x8] sm:$0xff] %vm2311_vm13, %v2310_v16  ;;  %v4750_v23 = vpack.c.bf16 %v2310_v16, %v2309_v22 }
 0x968   :  { %2935 = vmatmul.mubr.msk.bf16.vlgmr.msra.gmra.mrb[68].mxu0 %vm2337_vm14, %v4750_v23 }
 0x969   :  { %3018 = vmatpush3.bf16.msra.mxu0 %v3138_v63  ;;  %3033 = vmatprep.mubr.msk.bf16.mxu0 %vm3461_vm5, %v3460_v37 }
 0x96a   :  { %3019 = vmatprep.subr.bf16.mxu0 %v3460_v37 }
 0x96d   :  { %3020 = vmatpush3.bf16.msra.mxu0 %v3140_v29 }
 0x96e   :  { %3021 = vmatprep.subr.bf16.mxu0 %v3460_v37 }
 0x971   :  { %3022 = vmatpush3.bf16.msra.mxu0 %v3142_v30 }
 0x972   :  { %3023 = vmatprep.subr.bf16.mxu0 %v3460_v37 }
 0x975   :  { %3024 = vmatpush3.bf16.msra.mxu0 %v3144_v60 }
 0x976   :  { %3025 = vmatprep.subr.bf16.mxu0 %v3460_v37 }
 0x979   :  { %3026 = vmatpush3.bf16.msra.mxu0 %v3146_v49 }
 0x97a   :  { %3027 = vmatprep.subr.bf16.mxu0 %v3460_v37 }
 0x97d   :  { %3028 = vmatpush3.bf16.msra.mxu0 %v3148_v54 }
 0x97e   :  { %3029 = vmatprep.subr.bf16.mxu0 %v3460_v37 }
 0x981   :  { %3030 = vmatpush3.bf16.msra.mxu0 %v3150_v31 }
 0x982   :  { %3031 = vmatprep.subr.bf16.mxu0 %v3460_v37  ;;  %v4966_v37 = vld [vmem:[#allocation4_spill] sm:$0xff] }
 0x983   :  { %v2326_v48 = vrot.slane %v2317_v20, %v4966_v37  ;;  %v2752_v9 = vrot.slane %v2743_v50, %v4966_v37 }
 0x985   :  { %3032 = vmatpush3.bf16.msra.mxu0 %v3152_v33 }
 0x986   :  { %2956 = vmatprep.subr.msk.bf16.mxu0 %vm2168_vm4, %v2955_v17 }
 0xa3b   :  { %v2382_v0 = vpop.f32.mrb[68].mxu0 }
 0xa3c   :  { %v2383_v2 = vadd.f32 %v2382_v0, %v2322_v43  ;;  %v2384_v3 = vpop.f32.mrb[69].mxu0 }
 0xa3d   :  { %v2385_v62 = vadd.f32 %v2384_v3, %v2326_v48  ;;  %v2386_v4 = vpop.f32.mrb[70].mxu0 }
 0xa3e   :  { %v2387_v46 = vadd.f32 %v2386_v4, %v2322_v43  ;;  %v2388_v19 = vpop.f32.mrb[71].mxu0  ;;  %v2391_v6 = vmax.f32 %v2383_v2, 0.0 }
 0xa3f   :  { %v2389_v1 = vadd.f32 %v2388_v19, %v2326_v48  ;;  %v2392_v58 = vmax.f32 %v2385_v62, 0.0 }
 0xa40   :  { %v2393_v21 = vmax.f32 %v2387_v46, 0.0 }
 0xa41   :  { %v2394_v38 = vmax.f32 %v2389_v1, 0.0 }
 0xa42   :  { %v2395_v39 = vpack.c.bf16 %v2393_v21, %v2391_v6 }
 0xa43   :  { %v2396_v59 = vpack.c.bf16 %v2394_v38, %v2392_v58 }
 0xa44   :  { %3034 = vmatmul.mubr.bf16.vlgmr.msra.gmra.mrb[72].mxu0 %v2395_v39 }
 0xa45   :  { %3054 = vmatmul.mubr.bf16.vlgmr.msra.gmra.mrb[68].mxu1 %v2396_v59  ;;  %2644 = vmatpush1.bf16.msra.mxu0 %v2638_v56 }
 0xa46   :  { %2675 = vmatprep.mubr.bf16.mxu0 %v4940_v40  ;;  %2960 = vmatprep.subr.msk.bf16.mxu0 %vm2341_vm12, %v3156_v5 }
 0xa4c   :  { %2957 = vmatmul.mubr.msk.bf16.vlgmr.msra.gmra.mrb[76].mxu0 %vm2164_vm6, %v4672_v52 }
 0xa4d   :  { %2701 = vmatpush1.bf16.msra.mxu0 %v2695_v44  ;;  %2732 = vmatprep.mubr.bf16.mxu0 %v4940_v40 }
 0xa58   :  { %2961 = vmatmul.mubr.msk.bf16.vlgmr.msra.gmra.mrb[76].mxu0 %vm2337_vm14, %v4750_v23 }
 0xb17   :  { %v2502_v8 = vpop.f32.mrb[72].mxu0 }
 0xb18   :  { %v2503_v28 = vadd.f32 %v2936_v18, %v2502_v8  ;;  %v3035_v53 = vpop.f32.mrb[73].mxu0  ;;  %v2620_v24 = vpop.f32.mrb[68].mxu1 }
 0xb19   :  { %v2621_v15 = vadd.f32 %v2945_v51, %v2620_v24  ;;  %v2505_v52 = vpop.f32.mrb[74].mxu0  ;;  %v3055_v36 = vpop.f32.mrb[69].mxu1 }
 0xb1a   :  { %v2509_v47 = vmul.f32 1.442695, %v2503_v28  ;;  %v2506_v40 = vadd.f32 %v2936_v18, %v2505_v52  ;;  %v3036_v26 = vpop.f32.mrb[75].mxu0  ;;  %v2623_v57 = vpop.f32.mrb[70].mxu1 }
 0xb1b   :  { %2627 = vst [vmem:[%s4870_s20] sm:$0xff] %v2621_v15  ;;  %v2624_v27 = vadd.f32 %v2945_v51, %v2623_v57  ;;  %v3056_v45 = vpop.f32.mrb[71].mxu1 }
 0xb1c   :  { %3415 = vpow2.f32 %v2509_v47  ;;  %v2511_v13 = vmul.f32 1.442695, %v2506_v40 }
 0xb1d   :  { %2628 = vst [vmem:[%s4870_s20 + $0x8] sm:$0xff] %v2624_v27 }
 0xb1e   :  { %3417 = vpow2.f32 %v2511_v13 }
 0xb26   :  { %v3416_v32 = vpop.eup %3415 }
 0xb27   :  { %2513 = vst.msk [vmem:[%s4872_s19] sm:$0xff] %vm2164_vm6, %v3416_v32 }
 0xb28   :  { %v3418_v12 = vpop.eup %3417 }
 0xb29   :  { %2514 = vst.msk [vmem:[%s4872_s19 + $0x8] sm:$0xff] %vm2164_vm6, %v3418_v12 }
 0xb2b   :  { %v2734_v14 = vpop.f32.mrb[76].mxu0 }
 0xb2c   :  { %v2755_v11 = vadd.f32 %v2748_v25, %v2734_v14  ;;  %v2736_v22 = vpop.f32.mrb[77].mxu0 }
 0xb2d   :  { %v2756_v55 = vadd.f32 %v2752_v9, %v2736_v22  ;;  %v2738_v42 = vpop.f32.mrb[78].mxu0 }
 0xb2e   :  { %3419 = vtanh.f32 %v2755_v11  ;;  %v2757_v16 = vadd.f32 %v2748_v25, %v2738_v42  ;;  %v2740_v63 = vpop.f32.mrb[79].mxu0 }
 0xb2f   :  { %3421 = vtanh.f32 %v2756_v55  ;;  %v2758_v23 = vadd.f32 %v2752_v9, %v2740_v63 }
 0xb30   :  { %3423 = vtanh.f32 %v2757_v16 }
 0xb31   :  { %3425 = vtanh.f32 %v2758_v23 }
 0xb38   :  { %v3420_v29 = vpop.eup %3419 }
 0xb39   :  { %v3422_v30 = vpop.eup %3421  ;;  %2763 = vst [vmem:[%s4873_s21] sm:$0xff] %v3420_v29 }
 0xb3a   :  { %v3424_v60 = vpop.eup %3423  ;;  %2764 = vst [vmem:[%s4873_s21 + $0x8] sm:$0xff] %v3422_v30 }
 0xb3b   :  { %v3426_v49 = vpop.eup %3425  ;;  %2765 = vst [vmem:[%s4873_s21 + $0x10] sm:$0xff] %v3424_v60 }
 0xb3c   :  { %2766 = vst [vmem:[%s4873_s21 + $0x18] sm:$0xff] %v3426_v49 }

// kernel: textvae_forward.4
= control target key start
LH: loop header
LB: loop body
LE: loop exit
PB: predicated region body
PF: predicated region fallthrough
CT: control target
= control target key end

     0   :  { %v5603_v1 = vmov 0   ;;  %vm131_vm0 = vcmask 130048   ;;  %v51_v52 = vlaneseq  ;;  %s5595_s2 = inlined_call_operand.vmem [shape: bf16[16,512], index: 2, kind: input, shape index: {}]   ;;  %s5596_s0 = inlined_call_operand.vmem [shape: bf16[128,16], index: 0, kind: input, shape index: {}]   ;;  %s5597_s3 = inlined_call_operand.vmem [shape: bf16[128,512], index: 3, kind: input, shape index: {}]   ;;  %s5598_s1 = inlined_call_operand.vmem [shape: f32[128,1], index: 1, kind: input, shape index: {}]   ;;  %s5599_s5 = inlined_call_operand.vmem [shape: f32[16,128], index: 5, kind: input, shape index: {}]   ;;  %s5600_s4 = inlined_call_operand.vmem [shape: f32[1,512], index: 4, kind: input, shape index: {}]   ;;  %s5601_s6 = inlined_call_operand.vmem [shape: f32[16,128], index: 6, kind: input, shape index: {}]   ;;  %s5602_s7 = inlined_call_operand.vmem [shape: bf16[128,128], index: 7, kind: output, shape index: {}]  }
   0x1   :  { %v3919_v0 = vld [vmem:[%s5595_s2 + $0x4] ss:$16 sps:$4 sm:$0xff]   ;;  %188 = vmatprep.mubr.bf16.mxu0 %v5603_v1  ;;  %301 = vmatprep.mubr.bf16.mxu1 %v5603_v1  ;;  %v3921_v2 = vld [vmem:[%s5595_s2 + $0xc] ss:$16 sps:$4 sm:$0xff]   ;;  %v3923_v3 = vld [vmem:[%s5595_s2] ss:$16 sps:$4 sm:$0xff]  }
   0x2   :  { %3917 = vset.pattern.permute.xlu0 %v5603_v1  ;;  %3918 = vset.pattern.permute.xlu1 %v5603_v1  ;;  %v3924_v4 = vld [vmem:[%s5595_s2 + $0x8] ss:$16 sps:$4 sm:$0xff]   ;;  %v3925_v5 = vld [vmem:[%s5596_s0] sm:$0xff]   ;;  %v4426_v11 = vld [vmem:[%s5597_s3 + $0xc] ss:$16 sps:$4 sm:$0xff]   ;;  %v52_v53 = vshrl.u32 %v51_v52, 7 }
   0x3   :  { %156 = vmatprep.subr.bf16.mxu0 %v3919_v0  ;;  %269 = vmatprep.subr.bf16.mxu1 %v3921_v2  ;;  %v4396_v6 = vld [vmem:[%s5597_s3] ss:$16 sps:$4 sm:$0xff]   ;;  %v4401_v7 = vld [vmem:[%s5597_s3 + $0x4] ss:$16 sps:$4 sm:$0xff]   ;;  %v4421_v10 = vld [vmem:[%s5597_s3 + $0x8] ss:$16 sps:$4 sm:$0xff]  }
   0x4   :  { %157 = vmatpush1.bf16.msra.mxu0 %v3923_v3  ;;  %270 = vmatpush1.bf16.msra.mxu1 %v3924_v4  ;;  %v4407_v8 = vld [vmem:[%s5597_s3 + $0x20] ss:$16 sps:$4 sm:$0xff]   ;;  %v4414_v9 = vld [vmem:[%s5597_s3 + $0x24] ss:$16 sps:$4 sm:$0xff]   ;;  %v3929_v12 = vld [vmem:[%s5596_s0 + $0x8] sm:$0xff]   ;;  %v61_v56 = vsub.s32 2, %v52_v53 }
   0x5   :  { %650 = vmatprep.subr.bf16.mxu0 %v4401_v7  ;;  %693 = vmatprep.subr.bf16.mxu1 %v4426_v11  ;;  %v4437_v13 = vld [vmem:[%s5597_s3 + $0x44] ss:$16 sps:$4 sm:$0xff]   ;;  %v4442_v14 = vld [vmem:[%s5597_s3 + $0x40] ss:$16 sps:$4 sm:$0xff]   ;;  %v4449_v15 = vld [vmem:[%s5597_s3 + $0x2c] ss:$16 sps:$4 sm:$0xff]  }
   0x6   :  { %v4455_v16 = vld [vmem:[%s5597_s3 + $0x28] ss:$16 sps:$4 sm:$0xff]   ;;  %v4461_v17 = vld [vmem:[%s5597_s3 + $0x64] ss:$16 sps:$4 sm:$0xff]   ;;  %v4468_v18 = vld [vmem:[%s5597_s3 + $0x4c] ss:$16 sps:$4 sm:$0xff]  }
   0x7   :  { %3544 = vmatmul.mubr.msk.bf16.vlgmr.msra.gmra.mrb[0].mxu0 %vm131_vm0, %v3925_v5  ;;  %3552 = vmatmul.mubr.msk.bf16.vlgmr.msra.gmra.mrb[0].mxu1 %vm131_vm0, %v3925_v5  ;;  %v4475_v19 = vld [vmem:[%s5597_s3 + $0x60] ss:$16 sps:$4 sm:$0xff]   ;;  %v4482_v20 = vld [vmem:[%s5597_s3 + $0x48] ss:$16 sps:$4 sm:$0xff]   ;;  %v4489_v21 = vld [vmem:[%s5597_s3 + $0x84] ss:$16 sps:$4 sm:$0xff]  }
   0x8   :  { %651 = vmatpush1.bf16.msra.mxu0 %v4396_v6  ;;  %198 = vmatprep.mubr.bf16.mxu0 %v5603_v1  ;;  %v3936_v22 = vld [vmem:[%s5596_s0 + $0x10] sm:$0xff]   ;;  %v4497_v23 = vld [vmem:[%s5597_s3 + $0x6c] ss:$16 sps:$4 sm:$0xff]   ;;  %v4509_v25 = vld [vmem:[%s5597_s3 + $0x68] ss:$16 sps:$4 sm:$0xff]   ;;  %v65_v57 = vsub.s32 3, %v52_v53 }
   0x9   :  { %311 = vmatprep.mubr.bf16.mxu1 %v5603_v1  ;;  %652 = vmatprep.subr.bf16.mxu0 %v4414_v9  ;;  %v4503_v24 = vld [vmem:[%s5597_s3 + $0x80] ss:$16 sps:$4 sm:$0xff]   ;;  %v4516_v26 = vld [vmem:[%s5597_s3 + $0xa4] ss:$16 sps:$4 sm:$0xff]   ;;  %v4523_v27 = vld [vmem:[%s5597_s3 + $0x8c] ss:$16 sps:$4 sm:$0xff]  }
   0xa   :  { %694 = vmatpush1.bf16.msra.mxu1 %v4421_v10  ;;  %v4531_v28 = vld [vmem:[%s5597_s3 + $0xa0] ss:$16 sps:$4 sm:$0xff]   ;;  %v4537_v29 = vld [vmem:[%s5597_s3 + $0x88] ss:$16 sps:$4 sm:$0xff]   ;;  %v4544_v30 = vld [vmem:[%s5597_s3 + $0xc4] ss:$16 sps:$4 sm:$0xff]  }
   0xb   :  { %695 = vmatprep.subr.bf16.mxu1 %v4449_v15  ;;  %v4549_v31 = vld [vmem:[%s5597_s3 + $0xac] ss:$16 sps:$4 sm:$0xff]   ;;  %v4557_v33 = vld [vmem:[%s5597_s3 + $0xc0] ss:$16 sps:$4 sm:$0xff]   ;;  %v4564_v34 = vld [vmem:[%s5597_s3 + $0xa8] ss:$16 sps:$4 sm:$0xff]  }
   0xc   :  { %653 = vmatpush1.bf16.msra.mxu0 %v4407_v8  ;;  %v3943_v32 = vld [vmem:[%s5596_s0 + $0x18] sm:$0xff]   ;;  %v4571_v35 = vld [vmem:[%s5597_s3 + $0xe4] ss:$16 sps:$4 sm:$0xff]   ;;  %v4585_v37 = vld [vmem:[%s5597_s3 + $0xe0] ss:$16 sps:$4 sm:$0xff]   ;;  %v53_v59 = vsub.s32 0, %v52_v53 }
   0xd   :  { %654 = vmatprep.subr.bf16.mxu0 %v4437_v13  ;;  %v4576_v36 = vld [vmem:[%s5597_s3 + $0xcc] ss:$16 sps:$4 sm:$0xff]   ;;  %v4590_v38 = vld [vmem:[%s5597_s3 + $0xc8] ss:$16 sps:$4 sm:$0xff]   ;;  %v801_v39 = vld [vmem:[%s5598_s1] sm:$0xff]  ;;  %v57_v61 = vsub.s32 1, %v52_v53 }
   0xe   :  { %696 = vmatpush1.bf16.msra.mxu1 %v4455_v16  ;;  %v3950_v40 = vld [vmem:[%s5596_s0 + $0x20] sm:$0xff]   ;;  %v4603_v41 = vld [vmem:[%s5597_s3 + $0xec] ss:$16 sps:$4 sm:$0xff]   ;;  %vm803_vm1 = vcmp.gt.f32.partialorder %v801_v39, 0.5  ;;  %v4614_v44 = vld [vmem:[%s5597_s3 + $0xe8] ss:$16 sps:$4 sm:$0xff]  }
   0xf   :  { %3545 = vmatmul.mubr.msk.bf16.gmra.mrb[4].mxu0 %vm131_vm0, %v3929_v12  ;;  %3553 = vmatmul.mubr.msk.bf16.gmra.mrb[4].mxu1 %vm131_vm0, %v3929_v12  ;;  %v802_v42 = vld [vmem:[%s5598_s1 + $0x8] sm:$0xff]  ;;  %v805_v43 = vsel %vm803_vm1, 1, %v5603_v1  ;;  %v3964_v47 = vld [vmem:[%s5596_s0 + $0x30] sm:$0xff]   ;;  %v3971_v48 = vld [vmem:[%s5596_s0 + $0x38] sm:$0xff]  }
  0x10   :  { %208 = vmatprep.mubr.bf16.mxu0 %v5603_v1  ;;  %321 = vmatprep.mubr.bf16.mxu1 %v5603_v1  ;;  %vm804_vm2 = vcmp.gt.f32.partialorder %v802_v42, 0.5  ;;  %v3957_v46 = vld [vmem:[%s5596_s0 + $0x28] sm:$0xff]   ;;  %v446_v49 = vld [vmem:[%s5599_s5] sm:$0xff]  ;;  %v3639_v54 = vld [vmem:[%s5598_s1 + $0x10] sm:$0xff] }
  0x11   :  { %655 = vmatpush1.bf16.msra.mxu0 %v4442_v14  ;;  %697 = vmatprep.subr.bf16.mxu1 %v4468_v18  ;;  %v806_v45 = vsel %vm804_vm2, 1, %v5603_v1  ;;  %v447_v50 = vld [vmem:[%s5599_s5 + $0x8] sm:$0xff]  ;;  %v3640_v55 = vld [vmem:[%s5598_s1 + $0x18] sm:$0xff]  ;;  %vm1186_vm3 = vcmp.gt.f32.partialorder %v3639_v54, 0.5  ;;  %v49_v60 = vld [vmem:[%s5600_s4] sm:$0xf] }
  0x12   :  { %656 = vmatprep.subr.bf16.mxu0 %v4461_v17  ;;  %698 = vmatpush1.bf16.msra.mxu1 %v4482_v20  ;;  %v448_v51 = vpack.c.bf16 %v447_v50, %v446_v49  ;;  %vm1187_vm4 = vcmp.gt.f32.partialorder %v3640_v55, 0.5  ;;  %v1188_v58 = vsel %vm1186_vm3, 1, %v5603_v1  ;;  %v4697_v63 = vrot.slane %v49_v60, %v61_v56 }
  0x13   :  { %699 = vmatprep.subr.bf16.mxu1 %v4497_v23  ;;  %808 = vperm.xlu0 %3917, %v805_v43   ;;  %v1189_v62 = vsel %vm1187_vm4, 1, %v5603_v1  ;;  %v4699_v0 = vrot.slane %v49_v60, %v65_v57  ;;  %v4701_v2 = vrot.slane %v49_v60, %v53_v59  ;;  %v4703_v4 = vrot.slane %v49_v60, %v57_v61 }
  0x14   :  { %1191 = vperm.xlu1 %3918, %v1188_v58  }
  0x15   :  { %657 = vmatpush1.bf16.msra.mxu0 %v4475_v19 }
  0x16   :  { %658 = vmatprep.subr.bf16.mxu0 %v4489_v21  ;;  %700 = vmatpush1.bf16.msra.mxu1 %v4509_v25 }
  0x17   :  { %3546 = vmatmul.mubr.msk.bf16.gmra.mrb[8].mxu0 %vm131_vm0, %v3936_v22  ;;  %3554 = vmatmul.mubr.msk.bf16.gmra.mrb[8].mxu1 %vm131_vm0, %v3936_v22 }
  0x18   :  { %218 = vmatprep.mubr.bf16.mxu0 %v5603_v1  ;;  %331 = vmatprep.mubr.bf16.mxu1 %v5603_v1 }
  0x19   :  { %659 = vmatpush1.bf16.msra.mxu0 %v4503_v24  ;;  %701 = vmatprep.subr.bf16.mxu1 %v4523_v27 }
  0x1a   :  { %660 = vmatprep.subr.bf16.mxu0 %v4516_v26  ;;  %702 = vmatpush1.bf16.msra.mxu1 %v4537_v29 }
  0x1b   :  { %703 = vmatprep.subr.bf16.mxu1 %v4549_v31  ;;  %811 = vperm.xlu0 %3917, %v806_v45  }
  0x1c   :  { %1194 = vperm.xlu1 %3918, %v1189_v62  }
  0x1d   :  { %661 = vmatpush1.bf16.msra.mxu0 %v4531_v28 }
  0x1e   :  { %662 = vmatprep.subr.bf16.mxu0 %v4544_v30  ;;  %704 = vmatpush1.bf16.msra.mxu1 %v4564_v34 }
  0x1f   :  { %3547 = vmatmul.mubr.msk.bf16.gmra.mrb[12].mxu0 %vm131_vm0, %v3943_v32  ;;  %3555 = vmatmul.mubr.msk.bf16.gmra.mrb[12].mxu1 %vm131_vm0, %v3943_v32 }
  0x20   :  { %228 = vmatprep.mubr.bf16.mxu0 %v5603_v1  ;;  %341 = vmatprep.mubr.bf16.mxu1 %v5603_v1 }
  0x21   :  { %663 = vmatpush1.bf16.msra.mxu0 %v4557_v33  ;;  %705 = vmatprep.subr.bf16.mxu1 %v4576_v36 }
  0x22   :  { %664 = vmatprep.subr.bf16.mxu0 %v4571_v35  ;;  %706 = vmatpush1.bf16.msra.mxu1 %v4590_v38 }
  0x23   :  { %707 = vmatprep.subr.bf16.mxu1 %v4603_v41 }
  0x25   :  { %665 = vmatpush1.bf16.msra.mxu0 %v4585_v37 }
  0x26   :  { %1032 = vmatprep.subr.bf16.mxu0 %v4401_v7  ;;  %708 = vmatpush1.bf16.msra.mxu1 %v4614_v44 }
  0x27   :  { %3548 = vmatmul.mubr.msk.bf16.gmra.mrb[16].mxu0 %vm131_vm0, %v3950_v40  ;;  %3556 = vmatmul.mubr.msk.bf16.gmra.mrb[16].mxu1 %vm131_vm0, %v3950_v40 }
  0x28   :  { %238 = vmatprep.mubr.bf16.mxu0 %v5603_v1  ;;  %351 = vmatprep.mubr.bf16.mxu1 %v5603_v1 }
  0x29   :  { %1075 = vmatprep.subr.bf16.mxu1 %v4426_v11 }
  0x2f   :  { %3549 = vmatmul.mubr.msk.bf16.gmra.mrb[20].mxu0 %vm131_vm0, %v3957_v46  ;;  %3557 = vmatmul.mubr.msk.bf16.gmra.mrb[20].mxu1 %vm131_vm0, %v3957_v46 }
  0x30   :  { %248 = vmatprep.mubr.bf16.mxu0 %v5603_v1  ;;  %361 = vmatprep.mubr.bf16.mxu1 %v5603_v1 }
  0x37   :  { %3550 = vmatmul.mubr.msk.bf16.gmra.mrb[24].mxu0 %vm131_vm0, %v3964_v47  ;;  %3558 = vmatmul.mubr.msk.bf16.gmra.mrb[24].mxu1 %vm131_vm0, %v3964_v47 }
  0x38   :  { %258 = vmatprep.mubr.bf16.mxu0 %v5603_v1  ;;  %371 = vmatprep.mubr.bf16.mxu1 %v5603_v1 }
  0x3f   :  { %3551 = vmatmul.mubr.msk.bf16.gmra.mrb[28].mxu0 %vm131_vm0, %v3971_v48  ;;  %3559 = vmatmul.mubr.msk.bf16.gmra.mrb[28].mxu1 %vm131_vm0, %v3971_v48 }
  0x40   :  { %682 = vmatprep.mubr.bf16.mxu0 %v5603_v1  ;;  %725 = vmatprep.mubr.bf16.mxu1 %v5603_v1 }
  0x47   :  { %683 = vmatmul.mubr.bf16.vlgmr.msra.gmra.mrb[32].mxu0 %v448_v51  ;;  %726 = vmatmul.mubr.bf16.vlgmr.msra.gmra.mrb[32].mxu1 %v448_v51 }
  0x48   :  { %1033 = vmatpush1.bf16.msra.mxu0 %v4396_v6  ;;  %1076 = vmatpush1.bf16.msra.mxu1 %v4421_v10 }
  0x49   :  { %1034 = vmatprep.subr.bf16.mxu0 %v4414_v9  ;;  %1077 = vmatprep.subr.bf16.mxu1 %v4449_v15 }
  0x4a   :  { %1064 = vmatprep.mubr.bf16.mxu0 %v5603_v1  ;;  %1107 = vmatprep.mubr.bf16.mxu1 %v5603_v1 }
  0x4c   :  { %1035 = vmatpush1.bf16.msra.mxu0 %v4407_v8  ;;  %1078 = vmatpush1.bf16.msra.mxu1 %v4455_v16 }
  0x4d   :  { %1036 = vmatprep.subr.bf16.mxu0 %v4437_v13  ;;  %1079 = vmatprep.subr.bf16.mxu1 %v4468_v18 }
  0x50   :  { %1037 = vmatpush1.bf16.msra.mxu0 %v4442_v14  ;;  %1080 = vmatpush1.bf16.msra.mxu1 %v4482_v20 }
  0x51   :  { %1038 = vmatprep.subr.bf16.mxu0 %v4461_v17  ;;  %1081 = vmatprep.subr.bf16.mxu1 %v4497_v23 }
  0x54   :  { %1039 = vmatpush1.bf16.msra.mxu0 %v4475_v19  ;;  %1082 = vmatpush1.bf16.msra.mxu1 %v4509_v25 }
  0x55   :  { %1040 = vmatprep.subr.bf16.mxu0 %v4489_v21  ;;  %1083 = vmatprep.subr.bf16.mxu1 %v4523_v27 }
  0x58   :  { %1041 = vmatpush1.bf16.msra.mxu0 %v4503_v24  ;;  %1084 = vmatpush1.bf16.msra.mxu1 %v4537_v29 }
  0x59   :  { %1042 = vmatprep.subr.bf16.mxu0 %v4516_v26  ;;  %1085 = vmatprep.subr.bf16.mxu1 %v4549_v31 }
  0x5c   :  { %1043 = vmatpush1.bf16.msra.mxu0 %v4531_v28  ;;  %1086 = vmatpush1.bf16.msra.mxu1 %v4564_v34 }
  0x5d   :  { %1044 = vmatprep.subr.bf16.mxu0 %v4544_v30  ;;  %1087 = vmatprep.subr.bf16.mxu1 %v4576_v36 }
  0x60   :  { %1045 = vmatpush1.bf16.msra.mxu0 %v4557_v33  ;;  %1088 = vmatpush1.bf16.msra.mxu1 %v4590_v38 }
  0x61   :  { %1046 = vmatprep.subr.bf16.mxu0 %v4571_v35  ;;  %1089 = vmatprep.subr.bf16.mxu1 %v4603_v41 }
  0x64   :  { %1047 = vmatpush1.bf16.msra.mxu0 %v4585_v37  ;;  %1090 = vmatpush1.bf16.msra.mxu1 %v4614_v44 }
  0xda   :  { %v190_v3 = vpop.f32.mrb[0].mxu0  ;;  %v303_v5 = vpop.f32.mrb[0].mxu1 }
  0xdb   :  { %v192_v6 = vpop.f32.mrb[1].mxu0  ;;  %v304_v7 = vadd.f32 %v303_v5, %v4697_v63  ;;  %v305_v8 = vpop.f32.mrb[1].mxu1  ;;  %v191_v12 = vadd.f32 %v190_v3, %v4701_v2 }
  0xdc   :  { %v194_v9 = vpop.f32.mrb[2].mxu0  ;;  %v306_v10 = vadd.f32 %v305_v8, %v4699_v0  ;;  %v307_v11 = vpop.f32.mrb[2].mxu1  ;;  %v193_v17 = vadd.f32 %v192_v6, %v4703_v4 }
  0xdd   :  { %v195_v13 = vadd.f32 %v194_v9, %v4701_v2  ;;  %v196_v14 = vpop.f32.mrb[3].mxu0  ;;  %v308_v15 = vadd.f32 %v307_v11, %v4697_v63  ;;  %v309_v16 = vpop.f32.mrb[3].mxu1 }
  0xde   :  { %v197_v18 = vadd.f32 %v196_v14, %v4703_v4  ;;  %v310_v19 = vadd.f32 %v309_v16, %v4699_v0 }
  0xdf   :  { %v4713_v20 = vpack.c.bf16 %v195_v13, %v191_v12  ;;  %v4715_v21 = vpack.c.bf16 %v308_v15, %v304_v7 }
  0xe0   :  { %v4717_v22 = vpack.c.bf16 %v197_v18, %v193_v17  ;;  %v4719_v23 = vpack.c.bf16 %v310_v19, %v306_v10 }
  0xe2   :  { %v200_v24 = vpop.f32.mrb[4].mxu0  ;;  %v313_v25 = vpop.f32.mrb[4].mxu1 }
  0xe3   :  { %v201_v26 = vadd.f32 %v200_v24, %v4701_v2  ;;  %v202_v27 = vpop.f32.mrb[5].mxu0  ;;  %v314_v28 = vadd.f32 %v313_v25, %v4697_v63  ;;  %v315_v29 = vpop.f32.mrb[5].mxu1 }
  0xe4   :  { %v203_v30 = vadd.f32 %v202_v27, %v4703_v4  ;;  %v204_v31 = vpop.f32.mrb[6].mxu0  ;;  %v316_v32 = vadd.f32 %v315_v29, %v4699_v0  ;;  %v317_v33 = vpop.f32.mrb[6].mxu1 }
  0xe5   :  { %v205_v34 = vadd.f32 %v204_v31, %v4701_v2  ;;  %v206_v35 = vpop.f32.mrb[7].mxu0  ;;  %v318_v36 = vadd.f32 %v317_v33, %v4697_v63  ;;  %v319_v37 = vpop.f32.mrb[7].mxu1 }
  0xe6   :  { %v207_v38 = vadd.f32 %v206_v35, %v4703_v4  ;;  %v320_v39 = vadd.f32 %v319_v37, %v4699_v0 }
  0xe7   :  { %v4729_v40 = vpack.c.bf16 %v205_v34, %v201_v26  ;;  %v4731_v41 = vpack.c.bf16 %v318_v36, %v314_v28 }
  0xe8   :  { %v4733_v42 = vpack.c.bf16 %v207_v38, %v203_v30  ;;  %v4735_v43 = vpack.c.bf16 %v320_v39, %v316_v32 }
  0xea   :  { %v210_v44 = vpop.f32.mrb[8].mxu0  ;;  %v323_v45 = vpop.f32.mrb[8].mxu1 }
  0xeb   :  { %v211_v46 = vadd.f32 %v210_v44, %v4701_v2  ;;  %v212_v47 = vpop.f32.mrb[9].mxu0  ;;  %v324_v48 = vadd.f32 %v323_v45, %v4697_v63  ;;  %v325_v49 = vpop.f32.mrb[9].mxu1 }
  0xec   :  { %v213_v50 = vadd.f32 %v212_v47, %v4703_v4  ;;  %v214_v51 = vpop.f32.mrb[10].mxu0  ;;  %v326_v52 = vadd.f32 %v325_v49, %v4699_v0  ;;  %v327_v53 = vpop.f32.mrb[10].mxu1 }
  0xed   :  { %v215_v54 = vadd.f32 %v214_v51, %v4701_v2  ;;  %v216_v55 = vpop.f32.mrb[11].mxu0  ;;  %v328_v56 = vadd.f32 %v327_v53, %v4697_v63  ;;  %v329_v57 = vpop.f32.mrb[11].mxu1 }
  0xee   :  { %v217_v58 = vadd.f32 %v216_v55, %v4703_v4  ;;  %v330_v59 = vadd.f32 %v329_v57, %v4699_v0 }
  0xef   :  { %v4745_v60 = vpack.c.bf16 %v215_v54, %v211_v46  ;;  %v4747_v61 = vpack.c.bf16 %v328_v56, %v324_v48 }
  0xf0   :  { %v4749_v62 = vpack.c.bf16 %v217_v58, %v213_v50  ;;  %v4751_v3 = vpack.c.bf16 %v330_v59, %v326_v52 }
  0xf2   :  { %5626 = vst [vmem:[#allocation3_spill] sm:$0xff] %v4751_v3  ;;  %v220_v5 = vpop.f32.mrb[12].mxu0  ;;  %v333_v6 = vpop.f32.mrb[12].mxu1 }
  0xf3   :  { %v221_v7 = vadd.f32 %v220_v5, %v4701_v2  ;;  %v222_v8 = vpop.f32.mrb[13].mxu0  ;;  %v334_v9 = vadd.f32 %v333_v6, %v4697_v63  ;;  %v335_v10 = vpop.f32.mrb[13].mxu1 }
  0xf4   :  { %v223_v11 = vadd.f32 %v222_v8, %v4703_v4  ;;  %v224_v12 = vpop.f32.mrb[14].mxu0  ;;  %v336_v13 = vadd.f32 %v335_v10, %v4699_v0  ;;  %v337_v14 = vpop.f32.mrb[14].mxu1 }
  0xf5   :  { %v225_v15 = vadd.f32 %v224_v12, %v4701_v2  ;;  %v226_v16 = vpop.f32.mrb[15].mxu0  ;;  %v338_v17 = vadd.f32 %v337_v14, %v4697_v63  ;;  %v339_v18 = vpop.f32.mrb[15].mxu1 }
  0xf6   :  { %v227_v19 = vadd.f32 %v226_v16, %v4703_v4  ;;  %v340_v24 = vadd.f32 %v339_v18, %v4699_v0 }
  0xf7   :  { %v4761_v25 = vpack.c.bf16 %v225_v15, %v221_v7  ;;  %v4763_v26 = vpack.c.bf16 %v338_v17, %v334_v9 }
  0xf8   :  { %v4765_v27 = vpack.c.bf16 %v227_v19, %v223_v11  ;;  %v4767_v28 = vpack.c.bf16 %v340_v24, %v336_v13 }
  0xf9   :  { %5627 = vst [vmem:[#allocation4_spill] sm:$0xff] %v4761_v25  ;;  %5628 = vst [vmem:[#allocation5_spill] sm:$0xff] %v4763_v26 }
  0xfa   :  { %5629 = vst [vmem:[#allocation6_spill] sm:$0xff] %v4765_v27  ;;  %5630 = vst [vmem:[#allocation7_spill] sm:$0xff] %v4767_v28  ;;  %v230_v29 = vpop.f32.mrb[16].mxu0  ;;  %v343_v30 = vpop.f32.mrb[16].mxu1  ;;  %v1125_v28 = vunpack.c.h.bf16 %v4735_v43 }
  0xfb   :  { %v231_v31 = vadd.f32 %v230_v29, %v4701_v2  ;;  %v232_v32 = vpop.f32.mrb[17].mxu0  ;;  %v344_v33 = vadd.f32 %v343_v30, %v4697_v63  ;;  %v345_v34 = vpop.f32.mrb[17].mxu1 }
  0xfc   :  { %v233_v35 = vadd.f32 %v232_v32, %v4703_v4  ;;  %v234_v36 = vpop.f32.mrb[18].mxu0  ;;  %v346_v37 = vadd.f32 %v345_v34, %v4699_v0  ;;  %v347_v38 = vpop.f32.mrb[18].mxu1 }
  0xfd   :  { %v235_v39 = vadd.f32 %v234_v36, %v4701_v2  ;;  %v236_v44 = vpop.f32.mrb[19].mxu0  ;;  %v348_v45 = vadd.f32 %v347_v38, %v4697_v63  ;;  %v349_v46 = vpop.f32.mrb[19].mxu1 }
  0xfe   :  { %v237_v47 = vadd.f32 %v236_v44, %v4703_v4  ;;  %v350_v48 = vadd.f32 %v349_v46, %v4699_v0 }
  0xff   :  { %v4777_v49 = vpack.c.bf16 %v235_v39, %v231_v31  ;;  %v4779_v50 = vpack.c.bf16 %v348_v45, %v344_v33 }
 0x100   :  { %v4781_v51 = vpack.c.bf16 %v237_v47, %v233_v35  ;;  %v4783_v52 = vpack.c.bf16 %v350_v48, %v346_v37 }
 0x101   :  { %5631 = vst [vmem:[#allocation8_spill] sm:$0xff] %v4777_v49  ;;  %5632 = vst [vmem:[#allocation9_spill] sm:$0xff] %v4779_v50  ;;  %v1123_v49 = vunpack.c.h.bf16 %v4733_v42 }
 0x102   :  { %5633 = vst [vmem:[#allocation10_spill] sm:$0xff] %v4781_v51  ;;  %5634 = vst [vmem:[#allocation11_spill] sm:$0xff] %v4783_v52  ;;  %v240_v53 = vpop.f32.mrb[20].mxu0  ;;  %v353_v54 = vpop.f32.mrb[20].mxu1  ;;  %v1124_v52 = vunpack.c.h.bf16 %v4731_v41 }
 0x103   :  { %v241_v55 = vadd.f32 %v240_v53, %v4701_v2  ;;  %v242_v56 = vpop.f32.mrb[21].mxu0  ;;  %v354_v57 = vadd.f32 %v353_v54, %v4697_v63  ;;  %v355_v58 = vpop.f32.mrb[21].mxu1 }
 0x104   :  { %v243_v59 = vadd.f32 %v242_v56, %v4703_v4  ;;  %v244_v5 = vpop.f32.mrb[22].mxu0  ;;  %v356_v6 = vadd.f32 %v355_v58, %v4699_v0  ;;  %v357_v7 = vpop.f32.mrb[22].mxu1 }
 0x105   :  { %v245_v8 = vadd.f32 %v244_v5, %v4701_v2  ;;  %v246_v9 = vpop.f32.mrb[23].mxu0  ;;  %v358_v10 = vadd.f32 %v357_v7, %v4697_v63  ;;  %v359_v11 = vpop.f32.mrb[23].mxu1 }
 0x106   :  { %v247_v12 = vadd.f32 %v246_v9, %v4703_v4  ;;  %v360_v13 = vadd.f32 %v359_v11, %v4699_v0 }
 0x107   :  { %v4793_v14 = vpack.c.bf16 %v245_v8, %v241_v55  ;;  %v4795_v15 = vpack.c.bf16 %v358_v10, %v354_v57 }
 0x108   :  { %v4797_v16 = vpack.c.bf16 %v247_v12, %v243_v59  ;;  %v4799_v17 = vpack.c.bf16 %v360_v13, %v356_v6 }
 0x109   :  { %5635 = vst [vmem:[#allocation12_spill] sm:$0xff] %v4793_v14  ;;  %5636 = vst [vmem:[#allocation13_spill] sm:$0xff] %v4795_v15  ;;  %v1122_v14 = vunpack.c.h.bf16 %v4729_v40 }
 0x10a   :  { %5637 = vst [vmem:[#allocation14_spill] sm:$0xff] %v4797_v16  ;;  %5638 = vst [vmem:[#allocation15_spill] sm:$0xff] %v4799_v17  ;;  %v250_v18 = vpop.f32.mrb[24].mxu0  ;;  %v363_v19 = vpop.f32.mrb[24].mxu1  ;;  %v1121_v17 = vunpack.c.l.bf16 %v4735_v43 }
 0x10b   :  { %v251_v24 = vadd.f32 %v250_v18, %v4701_v2  ;;  %v252_v29 = vpop.f32.mrb[25].mxu0  ;;  %v364_v30 = vadd.f32 %v363_v19, %v4697_v63  ;;  %v365_v31 = vpop.f32.mrb[25].mxu1 }
 0x10c   :  { %v253_v32 = vadd.f32 %v252_v29, %v4703_v4  ;;  %v254_v33 = vpop.f32.mrb[26].mxu0  ;;  %v366_v34 = vadd.f32 %v365_v31, %v4699_v0  ;;  %v367_v35 = vpop.f32.mrb[26].mxu1  ;;  %v736_v31 = vunpack.c.l.bf16 %v4713_v20 }
 0x10d   :  { %v255_v36 = vadd.f32 %v254_v33, %v4701_v2  ;;  %v256_v37 = vpop.f32.mrb[27].mxu0  ;;  %v368_v38 = vadd.f32 %v367_v35, %v4697_v63  ;;  %v369_v39 = vpop.f32.mrb[27].mxu1 }
 0x10e   :  { %v257_v44 = vadd.f32 %v256_v37, %v4703_v4  ;;  %v370_v45 = vadd.f32 %v369_v39, %v4699_v0  ;;  %v740_v37 = vunpack.c.h.bf16 %v4713_v20 }
 0x10f   :  { %v4809_v46 = vpack.c.bf16 %v255_v36, %v251_v24  ;;  %v4811_v47 = vpack.c.bf16 %v368_v38, %v364_v30  ;;  %v742_v38 = vunpack.c.h.bf16 %v4715_v21 }
 0x110   :  { %v4813_v48 = vpack.c.bf16 %v257_v44, %v253_v32  ;;  %v4815_v53 = vpack.c.bf16 %v370_v45, %v366_v34 }
 0x111   :  { %5639 = vst [vmem:[#allocation16_spill] sm:$0xff] %v4809_v46  ;;  %5640 = vst [vmem:[#allocation17_spill] sm:$0xff] %v4811_v47  ;;  %v1119_v46 = vunpack.c.l.bf16 %v4733_v42 }
 0x112   :  { %5641 = vst [vmem:[#allocation18_spill] sm:$0xff] %v4813_v48  ;;  %5642 = vst [vmem:[#allocation19_spill] sm:$0xff] %v4815_v53  ;;  %v260_v54 = vpop.f32.mrb[28].mxu0  ;;  %v373_v55 = vpop.f32.mrb[28].mxu1  ;;  %v1120_v53 = vunpack.c.l.bf16 %v4731_v41 }
 0x113   :  { %v261_v56 = vadd.f32 %v260_v54, %v4701_v2  ;;  %v262_v57 = vpop.f32.mrb[29].mxu0  ;;  %v374_v58 = vadd.f32 %v373_v55, %v4697_v63  ;;  %v375_v59 = vpop.f32.mrb[29].mxu1  ;;  %v741_v55 = vunpack.c.h.bf16 %v4717_v22 }
 0x114   :  { %v263_v5 = vadd.f32 %v262_v57, %v4703_v4  ;;  %v264_v6 = vpop.f32.mrb[30].mxu0  ;;  %v376_v7 = vadd.f32 %v375_v59, %v4699_v0  ;;  %v377_v8 = vpop.f32.mrb[30].mxu1 }
 0x115   :  { %v265_v9 = vadd.f32 %v264_v6, %v4701_v2  ;;  %v266_v10 = vpop.f32.mrb[31].mxu0  ;;  %v378_v11 = vadd.f32 %v377_v8, %v4697_v63  ;;  %v379_v12 = vpop.f32.mrb[31].mxu1  ;;  %v738_v2 = vunpack.c.l.bf16 %v4715_v21  ;;  %v737_v63 = vunpack.c.l.bf16 %v4717_v22 }
 0x116   :  { %v267_v13 = vadd.f32 %v266_v10, %v4703_v4  ;;  %v380_v18 = vadd.f32 %v379_v12, %v4699_v0  ;;  %v739_v4 = vunpack.c.l.bf16 %v4719_v23 }
 0x117   :  { %v4825_v19 = vpack.c.bf16 %v265_v9, %v261_v56  ;;  %v4827_v24 = vpack.c.bf16 %v378_v11, %v374_v58  ;;  %v743_v56 = vunpack.c.h.bf16 %v4719_v23 }
 0x118   :  { %v4829_v29 = vpack.c.bf16 %v267_v13, %v263_v5  ;;  %v4831_v30 = vpack.c.bf16 %v380_v18, %v376_v7 }
 0x119   :  { %5643 = vst [vmem:[#allocation20_spill] sm:$0xff] %v4825_v19  ;;  %5644 = vst [vmem:[#allocation21_spill] sm:$0xff] %v4827_v24  ;;  %v1118_v19 = vunpack.c.l.bf16 %v4729_v40 }
 0x11a   :  { %5645 = vst [vmem:[#allocation22_spill] sm:$0xff] %v4829_v29  ;;  %5646 = vst [vmem:[#allocation23_spill] sm:$0xff] %v4831_v30  ;;  %v684_v32 = vpop.f32.mrb[32].mxu0  ;;  %v727_v33 = vpop.f32.mrb[32].mxu1  ;;  %v5647_v30 = vmov 0  }
 0x11b   :  { %v744_v34 = vadd.f32 %v736_v31, %v684_v32  ;;  %v746_v0 = vadd.f32 %v738_v2, %v727_v33  ;;  %v686_v35 = vpop.f32.mrb[33].mxu0  ;;  %v729_v36 = vpop.f32.mrb[33].mxu1 }
 0x11c   :  { %v745_v39 = vadd.f32 %v737_v63, %v686_v35  ;;  %v747_v44 = vadd.f32 %v739_v4, %v729_v36  ;;  %v688_v45 = vpop.f32.mrb[34].mxu0  ;;  %v731_v54 = vpop.f32.mrb[34].mxu1 }
 0x11d   :  { %v3592_v57 = vmul.f32 -1.442695, %v744_v34  ;;  %v748_v58 = vadd.f32 %v740_v37, %v688_v45  ;;  %v750_v59 = vadd.f32 %v742_v38, %v731_v54  ;;  %v690_v5 = vpop.f32.mrb[35].mxu0  ;;  %v733_v6 = vpop.f32.mrb[35].mxu1  ;;  %v449_v34 = vld [vmem:[%s5601_s6] sm:$0xff]  ;;  %v450_v54 = vld [vmem:[%s5601_s6 + $0x8] sm:$0xff] }
 0x11e   :  { %v3594_v7 = vmul.f32 -1.442695, %v745_v39  ;;  %v749_v8 = vadd.f32 %v741_v55, %v690_v5  ;;  %v751_v9 = vadd.f32 %v743_v56, %v733_v6  ;;  %v3596_v10 = vmul.f32 -1.442695, %v747_v44  ;;  %v809_v35 = vpop.permute.xlu0 %808 }
 0x11f   :  { %4077 = vpow2.f32 %v3592_v57  ;;  %v3593_v20 = vmul.f32 -1.442695, %v748_v58  ;;  %vm813_vm5 = vcmp.eq.s32.totalorder %v809_v35, 1  ;;  %v4905_v35 = vld [vmem:[%s5597_s3 + $0x28] ss:$16 sps:$4 sm:$0xff]  }
 0x120   :  { %4079 = vpow2.f32 %v3594_v7  ;;  %v3595_v21 = vmul.f32 -1.442695, %v749_v8  ;;  %v3597_v23 = vmul.f32 -1.442695, %v751_v9  ;;  %vm815_vm7 = vmpackc.low %vm813_vm5, %vm813_vm5 }
 0x121   :  { %4081 = vpow2.f32 %v3593_v20  ;;  %v817_v7 = vsel %vm815_vm7, 65537, %v5603_v1 }
 0x122   :  { %4083 = vpow2.f32 %v3595_v21  ;;  %v812_v5 = vpop.permute.xlu0 %811 }
 0x123   :  { %4085 = vtanh.f32 %v746_v0  ;;  %vm814_vm6 = vcmp.eq.s32.totalorder %v812_v5, 1  ;;  %v4977_v5 = vld [vmem:[%s5597_s3 + $0x88] ss:$16 sps:$4 sm:$0xff]  }
 0x124   :  { %4087 = vpow2.f32 %v3596_v10  ;;  %vm816_vm8 = vmpackc.low %vm814_vm6, %vm814_vm6 }
 0x125   :  { %4089 = vtanh.f32 %v750_v59  ;;  %v818_v8 = vsel %vm816_vm8, 65537, %v5603_v1 }
 0x126   :  { %v3598_v21 = vcombine.low %v817_v7, %v818_v8  ;;  %v4984_v7 = vld [vmem:[%s5597_s3 + $0xa4] ss:$16 sps:$4 sm:$0xff]   ;;  %v4989_v8 = vld [vmem:[%s5597_s3 + $0xac] ss:$16 sps:$4 sm:$0xff]  }
 0x128   :  { %vm822_vm9 = vcmp.ne.s16.totalorder %v3598_v21, 0  ;;  %v5008_v21 = vld [vmem:[%s5597_s3 + $0xc4] ss:$16 sps:$4 sm:$0xff]  }
 0x129   :  { %v4078_v11 = vpop.eup %4077 }
 0x12a   :  { %v4080_v22 = vpop.eup %4079  ;;  %v758_v12 = vadd.f32 1.0, %v4078_v11 }
 0x12b   :  { %v770_v13 = vadd.f32 1.0, %v4080_v22  ;;  %v4082_v18 = vpop.eup %4081 }
 0x12c   :  { %4091 = vrcp.f32 %v758_v12  ;;  %v759_v31 = vadd.f32 1.0, %v4082_v18  ;;  %v4084_v2 = vpop.eup %4083 }
 0x12d   :  { %4093 = vrcp.f32 %v770_v13  ;;  %v771_v32 = vadd.f32 1.0, %v4084_v2  ;;  %v4086_v33 = vpop.eup %4085  ;;  %v4866_v2 = vld [vmem:[%s5597_s3 + $0x4] ss:$16 sps:$4 sm:$0xff]  }
 0x12e   :  { %4095 = vpow2.f32 %v3597_v23  ;;  %v4088_v63 = vpop.eup %4087  ;;  %1416 = vmatprep.subr.bf16.mxu0 %v4866_v2 }
 0x12f   :  { %4097 = vrcp.f32 %v759_v31  ;;  %v4090_v4 = vpop.eup %4089  ;;  %v784_v45 = vadd.f32 1.0, %v4088_v63  ;;  %v4881_v63 = vld [vmem:[%s5597_s3 + $0x8] ss:$16 sps:$4 sm:$0xff]  }
 0x130   :  { %4099 = vrcp.f32 %v771_v32  ;;  %v4871_v32 = vld [vmem:[%s5597_s3 + $0xc] ss:$16 sps:$4 sm:$0xff]  }
 0x131   :  { %4101 = vrcp.f32 %v784_v45  ;;  %1459 = vmatprep.subr.bf16.mxu1 %v4871_v32  ;;  %v4943_v45 = vld [vmem:[%s5597_s3 + $0x6c] ss:$16 sps:$4 sm:$0xff]  }
 0x136   :  { %v4092_v0 = vpop.eup %4091 }
 0x137   :  { %v4094_v36 = vpop.eup %4093  ;;  %v792_v37 = vmul.f32 %v4092_v0, %v4086_v33  ;;  %v4876_v33 = vld [vmem:[%s5597_s3] ss:$16 sps:$4 sm:$0xff]  }
 0x138   :  { %v4096_v38 = vpop.eup %4095  ;;  %v790_v39 = vmul.f32 %v4094_v36, %v449_v34  ;;  %v4895_v34 = vld [vmem:[%s5597_s3 + $0x2c] ss:$16 sps:$4 sm:$0xff]   ;;  %v4900_v0 = vld [vmem:[%s5597_s3 + $0x20] ss:$16 sps:$4 sm:$0xff]   ;;  %v4914_v36 = vld [vmem:[%s5597_s3 + $0x44] ss:$16 sps:$4 sm:$0xff]  }
 0x139   :  { %v4098_v44 = vpop.eup %4097  ;;  %v785_v58 = vadd.f32 1.0, %v4096_v38  ;;  %v4924_v38 = vld [vmem:[%s5597_s3 + $0x40] ss:$16 sps:$4 sm:$0xff]  }
 0x13a   :  { %v4847_v55 = vadd.f32 %v792_v37, %v790_v39  ;;  %v793_v56 = vmul.f32 %v4098_v44, %v4090_v4  ;;  %v4100_v57 = vpop.eup %4099  ;;  %v4890_v4 = vld [vmem:[%s5597_s3 + $0x24] ss:$16 sps:$4 sm:$0xff]   ;;  %v4919_v37 = vld [vmem:[%s5597_s3 + $0x4c] ss:$16 sps:$4 sm:$0xff]   ;;  %v4929_v39 = vld [vmem:[%s5597_s3 + $0x48] ss:$16 sps:$4 sm:$0xff]  }
 0x13b   :  { %v791_v59 = vmul.f32 %v4100_v57, %v450_v54  ;;  %v4102_v9 = vpop.eup %4101  ;;  %v4938_v44 = vld [vmem:[%s5597_s3 + $0x64] ss:$16 sps:$4 sm:$0xff]   ;;  %v4948_v54 = vld [vmem:[%s5597_s3 + $0x60] ss:$16 sps:$4 sm:$0xff]  }
 0x13c   :  { %4103 = vtanh.f32 %v4847_v55  ;;  %v4962_v57 = vld [vmem:[%s5597_s3 + $0x84] ss:$16 sps:$4 sm:$0xff]  }
 0x13d   :  { %v4850_v6 = vadd.f32 %v793_v56, %v791_v59  ;;  %4105 = vrcp.f32 %v785_v58  ;;  %v4953_v56 = vld [vmem:[%s5597_s3 + $0x68] ss:$16 sps:$4 sm:$0xff]   ;;  %v4967_v58 = vld [vmem:[%s5597_s3 + $0x8c] ss:$16 sps:$4 sm:$0xff]   ;;  %v4972_v59 = vld [vmem:[%s5597_s3 + $0x80] ss:$16 sps:$4 sm:$0xff]  }
 0x13f   :  { %4107 = vtanh.f32 %v4850_v6 }
 0x146   :  { %v4104_v20 = vpop.eup %4103 }
 0x147   :  { %v4106_v10 = vpop.eup %4105  ;;  %v798_v22 = vmul.f32 %v4104_v20, %v4102_v9  ;;  %v4996_v9 = vld [vmem:[%s5597_s3 + $0xa0] ss:$16 sps:$4 sm:$0xff]   ;;  %v5001_v20 = vld [vmem:[%s5597_s3 + $0xa8] ss:$16 sps:$4 sm:$0xff]  }
 0x149   :  { %v4108_v11 = vpop.eup %4107 }
 0x14a   :  { %v799_v12 = vmul.f32 %v4108_v11, %v4106_v10  ;;  %v5013_v10 = vld [vmem:[%s5597_s3 + $0xcc] ss:$16 sps:$4 sm:$0xff]   ;;  %v5020_v11 = vld [vmem:[%s5597_s3 + $0xc0] ss:$16 sps:$4 sm:$0xff]  }
 0x14c   :  { %v800_v23 = vpack.c.bf16 %v799_v12, %v798_v22  ;;  %v5025_v22 = vld [vmem:[%s5597_s3 + $0xc8] ss:$16 sps:$4 sm:$0xff]   ;;  %v5034_v12 = vld [vmem:[%s5597_s3 + $0xe4] ss:$16 sps:$4 sm:$0xff]  }
 0x14e   :  { %v823_v13 = vsel %vm822_vm9, %v800_v23, 0  ;;  %1065 = vmatmul.mubr.bf16.vlgmr.msra.gmra.mrb[36].mxu0 %v800_v23  ;;  %1108 = vmatmul.mubr.bf16.vlgmr.msra.gmra.mrb[36].mxu1 %v800_v23  ;;  %v5039_v23 = vld [vmem:[%s5597_s3 + $0xec] ss:$16 sps:$4 sm:$0xff]  }
 0x14f   :  { %v3599_v18 = vcombine.low %v823_v13, %v823_v13  ;;  %v3600_v31 = vcombine.high %v823_v13, %v823_v13  ;;  %1448 = vmatprep.mubr.bf16.mxu0 %v5603_v1  ;;  %1491 = vmatprep.mubr.bf16.mxu1 %v5603_v1  ;;  %v5044_v13 = vld [vmem:[%s5597_s3 + $0xe0] ss:$16 sps:$4 sm:$0xff]  }
 0x150   :  { %1417 = vmatpush1.bf16.msra.mxu0 %v4876_v33  ;;  %1460 = vmatpush1.bf16.msra.mxu1 %v4881_v63  ;;  %v3684_v1 = vld [vmem:[%s5598_s1 + $0x20] sm:$0xff] }
 0x151   :  { %831 = vst [vmem:[%s5602_s7] sm:$0xf] %v3599_v18  ;;  %832 = vst [vmem:[%s5602_s7 + $0x4] sm:$0xf] %v3600_v31  ;;  %1418 = vmatprep.subr.bf16.mxu0 %v4890_v4  ;;  %1461 = vmatprep.subr.bf16.mxu1 %v4895_v34  ;;  %v5049_v18 = vld [vmem:[%s5597_s3 + $0xe8] ss:$16 sps:$4 sm:$0xff]   ;;  %vm1570_vm11 = vcmp.gt.f32.partialorder %v3684_v1, 0.5 }
 0x152   :  { %v3685_v31 = vld [vmem:[%s5598_s1 + $0x28] sm:$0xff]  ;;  %v1572_v24 = vsel %vm1570_vm11, 1, %v5647_v30 }
 0x153   :  { %vm1571_vm10 = vcmp.gt.f32.partialorder %v3685_v31, 0.5  ;;  %1575 = vperm.xlu0 %3917, %v1572_v24  }
 0x154   :  { %1419 = vmatpush1.bf16.msra.mxu0 %v4900_v0  ;;  %1462 = vmatpush1.bf16.msra.mxu1 %v4905_v35  ;;  %v1573_v29 = vsel %vm1571_vm10, 1, %v5647_v30 }
 0x155   :  { %1420 = vmatprep.subr.bf16.mxu0 %v4914_v36  ;;  %1463 = vmatprep.subr.bf16.mxu1 %v4919_v37 }
 0x156   :  { %1578 = vperm.xlu1 %3918, %v1573_v29  }
 0x158   :  { %1421 = vmatpush1.bf16.msra.mxu0 %v4924_v38  ;;  %1464 = vmatpush1.bf16.msra.mxu1 %v4929_v39 }
 0x159   :  { %1422 = vmatprep.subr.bf16.mxu0 %v4938_v44  ;;  %1465 = vmatprep.subr.bf16.mxu1 %v4943_v45 }
 0x15c   :  { %1423 = vmatpush1.bf16.msra.mxu0 %v4948_v54  ;;  %1466 = vmatpush1.bf16.msra.mxu1 %v4953_v56 }
 0x15d   :  { %1424 = vmatprep.subr.bf16.mxu0 %v4962_v57  ;;  %1467 = vmatprep.subr.bf16.mxu1 %v4967_v58 }
 0x160   :  { %1425 = vmatpush1.bf16.msra.mxu0 %v4972_v59  ;;  %1468 = vmatpush1.bf16.msra.mxu1 %v4977_v5 }
 0x161   :  { %1426 = vmatprep.subr.bf16.mxu0 %v4984_v7  ;;  %1469 = vmatprep.subr.bf16.mxu1 %v4989_v8 }
 0x164   :  { %1427 = vmatpush1.bf16.msra.mxu0 %v4996_v9  ;;  %1470 = vmatpush1.bf16.msra.mxu1 %v5001_v20 }
 0x165   :  { %1428 = vmatprep.subr.bf16.mxu0 %v5008_v21  ;;  %1471 = vmatprep.subr.bf16.mxu1 %v5013_v10 }
 0x168   :  { %1429 = vmatpush1.bf16.msra.mxu0 %v5020_v11  ;;  %1472 = vmatpush1.bf16.msra.mxu1 %v5025_v22 }
 0x169   :  { %1430 = vmatprep.subr.bf16.mxu0 %v5034_v12  ;;  %1473 = vmatprep.subr.bf16.mxu1 %v5039_v23 }
 0x16c   :  { %1431 = vmatpush1.bf16.msra.mxu0 %v5044_v13  ;;  %1474 = vmatpush1.bf16.msra.mxu1 %v5049_v18 }
 0x16d   :  { %1800 = vmatprep.subr.bf16.mxu0 %v4866_v2  ;;  %1843 = vmatprep.subr.bf16.mxu1 %v4871_v32 }
 0x221   :  { %v1066_v48 = vpop.f32.mrb[36].mxu0  ;;  %v1109_v47 = vpop.f32.mrb[36].mxu1 }
 0x222   :  { %v1126_v16 = vadd.f32 %v1118_v19, %v1066_v48  ;;  %v1128_v15 = vadd.f32 %v1120_v53, %v1109_v47  ;;  %v1068_v31 = vpop.f32.mrb[37].mxu0  ;;  %v1111_v1 = vpop.f32.mrb[37].mxu1 }
 0x223   :  { %v1127_v29 = vadd.f32 %v1119_v46, %v1068_v31  ;;  %v1129_v24 = vadd.f32 %v1121_v17, %v1111_v1  ;;  %v1070_v51 = vpop.f32.mrb[38].mxu0  ;;  %v1113_v50 = vpop.f32.mrb[38].mxu1 }
 0x224   :  { %v3633_v27 = vmul.f32 -1.442695, %v1126_v16  ;;  %v1130_v26 = vadd.f32 %v1122_v14, %v1070_v51  ;;  %v1132_v25 = vadd.f32 %v1124_v52, %v1113_v50  ;;  %v1072_v3 = vpop.f32.mrb[39].mxu0  ;;  %v1115_v48 = vpop.f32.mrb[39].mxu1 }
 0x225   :  { %v3635_v47 = vmul.f32 -1.442695, %v1127_v29  ;;  %v1131_v53 = vadd.f32 %v1123_v49, %v1072_v3  ;;  %v1133_v19 = vadd.f32 %v1125_v28, %v1115_v48  ;;  %v3637_v17 = vmul.f32 -1.442695, %v1129_v24 }
 0x226   :  { %4109 = vpow2.f32 %v3633_v27  ;;  %v3634_v40 = vmul.f32 -1.442695, %v1130_v26 }
 0x227   :  { %4111 = vpow2.f32 %v3635_v47  ;;  %v3636_v41 = vmul.f32 -1.442695, %v1131_v53  ;;  %v3638_v43 = vmul.f32 -1.442695, %v1133_v19 }
 0x228   :  { %4113 = vpow2.f32 %v3634_v40 }
 0x229   :  { %4115 = vpow2.f32 %v3636_v41 }
 0x22a   :  { %4117 = vtanh.f32 %v1128_v15  ;;  %v1192_v15 = vpop.permute.xlu1 %1191 }
 0x22b   :  { %4119 = vpow2.f32 %v3637_v17  ;;  %vm1196_vm12 = vcmp.eq.s32.totalorder %v1192_v15, 1  ;;  %v3729_v15 = vld [vmem:[%s5598_s1 + $0x30] sm:$0xff] }
 0x22c   :  { %4121 = vtanh.f32 %v1132_v25  ;;  %vm1198_vm14 = vmpackc.low %vm1196_vm12, %vm1196_vm12  ;;  %vm1954_vm2 = vcmp.gt.f32.partialorder %v3729_v15, 0.5 }
 0x22e   :  { %v1195_v17 = vpop.permute.xlu1 %1194 }
 0x22f   :  { %vm1197_vm13 = vcmp.eq.s32.totalorder %v1195_v17, 1 }
 0x230   :  { %v4110_v46 = vpop.eup %4109  ;;  %vm1199_vm15 = vmpackc.low %vm1197_vm13, %vm1197_vm13 }
 0x231   :  { %v4112_v42 = vpop.eup %4111  ;;  %v1140_v31 = vadd.f32 1.0, %v4110_v46 }
 0x232   :  { %v1152_v51 = vadd.f32 1.0, %v4112_v42  ;;  %v4114_v50 = vpop.eup %4113  ;;  %v1201_v42 = vsel %vm1199_vm15, 65537, %v5647_v30 }
 0x233   :  { %4123 = vrcp.f32 %v1140_v31  ;;  %v1141_v3 = vadd.f32 1.0, %v4114_v50  ;;  %v4116_v28 = vpop.eup %4115 }
 0x234   :  { %4125 = vrcp.f32 %v1152_v51  ;;  %v1153_v26 = vadd.f32 1.0, %v4116_v28  ;;  %v4118_v27 = vpop.eup %4117 }
 0x235   :  { %4127 = vpow2.f32 %v3638_v43  ;;  %v4120_v49 = vpop.eup %4119 }
 0x236   :  { %4129 = vrcp.f32 %v1141_v3  ;;  %v4122_v52 = vpop.eup %4121  ;;  %v1166_v48 = vadd.f32 1.0, %v4120_v49 }
 0x237   :  { %4131 = vrcp.f32 %v1153_v26 }
 0x238   :  { %4133 = vrcp.f32 %v1166_v48  ;;  %v5648_v48 = vld [vmem:[#allocation3_spill] sm:$0xff] }
 0x23d   :  { %v4124_v14 = vpop.eup %4123 }
 0x23e   :  { %v4126_v16 = vpop.eup %4125  ;;  %v1174_v1 = vmul.f32 %v4124_v14, %v4118_v27  ;;  %v3730_v14 = vld [vmem:[%s5598_s1 + $0x38] sm:$0xff] }
 0x23f   :  { %v4128_v29 = vpop.eup %4127  ;;  %v1172_v24 = vmul.f32 %v4126_v16, %v4847_v55  ;;  %v1200_v55 = vsel %vm1198_vm14, 65537, %v5647_v30  ;;  %vm1955_vm1 = vcmp.gt.f32.partialorder %v3730_v14, 0.5 }
 0x240   :  { %v4130_v25 = vpop.eup %4129  ;;  %v1167_v40 = vadd.f32 1.0, %v4128_v29  ;;  %v1957_v16 = vsel %vm1955_vm1, 1, %v5647_v30 }
 0x241   :  { %v5074_v47 = vadd.f32 %v1174_v1, %v1172_v24  ;;  %v1175_v53 = vmul.f32 %v4130_v25, %v4122_v52  ;;  %v4132_v19 = vpop.eup %4131  ;;  %v1956_v1 = vsel %vm1954_vm2, 1, %v5647_v30  ;;  %1962 = vperm.xlu1 %3918, %v1957_v16   ;;  %v1503_v25 = vunpack.c.l.bf16 %v4749_v62 }
 0x242   :  { %v1173_v41 = vmul.f32 %v4132_v19, %v4850_v6  ;;  %v4134_v31 = vpop.eup %4133  ;;  %v3641_v6 = vcombine.low %v1200_v55, %v1201_v42  ;;  %1959 = vperm.xlu0 %3917, %v1956_v1   ;;  %v1506_v55 = vunpack.c.h.bf16 %v4745_v60  ;;  %v1508_v42 = vunpack.c.h.bf16 %v4747_v61 }
 0x243   :  { %4135 = vtanh.f32 %v5074_v47 }
 0x244   :  { %v5078_v46 = vadd.f32 %v1175_v53, %v1173_v41  ;;  %4137 = vrcp.f32 %v1167_v40  ;;  %vm1205_vm0 = vcmp.ne.s16.totalorder %v3641_v6, 0  ;;  %v1505_v53 = vunpack.c.l.bf16 %v5648_v48 }
 0x246   :  { %4139 = vtanh.f32 %v5078_v46 }
 0x24d   :  { %v4136_v43 = vpop.eup %4135 }
 0x24e   :  { %v4138_v51 = vpop.eup %4137  ;;  %v1180_v3 = vmul.f32 %v4136_v43, %v4134_v31 }
 0x250   :  { %v4140_v50 = vpop.eup %4139 }
 0x251   :  { %v1181_v28 = vmul.f32 %v4140_v50, %v4138_v51  ;;  %v1507_v50 = vunpack.c.h.bf16 %v4749_v62 }
 0x253   :  { %v1182_v26 = vpack.c.bf16 %v1181_v28, %v1180_v3  ;;  %v1509_v3 = vunpack.c.h.bf16 %v5648_v48 }
 0x255   :  { %v1206_v27 = vsel %vm1205_vm0, %v1182_v26, 0  ;;  %1449 = vmatmul.mubr.bf16.vlgmr.msra.gmra.mrb[40].mxu0 %v1182_v26  ;;  %1492 = vmatmul.mubr.bf16.vlgmr.msra.gmra.mrb[40].mxu1 %v1182_v26 }
 0x256   :  { %v3642_v49 = vcombine.low %v1206_v27, %v1206_v27  ;;  %v3643_v52 = vcombine.high %v1206_v27, %v1206_v27  ;;  %1801 = vmatpush1.bf16.msra.mxu0 %v4876_v33  ;;  %1844 = vmatpush1.bf16.msra.mxu1 %v4881_v63 }
 0x257   :  { %1802 = vmatprep.subr.bf16.mxu0 %v4890_v4  ;;  %1845 = vmatprep.subr.bf16.mxu1 %v4895_v34 }
 0x258   :  { %3644 = vst [vmem:[%s5602_s7 + $0x8] sm:$0xf] %v3642_v49  ;;  %3645 = vst [vmem:[%s5602_s7 + $0xc] sm:$0xf] %v3643_v52  ;;  %1832 = vmatprep.mubr.bf16.mxu0 %v5647_v30  ;;  %1875 = vmatprep.mubr.bf16.mxu1 %v5647_v30 }
 0x25a   :  { %1803 = vmatpush1.bf16.msra.mxu0 %v4900_v0  ;;  %1846 = vmatpush1.bf16.msra.mxu1 %v4905_v35 }
 0x25b   :  { %1804 = vmatprep.subr.bf16.mxu0 %v4914_v36  ;;  %1847 = vmatprep.subr.bf16.mxu1 %v4919_v37 }
 0x25e   :  { %1805 = vmatpush1.bf16.msra.mxu0 %v4924_v38  ;;  %1848 = vmatpush1.bf16.msra.mxu1 %v4929_v39 }
 0x25f   :  { %1806 = vmatprep.subr.bf16.mxu0 %v4938_v44  ;;  %1849 = vmatprep.subr.bf16.mxu1 %v4943_v45 }
 0x262   :  { %1807 = vmatpush1.bf16.msra.mxu0 %v4948_v54  ;;  %1850 = vmatpush1.bf16.msra.mxu1 %v4953_v56 }
 0x263   :  { %1808 = vmatprep.subr.bf16.mxu0 %v4962_v57  ;;  %1851 = vmatprep.subr.bf16.mxu1 %v4967_v58 }
 0x266   :  { %1809 = vmatpush1.bf16.msra.mxu0 %v4972_v59  ;;  %1852 = vmatpush1.bf16.msra.mxu1 %v4977_v5 }
 0x267   :  { %1810 = vmatprep.subr.bf16.mxu0 %v4984_v7  ;;  %1853 = vmatprep.subr.bf16.mxu1 %v4989_v8 }
 0x26a   :  { %1811 = vmatpush1.bf16.msra.mxu0 %v4996_v9  ;;  %1854 = vmatpush1.bf16.msra.mxu1 %v5001_v20 }
 0x26b   :  { %1812 = vmatprep.subr.bf16.mxu0 %v5008_v21  ;;  %1855 = vmatprep.subr.bf16.mxu1 %v5013_v10 }
 0x26e   :  { %1813 = vmatpush1.bf16.msra.mxu0 %v5020_v11  ;;  %1856 = vmatpush1.bf16.msra.mxu1 %v5025_v22 }
 0x26f   :  { %1814 = vmatprep.subr.bf16.mxu0 %v5034_v12  ;;  %1857 = vmatprep.subr.bf16.mxu1 %v5039_v23 }
 0x272   :  { %1815 = vmatpush1.bf16.msra.mxu0 %v5044_v13  ;;  %1858 = vmatpush1.bf16.msra.mxu1 %v5049_v18 }
 0x273   :  { %2184 = vmatprep.subr.bf16.mxu0 %v4866_v2  ;;  %2227 = vmatprep.subr.bf16.mxu1 %v4871_v32  ;;  %v1502_v2 = vunpack.c.l.bf16 %v4745_v60  ;;  %v1504_v32 = vunpack.c.l.bf16 %v4747_v61 }
 0x328   :  { %v1450_v29 = vpop.f32.mrb[40].mxu0  ;;  %v1493_v24 = vpop.f32.mrb[40].mxu1 }
 0x329   :  { %v1510_v19 = vadd.f32 %v1502_v2, %v1450_v29  ;;  %v1512_v40 = vadd.f32 %v1504_v32, %v1493_v24  ;;  %v1452_v41 = vpop.f32.mrb[41].mxu0  ;;  %v1495_v17 = vpop.f32.mrb[41].mxu1 }
 0x32a   :  { %v1511_v31 = vadd.f32 %v1503_v25, %v1452_v41  ;;  %v1513_v43 = vadd.f32 %v1505_v53, %v1495_v17  ;;  %v1454_v6 = vpop.f32.mrb[42].mxu0  ;;  %v1497_v51 = vpop.f32.mrb[42].mxu1 }
 0x32b   :  { %v3678_v28 = vmul.f32 -1.442695, %v1510_v19  ;;  %v1514_v26 = vadd.f32 %v1506_v55, %v1454_v6  ;;  %v1516_v27 = vadd.f32 %v1508_v42, %v1497_v51  ;;  %v1456_v49 = vpop.f32.mrb[43].mxu0  ;;  %v1499_v52 = vpop.f32.mrb[43].mxu1 }
 0x32c   :  { %v3680_v14 = vmul.f32 -1.442695, %v1511_v31  ;;  %v1515_v15 = vadd.f32 %v1507_v50, %v1456_v49  ;;  %v1517_v16 = vadd.f32 %v1509_v3, %v1499_v52  ;;  %v3682_v1 = vmul.f32 -1.442695, %v1513_v43  ;;  %v1579_v49 = vpop.permute.xlu1 %1578 }
 0x32d   :  { %4141 = vpow2.f32 %v3678_v28  ;;  %v3679_v60 = vmul.f32 -1.442695, %v1514_v26  ;;  %vm1581_vm3 = vcmp.eq.s32.totalorder %v1579_v49, 1 }
 0x32e   :  { %4143 = vpow2.f32 %v3680_v14  ;;  %v3681_v61 = vmul.f32 -1.442695, %v1515_v15  ;;  %v3683_v29 = vmul.f32 -1.442695, %v1517_v16  ;;  %v1576_v14 = vpop.permute.xlu0 %1575  ;;  %vm1583_vm5 = vmpackc.low %vm1581_vm3, %vm1581_vm3 }
 0x32f   :  { %4145 = vpow2.f32 %v3679_v60  ;;  %vm1580_vm4 = vcmp.eq.s32.totalorder %v1576_v14, 1 }
 0x330   :  { %4147 = vpow2.f32 %v3681_v61  ;;  %vm1582_vm6 = vmpackc.low %vm1580_vm4, %vm1580_vm4 }
 0x331   :  { %4149 = vtanh.f32 %v1512_v40  ;;  %v1584_v16 = vsel %vm1582_vm6, 65537, %v5647_v30 }
 0x332   :  { %4151 = vpow2.f32 %v3682_v1 }
 0x333   :  { %4153 = vtanh.f32 %v1516_v27 }
 0x337   :  { %v4142_v2 = vpop.eup %4141 }
 0x338   :  { %v4144_v62 = vpop.eup %4143  ;;  %v1524_v32 = vadd.f32 1.0, %v4142_v2 }
 0x339   :  { %v1536_v24 = vadd.f32 1.0, %v4144_v62  ;;  %v4146_v25 = vpop.eup %4145 }
 0x33a   :  { %4155 = vrcp.f32 %v1524_v32  ;;  %v1525_v48 = vadd.f32 1.0, %v4146_v25  ;;  %v4148_v53 = vpop.eup %4147 }
 0x33b   :  { %4157 = vrcp.f32 %v1536_v24  ;;  %v1537_v19 = vadd.f32 1.0, %v4148_v53  ;;  %v4150_v41 = vpop.eup %4149 }
 0x33c   :  { %4159 = vpow2.f32 %v3683_v29  ;;  %v4152_v17 = vpop.eup %4151 }
 0x33d   :  { %4161 = vrcp.f32 %v1525_v48  ;;  %v4154_v55 = vpop.eup %4153  ;;  %v1550_v50 = vadd.f32 1.0, %v4152_v17 }
 0x33e   :  { %4163 = vrcp.f32 %v1537_v19 }
 0x33f   :  { %4165 = vrcp.f32 %v1550_v50 }
 0x344   :  { %v4156_v42 = vpop.eup %4155 }
 0x345   :  { %v4158_v40 = vpop.eup %4157  ;;  %v1558_v31 = vmul.f32 %v4156_v42, %v4150_v41 }
 0x346   :  { %v4160_v43 = vpop.eup %4159  ;;  %v1556_v6 = vmul.f32 %v4158_v40, %v5074_v47  ;;  %v1585_v47 = vsel %vm1583_vm5, 65537, %v5647_v30 }
 0x347   :  { %v4162_v51 = vpop.eup %4161  ;;  %v1551_v27 = vadd.f32 1.0, %v4160_v43 }
 0x348   :  { %v5140_v3 = vadd.f32 %v1558_v31, %v1556_v6  ;;  %v1559_v28 = vmul.f32 %v4162_v51, %v4154_v55  ;;  %v4164_v26 = vpop.eup %4163 }
 0x349   :  { %v1557_v52 = vmul.f32 %v4164_v26, %v5078_v46  ;;  %v4166_v60 = vpop.eup %4165  ;;  %v3686_v46 = vcombine.low %v1584_v16, %v1585_v47 }
 0x34a   :  { %4167 = vtanh.f32 %v5140_v3 }
 0x34b   :  { %v5144_v15 = vadd.f32 %v1559_v28, %v1557_v52  ;;  %4169 = vrcp.f32 %v1551_v27  ;;  %vm1589_vm7 = vcmp.ne.s16.totalorder %v3686_v46, 0 }
 0x34d   :  { %4171 = vtanh.f32 %v5144_v15 }
 0x354   :  { %v4168_v61 = vpop.eup %4167 }
 0x355   :  { %v4170_v1 = vpop.eup %4169  ;;  %v1564_v62 = vmul.f32 %v4168_v61, %v4166_v60 }
 0x357   :  { %v4172_v2 = vpop.eup %4171 }
 0x358   :  { %v1565_v32 = vmul.f32 %v4172_v2, %v4170_v1 }
 0x35a   :  { %v1566_v29 = vpack.c.bf16 %v1565_v32, %v1564_v62 }
 0x35c   :  { %v1590_v24 = vsel %vm1589_vm7, %v1566_v29, 0  ;;  %1833 = vmatmul.mubr.bf16.vlgmr.msra.gmra.mrb[44].mxu0 %v1566_v29  ;;  %1876 = vmatmul.mubr.bf16.vlgmr.msra.gmra.mrb[44].mxu1 %v1566_v29 }
 0x35d   :  { %v3687_v25 = vcombine.low %v1590_v24, %v1590_v24  ;;  %v3688_v48 = vcombine.high %v1590_v24, %v1590_v24  ;;  %2185 = vmatpush1.bf16.msra.mxu0 %v4876_v33  ;;  %2228 = vmatpush1.bf16.msra.mxu1 %v4881_v63  ;;  %v3775_v33 = vld [vmem:[%s5598_s1 + $0x48] sm:$0xff]  ;;  %v3774_v63 = vld [vmem:[%s5598_s1 + $0x40] sm:$0xff] }
 0x35e   :  { %2186 = vmatprep.subr.bf16.mxu0 %v4890_v4  ;;  %2229 = vmatprep.subr.bf16.mxu1 %v4895_v34  ;;  %vm2339_vm8 = vcmp.gt.f32.partialorder %v3775_v33, 0.5  ;;  %vm2338_vm9 = vcmp.gt.f32.partialorder %v3774_v63, 0.5  ;;  %v1960_v63 = vpop.permute.xlu0 %1959 }
 0x35f   :  { %3689 = vst [vmem:[%s5602_s7 + $0x10] sm:$0xf] %v3687_v25  ;;  %3690 = vst [vmem:[%s5602_s7 + $0x14] sm:$0xf] %v3688_v48  ;;  %2216 = vmatprep.mubr.bf16.mxu0 %v5647_v30  ;;  %2259 = vmatprep.mubr.bf16.mxu1 %v5647_v30  ;;  %v2341_v4 = vsel %vm2339_vm8, 1, %v5647_v30  ;;  %v2340_v34 = vsel %vm2338_vm9, 1, %v5647_v30  ;;  %v1963_v48 = vpop.permute.xlu1 %1962 }
 0x360   :  { %2346 = vperm.xlu1 %3918, %v2341_v4   ;;  %2343 = vperm.xlu0 %3917, %v2340_v34   ;;  %vm1965_vm10 = vcmp.eq.s32.totalorder %v1963_v48, 1  ;;  %vm1964_vm11 = vcmp.eq.s32.totalorder %v1960_v63, 1 }
 0x361   :  { %2187 = vmatpush1.bf16.msra.mxu0 %v4900_v0  ;;  %2230 = vmatpush1.bf16.msra.mxu1 %v4905_v35  ;;  %v5649_v0 = vld [vmem:[#allocation4_spill] sm:$0xff]  ;;  %vm1967_vm12 = vmpackc.low %vm1965_vm10, %vm1965_vm10 }
 0x362   :  { %2188 = vmatprep.subr.bf16.mxu0 %v4914_v36  ;;  %2231 = vmatprep.subr.bf16.mxu1 %v4919_v37  ;;  %v1886_v35 = vunpack.c.l.bf16 %v5649_v0  ;;  %v5650_v36 = vld [vmem:[#allocation5_spill] sm:$0xff]  ;;  %vm1966_vm13 = vmpackc.low %vm1964_vm11, %vm1964_vm11 }
 0x363   :  { %v1888_v37 = vunpack.c.l.bf16 %v5650_v36  ;;  %v1968_v34 = vsel %vm1966_vm13, 65537, %v5647_v30 }
 0x365   :  { %2189 = vmatpush1.bf16.msra.mxu0 %v4924_v38  ;;  %2232 = vmatpush1.bf16.msra.mxu1 %v4929_v39 }
 0x366   :  { %2190 = vmatprep.subr.bf16.mxu0 %v4938_v44  ;;  %2233 = vmatprep.subr.bf16.mxu1 %v4943_v45  ;;  %v5651_v44 = vld [vmem:[#allocation6_spill] sm:$0xff] }
 0x367   :  { %v1887_v45 = vunpack.c.l.bf16 %v5651_v44 }
 0x369   :  { %2191 = vmatpush1.bf16.msra.mxu0 %v4948_v54  ;;  %2234 = vmatpush1.bf16.msra.mxu1 %v4953_v56  ;;  %v5652_v54 = vld [vmem:[#allocation7_spill] sm:$0xff] }
 0x36a   :  { %2192 = vmatprep.subr.bf16.mxu0 %v4962_v57  ;;  %2235 = vmatprep.subr.bf16.mxu1 %v4967_v58  ;;  %v1889_v56 = vunpack.c.l.bf16 %v5652_v54 }
 0x36d   :  { %2193 = vmatpush1.bf16.msra.mxu0 %v4972_v59  ;;  %2236 = vmatpush1.bf16.msra.mxu1 %v4977_v5 }
 0x36e   :  { %2194 = vmatprep.subr.bf16.mxu0 %v4984_v7  ;;  %2237 = vmatprep.subr.bf16.mxu1 %v4989_v8  ;;  %v1890_v7 = vunpack.c.h.bf16 %v5649_v0  ;;  %v1892_v8 = vunpack.c.h.bf16 %v5650_v36 }
 0x371   :  { %2195 = vmatpush1.bf16.msra.mxu0 %v4996_v9  ;;  %2238 = vmatpush1.bf16.msra.mxu1 %v5001_v20 }
 0x372   :  { %2196 = vmatprep.subr.bf16.mxu0 %v5008_v21  ;;  %2239 = vmatprep.subr.bf16.mxu1 %v5013_v10 }
 0x375   :  { %2197 = vmatpush1.bf16.msra.mxu0 %v5020_v11  ;;  %2240 = vmatpush1.bf16.msra.mxu1 %v5025_v22  ;;  %v1891_v11 = vunpack.c.h.bf16 %v5651_v44  ;;  %v1893_v22 = vunpack.c.h.bf16 %v5652_v54 }
 0x376   :  { %2198 = vmatprep.subr.bf16.mxu0 %v5034_v12  ;;  %2241 = vmatprep.subr.bf16.mxu1 %v5039_v23 }
 0x379   :  { %2199 = vmatpush1.bf16.msra.mxu0 %v5044_v13  ;;  %2242 = vmatpush1.bf16.msra.mxu1 %v5049_v18 }
 0x42f   :  { %v1834_v38 = vpop.f32.mrb[44].mxu0  ;;  %v1877_v39 = vpop.f32.mrb[44].mxu1 }
 0x430   :  { %v1894_v57 = vadd.f32 %v1886_v35, %v1834_v38  ;;  %v1896_v58 = vadd.f32 %v1888_v37, %v1877_v39  ;;  %v1836_v59 = vpop.f32.mrb[45].mxu0  ;;  %v1879_v5 = vpop.f32.mrb[45].mxu1 }
 0x431   :  { %v1895_v9 = vadd.f32 %v1887_v45, %v1836_v59  ;;  %v1897_v20 = vadd.f32 %v1889_v56, %v1879_v5  ;;  %v1838_v21 = vpop.f32.mrb[46].mxu0  ;;  %v1881_v10 = vpop.f32.mrb[46].mxu1  ;;  %v5234_v59 = vld [vmem:[%s5597_s3] ss:$16 sps:$4 sm:$0xff]   ;;  %v5239_v5 = vld [vmem:[%s5597_s3 + $0x8] ss:$16 sps:$4 sm:$0xff]  }
 0x432   :  { %v3723_v12 = vmul.f32 -1.442695, %v1894_v57  ;;  %v1898_v23 = vadd.f32 %v1890_v7, %v1838_v21  ;;  %v1900_v13 = vadd.f32 %v1892_v8, %v1881_v10  ;;  %v1840_v18 = vpop.f32.mrb[47].mxu0  ;;  %v1883_v53 = vpop.f32.mrb[47].mxu1  ;;  %v5224_v57 = vld [vmem:[%s5597_s3 + $0x4] ss:$16 sps:$4 sm:$0xff]  }
 0x433   :  { %v3725_v19 = vmul.f32 -1.442695, %v1895_v9  ;;  %v1899_v41 = vadd.f32 %v1891_v11, %v1840_v18  ;;  %v1901_v17 = vadd.f32 %v1893_v22, %v1883_v53  ;;  %v3727_v40 = vmul.f32 -1.442695, %v1897_v20  ;;  %2568 = vmatprep.subr.bf16.mxu0 %v5224_v57  ;;  %v5248_v7 = vld [vmem:[%s5597_s3 + $0x24] ss:$16 sps:$4 sm:$0xff]  }
 0x434   :  { %4173 = vpow2.f32 %v3723_v12  ;;  %v3724_v55 = vmul.f32 -1.442695, %v1898_v23  ;;  %v5253_v8 = vld [vmem:[%s5597_s3 + $0x2c] ss:$16 sps:$4 sm:$0xff]   ;;  %v5258_v9 = vld [vmem:[%s5597_s3 + $0x20] ss:$16 sps:$4 sm:$0xff]  }
 0x435   :  { %4175 = vpow2.f32 %v3725_v19  ;;  %v3726_v42 = vmul.f32 -1.442695, %v1899_v41  ;;  %v3728_v51 = vmul.f32 -1.442695, %v1901_v17  ;;  %v5263_v20 = vld [vmem:[%s5597_s3 + $0x28] ss:$16 sps:$4 sm:$0xff]  }
 0x436   :  { %4177 = vpow2.f32 %v3724_v55  ;;  %v5272_v21 = vld [vmem:[%s5597_s3 + $0x44] ss:$16 sps:$4 sm:$0xff]   ;;  %v5277_v10 = vld [vmem:[%s5597_s3 + $0x4c] ss:$16 sps:$4 sm:$0xff]   ;;  %v5282_v11 = vld [vmem:[%s5597_s3 + $0x40] ss:$16 sps:$4 sm:$0xff]  }
 0x437   :  { %4179 = vpow2.f32 %v3726_v42  ;;  %v5287_v22 = vld [vmem:[%s5597_s3 + $0x48] ss:$16 sps:$4 sm:$0xff]   ;;  %v5296_v12 = vld [vmem:[%s5597_s3 + $0x64] ss:$16 sps:$4 sm:$0xff]   ;;  %v5301_v23 = vld [vmem:[%s5597_s3 + $0x6c] ss:$16 sps:$4 sm:$0xff]  }
 0x438   :  { %4181 = vtanh.f32 %v1896_v58  ;;  %v5229_v58 = vld [vmem:[%s5597_s3 + $0xc] ss:$16 sps:$4 sm:$0xff]   ;;  %v5311_v18 = vld [vmem:[%s5597_s3 + $0x68] ss:$16 sps:$4 sm:$0xff]   ;;  %v5320_v53 = vld [vmem:[%s5597_s3 + $0x84] ss:$16 sps:$4 sm:$0xff]  }
 0x439   :  { %4183 = vpow2.f32 %v3727_v40  ;;  %2611 = vmatprep.subr.bf16.mxu1 %v5229_v58  ;;  %v5325_v19 = vld [vmem:[%s5597_s3 + $0x8c] ss:$16 sps:$4 sm:$0xff]   ;;  %v5330_v41 = vld [vmem:[%s5597_s3 + $0x80] ss:$16 sps:$4 sm:$0xff]   ;;  %v5335_v17 = vld [vmem:[%s5597_s3 + $0x88] ss:$16 sps:$4 sm:$0xff]  }
 0x43a   :  { %4185 = vtanh.f32 %v1900_v13  ;;  %v5306_v13 = vld [vmem:[%s5597_s3 + $0x60] ss:$16 sps:$4 sm:$0xff]   ;;  %v5342_v55 = vld [vmem:[%s5597_s3 + $0xa4] ss:$16 sps:$4 sm:$0xff]   ;;  %v5347_v42 = vld [vmem:[%s5597_s3 + $0xac] ss:$16 sps:$4 sm:$0xff]  }
 0x43b   :  { %v5354_v40 = vld [vmem:[%s5597_s3 + $0xa0] ss:$16 sps:$4 sm:$0xff]  }
 0x43e   :  { %v4174_v31 = vpop.eup %4173 }
 0x43f   :  { %v4176_v43 = vpop.eup %4175  ;;  %v1908_v6 = vadd.f32 1.0, %v4174_v31  ;;  %v5359_v31 = vld [vmem:[%s5597_s3 + $0xa8] ss:$16 sps:$4 sm:$0xff]  }
 0x440   :  { %v1920_v50 = vadd.f32 1.0, %v4176_v43  ;;  %v4178_v28 = vpop.eup %4177  ;;  %v5366_v43 = vld [vmem:[%s5597_s3 + $0xc4] ss:$16 sps:$4 sm:$0xff]  }
 0x441   :  { %4187 = vrcp.f32 %v1908_v6  ;;  %v1909_v26 = vadd.f32 1.0, %v4178_v28  ;;  %v4180_v27 = vpop.eup %4179  ;;  %v5371_v6 = vld [vmem:[%s5597_s3 + $0xcc] ss:$16 sps:$4 sm:$0xff]   ;;  %v5392_v28 = vld [vmem:[%s5597_s3 + $0xe4] ss:$16 sps:$4 sm:$0xff]  }
 0x442   :  { %4189 = vrcp.f32 %v1920_v50  ;;  %v1921_v49 = vadd.f32 1.0, %v4180_v27  ;;  %v4182_v52 = vpop.eup %4181  ;;  %v5383_v50 = vld [vmem:[%s5597_s3 + $0xc8] ss:$16 sps:$4 sm:$0xff]   ;;  %v5402_v27 = vld [vmem:[%s5597_s3 + $0xe0] ss:$16 sps:$4 sm:$0xff]  }
 0x443   :  { %4191 = vpow2.f32 %v3728_v51  ;;  %v4184_v14 = vpop.eup %4183  ;;  %v5378_v51 = vld [vmem:[%s5597_s3 + $0xc0] ss:$16 sps:$4 sm:$0xff]  }
 0x444   :  { %4193 = vrcp.f32 %v1909_v26  ;;  %v4186_v47 = vpop.eup %4185  ;;  %v1934_v62 = vadd.f32 1.0, %v4184_v14  ;;  %v5397_v26 = vld [vmem:[%s5597_s3 + $0xec] ss:$16 sps:$4 sm:$0xff]   ;;  %v3819_v14 = vld [vmem:[%s5598_s1 + $0x50] sm:$0xff] }
 0x445   :  { %4195 = vrcp.f32 %v1921_v49  ;;  %v5407_v49 = vld [vmem:[%s5597_s3 + $0xe8] ss:$16 sps:$4 sm:$0xff]   ;;  %vm2722_vm0 = vcmp.gt.f32.partialorder %v3819_v14, 0.5 }
 0x446   :  { %4197 = vrcp.f32 %v1934_v62 }
 0x44b   :  { %v4188_v16 = vpop.eup %4187 }
 0x44c   :  { %v4190_v60 = vpop.eup %4189  ;;  %v1942_v61 = vmul.f32 %v4188_v16, %v4182_v52  ;;  %v3820_v52 = vld [vmem:[%s5598_s1 + $0x58] sm:$0xff]  ;;  %v2724_v16 = vsel %vm2722_vm0, 1, %v5647_v30 }
 0x44d   :  { %v4192_v46 = vpop.eup %4191  ;;  %v1940_v1 = vmul.f32 %v4190_v60, %v5140_v3  ;;  %v1969_v3 = vsel %vm1967_vm12, 65537, %v5647_v30  ;;  %vm2723_vm15 = vcmp.gt.f32.partialorder %v3820_v52, 0.5  ;;  %2727 = vperm.xlu0 %3917, %v2724_v16   ;;  %v5653_v60 = vld [vmem:[#allocation8_spill] sm:$0xff] }
 0x44e   :  { %v4194_v2 = vpop.eup %4193  ;;  %v1935_v25 = vadd.f32 1.0, %v4192_v46  ;;  %v5654_v46 = vld [vmem:[#allocation9_spill] sm:$0xff] }
 0x44f   :  { %v5204_v32 = vadd.f32 %v1942_v61, %v1940_v1  ;;  %v1943_v29 = vmul.f32 %v4194_v2, %v4186_v47  ;;  %v4196_v24 = vpop.eup %4195  ;;  %v2725_v47 = vsel %vm2723_vm15, 1, %v5647_v30  ;;  %v2270_v61 = vunpack.c.l.bf16 %v5653_v60 }
 0x450   :  { %v1941_v33 = vmul.f32 %v4196_v24, %v5144_v15  ;;  %v4198_v0 = vpop.eup %4197  ;;  %v3731_v15 = vcombine.low %v1968_v34, %v1969_v3  ;;  %2730 = vperm.xlu1 %3918, %v2725_v47   ;;  %v2272_v1 = vunpack.c.l.bf16 %v5654_v46 }
 0x451   :  { %4199 = vtanh.f32 %v5204_v32 }
 0x452   :  { %v5208_v4 = vadd.f32 %v1943_v29, %v1941_v33  ;;  %4201 = vrcp.f32 %v1935_v25  ;;  %vm1973_vm14 = vcmp.ne.s16.totalorder %v3731_v15, 0  ;;  %v5655_v29 = vld [vmem:[#allocation10_spill] sm:$0xff]  ;;  %v5656_v25 = vld [vmem:[#allocation11_spill] sm:$0xff] }
 0x453   :  { %v2271_v24 = vunpack.c.l.bf16 %v5655_v29  ;;  %v2273_v48 = vunpack.c.l.bf16 %v5656_v25 }
 0x454   :  { %4203 = vtanh.f32 %v5208_v4 }
 0x45b   :  { %v4200_v35 = vpop.eup %4199 }
 0x45c   :  { %v4202_v36 = vpop.eup %4201  ;;  %v1948_v38 = vmul.f32 %v4200_v35, %v4198_v0  ;;  %v2274_v0 = vunpack.c.h.bf16 %v5653_v60  ;;  %v2276_v35 = vunpack.c.h.bf16 %v5654_v46 }
 0x45e   :  { %v4204_v37 = vpop.eup %4203 }
 0x45f   :  { %v1949_v39 = vmul.f32 %v4204_v37, %v4202_v36 }
 0x461   :  { %v1950_v44 = vpack.c.bf16 %v1949_v39, %v1948_v38  ;;  %v2275_v39 = vunpack.c.h.bf16 %v5655_v29 }
 0x463   :  { %v1974_v45 = vsel %vm1973_vm14, %v1950_v44, 0  ;;  %2217 = vmatmul.mubr.bf16.vlgmr.msra.gmra.mrb[48].mxu0 %v1950_v44  ;;  %2260 = vmatmul.mubr.bf16.vlgmr.msra.gmra.mrb[48].mxu1 %v1950_v44  ;;  %v2277_v44 = vunpack.c.h.bf16 %v5656_v25 }
 0x464   :  { %v3732_v54 = vcombine.low %v1974_v45, %v1974_v45  ;;  %v3733_v56 = vcombine.high %v1974_v45, %v1974_v45  ;;  %2600 = vmatprep.mubr.bf16.mxu0 %v5647_v30  ;;  %2643 = vmatprep.mubr.bf16.mxu1 %v5647_v30 }
 0x465   :  { %2569 = vmatpush1.bf16.msra.mxu0 %v5234_v59  ;;  %2612 = vmatpush1.bf16.msra.mxu1 %v5239_v5 }
 0x466   :  { %3734 = vst [vmem:[%s5602_s7 + $0x18] sm:$0xf] %v3732_v54  ;;  %3735 = vst [vmem:[%s5602_s7 + $0x1c] sm:$0xf] %v3733_v56  ;;  %2570 = vmatprep.subr.bf16.mxu0 %v5248_v7  ;;  %2613 = vmatprep.subr.bf16.mxu1 %v5253_v8 }
 0x469   :  { %2571 = vmatpush1.bf16.msra.mxu0 %v5258_v9  ;;  %2614 = vmatpush1.bf16.msra.mxu1 %v5263_v20 }
 0x46a   :  { %2572 = vmatprep.subr.bf16.mxu0 %v5272_v21  ;;  %2615 = vmatprep.subr.bf16.mxu1 %v5277_v10 }
 0x46d   :  { %2573 = vmatpush1.bf16.msra.mxu0 %v5282_v11  ;;  %2616 = vmatpush1.bf16.msra.mxu1 %v5287_v22 }
 0x46e   :  { %2574 = vmatprep.subr.bf16.mxu0 %v5296_v12  ;;  %2617 = vmatprep.subr.bf16.mxu1 %v5301_v23 }
 0x471   :  { %2575 = vmatpush1.bf16.msra.mxu0 %v5306_v13  ;;  %2618 = vmatpush1.bf16.msra.mxu1 %v5311_v18 }
 0x472   :  { %2576 = vmatprep.subr.bf16.mxu0 %v5320_v53  ;;  %2619 = vmatprep.subr.bf16.mxu1 %v5325_v19 }
 0x475   :  { %2577 = vmatpush1.bf16.msra.mxu0 %v5330_v41  ;;  %2620 = vmatpush1.bf16.msra.mxu1 %v5335_v17 }
 0x476   :  { %2578 = vmatprep.subr.bf16.mxu0 %v5342_v55  ;;  %2621 = vmatprep.subr.bf16.mxu1 %v5347_v42 }
 0x479   :  { %2579 = vmatpush1.bf16.msra.mxu0 %v5354_v40  ;;  %2622 = vmatpush1.bf16.msra.mxu1 %v5359_v31 }
 0x47a   :  { %2580 = vmatprep.subr.bf16.mxu0 %v5366_v43  ;;  %2623 = vmatprep.subr.bf16.mxu1 %v5371_v6 }
 0x47d   :  { %2581 = vmatpush1.bf16.msra.mxu0 %v5378_v51  ;;  %2624 = vmatpush1.bf16.msra.mxu1 %v5383_v50 }
 0x47e   :  { %2582 = vmatprep.subr.bf16.mxu0 %v5392_v28  ;;  %2625 = vmatprep.subr.bf16.mxu1 %v5397_v26 }
 0x481   :  { %2583 = vmatpush1.bf16.msra.mxu0 %v5402_v27  ;;  %2626 = vmatpush1.bf16.msra.mxu1 %v5407_v49 }
 0x482   :  { %2952 = vmatprep.subr.bf16.mxu0 %v5224_v57  ;;  %2995 = vmatprep.subr.bf16.mxu1 %v5229_v58 }
 0x536   :  { %v2218_v2 = vpop.f32.mrb[48].mxu0  ;;  %v2261_v62 = vpop.f32.mrb[48].mxu1 }
 0x537   :  { %v2278_v33 = vadd.f32 %v2270_v61, %v2218_v2  ;;  %v2280_v63 = vadd.f32 %v2272_v1, %v2261_v62  ;;  %v2220_v3 = vpop.f32.mrb[49].mxu0  ;;  %v2263_v34 = vpop.f32.mrb[49].mxu1 }
 0x538   :  { %v2279_v15 = vadd.f32 %v2271_v24, %v2220_v3  ;;  %v2281_v36 = vadd.f32 %v2273_v48, %v2263_v34  ;;  %v2222_v37 = vpop.f32.mrb[50].mxu0  ;;  %v2265_v38 = vpop.f32.mrb[50].mxu1 }
 0x539   :  { %v3768_v45 = vmul.f32 -1.442695, %v2278_v33  ;;  %v2282_v54 = vadd.f32 %v2274_v0, %v2222_v37  ;;  %v2284_v56 = vadd.f32 %v2276_v35, %v2265_v38  ;;  %v2224_v52 = vpop.f32.mrb[51].mxu0  ;;  %v2267_v14 = vpop.f32.mrb[51].mxu1 }
 0x53a   :  { %v3770_v47 = vmul.f32 -1.442695, %v2279_v15  ;;  %v2283_v16 = vadd.f32 %v2275_v39, %v2224_v52  ;;  %v2285_v61 = vadd.f32 %v2277_v44, %v2267_v14  ;;  %v3772_v1 = vmul.f32 -1.442695, %v2281_v36 }
 0x53b   :  { %4205 = vpow2.f32 %v3768_v45  ;;  %v3769_v60 = vmul.f32 -1.442695, %v2282_v54 }
 0x53c   :  { %4207 = vpow2.f32 %v3770_v47  ;;  %v3771_v46 = vmul.f32 -1.442695, %v2283_v16  ;;  %v3773_v24 = vmul.f32 -1.442695, %v2285_v61  ;;  %v2347_v47 = vpop.permute.xlu1 %2346  ;;  %v2344_v61 = vpop.permute.xlu0 %2343 }
 0x53d   :  { %4209 = vpow2.f32 %v3769_v60  ;;  %vm2349_vm1 = vcmp.eq.s32.totalorder %v2347_v47, 1  ;;  %vm2348_vm2 = vcmp.eq.s32.totalorder %v2344_v61, 1 }
 0x53e   :  { %4211 = vpow2.f32 %v3771_v46  ;;  %vm2351_vm3 = vmpackc.low %vm2349_vm1, %vm2349_vm1 }
 0x53f   :  { %4213 = vtanh.f32 %v2280_v63  ;;  %vm2350_vm4 = vmpackc.low %vm2348_vm2, %vm2348_vm2 }
 0x540   :  { %4215 = vpow2.f32 %v3772_v1  ;;  %v2352_v46 = vsel %vm2350_vm4, 65537, %v5647_v30 }
 0x541   :  { %4217 = vtanh.f32 %v2284_v56 }
 0x545   :  { %v4206_v2 = vpop.eup %4205 }
 0x546   :  { %v4208_v62 = vpop.eup %4207  ;;  %v2292_v29 = vadd.f32 1.0, %v4206_v2 }
 0x547   :  { %v2304_v25 = vadd.f32 1.0, %v4208_v62  ;;  %v4210_v48 = vpop.eup %4209 }
 0x548   :  { %4219 = vrcp.f32 %v2292_v29  ;;  %v2293_v33 = vadd.f32 1.0, %v4210_v48  ;;  %v4212_v3 = vpop.eup %4211 }
 0x549   :  { %4221 = vrcp.f32 %v2304_v25  ;;  %v2305_v34 = vadd.f32 1.0, %v4212_v3  ;;  %v4214_v0 = vpop.eup %4213 }
 0x54a   :  { %4223 = vpow2.f32 %v3773_v24  ;;  %v4216_v35 = vpop.eup %4215 }
 0x54b   :  { %4225 = vrcp.f32 %v2293_v33  ;;  %v4218_v15 = vpop.eup %4217  ;;  %v2318_v45 = vadd.f32 1.0, %v4216_v35  ;;  %v3864_v35 = vld [vmem:[%s5598_s1 + $0x60] sm:$0xff] }
 0x54c   :  { %4227 = vrcp.f32 %v2305_v34  ;;  %vm3106_vm7 = vcmp.gt.f32.partialorder %v3864_v35, 0.5 }
 0x54d   :  { %4229 = vrcp.f32 %v2318_v45 }
 0x552   :  { %v4220_v36 = vpop.eup %4219 }
 0x553   :  { %v4222_v63 = vpop.eup %4221  ;;  %v2326_v37 = vmul.f32 %v4220_v36, %v4214_v0  ;;  %v3865_v0 = vld [vmem:[%s5598_s1 + $0x68] sm:$0xff]  ;;  %v3108_v36 = vsel %vm3106_vm7, 1, %v5647_v30 }
 0x554   :  { %v4224_v38 = vpop.eup %4223  ;;  %v2324_v39 = vmul.f32 %v4222_v63, %v5204_v32  ;;  %v2353_v32 = vsel %vm2351_vm3, 65537, %v5647_v30  ;;  %vm3107_vm6 = vcmp.gt.f32.partialorder %v3865_v0, 0.5  ;;  %3111 = vperm.xlu0 %3917, %v3108_v36   ;;  %v5657_v63 = vld [vmem:[#allocation12_spill] sm:$0xff] }
 0x555   :  { %v4226_v44 = vpop.eup %4225  ;;  %v2319_v14 = vadd.f32 1.0, %v4224_v38 }
 0x556   :  { %v5432_v54 = vadd.f32 %v2326_v37, %v2324_v39  ;;  %v2327_v56 = vmul.f32 %v4226_v44, %v4218_v15  ;;  %v4228_v52 = vpop.eup %4227  ;;  %v3109_v15 = vsel %vm3107_vm6, 1, %v5647_v30  ;;  %v5658_v37 = vld [vmem:[#allocation13_spill] sm:$0xff]  ;;  %v5659_v44 = vld [vmem:[#allocation14_spill] sm:$0xff] }
 0x557   :  { %v2325_v16 = vmul.f32 %v4228_v52, %v5208_v4  ;;  %v4230_v1 = vpop.eup %4229  ;;  %v3776_v4 = vcombine.low %v2352_v46, %v2353_v32  ;;  %3114 = vperm.xlu1 %3918, %v3109_v15   ;;  %v2655_v45 = vunpack.c.l.bf16 %v5659_v44  ;;  %v2658_v32 = vunpack.c.h.bf16 %v5657_v63 }
 0x558   :  { %4231 = vtanh.f32 %v5432_v54  ;;  %v2660_v46 = vunpack.c.h.bf16 %v5658_v37 }
 0x559   :  { %v5436_v60 = vadd.f32 %v2327_v56, %v2325_v16  ;;  %4233 = vrcp.f32 %v2319_v14  ;;  %vm2357_vm5 = vcmp.ne.s16.totalorder %v3776_v4, 0  ;;  %v5660_v56 = vld [vmem:[#allocation15_spill] sm:$0xff] }
 0x55a   :  { %v2657_v52 = vunpack.c.l.bf16 %v5660_v56 }
 0x55b   :  { %4235 = vtanh.f32 %v5436_v60 }
 0x562   :  { %v4232_v2 = vpop.eup %4231 }
 0x563   :  { %v4234_v62 = vpop.eup %4233  ;;  %v2332_v24 = vmul.f32 %v4232_v2, %v4230_v1 }
 0x565   :  { %v4236_v29 = vpop.eup %4235 }
 0x566   :  { %v2333_v25 = vmul.f32 %v4236_v29, %v4234_v62  ;;  %v2659_v29 = vunpack.c.h.bf16 %v5659_v44 }
 0x568   :  { %v2334_v48 = vpack.c.bf16 %v2333_v25, %v2332_v24  ;;  %v2661_v24 = vunpack.c.h.bf16 %v5660_v56 }
 0x56a   :  { %v2358_v33 = vsel %vm2357_vm5, %v2334_v48, 0  ;;  %2601 = vmatmul.mubr.bf16.vlgmr.msra.gmra.mrb[52].mxu0 %v2334_v48  ;;  %2644 = vmatmul.mubr.bf16.vlgmr.msra.gmra.mrb[52].mxu1 %v2334_v48 }
 0x56b   :  { %v3777_v3 = vcombine.low %v2358_v33, %v2358_v33  ;;  %v3778_v34 = vcombine.high %v2358_v33, %v2358_v33  ;;  %2953 = vmatpush1.bf16.msra.mxu0 %v5234_v59  ;;  %2996 = vmatpush1.bf16.msra.mxu1 %v5239_v5 }
 0x56c   :  { %2954 = vmatprep.subr.bf16.mxu0 %v5248_v7  ;;  %2997 = vmatprep.subr.bf16.mxu1 %v5253_v8 }
 0x56d   :  { %3779 = vst [vmem:[%s5602_s7 + $0x20] sm:$0xf] %v3777_v3  ;;  %3780 = vst [vmem:[%s5602_s7 + $0x24] sm:$0xf] %v3778_v34  ;;  %2984 = vmatprep.mubr.bf16.mxu0 %v5647_v30  ;;  %3027 = vmatprep.mubr.bf16.mxu1 %v5647_v30 }
 0x56f   :  { %2955 = vmatpush1.bf16.msra.mxu0 %v5258_v9  ;;  %2998 = vmatpush1.bf16.msra.mxu1 %v5263_v20 }
 0x570   :  { %2956 = vmatprep.subr.bf16.mxu0 %v5272_v21  ;;  %2999 = vmatprep.subr.bf16.mxu1 %v5277_v10 }
 0x573   :  { %2957 = vmatpush1.bf16.msra.mxu0 %v5282_v11  ;;  %3000 = vmatpush1.bf16.msra.mxu1 %v5287_v22 }
 0x574   :  { %2958 = vmatprep.subr.bf16.mxu0 %v5296_v12  ;;  %3001 = vmatprep.subr.bf16.mxu1 %v5301_v23 }
 0x577   :  { %2959 = vmatpush1.bf16.msra.mxu0 %v5306_v13  ;;  %3002 = vmatpush1.bf16.msra.mxu1 %v5311_v18 }
 0x578   :  { %2960 = vmatprep.subr.bf16.mxu0 %v5320_v53  ;;  %3003 = vmatprep.subr.bf16.mxu1 %v5325_v19 }
 0x57b   :  { %2961 = vmatpush1.bf16.msra.mxu0 %v5330_v41  ;;  %3004 = vmatpush1.bf16.msra.mxu1 %v5335_v17 }
 0x57c   :  { %2962 = vmatprep.subr.bf16.mxu0 %v5342_v55  ;;  %3005 = vmatprep.subr.bf16.mxu1 %v5347_v42 }
 0x57f   :  { %2963 = vmatpush1.bf16.msra.mxu0 %v5354_v40  ;;  %3006 = vmatpush1.bf16.msra.mxu1 %v5359_v31 }
 0x580   :  { %2964 = vmatprep.subr.bf16.mxu0 %v5366_v43  ;;  %3007 = vmatprep.subr.bf16.mxu1 %v5371_v6 }
 0x583   :  { %2965 = vmatpush1.bf16.msra.mxu0 %v5378_v51  ;;  %3008 = vmatpush1.bf16.msra.mxu1 %v5383_v50 }
 0x584   :  { %2966 = vmatprep.subr.bf16.mxu0 %v5392_v28  ;;  %3009 = vmatprep.subr.bf16.mxu1 %v5397_v26 }
 0x587   :  { %2967 = vmatpush1.bf16.msra.mxu0 %v5402_v27  ;;  %3010 = vmatpush1.bf16.msra.mxu1 %v5407_v49 }
 0x588   :  { %3336 = vmatprep.subr.bf16.mxu0 %v5224_v57  ;;  %3379 = vmatprep.subr.bf16.mxu1 %v5229_v58  ;;  %v2654_v57 = vunpack.c.l.bf16 %v5657_v63  ;;  %v2656_v58 = vunpack.c.l.bf16 %v5658_v37 }
 0x63d   :  { %v2602_v38 = vpop.f32.mrb[52].mxu0  ;;  %v2645_v39 = vpop.f32.mrb[52].mxu1 }
 0x63e   :  { %v2662_v14 = vadd.f32 %v2654_v57, %v2602_v38  ;;  %v2664_v47 = vadd.f32 %v2656_v58, %v2645_v39  ;;  %v2604_v16 = vpop.f32.mrb[53].mxu0  ;;  %v2647_v61 = vpop.f32.mrb[53].mxu1 }
 0x63f   :  { %v2663_v1 = vadd.f32 %v2655_v45, %v2604_v16  ;;  %v2665_v2 = vadd.f32 %v2657_v52, %v2647_v61  ;;  %v2606_v4 = vpop.f32.mrb[54].mxu0  ;;  %v2649_v62 = vpop.f32.mrb[54].mxu1 }
 0x640   :  { %v3813_v25 = vmul.f32 -1.442695, %v2662_v14  ;;  %v2666_v48 = vadd.f32 %v2658_v32, %v2606_v4  ;;  %v2668_v33 = vadd.f32 %v2660_v46, %v2649_v62  ;;  %v2608_v3 = vpop.f32.mrb[55].mxu0  ;;  %v2651_v34 = vpop.f32.mrb[55].mxu1 }
 0x641   :  { %v3815_v0 = vmul.f32 -1.442695, %v2663_v1  ;;  %v2667_v35 = vadd.f32 %v2659_v29, %v2608_v3  ;;  %v2669_v15 = vadd.f32 %v2661_v24, %v2651_v34  ;;  %v3817_v57 = vmul.f32 -1.442695, %v2665_v2  ;;  %v2731_v3 = vpop.permute.xlu1 %2730 }
 0x642   :  { %4237 = vpow2.f32 %v3813_v25  ;;  %v3814_v36 = vmul.f32 -1.442695, %v2666_v48  ;;  %vm2733_vm8 = vcmp.eq.s32.totalorder %v2731_v3, 1 }
 0x643   :  { %4239 = vpow2.f32 %v3815_v0  ;;  %v3816_v63 = vmul.f32 -1.442695, %v2667_v35  ;;  %v3818_v39 = vmul.f32 -1.442695, %v2669_v15  ;;  %v2728_v0 = vpop.permute.xlu0 %2727  ;;  %vm2735_vm10 = vmpackc.low %vm2733_vm8, %vm2733_vm8 }
 0x644   :  { %4241 = vpow2.f32 %v3814_v36  ;;  %vm2732_vm9 = vcmp.eq.s32.totalorder %v2728_v0, 1 }
 0x645   :  { %4243 = vpow2.f32 %v3816_v63  ;;  %vm2734_vm11 = vmpackc.low %vm2732_vm9, %vm2732_vm9 }
 0x646   :  { %4245 = vtanh.f32 %v2664_v47  ;;  %v2736_v15 = vsel %vm2734_vm11, 65537, %v5647_v30 }
 0x647   :  { %4247 = vpow2.f32 %v3817_v57 }
 0x648   :  { %4249 = vtanh.f32 %v2668_v33 }
 0x64c   :  { %v4238_v37 = vpop.eup %4237 }
 0x64d   :  { %v4240_v58 = vpop.eup %4239  ;;  %v2676_v38 = vadd.f32 1.0, %v4238_v37 }
 0x64e   :  { %v2688_v44 = vadd.f32 1.0, %v4240_v58  ;;  %v4242_v45 = vpop.eup %4241 }
 0x64f   :  { %4251 = vrcp.f32 %v2676_v38  ;;  %v2677_v56 = vadd.f32 1.0, %v4242_v45  ;;  %v4244_v52 = vpop.eup %4243 }
 0x650   :  { %4253 = vrcp.f32 %v2688_v44  ;;  %v2689_v14 = vadd.f32 1.0, %v4244_v52  ;;  %v4246_v16 = vpop.eup %4245 }
 0x651   :  { %4255 = vpow2.f32 %v3818_v39  ;;  %v4248_v61 = vpop.eup %4247 }
 0x652   :  { %4257 = vrcp.f32 %v2677_v56  ;;  %v4250_v32 = vpop.eup %4249  ;;  %v2702_v29 = vadd.f32 1.0, %v4248_v61 }
 0x653   :  { %4259 = vrcp.f32 %v2689_v14 }
 0x654   :  { %4261 = vrcp.f32 %v2702_v29 }
 0x659   :  { %v4252_v46 = vpop.eup %4251 }
 0x65a   :  { %v4254_v47 = vpop.eup %4253  ;;  %v2710_v1 = vmul.f32 %v4252_v46, %v4246_v16 }
 0x65b   :  { %v4256_v2 = vpop.eup %4255  ;;  %v2708_v4 = vmul.f32 %v4254_v47, %v5432_v54  ;;  %v2737_v54 = vsel %vm2735_vm10, 65537, %v5647_v30 }
 0x65c   :  { %v4258_v62 = vpop.eup %4257  ;;  %v2703_v33 = vadd.f32 1.0, %v4256_v2 }
 0x65d   :  { %v5498_v24 = vadd.f32 %v2710_v1, %v2708_v4  ;;  %v2711_v25 = vmul.f32 %v4258_v62, %v4250_v32  ;;  %v4260_v48 = vpop.eup %4259 }
 0x65e   :  { %v2709_v34 = vmul.f32 %v4260_v48, %v5436_v60  ;;  %v4262_v36 = vpop.eup %4261  ;;  %v3821_v60 = vcombine.low %v2736_v15, %v2737_v54 }
 0x65f   :  { %4263 = vtanh.f32 %v5498_v24 }
 0x660   :  { %v5502_v35 = vadd.f32 %v2711_v25, %v2709_v34  ;;  %4265 = vrcp.f32 %v2703_v33  ;;  %vm2741_vm12 = vcmp.ne.s16.totalorder %v3821_v60, 0 }
 0x662   :  { %4267 = vtanh.f32 %v5502_v35 }
 0x669   :  { %v4264_v63 = vpop.eup %4263 }
 0x66a   :  { %v4266_v57 = vpop.eup %4265  ;;  %v2716_v58 = vmul.f32 %v4264_v63, %v4262_v36 }
 0x66c   :  { %v4268_v37 = vpop.eup %4267 }
 0x66d   :  { %v2717_v38 = vmul.f32 %v4268_v37, %v4266_v57 }
 0x66f   :  { %v2718_v39 = vpack.c.bf16 %v2717_v38, %v2716_v58 }
 0x671   :  { %v2742_v44 = vsel %vm2741_vm12, %v2718_v39, 0  ;;  %2985 = vmatmul.mubr.bf16.vlgmr.msra.gmra.mrb[56].mxu0 %v2718_v39  ;;  %3028 = vmatmul.mubr.bf16.vlgmr.msra.gmra.mrb[56].mxu1 %v2718_v39 }
 0x672   :  { %v3822_v45 = vcombine.low %v2742_v44, %v2742_v44  ;;  %v3823_v56 = vcombine.high %v2742_v44, %v2742_v44  ;;  %3337 = vmatpush1.bf16.msra.mxu0 %v5234_v59  ;;  %3380 = vmatpush1.bf16.msra.mxu1 %v5239_v5  ;;  %v3910_v59 = vld [vmem:[%s5598_s1 + $0x78] sm:$0xff]  ;;  %v3909_v5 = vld [vmem:[%s5598_s1 + $0x70] sm:$0xff] }
 0x673   :  { %3338 = vmatprep.subr.bf16.mxu0 %v5248_v7  ;;  %3381 = vmatprep.subr.bf16.mxu1 %v5253_v8  ;;  %vm3491_vm13 = vcmp.gt.f32.partialorder %v3910_v59, 0.5  ;;  %vm3490_vm14 = vcmp.gt.f32.partialorder %v3909_v5, 0.5  ;;  %v3112_v5 = vpop.permute.xlu0 %3111 }
 0x674   :  { %3824 = vst [vmem:[%s5602_s7 + $0x28] sm:$0xf] %v3822_v45  ;;  %3825 = vst [vmem:[%s5602_s7 + $0x2c] sm:$0xf] %v3823_v56  ;;  %3368 = vmatprep.mubr.bf16.mxu0 %v5647_v30  ;;  %3411 = vmatprep.mubr.bf16.mxu1 %v5647_v30  ;;  %v3493_v7 = vsel %vm3491_vm13, 1, %v5647_v30  ;;  %v3492_v8 = vsel %vm3490_vm14, 1, %v5647_v30  ;;  %v3115_v56 = vpop.permute.xlu1 %3114 }
 0x675   :  { %3498 = vperm.xlu1 %3918, %v3493_v7   ;;  %3495 = vperm.xlu0 %3917, %v3492_v8   ;;  %vm3117_vm15 = vcmp.eq.s32.totalorder %v3115_v56, 1  ;;  %vm3116_vm0 = vcmp.eq.s32.totalorder %v3112_v5, 1 }
 0x676   :  { %3339 = vmatpush1.bf16.msra.mxu0 %v5258_v9  ;;  %3382 = vmatpush1.bf16.msra.mxu1 %v5263_v20  ;;  %v5661_v9 = vld [vmem:[#allocation16_spill] sm:$0xff]  ;;  %vm3119_vm1 = vmpackc.low %vm3117_vm15, %vm3117_vm15 }
 0x677   :  { %3340 = vmatprep.subr.bf16.mxu0 %v5272_v21  ;;  %3383 = vmatprep.subr.bf16.mxu1 %v5277_v10  ;;  %v3038_v20 = vunpack.c.l.bf16 %v5661_v9  ;;  %v5662_v21 = vld [vmem:[#allocation17_spill] sm:$0xff]  ;;  %vm3118_vm2 = vmpackc.low %vm3116_vm0, %vm3116_vm0 }
 0x678   :  { %v3040_v10 = vunpack.c.l.bf16 %v5662_v21  ;;  %v3120_v8 = vsel %vm3118_vm2, 65537, %v5647_v30 }
 0x67a   :  { %3341 = vmatpush1.bf16.msra.mxu0 %v5282_v11  ;;  %3384 = vmatpush1.bf16.msra.mxu1 %v5287_v22 }
 0x67b   :  { %3342 = vmatprep.subr.bf16.mxu0 %v5296_v12  ;;  %3385 = vmatprep.subr.bf16.mxu1 %v5301_v23  ;;  %v5663_v12 = vld [vmem:[#allocation18_spill] sm:$0xff] }
 0x67c   :  { %v3039_v23 = vunpack.c.l.bf16 %v5663_v12 }
 0x67e   :  { %3343 = vmatpush1.bf16.msra.mxu0 %v5306_v13  ;;  %3386 = vmatpush1.bf16.msra.mxu1 %v5311_v18  ;;  %v5664_v13 = vld [vmem:[#allocation19_spill] sm:$0xff] }
 0x67f   :  { %3344 = vmatprep.subr.bf16.mxu0 %v5320_v53  ;;  %3387 = vmatprep.subr.bf16.mxu1 %v5325_v19  ;;  %v3041_v18 = vunpack.c.l.bf16 %v5664_v13 }
 0x682   :  { %3345 = vmatpush1.bf16.msra.mxu0 %v5330_v41  ;;  %3388 = vmatpush1.bf16.msra.mxu1 %v5335_v17 }
 0x683   :  { %3346 = vmatprep.subr.bf16.mxu0 %v5342_v55  ;;  %3389 = vmatprep.subr.bf16.mxu1 %v5347_v42  ;;  %v3042_v55 = vunpack.c.h.bf16 %v5661_v9  ;;  %v3044_v42 = vunpack.c.h.bf16 %v5662_v21 }
 0x686   :  { %3347 = vmatpush1.bf16.msra.mxu0 %v5354_v40  ;;  %3390 = vmatpush1.bf16.msra.mxu1 %v5359_v31 }
 0x687   :  { %3348 = vmatprep.subr.bf16.mxu0 %v5366_v43  ;;  %3391 = vmatprep.subr.bf16.mxu1 %v5371_v6 }
 0x68a   :  { %3349 = vmatpush1.bf16.msra.mxu0 %v5378_v51  ;;  %3392 = vmatpush1.bf16.msra.mxu1 %v5383_v50  ;;  %v3043_v51 = vunpack.c.h.bf16 %v5663_v12  ;;  %v3045_v50 = vunpack.c.h.bf16 %v5664_v13 }
 0x68b   :  { %3350 = vmatprep.subr.bf16.mxu0 %v5392_v28  ;;  %3393 = vmatprep.subr.bf16.mxu1 %v5397_v26 }
 0x68e   :  { %3351 = vmatpush1.bf16.msra.mxu0 %v5402_v27  ;;  %3394 = vmatpush1.bf16.msra.mxu1 %v5407_v49 }
 0x744   :  { %v2986_v11 = vpop.f32.mrb[56].mxu0  ;;  %v3029_v22 = vpop.f32.mrb[56].mxu1 }
 0x745   :  { %v3046_v53 = vadd.f32 %v3038_v20, %v2986_v11  ;;  %v3048_v19 = vadd.f32 %v3040_v10, %v3029_v22  ;;  %v2988_v41 = vpop.f32.mrb[57].mxu0  ;;  %v3031_v17 = vpop.f32.mrb[57].mxu1 }
 0x746   :  { %v3047_v40 = vadd.f32 %v3039_v23, %v2988_v41  ;;  %v3049_v31 = vadd.f32 %v3041_v18, %v3031_v17  ;;  %v2990_v43 = vpop.f32.mrb[58].mxu0  ;;  %v3033_v6 = vpop.f32.mrb[58].mxu1  ;;  %v5666_v41 = vld [vmem:[#allocation21_spill] sm:$0xff] }
 0x747   :  { %v3858_v28 = vmul.f32 -1.442695, %v3046_v53  ;;  %v3050_v26 = vadd.f32 %v3042_v55, %v2990_v43  ;;  %v3052_v27 = vadd.f32 %v3044_v42, %v3033_v6  ;;  %v2992_v49 = vpop.f32.mrb[59].mxu0  ;;  %v3035_v52 = vpop.f32.mrb[59].mxu1  ;;  %v5665_v53 = vld [vmem:[#allocation20_spill] sm:$0xff]  ;;  %v3424_v17 = vunpack.c.l.bf16 %v5666_v41  ;;  %v5668_v43 = vld [vmem:[#allocation23_spill] sm:$0xff] }
 0x748   :  { %v3860_v14 = vmul.f32 -1.442695, %v3047_v40  ;;  %v3051_v16 = vadd.f32 %v3043_v51, %v2992_v49  ;;  %v3053_v61 = vadd.f32 %v3045_v50, %v3035_v52  ;;  %v3862_v47 = vmul.f32 -1.442695, %v3049_v31  ;;  %v5667_v40 = vld [vmem:[#allocation22_spill] sm:$0xff] }
 0x749   :  { %4269 = vpow2.f32 %v3858_v28  ;;  %v3859_v32 = vmul.f32 -1.442695, %v3050_v26  ;;  %v3423_v31 = vunpack.c.l.bf16 %v5667_v40  ;;  %v3425_v6 = vunpack.c.l.bf16 %v5668_v43 }
 0x74a   :  { %4271 = vpow2.f32 %v3860_v14  ;;  %v3861_v46 = vmul.f32 -1.442695, %v3051_v16  ;;  %v3863_v62 = vmul.f32 -1.442695, %v3053_v61  ;;  %v3428_v49 = vunpack.c.h.bf16 %v5666_v41 }
 0x74b   :  { %4273 = vpow2.f32 %v3859_v32  ;;  %v3427_v32 = vunpack.c.h.bf16 %v5667_v40 }
 0x74c   :  { %4275 = vpow2.f32 %v3861_v46  ;;  %v3429_v46 = vunpack.c.h.bf16 %v5668_v43 }
 0x74d   :  { %4277 = vtanh.f32 %v3048_v19  ;;  %v3422_v19 = vunpack.c.l.bf16 %v5665_v53 }
 0x74e   :  { %4279 = vpow2.f32 %v3862_v47 }
 0x74f   :  { %4281 = vtanh.f32 %v3052_v27  ;;  %v3426_v27 = vunpack.c.h.bf16 %v5665_v53 }
 0x753   :  { %v4270_v1 = vpop.eup %4269 }
 0x754   :  { %v4272_v2 = vpop.eup %4271  ;;  %v3060_v4 = vadd.f32 1.0, %v4270_v1 }
 0x755   :  { %v3072_v29 = vadd.f32 1.0, %v4272_v2  ;;  %v4274_v25 = vpop.eup %4273 }
 0x756   :  { %4283 = vrcp.f32 %v3060_v4  ;;  %v3061_v48 = vadd.f32 1.0, %v4274_v25  ;;  %v4276_v33 = vpop.eup %4275 }
 0x757   :  { %4285 = vrcp.f32 %v3072_v29  ;;  %v3073_v3 = vadd.f32 1.0, %v4276_v33  ;;  %v4278_v34 = vpop.eup %4277 }
 0x758   :  { %4287 = vpow2.f32 %v3863_v62  ;;  %v4280_v0 = vpop.eup %4279 }
 0x759   :  { %4289 = vrcp.f32 %v3061_v48  ;;  %v4282_v54 = vpop.eup %4281  ;;  %v3086_v58 = vadd.f32 1.0, %v4280_v0 }
 0x75a   :  { %4291 = vrcp.f32 %v3073_v3 }
 0x75b   :  { %4293 = vrcp.f32 %v3086_v58 }
 0x760   :  { %v4284_v15 = vpop.eup %4283 }
 0x761   :  { %v4286_v36 = vpop.eup %4285  ;;  %v3094_v63 = vmul.f32 %v4284_v15, %v4278_v34 }
 0x762   :  { %v4288_v60 = vpop.eup %4287  ;;  %v3092_v57 = vmul.f32 %v4286_v36, %v5498_v24  ;;  %v3121_v24 = vsel %vm3119_vm1, 65537, %v5647_v30 }
 0x763   :  { %v4290_v37 = vpop.eup %4289  ;;  %v3087_v45 = vadd.f32 1.0, %v4288_v60 }
 0x764   :  { %v5562_v38 = vadd.f32 %v3094_v63, %v3092_v57  ;;  %v3095_v39 = vmul.f32 %v4290_v37, %v4282_v54  ;;  %v4292_v44 = vpop.eup %4291 }
 0x765   :  { %v3093_v59 = vmul.f32 %v4292_v44, %v5502_v35  ;;  %v4294_v9 = vpop.eup %4293  ;;  %v3866_v35 = vcombine.low %v3120_v8, %v3121_v24 }
 0x766   :  { %4295 = vtanh.f32 %v5562_v38 }
 0x767   :  { %v5566_v7 = vadd.f32 %v3095_v39, %v3093_v59  ;;  %4297 = vrcp.f32 %v3087_v45  ;;  %vm3125_vm3 = vcmp.ne.s16.totalorder %v3866_v35, 0 }
 0x769   :  { %4299 = vtanh.f32 %v5566_v7 }
 0x770   :  { %v4296_v20 = vpop.eup %4295 }
 0x771   :  { %v4298_v21 = vpop.eup %4297  ;;  %v3100_v11 = vmul.f32 %v4296_v20, %v4294_v9 }
 0x773   :  { %v4300_v10 = vpop.eup %4299 }
 0x774   :  { %v3101_v22 = vmul.f32 %v4300_v10, %v4298_v21 }
 0x776   :  { %v3102_v12 = vpack.c.bf16 %v3101_v22, %v3100_v11 }
 0x778   :  { %v3126_v23 = vsel %vm3125_vm3, %v3102_v12, 0  ;;  %3369 = vmatmul.mubr.bf16.vlgmr.msra.gmra.mrb[60].mxu0 %v3102_v12  ;;  %3412 = vmatmul.mubr.bf16.vlgmr.msra.gmra.mrb[60].mxu1 %v3102_v12  ;;  %v3499_v12 = vpop.permute.xlu1 %3498 }
 0x779   :  { %v3867_v13 = vcombine.low %v3126_v23, %v3126_v23  ;;  %v3868_v18 = vcombine.high %v3126_v23, %v3126_v23  ;;  %vm3501_vm4 = vcmp.eq.s32.totalorder %v3499_v12, 1 }
 0x77a   :  { %vm3503_vm6 = vmpackc.low %vm3501_vm4, %vm3501_vm4 }
 0x77b   :  { %3869 = vst [vmem:[%s5602_s7 + $0x30] sm:$0xf] %v3867_v13  ;;  %3870 = vst [vmem:[%s5602_s7 + $0x34] sm:$0xf] %v3868_v18  ;;  %v3496_v13 = vpop.permute.xlu0 %3495  ;;  %v3505_v53 = vsel %vm3503_vm6, 65537, %v5647_v30 }
 0x77c   :  { %vm3500_vm5 = vcmp.eq.s32.totalorder %v3496_v13, 1 }
 0x77d   :  { %vm3502_vm7 = vmpackc.low %vm3500_vm5, %vm3500_vm5 }
 0x77e   :  { %v3504_v41 = vsel %vm3502_vm7, 65537, %v5647_v30 }
 0x84b   :  { %v3370_v55 = vpop.f32.mrb[60].mxu0  ;;  %v3413_v42 = vpop.f32.mrb[60].mxu1 }
 0x84c   :  { %v3430_v51 = vadd.f32 %v3422_v19, %v3370_v55  ;;  %v3432_v50 = vadd.f32 %v3424_v17, %v3413_v42  ;;  %v3372_v28 = vpop.f32.mrb[61].mxu0  ;;  %v3415_v26 = vpop.f32.mrb[61].mxu1  ;;  %v3911_v42 = vcombine.low %v3504_v41, %v3505_v53 }
 0x84d   :  { %v3431_v52 = vadd.f32 %v3423_v31, %v3372_v28  ;;  %v3433_v14 = vadd.f32 %v3425_v6, %v3415_v26  ;;  %v3374_v16 = vpop.f32.mrb[62].mxu0  ;;  %v3417_v61 = vpop.f32.mrb[62].mxu1 }
 0x84e   :  { %v3903_v47 = vmul.f32 -1.442695, %v3430_v51  ;;  %v3434_v1 = vadd.f32 %v3426_v27, %v3374_v16  ;;  %v3436_v2 = vadd.f32 %v3428_v49, %v3417_v61  ;;  %v3376_v4 = vpop.f32.mrb[63].mxu0  ;;  %v3419_v62 = vpop.f32.mrb[63].mxu1  ;;  %vm3509_vm8 = vcmp.ne.s16.totalorder %v3911_v42, 0 }
 0x84f   :  { %v3905_v29 = vmul.f32 -1.442695, %v3431_v52  ;;  %v3435_v25 = vadd.f32 %v3427_v32, %v3376_v4  ;;  %v3437_v48 = vadd.f32 %v3429_v46, %v3419_v62  ;;  %v3907_v34 = vmul.f32 -1.442695, %v3433_v14 }
 0x850   :  { %4301 = vpow2.f32 %v3903_v47  ;;  %v3904_v33 = vmul.f32 -1.442695, %v3434_v1 }
 0x851   :  { %4303 = vpow2.f32 %v3905_v29  ;;  %v3906_v3 = vmul.f32 -1.442695, %v3435_v25  ;;  %v3908_v36 = vmul.f32 -1.442695, %v3437_v48 }
 0x852   :  { %4305 = vpow2.f32 %v3904_v33 }
 0x853   :  { %4307 = vpow2.f32 %v3906_v3 }
 0x854   :  { %4309 = vtanh.f32 %v3432_v50 }
 0x855   :  { %4311 = vpow2.f32 %v3907_v34 }
 0x856   :  { %4313 = vtanh.f32 %v3436_v2 }
 0x85a   :  { %v4302_v0 = vpop.eup %4301 }
 0x85b   :  { %v4304_v54 = vpop.eup %4303  ;;  %v3444_v15 = vadd.f32 1.0, %v4302_v0 }
 0x85c   :  { %v3456_v63 = vadd.f32 1.0, %v4304_v54  ;;  %v4306_v60 = vpop.eup %4305 }
 0x85d   :  { %4315 = vrcp.f32 %v3444_v15  ;;  %v3445_v57 = vadd.f32 1.0, %v4306_v60  ;;  %v4308_v37 = vpop.eup %4307 }
 0x85e   :  { %4317 = vrcp.f32 %v3456_v63  ;;  %v3457_v58 = vadd.f32 1.0, %v4308_v37  ;;  %v4310_v39 = vpop.eup %4309 }
 0x85f   :  { %4319 = vpow2.f32 %v3908_v36  ;;  %v4312_v44 = vpop.eup %4311 }
 0x860   :  { %4321 = vrcp.f32 %v3445_v57  ;;  %v4314_v45 = vpop.eup %4313  ;;  %v3470_v24 = vadd.f32 1.0, %v4312_v44 }
 0x861   :  { %4323 = vrcp.f32 %v3457_v58 }
 0x862   :  { %4325 = vrcp.f32 %v3470_v24 }
 0x867   :  { %v4316_v56 = vpop.eup %4315 }
 0x868   :  { %v4318_v59 = vpop.eup %4317  ;;  %v3478_v5 = vmul.f32 %v4316_v56, %v4310_v39 }
 0x869   :  { %v4320_v8 = vpop.eup %4319  ;;  %v3476_v9 = vmul.f32 %v4318_v59, %v5562_v38 }
 0x86a   :  { %v4322_v20 = vpop.eup %4321  ;;  %v3471_v11 = vadd.f32 1.0, %v4320_v8 }
 0x86b   :  { %v3480_v35 = vadd.f32 %v3478_v5, %v3476_v9  ;;  %v3479_v21 = vmul.f32 %v4322_v20, %v4314_v45  ;;  %v4324_v10 = vpop.eup %4323 }
 0x86c   :  { %v3477_v22 = vmul.f32 %v4324_v10, %v5566_v7  ;;  %v4326_v18 = vpop.eup %4325 }
 0x86d   :  { %4327 = vtanh.f32 %v3480_v35 }
 0x86e   :  { %v3481_v23 = vadd.f32 %v3479_v21, %v3477_v22  ;;  %4329 = vrcp.f32 %v3471_v11 }
 0x870   :  { %4331 = vtanh.f32 %v3481_v23 }
 0x877   :  { %v4328_v38 = vpop.eup %4327 }
 0x878   :  { %v3484_v19 = vmul.f32 %v4328_v38, %v4326_v18  ;;  %v4330_v17 = vpop.eup %4329 }
 0x87a   :  { %v4332_v55 = vpop.eup %4331 }
 0x87b   :  { %v3485_v7 = vmul.f32 %v4332_v55, %v4330_v17 }
 0x87d   :  { %v3486_v40 = vpack.c.bf16 %v3485_v7, %v3484_v19 }
 0x87f   :  { %v3510_v31 = vsel %vm3509_vm8, %v3486_v40, 0 }
 0x880   :  { %v3912_v43 = vcombine.low %v3510_v31, %v3510_v31  ;;  %v3913_v6 = vcombine.high %v3510_v31, %v3510_v31 }
 0x882   :  { %3914 = vst [vmem:[%s5602_s7 + $0x38] sm:$0xf] %v3912_v43  ;;  %3915 = vst [vmem:[%s5602_s7 + $0x3c] sm:$0xf] %v3913_v6 }

</bundles_post_ra>
